<compile_context>
chip_gen: v6e
topology: v6e:2x2x1
jax: 0.10.0
libtpu: 0.0.40
codegen_flags: <defaults>
</compile_context>

<pallas_src>
import functools

import jax
import jax.numpy as jnp
import numpy as np
from jax import lax
from jax.experimental import pallas as pl
from jax.experimental.pallas import tpu as pltpu

EPS = 1e-5


# ------------------------------- Fused kernel -------------------------------- #

def _vgg_conv2_fused_kernel(qf_ref, w1_ref, b1_ref, w2_ref, b2_ref,
                            o_ref, q2_ref, h2_ref, *, H, W, Wp, q2_off):
    """One image per grid step; all intermediates stay in VMEM.

    Flat-spatial convention: a zero-padded row has pitch Wp = W + 2; padded pixel
    (y, x) of the layer-1 input sits at flat row y*Wp + x of qf (the wrapper pads one
    row on top, two at the bottom, one column left/right).  Layer-1 output pixel (y, x)
    sits at flat row y*Wp + x (junk columns x >= W are zeroed by the in-kernel mask and
    double as the left/right padding for layer 2).

    qf_ref: (1, (H+3)*Wp, Cin) bf16   zero-padded input image, flat rows
    w1_ref: (3, 3, Cin, C1)    bf16   per-(ky, kx) taps, BN scale folded in
    b1_ref: (1, C1)            f32    folded bias (conv bias + BN)
    w2_ref: (3, 3, C1, C2)     bf16
    b2_ref: (1, C2)            f32
    o_ref : (1, Ho, Wo, C2)    f32    pooled output (NHWC)
    q2_ref: (q2_rows, C1)      bf16   scratch: zero-padded layer-1 activation
                                      (interior starts at sublane-aligned q2_off)
    h2_ref: (H*Wp, C2)         f32    scratch: flat layer-2 activation staged for pooling
    """
    _, Ho, Wo, C2 = o_ref.shape
    HWp = H * Wp
    q2_rows, C1 = q2_ref.shape

    # ------------------ conv2_1 (+ folded bn2_1) + relu2_1 ------------------ #
    # 9 per-tap dots (K = Cin) on shifted contiguous windows of the flat input; the
    # accumulation, bias, ReLU, junk-column mask and bf16 cast all stay in vregs and a
    # single store lands the result in the q2 interior.
    acc1 = None
    for ky in range(3):
        for kx in range(3):
            d = jnp.dot(qf_ref[0, pl.ds(ky * Wp + kx, HWp), :], w1_ref[ky, kx],
                        preferred_element_type=jnp.float32)
            acc1 = d if acc1 is None else acc1 + d
    h1 = jnp.maximum(acc1 + b1_ref[...], 0.0)
    # Zero the (Wp - W) junk columns so they act as left/right padding for conv2_2.
    col = lax.broadcasted_iota(jnp.int32, (HWp, 1), 0) % Wp
    h1 = jnp.where(col < W, h1, 0.0)

    # Zero only the halo rows (interior is fully overwritten by the masked h1).
    q2_ref[pl.ds(0, q2_off), :] = jnp.zeros((q2_off, C1), q2_ref.dtype)
    tail = q2_rows - q2_off - HWp
    q2_ref[pl.ds(q2_off + HWp, tail), :] = jnp.zeros((tail, C1), q2_ref.dtype)
    q2_ref[pl.ds(q2_off, HWp), :] = h1.astype(q2_ref.dtype)      # aligned interior store

    # ------------------ conv2_2 (+ folded bn2_2) + relu2_2 ------------------ #
    base = q2_off - (Wp + 1)                 # flat q2 offset of padded pixel (-1, -1)
    acc2 = None
    for ky in range(3):
        for kx in range(3):
            d = jnp.dot(q2_ref[pl.ds(base + ky * Wp + kx, HWp), :], w2_ref[ky, kx],
                        preferred_element_type=jnp.float32)
            acc2 = d if acc2 is None else acc2 + d
    h2_ref[...] = jnp.maximum(acc2 + b2_ref[...], 0.0)           # single flat store

    # --------------------------- pool2 (2x2, stride 2) ---------------------- #
    # Strided column reads off the flat ref; one aligned, lane-dense (Wo, C2) store per
    # output row.  Junk columns (x >= W) are never touched.
    for r in range(Ho):
        r0 = 2 * r * Wp                      # flat start of image row 2r
        r1 = r0 + Wp                         # flat start of image row 2r + 1
        o_ref[0, r, :, :] = jnp.maximum(
            jnp.maximum(h2_ref[pl.ds(r0, Wo, stride=2), :],
                        h2_ref[pl.ds(r0 + 1, Wo, stride=2), :]),
            jnp.maximum(h2_ref[pl.ds(r1, Wo, stride=2), :],
                        h2_ref[pl.ds(r1 + 1, Wo, stride=2), :]))


# ------------------------------ Pallas wrapper ------------------------------- #

def vgg_conv2_fused(x_nhwc, w1, b1, w2, b2):
    """Fused conv-bn-relu x2 + maxpool2x2.  x_nhwc: (N, H, W, Cin) f32."""
    N, H, W, Cin = x_nhwc.shape
    C1 = w1.shape[-1]
    C2 = w2.shape[-1]
    assert H % 2 == 0 and W % 2 == 0
    # TODO(synk): ceil_mode extra-edge handling for odd spatial dims not implemented
    # (identical to floor mode for even H/W, which is what this module sees here).
    Ho, Wo = H // 2, W // 2
    Wp = W + 2                               # padded row pitch (no multiple-of-8 rounding)
    HWp = H * Wp
    qf_rows = (H + 3) * Wp
    # Layer-1 activation interior starts at a bf16-sublane-aligned offset so the big q2
    # store is unmasked; >= Wp+1 rows of zero halo live on either side.
    q2_off = ((Wp + 1 + 15) // 16) * 16
    q2_rows = q2_off + HWp + q2_off

    # Wrapper-side prep is a plain pad + reshape (no gathers / concats): one zero row on
    # top, two at the bottom, one zero column left/right.
    xq = jnp.pad(x_nhwc, ((0, 0), (1, 2), (1, Wp - 1 - W), (0, 0)))   # (N, H+3, Wp, Cin)
    qf = xq.reshape(N, qf_rows, Cin).astype(jnp.bfloat16)

    kernel = functools.partial(_vgg_conv2_fused_kernel, H=H, W=W, Wp=Wp, q2_off=q2_off)

    # TODO(synk): for larger batches, block several images per grid step so each
    # TensorCore (v7x megacore) gets >= 2 steps and the input DMA pipelines behind compute.
    return pl.pallas_call(
        kernel,
        out_shape=jax.ShapeDtypeStruct((N, Ho, Wo, C2), jnp.float32),
        grid_spec=pltpu.PrefetchScalarGridSpec(
            num_scalar_prefetch=0,
            grid=(N,),
            in_specs=[
                pl.BlockSpec((1, qf_rows, Cin), lambda n: (n, 0, 0)),
                pl.BlockSpec((3, 3, Cin, C1), lambda n: (0, 0, 0, 0)),
                pl.BlockSpec((1, C1), lambda n: (0, 0)),
                pl.BlockSpec((3, 3, C1, C2), lambda n: (0, 0, 0, 0)),
                pl.BlockSpec((1, C2), lambda n: (0, 0)),
            ],
            out_specs=pl.BlockSpec((1, Ho, Wo, C2), lambda n: (n, 0, 0, 0)),
            scratch_shapes=[
                pltpu.VMEM((q2_rows, C1), jnp.bfloat16),   # zero-padded layer-1 activation
                pltpu.VMEM((HWp, C2), jnp.float32),        # flat layer-2 activation
            ],
        ),
        compiler_params=pltpu.CompilerParams(
            dimension_semantics=("parallel",)),            # megacore: shard batch over TCs
    )(qf, w1, b1, w2, b2)


# -------------------------------- Parameters --------------------------------- #

def init_raw_params(key):
    """Deterministic synthetic parameters matching nn.Conv2d / nn.BatchNorm2d shapes."""
    ks = jax.random.split(key, 12)

    def conv_p(kw, kb, cin, cout):
        w = 0.05 * jax.random.normal(kw, (cout, cin, 3, 3), jnp.float32)  # OIHW (torch)
        b = 0.05 * jax.random.normal(kb, (cout,), jnp.float32)
        return w, b

    def bn_p(kg, kbt, km, kv, c):
        gamma = 1.0 + 0.1 * jax.random.normal(kg, (c,), jnp.float32)
        beta = 0.1 * jax.random.normal(kbt, (c,), jnp.float32)
        mean = 0.1 * jax.random.normal(km, (c,), jnp.float32)
        var = jax.random.uniform(kv, (c,), jnp.float32, minval=0.5, maxval=1.5)
        return gamma, beta, mean, var

    w1, b1 = conv_p(ks[0], ks[1], 64, 128)
    g1, be1, m1, v1 = bn_p(ks[2], ks[3], ks[4], ks[5], 128)
    w2, b2 = conv_p(ks[6], ks[7], 128, 128)
    g2, be2, m2, v2 = bn_p(ks[8], ks[9], ks[10], ks[11], 128)
    return (w1, b1, g1, be1, m1, v1, w2, b2, g2, be2, m2, v2)


def fold_params(raw):
    """Fold conv bias + eval-mode BN into weights/bias; convert to per-tap HWIO; bf16.

    Produces, per layer:
      w: (3, 3, Cin, Cout) bf16 with  w[ky, kx, c, o] = w_torch[o, c, ky, kx] * scale[o]
      b: (1, Cout) f32 with  b = beta + (conv_bias - running_mean) * scale
    """
    (w1, cb1, g1, be1, m1, v1, w2, cb2, g2, be2, m2, v2) = raw

    def fold(w_oihw, b, g, be, m, v):
        cout = w_oihw.shape[0]
        scale = g / jnp.sqrt(v + EPS)                                   # (Cout,)
        bias = (be + (b - m) * scale).reshape(1, cout).astype(jnp.float32)
        w_hwio = jnp.transpose(w_oihw, (2, 3, 1, 0)) * scale            # OIHW->HWIO, BN folded
        return w_hwio.astype(jnp.bfloat16), bias

    w1f, b1f = fold(w1, cb1, g1, be1, m1, v1)
    w2f, b2f = fold(w2, cb2, g2, be2, m2, v2)
    return (w1f, b1f, w2f, b2f)


# ------------------------------- Forward pass --------------------------------- #

@jax.jit
def vgg_conv2_forward(x_nchw, folded):
    w1f, b1f, w2f, b2f = folded
    x = jnp.transpose(x_nchw, (0, 2, 3, 1))            # NCHW -> NHWC (boundary plumbing)
    y = vgg_conv2_fused(x, w1f, b1f, w2f, b2f)         # (N, Ho, Wo, 128) NHWC
    return jnp.transpose(y, (0, 3, 1, 2))              # back to NCHW


def reference(x_nchw, raw):
    """Pure-JAX f32 reference (same eval-mode BN semantics) for validation."""
    (w1, b1, g1, be1, m1, v1, w2, b2, g2, be2, m2, v2) = raw
    x = jnp.transpose(x_nchw, (0, 2, 3, 1))

    def block(x, w_oihw, b, g, be, m, v):
        w = jnp.transpose(w_oihw, (2, 3, 1, 0))
        y = lax.conv_general_dilated(x, w, (1, 1), ((1, 1), (1, 1)),
                                     dimension_numbers=("NHWC", "HWIO", "NHWC"))
        y = y + b
        y = (y - m) / jnp.sqrt(v + EPS) * g + be
        return jnp.maximum(y, 0.0)

    h = block(x, w1, b1, g1, be1, m1, v1)
    h = block(h, w2, b2, g2, be2, m2, v2)
    h = lax.reduce_window(h, -jnp.inf, lax.max, (1, 2, 2, 1), (1, 2, 2, 1), "VALID")
    return jnp.transpose(h, (0, 3, 1, 2))


# ----------------------------------- Main -------------------------------------- #

if __name__ == "__main__":
    key = jax.random.PRNGKey(0)
    kx, kp = jax.random.split(key)

    # Input channels are fixed to 64 by the module; small batch/spatial dims.
    N, C, H, W = 2, 64, 16, 16
    x = jax.random.normal(kx, (N, C, H, W), jnp.float32)

    raw = init_raw_params(kp)
    folded = fold_params(raw)

    out = vgg_conv2_forward(x, folded)
    out = jax.block_until_ready(out)

    assert out.shape == (N, 128, H // 2, W // 2), out.shape

    ref = jax.block_until_ready(reference(x, raw))
    # Tolerance accounts for bf16 MXU inputs (f32 accumulation) vs. the f32 reference.
    np.testing.assert_allclose(np.asarray(out), np.asarray(ref), rtol=2e-2, atol=3e-2)

    print("KERNEL_OK")
</pallas_src>

<mosaic_0001>
module attributes {stable_mosaic.version = 11 : i64} {
  func.func @_vgg_conv2_fused_kernel(%arg0: i32, %arg1: memref<1x342x64xbf16, #tpu.memory_space<vmem>>, %arg2: memref<3x3x64x128xbf16, #tpu.memory_space<vmem>>, %arg3: memref<1x128xf32, #tpu.memory_space<vmem>>, %arg4: memref<3x3x128x128xbf16, #tpu.memory_space<vmem>>, %arg5: memref<1x128xf32, #tpu.memory_space<vmem>>, %arg6: memref<1x8x8x128xf32, #tpu.memory_space<vmem>>, %arg7: memref<352x128xbf16, #tpu.memory_space<vmem>>, %arg8: memref<288x128xf32, #tpu.memory_space<vmem>>) attributes {dimension_semantics = [#tpu.dimension_semantics<parallel>], iteration_bounds = array<i64: 2>, scalar_prefetch = 0 : i64, scratch_operands = 2 : i64, tpu.core_type = #tpu.core_type<tc>, window_params = [{transform_indices = @transform_0, window_bounds = array<i64: 1, 342, 64>}, {pipeline_mode = #tpu.pipeline_mode<synchronous>, transform_indices = @transform_1, window_bounds = array<i64: 3, 3, 64, 128>}, {pipeline_mode = #tpu.pipeline_mode<synchronous>, transform_indices = @transform_2, window_bounds = array<i64: 1, 128>}, {pipeline_mode = #tpu.pipeline_mode<synchronous>, transform_indices = @transform_3, window_bounds = array<i64: 3, 3, 128, 128>}, {pipeline_mode = #tpu.pipeline_mode<synchronous>, transform_indices = @transform_4, window_bounds = array<i64: 1, 128>}, {transform_indices = @transform_5, window_bounds = array<i64: 1, 8, 8, 128>}]} {
    %c0 = arith.constant 0 : index
    %c0_0 = arith.constant 0 : index
    %c0_1 = arith.constant 0 : index
    %0 = vector.load %arg1[%c0, %c0_0, %c0_1] : memref<1x342x64xbf16, #tpu.memory_space<vmem>>, vector<1x288x64xbf16>
    %1 = vector.shape_cast %0 : vector<1x288x64xbf16> to vector<288x64xbf16>
    %c0_2 = arith.constant 0 : index
    %c0_3 = arith.constant 0 : index
    %c0_4 = arith.constant 0 : index
    %c0_5 = arith.constant 0 : index
    %2 = vector.load %arg2[%c0_2, %c0_3, %c0_4, %c0_5] : memref<3x3x64x128xbf16, #tpu.memory_space<vmem>>, vector<1x1x64x128xbf16>
    %3 = vector.shape_cast %2 : vector<1x1x64x128xbf16> to vector<64x128xbf16>
    %cst = arith.constant dense<0.000000e+00> : vector<288x128xf32>
    %4 = tpu.matmul %1, %3, %cst {dimension_numbers = #tpu.dot_dimension_numbers<[1], [0], [0], [1], [0, 0, 1, 1], [], []>} : vector<288x64xbf16>, vector<64x128xbf16>, vector<288x128xf32> -> vector<288x128xf32>
    %c0_6 = arith.constant 0 : index
    %c1 = arith.constant 1 : index
    %c0_7 = arith.constant 0 : index
    %5 = vector.load %arg1[%c0_6, %c1, %c0_7] : memref<1x342x64xbf16, #tpu.memory_space<vmem>>, vector<1x288x64xbf16>
    %6 = vector.shape_cast %5 : vector<1x288x64xbf16> to vector<288x64xbf16>
    %c0_8 = arith.constant 0 : index
    %c1_9 = arith.constant 1 : index
    %c0_10 = arith.constant 0 : index
    %c0_11 = arith.constant 0 : index
    %7 = vector.load %arg2[%c0_8, %c1_9, %c0_10, %c0_11] : memref<3x3x64x128xbf16, #tpu.memory_space<vmem>>, vector<1x1x64x128xbf16>
    %8 = vector.shape_cast %7 : vector<1x1x64x128xbf16> to vector<64x128xbf16>
    %cst_12 = arith.constant dense<0.000000e+00> : vector<288x128xf32>
    %9 = tpu.matmul %6, %8, %cst_12 {dimension_numbers = #tpu.dot_dimension_numbers<[1], [0], [0], [1], [0, 0, 1, 1], [], []>} : vector<288x64xbf16>, vector<64x128xbf16>, vector<288x128xf32> -> vector<288x128xf32>
    %10 = arith.addf %4, %9 : vector<288x128xf32>
    %c0_13 = arith.constant 0 : index
    %c2 = arith.constant 2 : index
    %c0_14 = arith.constant 0 : index
    %11 = vector.load %arg1[%c0_13, %c2, %c0_14] : memref<1x342x64xbf16, #tpu.memory_space<vmem>>, vector<1x288x64xbf16>
    %12 = vector.shape_cast %11 : vector<1x288x64xbf16> to vector<288x64xbf16>
    %c0_15 = arith.constant 0 : index
    %c2_16 = arith.constant 2 : index
    %c0_17 = arith.constant 0 : index
    %c0_18 = arith.constant 0 : index
    %13 = vector.load %arg2[%c0_15, %c2_16, %c0_17, %c0_18] : memref<3x3x64x128xbf16, #tpu.memory_space<vmem>>, vector<1x1x64x128xbf16>
    %14 = vector.shape_cast %13 : vector<1x1x64x128xbf16> to vector<64x128xbf16>
    %cst_19 = arith.constant dense<0.000000e+00> : vector<288x128xf32>
    %15 = tpu.matmul %12, %14, %cst_19 {dimension_numbers = #tpu.dot_dimension_numbers<[1], [0], [0], [1], [0, 0, 1, 1], [], []>} : vector<288x64xbf16>, vector<64x128xbf16>, vector<288x128xf32> -> vector<288x128xf32>
    %16 = arith.addf %10, %15 : vector<288x128xf32>
    %c0_20 = arith.constant 0 : index
    %c18 = arith.constant 18 : index
    %c0_21 = arith.constant 0 : index
    %17 = vector.load %arg1[%c0_20, %c18, %c0_21] : memref<1x342x64xbf16, #tpu.memory_space<vmem>>, vector<1x288x64xbf16>
    %18 = vector.shape_cast %17 : vector<1x288x64xbf16> to vector<288x64xbf16>
    %c1_22 = arith.constant 1 : index
    %c0_23 = arith.constant 0 : index
    %c0_24 = arith.constant 0 : index
    %c0_25 = arith.constant 0 : index
    %19 = vector.load %arg2[%c1_22, %c0_23, %c0_24, %c0_25] : memref<3x3x64x128xbf16, #tpu.memory_space<vmem>>, vector<1x1x64x128xbf16>
    %20 = vector.shape_cast %19 : vector<1x1x64x128xbf16> to vector<64x128xbf16>
    %cst_26 = arith.constant dense<0.000000e+00> : vector<288x128xf32>
    %21 = tpu.matmul %18, %20, %cst_26 {dimension_numbers = #tpu.dot_dimension_numbers<[1], [0], [0], [1], [0, 0, 1, 1], [], []>} : vector<288x64xbf16>, vector<64x128xbf16>, vector<288x128xf32> -> vector<288x128xf32>
    %22 = arith.addf %16, %21 : vector<288x128xf32>
    %c0_27 = arith.constant 0 : index
    %c19 = arith.constant 19 : index
    %c0_28 = arith.constant 0 : index
    %23 = vector.load %arg1[%c0_27, %c19, %c0_28] : memref<1x342x64xbf16, #tpu.memory_space<vmem>>, vector<1x288x64xbf16>
    %24 = vector.shape_cast %23 : vector<1x288x64xbf16> to vector<288x64xbf16>
    %c1_29 = arith.constant 1 : index
    %c1_30 = arith.constant 1 : index
    %c0_31 = arith.constant 0 : index
    %c0_32 = arith.constant 0 : index
    %25 = vector.load %arg2[%c1_29, %c1_30, %c0_31, %c0_32] : memref<3x3x64x128xbf16, #tpu.memory_space<vmem>>, vector<1x1x64x128xbf16>
    %26 = vector.shape_cast %25 : vector<1x1x64x128xbf16> to vector<64x128xbf16>
    %cst_33 = arith.constant dense<0.000000e+00> : vector<288x128xf32>
    %27 = tpu.matmul %24, %26, %cst_33 {dimension_numbers = #tpu.dot_dimension_numbers<[1], [0], [0], [1], [0, 0, 1, 1], [], []>} : vector<288x64xbf16>, vector<64x128xbf16>, vector<288x128xf32> -> vector<288x128xf32>
    %28 = arith.addf %22, %27 : vector<288x128xf32>
    %c0_34 = arith.constant 0 : index
    %c20 = arith.constant 20 : index
    %c0_35 = arith.constant 0 : index
    %29 = vector.load %arg1[%c0_34, %c20, %c0_35] : memref<1x342x64xbf16, #tpu.memory_space<vmem>>, vector<1x288x64xbf16>
    %30 = vector.shape_cast %29 : vector<1x288x64xbf16> to vector<288x64xbf16>
    %c1_36 = arith.constant 1 : index
    %c2_37 = arith.constant 2 : index
    %c0_38 = arith.constant 0 : index
    %c0_39 = arith.constant 0 : index
    %31 = vector.load %arg2[%c1_36, %c2_37, %c0_38, %c0_39] : memref<3x3x64x128xbf16, #tpu.memory_space<vmem>>, vector<1x1x64x128xbf16>
    %32 = vector.shape_cast %31 : vector<1x1x64x128xbf16> to vector<64x128xbf16>
    %cst_40 = arith.constant dense<0.000000e+00> : vector<288x128xf32>
    %33 = tpu.matmul %30, %32, %cst_40 {dimension_numbers = #tpu.dot_dimension_numbers<[1], [0], [0], [1], [0, 0, 1, 1], [], []>} : vector<288x64xbf16>, vector<64x128xbf16>, vector<288x128xf32> -> vector<288x128xf32>
    %34 = arith.addf %28, %33 : vector<288x128xf32>
    %c0_41 = arith.constant 0 : index
    %c36 = arith.constant 36 : index
    %c0_42 = arith.constant 0 : index
    %35 = vector.load %arg1[%c0_41, %c36, %c0_42] : memref<1x342x64xbf16, #tpu.memory_space<vmem>>, vector<1x288x64xbf16>
    %36 = vector.shape_cast %35 : vector<1x288x64xbf16> to vector<288x64xbf16>
    %c2_43 = arith.constant 2 : index
    %c0_44 = arith.constant 0 : index
    %c0_45 = arith.constant 0 : index
    %c0_46 = arith.constant 0 : index
    %37 = vector.load %arg2[%c2_43, %c0_44, %c0_45, %c0_46] : memref<3x3x64x128xbf16, #tpu.memory_space<vmem>>, vector<1x1x64x128xbf16>
    %38 = vector.shape_cast %37 : vector<1x1x64x128xbf16> to vector<64x128xbf16>
    %cst_47 = arith.constant dense<0.000000e+00> : vector<288x128xf32>
    %39 = tpu.matmul %36, %38, %cst_47 {dimension_numbers = #tpu.dot_dimension_numbers<[1], [0], [0], [1], [0, 0, 1, 1], [], []>} : vector<288x64xbf16>, vector<64x128xbf16>, vector<288x128xf32> -> vector<288x128xf32>
    %40 = arith.addf %34, %39 : vector<288x128xf32>
    %c0_48 = arith.constant 0 : index
    %c37 = arith.constant 37 : index
    %c0_49 = arith.constant 0 : index
    %41 = vector.load %arg1[%c0_48, %c37, %c0_49] : memref<1x342x64xbf16, #tpu.memory_space<vmem>>, vector<1x288x64xbf16>
    %42 = vector.shape_cast %41 : vector<1x288x64xbf16> to vector<288x64xbf16>
    %c2_50 = arith.constant 2 : index
    %c1_51 = arith.constant 1 : index
    %c0_52 = arith.constant 0 : index
    %c0_53 = arith.constant 0 : index
    %43 = vector.load %arg2[%c2_50, %c1_51, %c0_52, %c0_53] : memref<3x3x64x128xbf16, #tpu.memory_space<vmem>>, vector<1x1x64x128xbf16>
    %44 = vector.shape_cast %43 : vector<1x1x64x128xbf16> to vector<64x128xbf16>
    %cst_54 = arith.constant dense<0.000000e+00> : vector<288x128xf32>
    %45 = tpu.matmul %42, %44, %cst_54 {dimension_numbers = #tpu.dot_dimension_numbers<[1], [0], [0], [1], [0, 0, 1, 1], [], []>} : vector<288x64xbf16>, vector<64x128xbf16>, vector<288x128xf32> -> vector<288x128xf32>
    %46 = arith.addf %40, %45 : vector<288x128xf32>
    %c0_55 = arith.constant 0 : index
    %c38 = arith.constant 38 : index
    %c0_56 = arith.constant 0 : index
    %47 = vector.load %arg1[%c0_55, %c38, %c0_56] : memref<1x342x64xbf16, #tpu.memory_space<vmem>>, vector<1x288x64xbf16>
    %48 = vector.shape_cast %47 : vector<1x288x64xbf16> to vector<288x64xbf16>
    %c2_57 = arith.constant 2 : index
    %c2_58 = arith.constant 2 : index
    %c0_59 = arith.constant 0 : index
    %c0_60 = arith.constant 0 : index
    %49 = vector.load %arg2[%c2_57, %c2_58, %c0_59, %c0_60] : memref<3x3x64x128xbf16, #tpu.memory_space<vmem>>, vector<1x1x64x128xbf16>
    %50 = vector.shape_cast %49 : vector<1x1x64x128xbf16> to vector<64x128xbf16>
    %cst_61 = arith.constant dense<0.000000e+00> : vector<288x128xf32>
    %51 = tpu.matmul %48, %50, %cst_61 {dimension_numbers = #tpu.dot_dimension_numbers<[1], [0], [0], [1], [0, 0, 1, 1], [], []>} : vector<288x64xbf16>, vector<64x128xbf16>, vector<288x128xf32> -> vector<288x128xf32>
    %52 = arith.addf %46, %51 : vector<288x128xf32>
    %c0_62 = arith.constant 0 : index
    %c0_63 = arith.constant 0 : index
    %53 = vector.load %arg3[%c0_62, %c0_63] : memref<1x128xf32, #tpu.memory_space<vmem>>, vector<1x128xf32>
    %54 = vector.broadcast %53 : vector<1x128xf32> to vector<288x128xf32>
    %55 = arith.addf %52, %54 : vector<288x128xf32>
    %cst_64 = arith.constant 0.000000e+00 : f32
    %56 = vector.broadcast %cst_64 : f32 to vector<288x128xf32>
    %57 = arith.maximumf %55, %56 : vector<288x128xf32>
    %58 = tpu.iota {dimensions = array<i32: 0>} : vector<288x1xi32>
    %c18_i32 = arith.constant 18 : i32
    %c0_i32 = arith.constant 0 : i32
    %59 = arith.cmpi eq, %c18_i32, %c0_i32 : i32
    %c1_i32 = arith.constant 1 : i32
    %60 = arith.select %59, %c1_i32, %c18_i32 : i32
    %61 = vector.broadcast %60 : i32 to vector<288x1xi32>
    %62 = arith.remsi %58, %61 : vector<288x1xi32>
    %c0_i32_65 = arith.constant 0 : i32
    %63 = vector.broadcast %c0_i32_65 : i32 to vector<288x1xi32>
    %64 = arith.cmpi ne, %62, %63 : vector<288x1xi32>
    %c0_i32_66 = arith.constant 0 : i32
    %65 = vector.broadcast %c0_i32_66 : i32 to vector<288x1xi32>
    %66 = arith.cmpi slt, %62, %65 : vector<288x1xi32>
    %c0_i32_67 = arith.constant 0 : i32
    %67 = arith.cmpi slt, %60, %c0_i32_67 : i32
    %68 = vector.broadcast %67 : i1 to vector<288x1xi1>
    %69 = vector.broadcast %68 : vector<288x1xi1> to vector<288x1xi1>
    %70 = arith.xori %66, %69 : vector<288x1xi1>
    %71 = arith.andi %70, %64 : vector<288x1xi1>
    %72 = vector.broadcast %60 : i32 to vector<288x1xi32>
    %73 = arith.addi %62, %72 : vector<288x1xi32>
    %74 = arith.select %71, %73, %62 : vector<288x1xi1>, vector<288x1xi32>
    %c16_i32 = arith.constant 16 : i32
    %75 = vector.broadcast %c16_i32 : i32 to vector<288x1xi32>
    %76 = arith.cmpi slt, %74, %75 : vector<288x1xi32>
    %cst_68 = arith.constant 0.000000e+00 : f32
    %77 = vector.shape_cast %76 : vector<288x1xi1> to vector<288x1xi1>
    %78 = vector.broadcast %77 : vector<288x1xi1> to vector<288x128xi1>
    %79 = vector.broadcast %cst_68 : f32 to vector<288x128xf32>
    %80 = arith.select %78, %57, %79 : vector<288x128xi1>, vector<288x128xf32>
    %cst_69 = arith.constant 0.000000e+00 : bf16
    %81 = vector.broadcast %cst_69 : bf16 to vector<32x128xbf16>
    %c0_70 = arith.constant 0 : index
    %c0_71 = arith.constant 0 : index
    %82 = vector.load %arg7[%c0_70, %c0_71] : memref<352x128xbf16, #tpu.memory_space<vmem>>, vector<32x128xbf16>
    tpu.vector_store %arg7[%c0_70, %c0_71], %81 {strides = array<i32>} : memref<352x128xbf16, #tpu.memory_space<vmem>>, vector<32x128xbf16>,
    %cst_72 = arith.constant 0.000000e+00 : bf16
    %83 = vector.broadcast %cst_72 : bf16 to vector<32x128xbf16>
    %c320 = arith.constant 320 : index
    %c0_73 = arith.constant 0 : index
    %84 = vector.load %arg7[%c320, %c0_73] : memref<352x128xbf16, #tpu.memory_space<vmem>>, vector<32x128xbf16>
    tpu.vector_store %arg7[%c320, %c0_73], %83 {strides = array<i32>} : memref<352x128xbf16, #tpu.memory_space<vmem>>, vector<32x128xbf16>,
    %85 = arith.truncf %80 : vector<288x128xf32> to vector<288x128xbf16>
    %c32 = arith.constant 32 : index
    %c0_74 = arith.constant 0 : index
    %86 = vector.load %arg7[%c32, %c0_74] : memref<352x128xbf16, #tpu.memory_space<vmem>>, vector<288x128xbf16>
    tpu.vector_store %arg7[%c32, %c0_74], %85 {strides = array<i32>} : memref<352x128xbf16, #tpu.memory_space<vmem>>, vector<288x128xbf16>,
    %c13 = arith.constant 13 : index
    %c0_75 = arith.constant 0 : index
    %87 = vector.load %arg7[%c13, %c0_75] : memref<352x128xbf16, #tpu.memory_space<vmem>>, vector<288x128xbf16>
    %c0_76 = arith.constant 0 : index
    %c0_77 = arith.constant 0 : index
    %c0_78 = arith.constant 0 : index
    %c0_79 = arith.constant 0 : index
    %88 = vector.load %arg4[%c0_76, %c0_77, %c0_78, %c0_79] : memref<3x3x128x128xbf16, #tpu.memory_space<vmem>>, vector<1x1x128x128xbf16>
    %89 = vector.shape_cast %88 : vector<1x1x128x128xbf16> to vector<128x128xbf16>
    %cst_80 = arith.constant dense<0.000000e+00> : vector<288x128xf32>
    %90 = tpu.matmul %87, %89, %cst_80 {dimension_numbers = #tpu.dot_dimension_numbers<[1], [0], [0], [1], [0, 0, 1, 1], [], []>} : vector<288x128xbf16>, vector<128x128xbf16>, vector<288x128xf32> -> vector<288x128xf32>
    %c14 = arith.constant 14 : index
    %c0_81 = arith.constant 0 : index
    %91 = vector.load %arg7[%c14, %c0_81] : memref<352x128xbf16, #tpu.memory_space<vmem>>, vector<288x128xbf16>
    %c0_82 = arith.constant 0 : index
    %c1_83 = arith.constant 1 : index
    %c0_84 = arith.constant 0 : index
    %c0_85 = arith.constant 0 : index
    %92 = vector.load %arg4[%c0_82, %c1_83, %c0_84, %c0_85] : memref<3x3x128x128xbf16, #tpu.memory_space<vmem>>, vector<1x1x128x128xbf16>
    %93 = vector.shape_cast %92 : vector<1x1x128x128xbf16> to vector<128x128xbf16>
    %cst_86 = arith.constant dense<0.000000e+00> : vector<288x128xf32>
    %94 = tpu.matmul %91, %93, %cst_86 {dimension_numbers = #tpu.dot_dimension_numbers<[1], [0], [0], [1], [0, 0, 1, 1], [], []>} : vector<288x128xbf16>, vector<128x128xbf16>, vector<288x128xf32> -> vector<288x128xf32>
    %95 = arith.addf %90, %94 : vector<288x128xf32>
    %c15 = arith.constant 15 : index
    %c0_87 = arith.constant 0 : index
    %96 = vector.load %arg7[%c15, %c0_87] : memref<352x128xbf16, #tpu.memory_space<vmem>>, vector<288x128xbf16>
    %c0_88 = arith.constant 0 : index
    %c2_89 = arith.constant 2 : index
    %c0_90 = arith.constant 0 : index
    %c0_91 = arith.constant 0 : index
    %97 = vector.load %arg4[%c0_88, %c2_89, %c0_90, %c0_91] : memref<3x3x128x128xbf16, #tpu.memory_space<vmem>>, vector<1x1x128x128xbf16>
    %98 = vector.shape_cast %97 : vector<1x1x128x128xbf16> to vector<128x128xbf16>
    %cst_92 = arith.constant dense<0.000000e+00> : vector<288x128xf32>
    %99 = tpu.matmul %96, %98, %cst_92 {dimension_numbers = #tpu.dot_dimension_numbers<[1], [0], [0], [1], [0, 0, 1, 1], [], []>} : vector<288x128xbf16>, vector<128x128xbf16>, vector<288x128xf32> -> vector<288x128xf32>
    %100 = arith.addf %95, %99 : vector<288x128xf32>
    %c31 = arith.constant 31 : index
    %c0_93 = arith.constant 0 : index
    %101 = vector.load %arg7[%c31, %c0_93] : memref<352x128xbf16, #tpu.memory_space<vmem>>, vector<288x128xbf16>
    %c1_94 = arith.constant 1 : index
    %c0_95 = arith.constant 0 : index
    %c0_96 = arith.constant 0 : index
    %c0_97 = arith.constant 0 : index
    %102 = vector.load %arg4[%c1_94, %c0_95, %c0_96, %c0_97] : memref<3x3x128x128xbf16, #tpu.memory_space<vmem>>, vector<1x1x128x128xbf16>
    %103 = vector.shape_cast %102 : vector<1x1x128x128xbf16> to vector<128x128xbf16>
    %cst_98 = arith.constant dense<0.000000e+00> : vector<288x128xf32>
    %104 = tpu.matmul %101, %103, %cst_98 {dimension_numbers = #tpu.dot_dimension_numbers<[1], [0], [0], [1], [0, 0, 1, 1], [], []>} : vector<288x128xbf16>, vector<128x128xbf16>, vector<288x128xf32> -> vector<288x128xf32>
    %105 = arith.addf %100, %104 : vector<288x128xf32>
    %c32_99 = arith.constant 32 : index
    %c0_100 = arith.constant 0 : index
    %106 = vector.load %arg7[%c32_99, %c0_100] : memref<352x128xbf16, #tpu.memory_space<vmem>>, vector<288x128xbf16>
    %c1_101 = arith.constant 1 : index
    %c1_102 = arith.constant 1 : index
    %c0_103 = arith.constant 0 : index
    %c0_104 = arith.constant 0 : index
    %107 = vector.load %arg4[%c1_101, %c1_102, %c0_103, %c0_104] : memref<3x3x128x128xbf16, #tpu.memory_space<vmem>>, vector<1x1x128x128xbf16>
    %108 = vector.shape_cast %107 : vector<1x1x128x128xbf16> to vector<128x128xbf16>
    %cst_105 = arith.constant dense<0.000000e+00> : vector<288x128xf32>
    %109 = tpu.matmul %106, %108, %cst_105 {dimension_numbers = #tpu.dot_dimension_numbers<[1], [0], [0], [1], [0, 0, 1, 1], [], []>} : vector<288x128xbf16>, vector<128x128xbf16>, vector<288x128xf32> -> vector<288x128xf32>
    %110 = arith.addf %105, %109 : vector<288x128xf32>
    %c33 = arith.constant 33 : index
    %c0_106 = arith.constant 0 : index
    %111 = vector.load %arg7[%c33, %c0_106] : memref<352x128xbf16, #tpu.memory_space<vmem>>, vector<288x128xbf16>
    %c1_107 = arith.constant 1 : index
    %c2_108 = arith.constant 2 : index
    %c0_109 = arith.constant 0 : index
    %c0_110 = arith.constant 0 : index
    %112 = vector.load %arg4[%c1_107, %c2_108, %c0_109, %c0_110] : memref<3x3x128x128xbf16, #tpu.memory_space<vmem>>, vector<1x1x128x128xbf16>
    %113 = vector.shape_cast %112 : vector<1x1x128x128xbf16> to vector<128x128xbf16>
    %cst_111 = arith.constant dense<0.000000e+00> : vector<288x128xf32>
    %114 = tpu.matmul %111, %113, %cst_111 {dimension_numbers = #tpu.dot_dimension_numbers<[1], [0], [0], [1], [0, 0, 1, 1], [], []>} : vector<288x128xbf16>, vector<128x128xbf16>, vector<288x128xf32> -> vector<288x128xf32>
    %115 = arith.addf %110, %114 : vector<288x128xf32>
    %c49 = arith.constant 49 : index
    %c0_112 = arith.constant 0 : index
    %116 = vector.load %arg7[%c49, %c0_112] : memref<352x128xbf16, #tpu.memory_space<vmem>>, vector<288x128xbf16>
    %c2_113 = arith.constant 2 : index
    %c0_114 = arith.constant 0 : index
    %c0_115 = arith.constant 0 : index
    %c0_116 = arith.constant 0 : index
    %117 = vector.load %arg4[%c2_113, %c0_114, %c0_115, %c0_116] : memref<3x3x128x128xbf16, #tpu.memory_space<vmem>>, vector<1x1x128x128xbf16>
    %118 = vector.shape_cast %117 : vector<1x1x128x128xbf16> to vector<128x128xbf16>
    %cst_117 = arith.constant dense<0.000000e+00> : vector<288x128xf32>
    %119 = tpu.matmul %116, %118, %cst_117 {dimension_numbers = #tpu.dot_dimension_numbers<[1], [0], [0], [1], [0, 0, 1, 1], [], []>} : vector<288x128xbf16>, vector<128x128xbf16>, vector<288x128xf32> -> vector<288x128xf32>
    %120 = arith.addf %115, %119 : vector<288x128xf32>
    %c50 = arith.constant 50 : index
    %c0_118 = arith.constant 0 : index
    %121 = vector.load %arg7[%c50, %c0_118] : memref<352x128xbf16, #tpu.memory_space<vmem>>, vector<288x128xbf16>
    %c2_119 = arith.constant 2 : index
    %c1_120 = arith.constant 1 : index
    %c0_121 = arith.constant 0 : index
    %c0_122 = arith.constant 0 : index
    %122 = vector.load %arg4[%c2_119, %c1_120, %c0_121, %c0_122] : memref<3x3x128x128xbf16, #tpu.memory_space<vmem>>, vector<1x1x128x128xbf16>
    %123 = vector.shape_cast %122 : vector<1x1x128x128xbf16> to vector<128x128xbf16>
    %cst_123 = arith.constant dense<0.000000e+00> : vector<288x128xf32>
    %124 = tpu.matmul %121, %123, %cst_123 {dimension_numbers = #tpu.dot_dimension_numbers<[1], [0], [0], [1], [0, 0, 1, 1], [], []>} : vector<288x128xbf16>, vector<128x128xbf16>, vector<288x128xf32> -> vector<288x128xf32>
    %125 = arith.addf %120, %124 : vector<288x128xf32>
    %c51 = arith.constant 51 : index
    %c0_124 = arith.constant 0 : index
    %126 = vector.load %arg7[%c51, %c0_124] : memref<352x128xbf16, #tpu.memory_space<vmem>>, vector<288x128xbf16>
    %c2_125 = arith.constant 2 : index
    %c2_126 = arith.constant 2 : index
    %c0_127 = arith.constant 0 : index
    %c0_128 = arith.constant 0 : index
    %127 = vector.load %arg4[%c2_125, %c2_126, %c0_127, %c0_128] : memref<3x3x128x128xbf16, #tpu.memory_space<vmem>>, vector<1x1x128x128xbf16>
    %128 = vector.shape_cast %127 : vector<1x1x128x128xbf16> to vector<128x128xbf16>
    %cst_129 = arith.constant dense<0.000000e+00> : vector<288x128xf32>
    %129 = tpu.matmul %126, %128, %cst_129 {dimension_numbers = #tpu.dot_dimension_numbers<[1], [0], [0], [1], [0, 0, 1, 1], [], []>} : vector<288x128xbf16>, vector<128x128xbf16>, vector<288x128xf32> -> vector<288x128xf32>
    %130 = arith.addf %125, %129 : vector<288x128xf32>
    %c0_130 = arith.constant 0 : index
    %c0_131 = arith.constant 0 : index
    %131 = vector.load %arg5[%c0_130, %c0_131] : memref<1x128xf32, #tpu.memory_space<vmem>>, vector<1x128xf32>
    %132 = vector.broadcast %131 : vector<1x128xf32> to vector<288x128xf32>
    %133 = arith.addf %130, %132 : vector<288x128xf32>
    %cst_132 = arith.constant 0.000000e+00 : f32
    %134 = vector.broadcast %cst_132 : f32 to vector<288x128xf32>
    %135 = arith.maximumf %133, %134 : vector<288x128xf32>
    %c0_133 = arith.constant 0 : index
    %c0_134 = arith.constant 0 : index
    %136 = vector.load %arg8[%c0_133, %c0_134] : memref<288x128xf32, #tpu.memory_space<vmem>>, vector<288x128xf32>
    tpu.vector_store %arg8[%c0_133, %c0_134], %135 {strides = array<i32>} : memref<288x128xf32, #tpu.memory_space<vmem>>, vector<288x128xf32>,
    %c0_135 = arith.constant 0 : index
    %c0_136 = arith.constant 0 : index
    %137 = tpu.strided_load %arg8[%c0_135, %c0_136] {strides = array<i32: 2, 1>} : memref<288x128xf32, #tpu.memory_space<vmem>>, vector<8x128xf32>
    %c1_137 = arith.constant 1 : index
    %c0_138 = arith.constant 0 : index
    %138 = tpu.strided_load %arg8[%c1_137, %c0_138] {strides = array<i32: 2, 1>} : memref<288x128xf32, #tpu.memory_space<vmem>>, vector<8x128xf32>
    %139 = arith.maximumf %137, %138 : vector<8x128xf32>
    %c18_139 = arith.constant 18 : index
    %c0_140 = arith.constant 0 : index
    %140 = tpu.strided_load %arg8[%c18_139, %c0_140] {strides = array<i32: 2, 1>} : memref<288x128xf32, #tpu.memory_space<vmem>>, vector<8x128xf32>
    %c19_141 = arith.constant 19 : index
    %c0_142 = arith.constant 0 : index
    %141 = tpu.strided_load %arg8[%c19_141, %c0_142] {strides = array<i32: 2, 1>} : memref<288x128xf32, #tpu.memory_space<vmem>>, vector<8x128xf32>
    %142 = arith.maximumf %140, %141 : vector<8x128xf32>
    %143 = arith.maximumf %139, %142 : vector<8x128xf32>
    %c0_143 = arith.constant 0 : index
    %c0_144 = arith.constant 0 : index
    %c0_145 = arith.constant 0 : index
    %c0_146 = arith.constant 0 : index
    %144 = vector.load %arg6[%c0_143, %c0_144, %c0_145, %c0_146] : memref<1x8x8x128xf32, #tpu.memory_space<vmem>>, vector<1x1x8x128xf32>
    %145 = vector.shape_cast %144 : vector<1x1x8x128xf32> to vector<8x128xf32>
    %146 = vector.shape_cast %143 : vector<8x128xf32> to vector<1x1x8x128xf32>
    tpu.vector_store %arg6[%c0_143, %c0_144, %c0_145, %c0_146], %146 {strides = array<i32>} : memref<1x8x8x128xf32, #tpu.memory_space<vmem>>, vector<1x1x8x128xf32>,
    %c36_147 = arith.constant 36 : index
    %c0_148 = arith.constant 0 : index
    %147 = tpu.strided_load %arg8[%c36_147, %c0_148] {strides = array<i32: 2, 1>} : memref<288x128xf32, #tpu.memory_space<vmem>>, vector<8x128xf32>
    %c37_149 = arith.constant 37 : index
    %c0_150 = arith.constant 0 : index
    %148 = tpu.strided_load %arg8[%c37_149, %c0_150] {strides = array<i32: 2, 1>} : memref<288x128xf32, #tpu.memory_space<vmem>>, vector<8x128xf32>
    %149 = arith.maximumf %147, %148 : vector<8x128xf32>
    %c54 = arith.constant 54 : index
    %c0_151 = arith.constant 0 : index
    %150 = tpu.strided_load %arg8[%c54, %c0_151] {strides = array<i32: 2, 1>} : memref<288x128xf32, #tpu.memory_space<vmem>>, vector<8x128xf32>
    %c55 = arith.constant 55 : index
    %c0_152 = arith.constant 0 : index
    %151 = tpu.strided_load %arg8[%c55, %c0_152] {strides = array<i32: 2, 1>} : memref<288x128xf32, #tpu.memory_space<vmem>>, vector<8x128xf32>
    %152 = arith.maximumf %150, %151 : vector<8x128xf32>
    %153 = arith.maximumf %149, %152 : vector<8x128xf32>
    %c0_153 = arith.constant 0 : index
    %c1_154 = arith.constant 1 : index
    %c0_155 = arith.constant 0 : index
    %c0_156 = arith.constant 0 : index
    %154 = vector.load %arg6[%c0_153, %c1_154, %c0_155, %c0_156] : memref<1x8x8x128xf32, #tpu.memory_space<vmem>>, vector<1x1x8x128xf32>
    %155 = vector.shape_cast %154 : vector<1x1x8x128xf32> to vector<8x128xf32>
    %156 = vector.shape_cast %153 : vector<8x128xf32> to vector<1x1x8x128xf32>
    tpu.vector_store %arg6[%c0_153, %c1_154, %c0_155, %c0_156], %156 {strides = array<i32>} : memref<1x8x8x128xf32, #tpu.memory_space<vmem>>, vector<1x1x8x128xf32>,
    %c72 = arith.constant 72 : index
    %c0_157 = arith.constant 0 : index
    %157 = tpu.strided_load %arg8[%c72, %c0_157] {strides = array<i32: 2, 1>} : memref<288x128xf32, #tpu.memory_space<vmem>>, vector<8x128xf32>
    %c73 = arith.constant 73 : index
    %c0_158 = arith.constant 0 : index
    %158 = tpu.strided_load %arg8[%c73, %c0_158] {strides = array<i32: 2, 1>} : memref<288x128xf32, #tpu.memory_space<vmem>>, vector<8x128xf32>
    %159 = arith.maximumf %157, %158 : vector<8x128xf32>
    %c90 = arith.constant 90 : index
    %c0_159 = arith.constant 0 : index
    %160 = tpu.strided_load %arg8[%c90, %c0_159] {strides = array<i32: 2, 1>} : memref<288x128xf32, #tpu.memory_space<vmem>>, vector<8x128xf32>
    %c91 = arith.constant 91 : index
    %c0_160 = arith.constant 0 : index
    %161 = tpu.strided_load %arg8[%c91, %c0_160] {strides = array<i32: 2, 1>} : memref<288x128xf32, #tpu.memory_space<vmem>>, vector<8x128xf32>
    %162 = arith.maximumf %160, %161 : vector<8x128xf32>
    %163 = arith.maximumf %159, %162 : vector<8x128xf32>
    %c0_161 = arith.constant 0 : index
    %c2_162 = arith.constant 2 : index
    %c0_163 = arith.constant 0 : index
    %c0_164 = arith.constant 0 : index
    %164 = vector.load %arg6[%c0_161, %c2_162, %c0_163, %c0_164] : memref<1x8x8x128xf32, #tpu.memory_space<vmem>>, vector<1x1x8x128xf32>
    %165 = vector.shape_cast %164 : vector<1x1x8x128xf32> to vector<8x128xf32>
    %166 = vector.shape_cast %163 : vector<8x128xf32> to vector<1x1x8x128xf32>
    tpu.vector_store %arg6[%c0_161, %c2_162, %c0_163, %c0_164], %166 {strides = array<i32>} : memref<1x8x8x128xf32, #tpu.memory_space<vmem>>, vector<1x1x8x128xf32>,
    %c108 = arith.constant 108 : index
    %c0_165 = arith.constant 0 : index
    %167 = tpu.strided_load %arg8[%c108, %c0_165] {strides = array<i32: 2, 1>} : memref<288x128xf32, #tpu.memory_space<vmem>>, vector<8x128xf32>
    %c109 = arith.constant 109 : index
    %c0_166 = arith.constant 0 : index
    %168 = tpu.strided_load %arg8[%c109, %c0_166] {strides = array<i32: 2, 1>} : memref<288x128xf32, #tpu.memory_space<vmem>>, vector<8x128xf32>
    %169 = arith.maximumf %167, %168 : vector<8x128xf32>
    %c126 = arith.constant 126 : index
    %c0_167 = arith.constant 0 : index
    %170 = tpu.strided_load %arg8[%c126, %c0_167] {strides = array<i32: 2, 1>} : memref<288x128xf32, #tpu.memory_space<vmem>>, vector<8x128xf32>
    %c127 = arith.constant 127 : index
    %c0_168 = arith.constant 0 : index
    %171 = tpu.strided_load %arg8[%c127, %c0_168] {strides = array<i32: 2, 1>} : memref<288x128xf32, #tpu.memory_space<vmem>>, vector<8x128xf32>
    %172 = arith.maximumf %170, %171 : vector<8x128xf32>
    %173 = arith.maximumf %169, %172 : vector<8x128xf32>
    %c0_169 = arith.constant 0 : index
    %c3 = arith.constant 3 : index
    %c0_170 = arith.constant 0 : index
    %c0_171 = arith.constant 0 : index
    %174 = vector.load %arg6[%c0_169, %c3, %c0_170, %c0_171] : memref<1x8x8x128xf32, #tpu.memory_space<vmem>>, vector<1x1x8x128xf32>
    %175 = vector.shape_cast %174 : vector<1x1x8x128xf32> to vector<8x128xf32>
    %176 = vector.shape_cast %173 : vector<8x128xf32> to vector<1x1x8x128xf32>
    tpu.vector_store %arg6[%c0_169, %c3, %c0_170, %c0_171], %176 {strides = array<i32>} : memref<1x8x8x128xf32, #tpu.memory_space<vmem>>, vector<1x1x8x128xf32>,
    %c144 = arith.constant 144 : index
    %c0_172 = arith.constant 0 : index
    %177 = tpu.strided_load %arg8[%c144, %c0_172] {strides = array<i32: 2, 1>} : memref<288x128xf32, #tpu.memory_space<vmem>>, vector<8x128xf32>
    %c145 = arith.constant 145 : index
    %c0_173 = arith.constant 0 : index
    %178 = tpu.strided_load %arg8[%c145, %c0_173] {strides = array<i32: 2, 1>} : memref<288x128xf32, #tpu.memory_space<vmem>>, vector<8x128xf32>
    %179 = arith.maximumf %177, %178 : vector<8x128xf32>
    %c162 = arith.constant 162 : index
    %c0_174 = arith.constant 0 : index
    %180 = tpu.strided_load %arg8[%c162, %c0_174] {strides = array<i32: 2, 1>} : memref<288x128xf32, #tpu.memory_space<vmem>>, vector<8x128xf32>
    %c163 = arith.constant 163 : index
    %c0_175 = arith.constant 0 : index
    %181 = tpu.strided_load %arg8[%c163, %c0_175] {strides = array<i32: 2, 1>} : memref<288x128xf32, #tpu.memory_space<vmem>>, vector<8x128xf32>
    %182 = arith.maximumf %180, %181 : vector<8x128xf32>
    %183 = arith.maximumf %179, %182 : vector<8x128xf32>
    %c0_176 = arith.constant 0 : index
    %c4 = arith.constant 4 : index
    %c0_177 = arith.constant 0 : index
    %c0_178 = arith.constant 0 : index
    %184 = vector.load %arg6[%c0_176, %c4, %c0_177, %c0_178] : memref<1x8x8x128xf32, #tpu.memory_space<vmem>>, vector<1x1x8x128xf32>
    %185 = vector.shape_cast %184 : vector<1x1x8x128xf32> to vector<8x128xf32>
    %186 = vector.shape_cast %183 : vector<8x128xf32> to vector<1x1x8x128xf32>
    tpu.vector_store %arg6[%c0_176, %c4, %c0_177, %c0_178], %186 {strides = array<i32>} : memref<1x8x8x128xf32, #tpu.memory_space<vmem>>, vector<1x1x8x128xf32>,
    %c180 = arith.constant 180 : index
    %c0_179 = arith.constant 0 : index
    %187 = tpu.strided_load %arg8[%c180, %c0_179] {strides = array<i32: 2, 1>} : memref<288x128xf32, #tpu.memory_space<vmem>>, vector<8x128xf32>
    %c181 = arith.constant 181 : index
    %c0_180 = arith.constant 0 : index
    %188 = tpu.strided_load %arg8[%c181, %c0_180] {strides = array<i32: 2, 1>} : memref<288x128xf32, #tpu.memory_space<vmem>>, vector<8x128xf32>
    %189 = arith.maximumf %187, %188 : vector<8x128xf32>
    %c198 = arith.constant 198 : index
    %c0_181 = arith.constant 0 : index
    %190 = tpu.strided_load %arg8[%c198, %c0_181] {strides = array<i32: 2, 1>} : memref<288x128xf32, #tpu.memory_space<vmem>>, vector<8x128xf32>
    %c199 = arith.constant 199 : index
    %c0_182 = arith.constant 0 : index
    %191 = tpu.strided_load %arg8[%c199, %c0_182] {strides = array<i32: 2, 1>} : memref<288x128xf32, #tpu.memory_space<vmem>>, vector<8x128xf32>
    %192 = arith.maximumf %190, %191 : vector<8x128xf32>
    %193 = arith.maximumf %189, %192 : vector<8x128xf32>
    %c0_183 = arith.constant 0 : index
    %c5 = arith.constant 5 : index
    %c0_184 = arith.constant 0 : index
    %c0_185 = arith.constant 0 : index
    %194 = vector.load %arg6[%c0_183, %c5, %c0_184, %c0_185] : memref<1x8x8x128xf32, #tpu.memory_space<vmem>>, vector<1x1x8x128xf32>
    %195 = vector.shape_cast %194 : vector<1x1x8x128xf32> to vector<8x128xf32>
    %196 = vector.shape_cast %193 : vector<8x128xf32> to vector<1x1x8x128xf32>
    tpu.vector_store %arg6[%c0_183, %c5, %c0_184, %c0_185], %196 {strides = array<i32>} : memref<1x8x8x128xf32, #tpu.memory_space<vmem>>, vector<1x1x8x128xf32>,
    %c216 = arith.constant 216 : index
    %c0_186 = arith.constant 0 : index
    %197 = tpu.strided_load %arg8[%c216, %c0_186] {strides = array<i32: 2, 1>} : memref<288x128xf32, #tpu.memory_space<vmem>>, vector<8x128xf32>
    %c217 = arith.constant 217 : index
    %c0_187 = arith.constant 0 : index
    %198 = tpu.strided_load %arg8[%c217, %c0_187] {strides = array<i32: 2, 1>} : memref<288x128xf32, #tpu.memory_space<vmem>>, vector<8x128xf32>
    %199 = arith.maximumf %197, %198 : vector<8x128xf32>
    %c234 = arith.constant 234 : index
    %c0_188 = arith.constant 0 : index
    %200 = tpu.strided_load %arg8[%c234, %c0_188] {strides = array<i32: 2, 1>} : memref<288x128xf32, #tpu.memory_space<vmem>>, vector<8x128xf32>
    %c235 = arith.constant 235 : index
    %c0_189 = arith.constant 0 : index
    %201 = tpu.strided_load %arg8[%c235, %c0_189] {strides = array<i32: 2, 1>} : memref<288x128xf32, #tpu.memory_space<vmem>>, vector<8x128xf32>
    %202 = arith.maximumf %200, %201 : vector<8x128xf32>
    %203 = arith.maximumf %199, %202 : vector<8x128xf32>
    %c0_190 = arith.constant 0 : index
    %c6 = arith.constant 6 : index
    %c0_191 = arith.constant 0 : index
    %c0_192 = arith.constant 0 : index
    %204 = vector.load %arg6[%c0_190, %c6, %c0_191, %c0_192] : memref<1x8x8x128xf32, #tpu.memory_space<vmem>>, vector<1x1x8x128xf32>
    %205 = vector.shape_cast %204 : vector<1x1x8x128xf32> to vector<8x128xf32>
    %206 = vector.shape_cast %203 : vector<8x128xf32> to vector<1x1x8x128xf32>
    tpu.vector_store %arg6[%c0_190, %c6, %c0_191, %c0_192], %206 {strides = array<i32>} : memref<1x8x8x128xf32, #tpu.memory_space<vmem>>, vector<1x1x8x128xf32>,
    %c252 = arith.constant 252 : index
    %c0_193 = arith.constant 0 : index
    %207 = tpu.strided_load %arg8[%c252, %c0_193] {strides = array<i32: 2, 1>} : memref<288x128xf32, #tpu.memory_space<vmem>>, vector<8x128xf32>
    %c253 = arith.constant 253 : index
    %c0_194 = arith.constant 0 : index
    %208 = tpu.strided_load %arg8[%c253, %c0_194] {strides = array<i32: 2, 1>} : memref<288x128xf32, #tpu.memory_space<vmem>>, vector<8x128xf32>
    %209 = arith.maximumf %207, %208 : vector<8x128xf32>
    %c270 = arith.constant 270 : index
    %c0_195 = arith.constant 0 : index
    %210 = tpu.strided_load %arg8[%c270, %c0_195] {strides = array<i32: 2, 1>} : memref<288x128xf32, #tpu.memory_space<vmem>>, vector<8x128xf32>
    %c271 = arith.constant 271 : index
    %c0_196 = arith.constant 0 : index
    %211 = tpu.strided_load %arg8[%c271, %c0_196] {strides = array<i32: 2, 1>} : memref<288x128xf32, #tpu.memory_space<vmem>>, vector<8x128xf32>
    %212 = arith.maximumf %210, %211 : vector<8x128xf32>
    %213 = arith.maximumf %209, %212 : vector<8x128xf32>
    %c0_197 = arith.constant 0 : index
    %c7 = arith.constant 7 : index
    %c0_198 = arith.constant 0 : index
    %c0_199 = arith.constant 0 : index
    %214 = vector.load %arg6[%c0_197, %c7, %c0_198, %c0_199] : memref<1x8x8x128xf32, #tpu.memory_space<vmem>>, vector<1x1x8x128xf32>
    %215 = vector.shape_cast %214 : vector<1x1x8x128xf32> to vector<8x128xf32>
    %216 = vector.shape_cast %213 : vector<8x128xf32> to vector<1x1x8x128xf32>
    tpu.vector_store %arg6[%c0_197, %c7, %c0_198, %c0_199], %216 {strides = array<i32>} : memref<1x8x8x128xf32, #tpu.memory_space<vmem>>, vector<1x1x8x128xf32>,
    return
  }
  func.func @transform_0(%arg0: i32) -> (i32, i32, i32) {
    %c0_i32 = arith.constant 0 : i32
    %c0_i32_0 = arith.constant 0 : i32
    %c0_i32_1 = arith.constant 0 : i32
    return %arg0, %c0_i32, %c0_i32_0 : i32, i32, i32
  }
  func.func @transform_1(%arg0: i32) -> (i32, i32, i32, i32) {
    %c0_i32 = arith.constant 0 : i32
    %c0_i32_0 = arith.constant 0 : i32
    %c0_i32_1 = arith.constant 0 : i32
    %c0_i32_2 = arith.constant 0 : i32
    %c0_i32_3 = arith.constant 0 : i32
    return %c0_i32, %c0_i32_0, %c0_i32_1, %c0_i32_2 : i32, i32, i32, i32
  }
  func.func @transform_2(%arg0: i32) -> (i32, i32) {
    %c0_i32 = arith.constant 0 : i32
    %c0_i32_0 = arith.constant 0 : i32
    %c0_i32_1 = arith.constant 0 : i32
    return %c0_i32, %c0_i32_0 : i32, i32
  }
  func.func @transform_3(%arg0: i32) -> (i32, i32, i32, i32) {
    %c0_i32 = arith.constant 0 : i32
    %c0_i32_0 = arith.constant 0 : i32
    %c0_i32_1 = arith.constant 0 : i32
    %c0_i32_2 = arith.constant 0 : i32
    %c0_i32_3 = arith.constant 0 : i32
    return %c0_i32, %c0_i32_0, %c0_i32_1, %c0_i32_2 : i32, i32, i32, i32
  }
  func.func @transform_4(%arg0: i32) -> (i32, i32) {
    %c0_i32 = arith.constant 0 : i32
    %c0_i32_0 = arith.constant 0 : i32
    %c0_i32_1 = arith.constant 0 : i32
    return %c0_i32, %c0_i32_0 : i32, i32
  }
  func.func @transform_5(%arg0: i32) -> (i32, i32, i32, i32) {
    %c0_i32 = arith.constant 0 : i32
    %c0_i32_0 = arith.constant 0 : i32
    %c0_i32_1 = arith.constant 0 : i32
    %c0_i32_2 = arith.constant 0 : i32
    return %arg0, %c0_i32, %c0_i32_0, %c0_i32_1 : i32, i32, i32, i32
  }
}

</mosaic_0001>

<bundles_post_ra>
// kernel: vgg_conv2_forward.1
= control target key start
LH: loop header
LB: loop body
LE: loop exit
PB: predicated region body
PF: predicated region fallthrough
CT: control target
= control target key end

     0   :  { %10 = vsyncpa [#allocation5], 0  ;;  %s17016_s0 = inlined_call_operand.vmem [shape: bf16[2,342,64], index: 0, kind: input, shape index: {}]   ;;  %s17017_s1 = inlined_call_operand.vmem [shape: bf16[3,3,64,128], index: 1, kind: input, shape index: {}]   ;;  %s17018_s2 = inlined_call_operand.vmem [shape: f32[1,128], index: 2, kind: input, shape index: {}]   ;;  %s17019_s3 = inlined_call_operand.vmem [shape: bf16[3,3,128,128], index: 3, kind: input, shape index: {}]   ;;  %s17020_s4 = inlined_call_operand.vmem [shape: f32[1,128], index: 4, kind: input, shape index: {}]   ;;  %s17021_s5 = inlined_call_operand.hbm [shape: f32[2,8,8,128], index: 5, kind: output, shape index: {}]  }
   0x1   :  { %12 = vsyncpa [#allocation5 + $0x1], 0  ;;  %s11866_s18 = smov 0   ;;  %s11868_s19 = smov 0  }
   0x2   :  { %s11870_s20 = smov 0   ;;  %s11872_s21 = smov 0  }
   0x3 LB: > { %s11887_s22 = sadd.s32 4294967295, %s11830_s21   ;;  %s9266_s23 = sadd.s32 4294967294, %s11830_s21   ;;  %s11830_s21 = sphi %s11872_s21, %s18022_s21   ;;  %s11826_s20 = sphi %s11870_s20, %s18021_s20   ;;  %s11822_s19 = sphi %s11868_s19, %s18020_s19   ;;  %s11818_s18 = sphi %s11866_s18, %s18019_s18  }
   0x4   : > { %s11891_s24 = sadd.s32 1, %s11830_s21   ;;  %s135_s25 = sadd.s32 1, %s11826_s20 }
   0x5   : > { %s132_s26 = ssub.s32 %s11830_s21, %s11891_s24  ;;  %p145_p0 = scmp.ne.s32.totalorder %s11826_s20, %s11822_s19 }
   0x6   : > { %p133_p1 = scmp.eq.s32.totalorder %s132_s26, 0  ;;  %p146_p2 = scmp.eq.s32.totalorder %s11887_s22, 1 }
   0x7   : > { %p151_p3 = scmp.ne.s32.totalorder %s11822_s19, %s11818_s18  ;;  %p152_p4 = scmp.eq.s32.totalorder %s9266_s23, 1 }
   0x8   : > { %s11902_s27 = scalar_select %p133_p1, %s11826_s20, %s135_s25  }
   0x9   : > { %p11904_p5 = por %p146_p2, %p145_p0  ;;  %p11908_p6 = por %p152_p4, %p151_p3 }
   0xa   : > { %p9269_p7 = scmp.ge.s32.totalorder %s11830_s21, 1  ;;  %p190_p8 = scmp.lt.s32.totalorder %s11830_s21, 3 }
   0xc   : > { %p191_p9 = pnand %p9269_p7, %p190_p8 }
   0xe   : > { %194 = sbr.rel (%p191_p9) target bundleno = 1170 (0x492), region = 40 }
  0x13   : > { %v11500_v0 = vld [vmem:[%s17017_s1 + $0x38] sm:$0xff]   ;;  %p218_p10 = scmp.lt.s32.totalorder %s11887_s22, 1  ;;  %v11502_v2 = vld [vmem:[%s17017_s1 + $0x30] sm:$0xff]   ;;  %v11504_v4 = vld [vmem:[%s17017_s1 + $0x28] sm:$0xff]   ;;  %vm544_vm0 = vcmask 523264   ;;  %vm17040_vm2 = vcmask 1046528  }
  0x14   : > { %v11501_v1 = vld [vmem:[%s17017_s1 + $0x18] sm:$0xff]   ;;  %10521 = vmatprep.subr.bf16.mxu0 %v11500_v0  ;;  %v11503_v3 = vld [vmem:[%s17017_s1 + $0x10] sm:$0xff]   ;;  %v11505_v5 = vld [vmem:[%s17017_s1 + $0x8] sm:$0xff]   ;;  %vm17042_vm1 = vsmask.f32 7424  ;;  %vm2310_vm4 = vcmask 1045504  }
  0x15   : > { %s219_s11 = scalar_select %p218_p10, %s11887_s22, 1  ;;  %10565 = vmatprep.subr.bf16.mxu1 %v11501_v1  ;;  %10522 = vmatpush3.bf16.msra.mxu0 %v11500_v0  ;;  %v11506_v6 = vld [vmem:[%s17017_s1 + $0x20] sm:$0xff]   ;;  %v11511_v18 = vld [vmem:[%s17017_s1 + $0x58] sm:$0xff]   ;;  %v11516_v37 = vld [vmem:[%s17017_s1 + $0x50] sm:$0xff]   ;;  %vm17041_vm3 = vsmask.f32 6400 }
  0x16   : > { %10566 = vmatpush3.bf16.msra.mxu1 %v11501_v1  ;;  %10523 = vmatprep.subr.bf16.mxu0 %v11502_v2  ;;  %v11507_v7 = vld [vmem:[%s17017_s1] sm:$0xff]   ;;  %v11521_v48 = vld [vmem:[%s17017_s1 + $0x48] sm:$0xff]   ;;  %vm17044_vm5 = vsmask.f32 5376  ;;  %vm17048_vm6 = vcmask 1044480   ;;  %s215_s13 = sand.u32 1, %s11822_s19  }
  0x17   : > { %s11385_s16 = smul.u32 172, %s219_s11  ;;  %10567 = vmatprep.subr.bf16.mxu1 %v11503_v3  ;;  %v11526_v58 = vld [vmem:[%s17017_s1 + $0x40] sm:$0xff]   ;;  %s9270_s14 = sshll.u32 %s215_s13, 6 }
  0x18   : > { %s16892_s15 = scalar_lea.vmem [#allocation4], %s9270_s14  ;;  %s11833_s30 = smov [#allocation4]  }
  0x19   : > { %s11940_s7 = scalar_lea.vmem %s17016_s0, %s11385_s16  ;;  %10524 = vmatpush3.bf16.msra.mxu0 %v11502_v2  ;;  %v11529_v2 = vld [vmem:[%s17017_s1 + $0x78] sm:$0xff]   ;;  %s9980_s16 = sshll.u32 %s11887_s22, 10 }
  0x1a   : > { %10568 = vmatpush3.bf16.msra.mxu1 %v11503_v3  ;;  %10525 = vmatprep.subr.bf16.mxu0 %v11504_v4  ;;  %v224_v8 = vld [vmem:[%s11940_s7] sm:$0xf]  ;;  %v11947_v9 = vld [vmem:[%s11940_s7 + $0x4] sm:$0xf]  ;;  %v11951_v11 = vld [vmem:[%s11940_s7 + $0x8] sm:$0xff]   ;;  %s9204_s17 = sshll.u32 %s16892_s15, 4  ;;  %s16969_s26 = scalar_lea.hbm %s17021_s5, %s9980_s16  ;;  %s16971_s17 = int_to_ptr.vmem [resolvable:$true] %s9204_s17 }
  0x1b   : > { %10569 = vmatprep.subr.bf16.mxu1 %v11505_v5  ;;  %v9280_v10 = vcombine.low %v224_v8, %v11947_v9  ;;  %v11954_v12 = vld [vmem:[%s11940_s7 + $0x10] sm:$0xff]   ;;  %v380_v15 = vshll.u32 %v11951_v11, 16  ;;  %v384_v16 = vshrl.u32 %v11951_v11, 16  ;;  %v11964_v21 = vld [vmem:[%s11940_s7 + $0x18] sm:$0xff]   ;;  %v11968_v24 = vld [vmem:[%s11940_s7 + $0x20] sm:$0xff]   ;;  %s16976_s22 = scalar_lea.sflag [#allocation5], %s215_s13 }
  0x1c   : > { %v388_v17 = vshll.u32 %v11954_v12, 16  ;;  %v392_v22 = vshrl.u32 %v11954_v12, 16  ;;  %v396_v27 = vshll.u32 %v11964_v21, 16  ;;  %v400_v28 = vshrl.u32 %v11964_v21, 16  ;;  %v11973_v29 = vld [vmem:[%s11940_s7 + $0x28] sm:$0xff]   ;;  %v11989_v40 = vld [vmem:[%s11940_s7 + $0x30] sm:$0xff]  }
  0x1d   : > { %10526 = vmatpush3.bf16.msra.mxu0 %v11504_v4  ;;  %v373_v13 = vshrl.u32 %v9280_v10, 16  ;;  %v375_v14 = vshll.u32 %v9280_v10, 16  ;;  %10573 = vmatprep.mubr.msk.bf16.mxu1 %vm544_vm0, %v9280_v10  ;;  %v382_v20 = vrot.slane %v380_v15, 1  ;;  %v404_v31 = vshll.u32 %v11968_v24, 16  ;;  %v11995_v44 = vld [vmem:[%s11940_s7 + $0x38] sm:$0xff]   ;;  %v12010_v53 = vld [vmem:[%s11940_s7 + $0x40] sm:$0xff]  }
  0x1e   : > { %10570 = vmatpush3.bf16.msra.mxu1 %v11505_v5  ;;  %10527 = vmatprep.subr.bf16.mxu0 %v11506_v6  ;;  %v390_v23 = vrot.slane %v388_v17, 1  ;;  %v408_v32 = vshrl.u32 %v11968_v24, 16  ;;  %v398_v35 = vrot.slane %v396_v27, 1  ;;  %v412_v36 = vshll.u32 %v11973_v29, 16  ;;  %v12016_v57 = vld [vmem:[%s11940_s7 + $0x48] sm:$0xff]   ;;  %v12023_v60 = vld [vmem:[%s11940_s7 + $0x50] sm:$0xff]  }
  0x1f   : > { %10571 = vmatprep.subr.bf16.mxu1 %v11507_v7  ;;  %v377_v19 = vrot.slane %v375_v14, 1  ;;  %v386_v26 = vor.u32 %v384_v16, %v382_v20  ;;  %v406_v39 = vrot.slane %v404_v31, 1  ;;  %v420_v45 = vshll.u32 %v11989_v40, 16  ;;  %v11530_v5 = vld [vmem:[%s17017_s1 + $0x70] sm:$0xff]   ;;  %v12048_v14 = vld [vmem:[%s11940_s7 + $0x60] sm:$0xff]   ;;  %v12051_v15 = vld [vmem:[%s11940_s7 + $0x68] sm:$0xff]  }
  0x20   : > { %v394_v30 = vor.u32 %v392_v22, %v390_v23  ;;  %v402_v41 = vor.u32 %v400_v28, %v398_v35  ;;  %v414_v43 = vrot.slane %v412_v36, 1  ;;  %v416_v47 = vshrl.u32 %v11973_v29, 16  ;;  %v12054_v16 = vld [vmem:[%s11940_s7 + $0x70] sm:$0xff]   ;;  %v1013_v22 = vld [vmem:[%s11940_s7] sm:$0xe]  ;;  %v11533_v28 = vld [vmem:[%s17017_s1 + $0x68] sm:$0xff]  }
  0x21   : > { %10528 = vmatpush3.bf16.msra.mxu0 %v11506_v6  ;;  %v378_v25 = vor.u32 %v377_v19, %v373_v13  ;;  %v391_v34 = vsel %vm17042_vm1, %v386_v26, %v390_v23  ;;  %v410_v42 = vor.u32 %v408_v32, %v406_v39  ;;  %v424_v50 = vshrl.u32 %v11989_v40, 16  ;;  %v12045_v13 = vld [vmem:[%s11940_s7 + $0x58] sm:$0xff]   ;;  %s11774_s6 = sshll.u32 %s11833_s30, 4  ;;  %s11775_s6 = int_to_ptr.vmem [resolvable:$false] %s11774_s6 }
  0x22   : > { %10572 = vmatpush3.bf16.msra.mxu1 %v11507_v7  ;;  %10609 = vmatprep.subr.bf16.mxu0 %v11511_v18  ;;  %v399_v38 = vsel %vm17042_vm1, %v394_v30, %v398_v35  ;;  %v407_v46 = vsel %vm17042_vm1, %v402_v41, %v406_v39  ;;  %v428_v51 = vshll.u32 %v11995_v44, 16  ;;  %v422_v52 = vrot.slane %v420_v45, 1  ;;  %s11776_s8 = scalar_lea.vmem %s11775_s6, 2048  ;;  %p11777_p0 = scmp.lt.s32.totalorder %s16971_s17, %s11775_s6 }
  0x23   : > { %v383_v33 = vsel %vm17042_vm1, %v378_v25, %v382_v20  ;;  %v415_v49 = vsel %vm17042_vm1, %v410_v42, %v414_v43  ;;  %v418_v54 = vor.u32 %v416_v47, %v414_v43  ;;  %v436_v59 = vshll.u32 %v12010_v53, 16  ;;  %10653 = vmatprep.subr.bf16.mxu1 %v11529_v2  ;;  %v12064_v25 = vld [vmem:[%s17017_s1 + $0x98] sm:$0xff]  }
  0x24   : > { %10529 = vmatprep.mubr.msk.bf16.mxu0 %vm544_vm0, %v383_v33  ;;  %v426_v55 = vor.u32 %v424_v50, %v422_v52  ;;  %v430_v56 = vrot.slane %v428_v51, 1  ;;  %v432_v62 = vshrl.u32 %v11995_v44, 16  ;;  %v440_v0 = vshrl.u32 %v12010_v53, 16  ;;  %v12093_v42 = vld [vmem:[%s11940_s7 + $0x78] sm:$0xff]  }
  0x25   : > { %10530 = vmatmul.mubr.msk.bf16.vlgmr.msra.gmra.mxu0 %vm544_vm0, %v391_v34  ;;  %10574 = vmatmul.mubr.msk.bf16.vlgmr.msra.gmra.mxu1 %vm544_vm0, %v11951_v11  ;;  %v423_v61 = vsel %vm17042_vm1, %v418_v54, %v422_v52  ;;  %v444_v1 = vshll.u32 %v12016_v57, 16  ;;  %v438_v3 = vrot.slane %v436_v59, 1  ;;  %v452_v4 = vshll.u32 %v12023_v60, 16  ;;  %v12111_v52 = vld [vmem:[%s11940_s7 + $0x80] sm:$0xff]   ;;  %v12120_v59 = vld [vmem:[%s11940_s7 + $0x88] sm:$0xff]  }
  0x26   : > { %10610 = vmatpush3.bf16.msra.mxu0 %v11511_v18  ;;  %10533 = vmatprep.mubr.msk.bf16.mxu0 %vm544_vm0, %v399_v38  ;;  %v431_v63 = vsel %vm17042_vm1, %v426_v55, %v430_v56  ;;  %v434_v6 = vor.u32 %v432_v62, %v430_v56  ;;  %v448_v10 = vshrl.u32 %v12016_v57, 16  ;;  %v1028_v17 = vrot.slane %v11951_v11, 1  ;;  %v12114_v54 = vld [vmem:[%s11940_s7 + $0x90] ss:$0 sps:$4 sm:$0x11]  }
  0x27   : > { %10577 = vmatprep.mubr.msk.bf16.mxu1 %vm544_vm0, %v11954_v12  ;;  %10611 = vmatprep.subr.bf16.mxu0 %v11516_v37  ;;  %v442_v7 = vor.u32 %v440_v0, %v438_v3  ;;  %v446_v8 = vrot.slane %v444_v1, 1  ;;  %v454_v18 = vrot.slane %v452_v4, 1  ;;  %v456_v19 = vshrl.u32 %v12023_v60, 16  ;;  %v1355_v62 = vld [vmem:[%s11940_s7 + $0x8] sm:$0xe] }
  0x28   : > { %10654 = vmatpush3.bf16.msra.mxu1 %v11529_v2  ;;  %v439_v20 = vsel %vm17042_vm1, %v434_v6, %v438_v3  ;;  %v1030_v23 = vrot.slane %v11954_v12, 1  ;;  %v460_v27 = vshll.u32 %v12045_v13, 16  ;;  %v468_v11 = vshll.u32 %v12048_v14, 16 }
  0x29   : > { %10655 = vmatprep.subr.bf16.mxu1 %v11530_v5  ;;  %v447_v26 = vsel %vm17042_vm1, %v442_v7, %v446_v8  ;;  %v9351_v30 = vcombine.low %v1013_v22, %v11947_v9  ;;  %v476_v31 = vshll.u32 %v12051_v15, 16  ;;  %v484_v12 = vshll.u32 %v12054_v16, 16  ;;  %v11534_v9 = vld [vmem:[%s17017_s1 + $0x60] sm:$0xff]  }
  0x2a   : > { %10612 = vmatpush3.bf16.msra.mxu0 %v11516_v37  ;;  %v12076_v32 = vsel %vm17040_vm2, %v1028_v17, %v1030_v23  ;;  %v450_v33 = vor.u32 %v448_v10, %v446_v8  ;;  %v464_v35 = vshrl.u32 %v12045_v13, 16  ;;  %v472_v36 = vshrl.u32 %v12048_v14, 16 }
  0x2b   : > { %10613 = vmatprep.subr.bf16.mxu0 %v11521_v48  ;;  %v1027_v34 = vrot.slane %v9351_v30, 1  ;;  %v1032_v37 = vrot.slane %v11964_v21, 1  ;;  %v1034_v38 = vrot.slane %v11968_v24, 1  ;;  %v458_v39 = vor.u32 %v456_v19, %v454_v18 }
  0x2c   : > { %10656 = vmatpush3.bf16.msra.mxu1 %v11530_v5  ;;  %v462_v41 = vrot.slane %v460_v27, 1  ;;  %v470_v45 = vrot.slane %v468_v11, 1  ;;  %v1038_v50 = vrot.slane %v11989_v40, 1  ;;  %v455_v51 = vsel %vm17042_vm1, %v450_v33, %v454_v18  ;;  %v12170_v11 = vld [vmem:[%s11940_s7 + $0x18] sm:$0xff]  }
  0x2d   : > { %10534 = vmatmul.mubr.msk.bf16.gmra.mxu0 %vm544_vm0, %v407_v46  ;;  %10578 = vmatmul.mubr.msk.bf16.gmra.mxu1 %vm544_vm0, %v11964_v21  ;;  %v12096_v43 = vsel %vm17040_vm2, %v1027_v34, %v1028_v17  ;;  %v480_v46 = vshrl.u32 %v12051_v15, 16  ;;  %v12100_v47 = vsel %vm17040_vm2, %v1030_v23, %v1032_v37  ;;  %v12103_v21 = vsel %vm17040_vm2, %v1032_v37, %v1034_v38  ;;  %v12156_v17 = vld [vmem:[%s11940_s7 + $0x10] sm:$0xff]   ;;  %v12187_v37 = vld [vmem:[%s11940_s7 + $0x20] sm:$0xff]  }
  0x2e   : > { %10537 = vmatprep.mubr.msk.bf16.mxu0 %vm544_vm0, %v415_v49  ;;  %10581 = vmatprep.mubr.msk.bf16.mxu1 %vm544_vm0, %v11968_v24  ;;  %v478_v24 = vrot.slane %v476_v31, 1  ;;  %v1036_v49 = vrot.slane %v11973_v29, 1  ;;  %v1040_v55 = vrot.slane %v11995_v44, 1  ;;  %v463_v56 = vsel %vm17042_vm1, %v458_v39, %v462_v41 }
  0x2f   : > { %10614 = vmatpush3.bf16.msra.mxu0 %v11521_v48  ;;  %10657 = vmatprep.subr.bf16.mxu1 %v11533_v28  ;;  %v12105_v48 = vrot.slane %v484_v12, 1  ;;  %v1042_v0 = vrot.slane %v12010_v53, 1  ;;  %v466_v1 = vor.u32 %v464_v35, %v462_v41  ;;  %v496_v2 = vshrl.u32 %v12093_v42, 16 }
  0x30   : > { %10615 = vmatprep.subr.bf16.mxu0 %v11526_v58  ;;  %10658 = vmatpush3.bf16.msra.mxu1 %v11533_v28  ;;  %v1044_v3 = vrot.slane %v12016_v57, 1  ;;  %v474_v4 = vor.u32 %v472_v36, %v470_v45  ;;  %v500_v5 = vshll.u32 %v12111_v52, 16  ;;  %v1046_v6 = vrot.slane %v12023_v60, 1 }
  0x31   : > { %10659 = vmatprep.subr.bf16.mxu1 %v11534_v9  ;;  %v508_v8 = vshll.u32 %v12120_v59, 16  ;;  %v504_v19 = vshrl.u32 %v12111_v52, 16  ;;  %v1050_v22 = vrot.slane %v12048_v14, 1  ;;  %v471_v23 = vsel %vm17042_vm1, %v466_v1, %v470_v45  ;;  %v12199_v45 = vld [vmem:[%s11940_s7 + $0x28] sm:$0xff]  }
  0x32   : > { %v12152_v10 = vsel %vm17040_vm2, %v1042_v0, %v1044_v3  ;;  %v12159_v18 = vsel %vm17040_vm2, %v1044_v3, %v1046_v6  ;;  %v502_v27 = vrot.slane %v500_v5, 1  ;;  %v512_v28 = vshrl.u32 %v12120_v59, 16  ;;  %v12227_v3 = vld [vmem:[%s17017_s1 + $0xb8] sm:$0xff]  }
  0x33   : > { %10616 = vmatpush3.bf16.msra.mxu0 %v11526_v58  ;;  %v492_v58 = vshll.u32 %v12093_v42, 16  ;;  %v1052_v12 = vrot.slane %v12051_v15, 1  ;;  %v510_v33 = vrot.slane %v508_v8, 1  ;;  %v1495_v34 = vrot.slane %v12156_v17, 1 }
  0x34   : > { %10697 = vmatprep.subr.bf16.mxu0 %v12064_v25  ;;  %10660 = vmatpush3.bf16.msra.mxu1 %v11534_v9  ;;  %v1054_v35 = vrot.slane %v12054_v16, 1  ;;  %v482_v39 = vor.u32 %v480_v46, %v478_v24  ;;  %v1497_v41 = vrot.slane %v12170_v11, 1 }
  0x35   : > { %10538 = vmatmul.mubr.msk.bf16.gmra.mxu0 %vm544_vm0, %v423_v61  ;;  %10582 = vmatmul.mubr.msk.bf16.gmra.mxu1 %vm544_vm0, %v11973_v29  ;;  %v12123_v61 = vsel %vm17040_vm2, %v1034_v38, %v1036_v49  ;;  %v12126_v29 = vsel %vm17040_vm2, %v1036_v49, %v1038_v50  ;;  %v494_v7 = vrot.slane %v492_v58, 1  ;;  %v12190_v38 = vsel %vm17040_vm2, %v1050_v22, %v1052_v12  ;;  %v12208_v58 = vld [vmem:[%s11940_s7 + $0x30] sm:$0xff]  }
  0x36   : > { %10541 = vmatprep.mubr.msk.bf16.mxu0 %vm544_vm0, %v431_v63  ;;  %10585 = vmatprep.mubr.msk.bf16.mxu1 %vm544_vm0, %v11989_v40  ;;  %v488_v40 = vshrl.u32 %v12054_v16, 16  ;;  %v12131_v63 = vld [vmem:[%s11940_s7 + $0xc] sm:$0xf]  ;;  %v514_v46 = vor.u32 %v512_v28, %v510_v33  ;;  %v487_v1 = vsel %vm17042_vm1, %v482_v39, %v12105_v48  ;;  %v17022_v8 = vrot.slane %v12208_v58, 1 }
  0x37   : > { %10741 = vmatprep.subr.bf16.mxu1 %v12227_v3 }
  0x38   : > { %v490_v49 = vor.u32 %v488_v40, %v12105_v48  ;;  %v1062_v40 = vrot.slane %v12114_v54, 1 }
  0x3a   : > { %v495_v5 = vsel %vm17042_vm1, %v490_v49, %v494_v7 }
  0x3d   : > { %10542 = vmatmul.mubr.msk.bf16.gmra.mxu0 %vm544_vm0, %v439_v20  ;;  %10586 = vmatmul.mubr.msk.bf16.gmra.mxu1 %vm544_vm0, %v11995_v44  ;;  %v12134_v44 = vsel %vm17040_vm2, %v1038_v50, %v1040_v55  ;;  %v12163_v20 = vcombine.low %v1355_v62, %v12131_v63  ;;  %v1056_v50 = vrot.slane %v12093_v42, 1 }
  0x3e   : > { %10545 = vmatprep.mubr.msk.bf16.mxu0 %vm544_vm0, %v447_v26  ;;  %10589 = vmatprep.mubr.msk.bf16.mxu1 %vm544_vm0, %v12010_v53  ;;  %v12147_v53 = vsel %vm17040_vm2, %v1040_v55, %v1042_v0  ;;  %v479_v26 = vsel %vm17042_vm1, %v474_v4, %v478_v24  ;;  %v498_v55 = vor.u32 %v496_v2, %v494_v7  ;;  %v12212_v24 = vld [vmem:[%s11940_s7 + $0x38] sm:$0xff]   ;;  %v1499_v2 = vrot.slane %v12187_v37, 1 }
  0x3f   : > { %v1494_v36 = vrot.slane %v12163_v20, 1  ;;  %v12215_v62 = vsel %vm17040_vm2, %v1054_v35, %v1056_v50  ;;  %v1840_v28 = vshll.u32 %v12163_v20, 16 }
  0x40   : > { %v503_v48 = vsel %vm17042_vm1, %v498_v55, %v502_v27 }
  0x45   : > { %10546 = vmatmul.mubr.msk.bf16.gmra.mxu0 %vm544_vm0, %v455_v51  ;;  %10590 = vmatmul.mubr.msk.bf16.gmra.mxu1 %vm544_vm0, %v12016_v57  ;;  %v516_v57 = vshll.u32 %v12114_v54, 16  ;;  %v1058_v51 = vrot.slane %v12111_v52, 1  ;;  %v1501_v54 = vrot.slane %v12199_v45, 1 }
  0x46   : > { %10549 = vmatprep.mubr.msk.bf16.mxu0 %vm544_vm0, %v463_v56  ;;  %10593 = vmatprep.mubr.msk.bf16.mxu1 %vm544_vm0, %v12023_v60  ;;  %v1048_v60 = vrot.slane %v12045_v13, 1  ;;  %v506_v56 = vor.u32 %v504_v19, %v502_v27  ;;  %v12248_v19 = vld [vmem:[%s11940_s7 + $0x40] sm:$0xff]  }
  0x47   : > { %v518_v9 = vrot.slane %v516_v57, 1  ;;  %v12218_v0 = vsel %vm17040_vm2, %v1056_v50, %v1058_v51 }
  0x48   : > { %v12174_v30 = vsel %vm17040_vm2, %v1046_v6, %v1048_v60  ;;  %v12177_v31 = vsel %vm17040_vm2, %v1048_v60, %v1050_v22  ;;  %v511_v57 = vsel %vm17042_vm1, %v506_v56, %v510_v33  ;;  %v1837_v60 = vshrl.u32 %v12163_v20, 16 }
  0x49   : > { %v12245_v7 = vsel %vm17042_vm1, %v514_v46, %v518_v9  ;;  %v12255_v22 = vsel %vm17040_vm2, %v1494_v36, %v1495_v34  ;;  %v12272_v33 = vsel %vm17040_vm2, %v1501_v54, %v17022_v8  ;;  %v1848_v9 = vshll.u32 %v12156_v17, 16 }
  0x4a   : > { %v1839_v27 = vrot.slane %v1837_v60, 1  ;;  %v1842_v36 = vrot.slane %v1840_v28, 2  ;;  %v1857_v20 = vshll.u32 %v12170_v11, 16  ;;  %v2314_v46 = vrot.slane %v12170_v11, 2 }
  0x4b   : > { %v1850_v49 = vrot.slane %v1848_v9, 2  ;;  %v1872_v60 = vshrl.u32 %v12199_v45, 16 }
  0x4c   : > { %v1843_v55 = vor.u32 %v1842_v36, %v1839_v27  ;;  %v1859_v56 = vrot.slane %v1857_v20, 2  ;;  %v2318_v36 = vrot.slane %v12199_v45, 2 }
  0x4d   : > { %10550 = vmatmul.mubr.msk.bf16.gmra.mxu0 %vm544_vm0, %v471_v23  ;;  %10594 = vmatmul.mubr.msk.bf16.gmra.mxu1 %vm544_vm0, %v12045_v13  ;;  %v12202_v13 = vsel %vm17040_vm2, %v1052_v12, %v1054_v35  ;;  %v12261_v23 = vsel %vm17040_vm2, %v1497_v41, %v1499_v2  ;;  %v1845_v12 = vshrl.u32 %v12156_v17, 16 }
  0x4e   : > { %10553 = vmatprep.mubr.msk.bf16.mxu0 %vm544_vm0, %v479_v26  ;;  %10597 = vmatprep.mubr.msk.bf16.mxu1 %vm544_vm0, %v12048_v14  ;;  %v1060_v14 = vrot.slane %v12120_v59, 1 }
  0x4f   : > { %v1847_v39 = vrot.slane %v1845_v12, 1  ;;  %v1874_v12 = vrot.slane %v1872_v60, 1  ;;  %v1899_v60 = vshrl.u32 %v12248_v19, 16 }
  0x50   : > { %v12230_v4 = vsel %vm17040_vm2, %v1058_v51, %v1060_v14  ;;  %v12234_v6 = vsel %vm17040_vm2, %v1060_v14, %v1062_v40  ;;  %v2312_v14 = vrot.slane %v12156_v17, 2  ;;  %v1875_v17 = vshll.u32 %v12199_v45, 16 }
  0x51   : > { %v1851_v40 = vor.u32 %v1850_v49, %v1847_v39  ;;  %v1884_v39 = vshll.u32 %v12208_v58, 16  ;;  %v1890_v49 = vshrl.u32 %v12212_v24, 16 }
  0x52   : > { %v1877_v9 = vrot.slane %v1875_v17, 2  ;;  %v1902_v17 = vshll.u32 %v12248_v19, 16 }
  0x54   : > { %v1878_v20 = vor.u32 %v1877_v9, %v1874_v12 }
  0x55   : > { %10554 = vmatmul.mubr.msk.bf16.gmra.mxu0 %vm544_vm0, %v487_v1  ;;  %10598 = vmatmul.mubr.msk.bf16.gmra.mxu1 %vm544_vm0, %v12051_v15  ;;  %v12258_v15 = vsel %vm17040_vm2, %v1495_v34, %v1497_v41  ;;  %v1854_v34 = vshrl.u32 %v12170_v11, 16  ;;  %v2297_v41 = vld [vmem:[%s11940_s7 + $0x8] sm:$0xc]  ;;  %v12296_v11 = vsel %vm17041_vm3, %v1843_v55, %v1851_v40  ;;  %v1886_v55 = vrot.slane %v1884_v39, 2 }
  0x56   : > { %10557 = vmatprep.mubr.msk.bf16.mxu0 %vm544_vm0, %v495_v5  ;;  %10601 = vmatprep.mubr.msk.bf16.mxu1 %vm544_vm0, %v12054_v16  ;;  %v12267_v16 = vsel %vm17040_vm2, %v1499_v2, %v1501_v54  ;;  %v9462_v51 = vcombine.low %v2297_v41, %v12131_v63  ;;  %v1863_v2 = vshrl.u32 %v12187_v37, 16  ;;  %v1866_v5 = vshll.u32 %v12187_v37, 16 }
  0x57   : > { %v1856_v50 = vrot.slane %v1854_v34, 1  ;;  %v12288_v63 = vsel %vm2310_vm4, %v2312_v14, %v2314_v46  ;;  %v2316_v34 = vrot.slane %v12187_v37, 2 }
  0x58   : > { %v2311_v1 = vrot.slane %v9462_v51, 2  ;;  %v1868_v27 = vrot.slane %v1866_v5, 2 }
  0x59   : > { %v1860_v54 = vor.u32 %v1859_v56, %v1856_v50  ;;  %v12309_v41 = vsel %vm2310_vm4, %v2314_v46, %v2316_v34  ;;  %v1893_v50 = vshll.u32 %v12212_v24, 16  ;;  %v12317_v37 = vsel %vm2310_vm4, %v2316_v34, %v2318_v36  ;;  %v12320_v56 = vld [vmem:[%s11940_s7 + $0x48] sm:$0xff]  }
  0x5a   : > { %v1908_v12 = vshrl.u32 %v12320_v56, 16  ;;  %v1911_v9 = vshll.u32 %v12320_v56, 16  ;;  %v1901_v34 = vrot.slane %v1899_v60, 1 }
  0x5b   : > { %v12302_v28 = vsel %vm17041_vm3, %v1851_v40, %v1860_v54  ;;  %v1892_v40 = vrot.slane %v1890_v49, 1  ;;  %v1895_v46 = vrot.slane %v1893_v50, 2  ;;  %v12359_v50 = vld [vmem:[%s11940_s7 + $0x60] sm:$0xff]  }
  0x5c   : > { %v1910_v39 = vrot.slane %v1908_v12, 1  ;;  %v1913_v49 = vrot.slane %v1911_v9, 2 }
  0x5d   : > { %10558 = vmatmul.mubr.msk.bf16.gmra.mxu0 %vm544_vm0, %v503_v48  ;;  %10602 = vmatmul.mubr.msk.bf16.gmra.mxu1 %vm544_vm0, %v12093_v42  ;;  %v12299_v48 = vsel %vm2310_vm4, %v2311_v1, %v2312_v14  ;;  %v1865_v42 = vrot.slane %v1863_v2, 1  ;;  %v2320_v1 = vrot.slane %v12208_v58, 2  ;;  %v12327_v2 = vld [vmem:[%s11940_s7 + $0x50] sm:$0xff]  }
  0x5e   : > { %10561 = vmatprep.mubr.msk.bf16.mxu0 %vm544_vm0, %v511_v57  ;;  %10605 = vmatprep.mubr.msk.bf16.mxu1 %vm544_vm0, %v12111_v52  ;;  %v1881_v52 = vshrl.u32 %v12208_v58, 16  ;;  %v2328_v35 = vrot.slane %v12327_v2, 2 }
  0x5f   : > { %v1869_v57 = vor.u32 %v1868_v27, %v1865_v42  ;;  %v1896_v42 = vor.u32 %v1895_v46, %v1892_v40  ;;  %v12337_v27 = vsel %vm2310_vm4, %v2318_v36, %v2320_v1  ;;  %v12352_v36 = vld [vmem:[%s11940_s7 + $0x58] sm:$0xff]   ;;  %v11544_v40 = vld [vmem:[%s17017_s1 + $0x90] sm:$0xff]   ;;  %v1914_v46 = vor.u32 %v1913_v49, %v1910_v39 }
  0x60   : > { %v1883_v45 = vrot.slane %v1881_v52, 1  ;;  %v1929_v60 = vshll.u32 %v12352_v36, 16  ;;  %v2330_v26 = vrot.slane %v12352_v36, 2 }
  0x61   : > { %v12314_v51 = vsel %vm17041_vm3, %v1860_v54, %v1869_v57  ;;  %v12323_v14 = vsel %vm17041_vm3, %v1869_v57, %v1878_v20  ;;  %v2322_v54 = vrot.slane %v12212_v24, 2  ;;  %v1904_v57 = vrot.slane %v1902_v17, 2 }
  0x62   : > { %v1887_v5 = vor.u32 %v1886_v55, %v1883_v45  ;;  %v1917_v45 = vshrl.u32 %v12327_v2, 16  ;;  %v1920_v55 = vshll.u32 %v12327_v2, 16  ;;  %v1931_v49 = vrot.slane %v1929_v60, 2 }
  0x64   : > { %v12355_v52 = vsel %vm17041_vm3, %v1887_v5, %v1896_v42  ;;  %v1919_v9 = vrot.slane %v1917_v45, 1  ;;  %v11558_v45 = vld [vmem:[%s17017_s1 + $0xb0] sm:$0xff]  }
  0x65   : > { %10562 = vmatmul.mubr.msk.bf16.gmra.mxu0 %vm544_vm0, %v12245_v7  ;;  %10606 = vmatmul.mubr.msk.bf16.gmra.mxu1 %vm544_vm0, %v12120_v59  ;;  %v12346_v7 = vsel %vm17041_vm3, %v1878_v20, %v1887_v5  ;;  %v12349_v59 = vsel %vm2310_vm4, %v2320_v1, %v2322_v54  ;;  %v2326_v20 = vrot.slane %v12320_v56, 2  ;;  %v1926_v5 = vshrl.u32 %v12352_v36, 16 }
  0x66   : > { %10617 = vmatprep.mubr.msk.bf16.mxu0 %vm544_vm0, %v12096_v43  ;;  %10661 = vmatprep.mubr.msk.bf16.mxu1 %vm544_vm0, %v12255_v22  ;;  %v2324_v43 = vrot.slane %v12248_v19, 2  ;;  %v1905_v22 = vor.u32 %v1904_v57, %v1901_v34  ;;  %v1922_v34 = vrot.slane %v1920_v55, 2  ;;  %v12379_v57 = vld [vmem:[%s11940_s7 + $0x68] sm:$0xff]  }
  0x67   : > { %v1947_v60 = vshll.u32 %v12379_v57, 16 }
  0x68   : > { %v12368_v1 = vsel %vm2310_vm4, %v2322_v54, %v2324_v43  ;;  %v12373_v17 = vsel %vm17041_vm3, %v1896_v42, %v1905_v22  ;;  %v12376_v12 = vsel %vm2310_vm4, %v2324_v43, %v2326_v20  ;;  %v12382_v39 = vsel %vm17041_vm3, %v1905_v22, %v1914_v46  ;;  %v11549_v43 = vld [vmem:[%s17017_s1 + $0x88] sm:$0xff]   ;;  %v12396_v22 = vld [vmem:[%s11940_s7 + $0x70] sm:$0xff]  }
  0x69   : > { %17188 = vst [vmem:[#allocation7_spill] sm:$0xff] %v12368_v1  ;;  %v1928_v54 = vrot.slane %v1926_v5, 1  ;;  %v1923_v8 = vor.u32 %v1922_v34, %v1919_v9  ;;  %v1935_v42 = vshrl.u32 %v12359_v50, 16  ;;  %v1938_v1 = vshll.u32 %v12359_v50, 16 }
  0x6a   : > { %v12402_v5 = vsel %vm2310_vm4, %v2326_v20, %v2328_v35  ;;  %v12413_v9 = vsel %vm2310_vm4, %v2328_v35, %v2330_v26 }
  0x6b   : > { %v1932_v55 = vor.u32 %v1931_v49, %v1928_v54  ;;  %17189 = vst [vmem:[#allocation8_spill] sm:$0xff] %v12402_v5  ;;  %17191 = vst [vmem:[#allocation10_spill] sm:$0xff] %v12413_v9  ;;  %v1937_v34 = vrot.slane %v1935_v42, 1  ;;  %v1940_v20 = vrot.slane %v1938_v1, 2  ;;  %v12418_v54 = vld [vmem:[%s11940_s7 + $0x78] sm:$0xff]   ;;  %v1949_v49 = vrot.slane %v1947_v60, 2 }
  0x6c   : > { %v2334_v9 = vrot.slane %v12379_v57, 2  ;;  %v1953_v1 = vshrl.u32 %v12396_v22, 16  ;;  %v1956_v42 = vshll.u32 %v12396_v22, 16  ;;  %v12432_v5 = vld [vmem:[%s11940_s7 + $0x88] sm:$0xff]   ;;  %v1962_v60 = vshrl.u32 %v12418_v54, 16 }
  0x6d   : > { %10618 = vmatmul.mubr.msk.bf16.vlgmr.msra.gmra.mxu0 %vm544_vm0, %v12076_v32  ;;  %10662 = vmatmul.mubr.msk.bf16.vlgmr.msra.gmra.mxu1 %vm544_vm0, %v12258_v15  ;;  %v1944_v32 = vshrl.u32 %v12379_v57, 16  ;;  %v12410_v15 = vsel %vm17041_vm3, %v1914_v46, %v1923_v8  ;;  %v2332_v46 = vrot.slane %v12359_v50, 2  ;;  %v1941_v35 = vor.u32 %v1940_v20, %v1937_v34 }
  0x6e   : > { %10698 = vmatpush3.bf16.msra.mxu0 %v12064_v25  ;;  %10621 = vmatprep.mubr.msk.bf16.mxu0 %vm544_vm0, %v12100_v47  ;;  %17190 = vst [vmem:[#allocation9_spill] sm:$0xff] %v12410_v15  ;;  %v12421_v25 = vsel %vm17041_vm3, %v1923_v8, %v1932_v55  ;;  %v1958_v15 = vrot.slane %v1956_v42, 2 }
  0x6f   : > { %10665 = vmatprep.mubr.msk.bf16.mxu1 %vm544_vm0, %v12261_v23  ;;  %10699 = vmatprep.subr.bf16.mxu0 %v11544_v40  ;;  %17192 = vst [vmem:[#allocation11_spill] sm:$0xff] %v12421_v25  ;;  %v1946_v47 = vrot.slane %v1944_v32, 1  ;;  %v12429_v23 = vld [vmem:[%s11940_s7 + $0x80] sm:$0xff]   ;;  %v12435_v32 = vsel %vm2310_vm4, %v2330_v26, %v2332_v46  ;;  %v12440_v34 = vsel %vm17041_vm3, %v1932_v55, %v1941_v35  ;;  %v1955_v25 = vrot.slane %v1953_v1, 1 }
  0x70   : > { %10742 = vmatpush3.bf16.msra.mxu1 %v12227_v3  ;;  %17193 = vst [vmem:[#allocation12_spill] sm:$0xff] %v12435_v32  ;;  %v1965_v3 = vshll.u32 %v12418_v54, 16  ;;  %17194 = vst [vmem:[#allocation13_spill] sm:$0xff] %v12440_v34  ;;  %v12443_v20 = vsel %vm2310_vm4, %v2332_v46, %v2334_v9  ;;  %v11554_v55 = vld [vmem:[%s17017_s1 + $0x80] sm:$0xff]   ;;  %v2338_v1 = vrot.slane %v12418_v54, 2  ;;  %v1971_v42 = vshrl.u32 %v12429_v23, 16 }
  0x71   : > { %10743 = vmatprep.subr.bf16.mxu1 %v11558_v45  ;;  %v1950_v8 = vor.u32 %v1949_v49, %v1946_v47  ;;  %17195 = vst [vmem:[#allocation14_spill] sm:$0xff] %v12443_v20  ;;  %v11561_v47 = vld [vmem:[%s17017_s1 + $0xa8] sm:$0xff]   ;;  %v1964_v49 = vrot.slane %v1962_v60, 1  ;;  %v1959_v46 = vor.u32 %v1958_v15, %v1955_v25  ;;  %v1974_v20 = vshll.u32 %v12429_v23, 16 }
  0x72   : > { %10700 = vmatpush3.bf16.msra.mxu0 %v11544_v40  ;;  %v1967_v32 = vrot.slane %v1965_v3, 2  ;;  %v2336_v40 = vrot.slane %v12396_v22, 2  ;;  %v1980_v15 = vshrl.u32 %v12432_v5, 16  ;;  %v1983_v25 = vshll.u32 %v12432_v5, 16 }
  0x73   : > { %10701 = vmatprep.subr.bf16.mxu0 %v11549_v43  ;;  %v12449_v26 = vsel %vm17041_vm3, %v1941_v35, %v1950_v8  ;;  %v11562_v35 = vld [vmem:[%s17017_s1 + $0xa0] sm:$0xff]   ;;  %v1976_v3 = vrot.slane %v1974_v20, 2 }
  0x74   : > { %17196 = vst [vmem:[#allocation15_spill] sm:$0xff] %v12449_v26  ;;  %10744 = vmatpush3.bf16.msra.mxu1 %v11558_v45  ;;  %v1968_v60 = vor.u32 %v1967_v32, %v1964_v49  ;;  %v12466_v45 = vsel %vm2310_vm4, %v2334_v9, %v2336_v40  ;;  %v12481_v32 = vsel %vm2310_vm4, %v2336_v40, %v2338_v1  ;;  %v1973_v9 = vrot.slane %v1971_v42, 1 }
  0x75   : > { %10622 = vmatmul.mubr.msk.bf16.gmra.mxu0 %vm544_vm0, %v12103_v21  ;;  %10666 = vmatmul.mubr.msk.bf16.gmra.mxu1 %vm544_vm0, %v12267_v16  ;;  %17197 = vst [vmem:[#allocation16_spill] sm:$0xff] %v12466_v45  ;;  %v12475_v21 = vld [vmem:[%s11940_s7 + $0x90] sm:$0xff]   ;;  %v12478_v16 = vsel %vm17041_vm3, %v1950_v8, %v1959_v46  ;;  %17199 = vst [vmem:[#allocation18_spill] sm:$0xff] %v12481_v32  ;;  %v1982_v45 = vrot.slane %v1980_v15, 1  ;;  %v2340_v26 = vrot.slane %v12429_v23, 2  ;;  %v2342_v40 = vrot.slane %v12432_v5, 2 }
  0x76   : > { %10625 = vmatprep.mubr.msk.bf16.mxu0 %vm544_vm0, %v12123_v61  ;;  %10669 = vmatprep.mubr.msk.bf16.mxu1 %vm544_vm0, %v12272_v33  ;;  %17198 = vst [vmem:[#allocation17_spill] sm:$0xff] %v12478_v16  ;;  %v12484_v49 = vsel %vm17041_vm3, %v1959_v46, %v1968_v60  ;;  %v1985_v61 = vrot.slane %v1983_v25, 2  ;;  %v12490_v33 = vld [vmem:[%s17017_s1 + $0xd8] sm:$0xff]   ;;  %v1977_v8 = vor.u32 %v1976_v3, %v1973_v9  ;;  %v1992_v20 = vshll.u32 %v12475_v21, 16 }
  0x77   : > { %10702 = vmatpush3.bf16.msra.mxu0 %v11549_v43  ;;  %10745 = vmatprep.subr.bf16.mxu1 %v11561_v47  ;;  %17200 = vst [vmem:[#allocation19_spill] sm:$0xff] %v12484_v49  ;;  %v1989_v43 = vshrl.u32 %v12475_v21, 16  ;;  %v17201_v46 = vrot.slane %v12212_v24, 1  ;;  %v17202_v42 = vrot.slane %v12208_v58, 1  ;;  %v12501_v25 = vsel %vm2310_vm4, %v2338_v1, %v2340_v26  ;;  %v12520_v1 = vld [vmem:[%s17017_s1 + $0xf8] sm:$0xff]  }
  0x78   : > { %10703 = vmatprep.subr.bf16.mxu0 %v11554_v55  ;;  %10746 = vmatpush3.bf16.msra.mxu1 %v11561_v47  ;;  %v1986_v47 = vor.u32 %v1985_v61, %v1982_v45  ;;  %v12504_v32 = vsel %vm17041_vm3, %v1968_v60, %v1977_v8  ;;  %v12507_v9 = vsel %vm2310_vm4, %v2340_v26, %v2342_v40  ;;  %v1994_v49 = vrot.slane %v1992_v20, 2 }
  0x79   : > { %v1506_v15 = vsel %vm17040_vm2, %v17202_v42, %v17201_v46  ;;  %10747 = vmatprep.subr.bf16.mxu1 %v11562_v35  ;;  %v1991_v3 = vrot.slane %v1989_v43, 1  ;;  %v17203_v16 = vrot.slane %v12248_v19, 1  ;;  %v17204_v34 = vmov %v17201_v46  ;;  %v12686_v43 = vld [vmem:[%s11940_s7 + $0x18] sm:$0xff]  }
  0x7a   : > { %v12515_v45 = vsel %vm17041_vm3, %v1977_v8, %v1986_v47  ;;  %v2344_v26 = vrot.slane %v12475_v21, 2  ;;  %v11570_v8 = vld [vmem:[%s11940_s7 + $0x98] ss:$0 sps:$4 sm:$0x33]  }
  0x7b   : > { %v1508_v58 = vsel %vm17040_vm2, %v17204_v34, %v17203_v16  ;;  %10704 = vmatpush3.bf16.msra.mxu0 %v11554_v55  ;;  %v12524_v60 = vor.u32 %v1994_v49, %v1991_v3  ;;  %v1509_v34 = vrot.slane %v12320_v56, 1  ;;  %v1515_v56 = vrot.slane %v12359_v50, 1 }
  0x7c   : > { %10748 = vmatpush3.bf16.msra.mxu1 %v11562_v35  ;;  %10785 = vmatprep.subr.bf16.mxu0 %v12490_v33  ;;  %v12532_v24 = vsel %vm2310_vm4, %v2342_v40, %v2344_v26  ;;  %v17205_v35 = vmov %v17203_v16  ;;  %v1998_v3 = vshrl.u32 %v11570_v8, 16 }
  0x7d   : > { %10626 = vmatmul.mubr.msk.bf16.gmra.mxu0 %vm544_vm0, %v12126_v29  ;;  %10670 = vmatmul.mubr.msk.bf16.gmra.mxu1 %vm544_vm0, %v1506_v15  ;;  %v12540_v55 = vsel %vm17041_vm3, %v1986_v47, %v12524_v60  ;;  %v1511_v29 = vrot.slane %v12327_v2, 1  ;;  %v1510_v16 = vsel %vm17040_vm2, %v17205_v35, %v1509_v34  ;;  %v17218_v15 = vld [vmem:[#allocation18_spill] sm:$0xff] }
  0x7e   : > { %10629 = vmatprep.mubr.msk.bf16.mxu0 %vm544_vm0, %v12134_v44  ;;  %10673 = vmatprep.mubr.msk.bf16.mxu1 %vm544_vm0, %v1508_v58  ;;  %v1513_v44 = vrot.slane %v12352_v36, 1  ;;  %v17217_v42 = vld [vmem:[#allocation19_spill] sm:$0xff]  ;;  %v2001_v58 = vshll.u32 %v11570_v8, 16 }
  0x7f   : > { %10829 = vmatprep.subr.bf16.mxu1 %v12520_v1  ;;  %v1512_v49 = vsel %vm17040_vm2, %v1509_v34, %v1511_v29 }
  0x80   : > { %v1514_v19 = vsel %vm17040_vm2, %v1511_v29, %v1513_v44  ;;  %v1516_v2 = vsel %vm17040_vm2, %v1513_v44, %v1515_v56 }
  0x85   : > { %10630 = vmatmul.mubr.msk.bf16.gmra.mxu0 %vm544_vm0, %v12147_v53  ;;  %10674 = vmatmul.mubr.msk.bf16.gmra.mxu1 %vm544_vm0, %v1510_v16  ;;  %v1517_v53 = vrot.slane %v12379_v57, 1  ;;  %v3129_v16 = vshrl.u32 %v12686_v43, 16 }
  0x86   : > { %10633 = vmatprep.mubr.msk.bf16.mxu0 %vm544_vm0, %v12152_v10  ;;  %10677 = vmatprep.mubr.msk.bf16.mxu1 %vm544_vm0, %v1512_v49  ;;  %v1519_v10 = vrot.slane %v12396_v22, 1  ;;  %v3132_v49 = vshll.u32 %v12686_v43, 16 }
  0x87   : > { %v1518_v36 = vsel %vm17040_vm2, %v1515_v56, %v1517_v53 }
  0x88   : > { %v1520_v50 = vsel %vm17040_vm2, %v1517_v53, %v1519_v10  ;;  %v12707_v53 = vld [vmem:[%s11940_s7 + $0x20] sm:$0xff]  }
  0x8d   : > { %10634 = vmatmul.mubr.msk.bf16.gmra.mxu0 %vm544_vm0, %v12159_v18  ;;  %10678 = vmatmul.mubr.msk.bf16.gmra.mxu1 %vm544_vm0, %v1514_v19  ;;  %v1521_v18 = vrot.slane %v12418_v54, 1 }
  0x8e   : > { %10637 = vmatprep.mubr.msk.bf16.mxu0 %vm544_vm0, %v12174_v30  ;;  %10681 = vmatprep.mubr.msk.bf16.mxu1 %vm544_vm0, %v1516_v2  ;;  %v1523_v30 = vrot.slane %v12429_v23, 1  ;;  %v11560_v23 = vld [vmem:[%s11940_s7 + $0x98] ss:$0 sps:$4 sm:$0x11]   ;;  %v2003_v2 = vrot.slane %v2001_v58, 2 }
  0x8f   : > { %v1522_v57 = vsel %vm17040_vm2, %v1519_v10, %v1521_v18 }
  0x90   : > { %v1524_v22 = vsel %vm17040_vm2, %v1521_v18, %v1523_v30 }
  0x95   : > { %10638 = vmatmul.mubr.msk.bf16.gmra.mxu0 %vm544_vm0, %v12177_v31  ;;  %10682 = vmatmul.mubr.msk.bf16.gmra.mxu1 %vm544_vm0, %v1518_v36  ;;  %v1525_v31 = vrot.slane %v12432_v5, 1  ;;  %v2639_v5 = vld [vmem:[%s11940_s7 + $0x10] sm:$0xc] }
  0x96   : > { %10641 = vmatprep.mubr.msk.bf16.mxu0 %vm544_vm0, %v12190_v38  ;;  %10685 = vmatprep.mubr.msk.bf16.mxu1 %vm544_vm0, %v1520_v50  ;;  %v1527_v38 = vrot.slane %v12475_v21, 1 }
  0x97   : > { %v1526_v54 = vsel %vm17040_vm2, %v1523_v30, %v1525_v31  ;;  %v3131_v30 = vrot.slane %v3129_v16, 2 }
  0x98   : > { %v1528_v61 = vsel %vm17040_vm2, %v1525_v31, %v1527_v38  ;;  %v12712_v31 = vld [vmem:[%s11940_s7 + $0x28] sm:$0xff]  }
  0x9d   : > { %10642 = vmatmul.mubr.msk.bf16.gmra.mxu0 %vm544_vm0, %v12202_v13  ;;  %10686 = vmatmul.mubr.msk.bf16.gmra.mxu1 %vm544_vm0, %v1522_v57  ;;  %v1529_v13 = vrot.slane %v11560_v23, 1  ;;  %v3134_v57 = vrot.slane %v3132_v49, 3  ;;  %v2346_v23 = vrot.slane %v11570_v8, 2  ;;  %v12745_v8 = vld [vmem:[%s11940_s7 + $0x38] sm:$0xff]  }
  0x9e   : > { %10645 = vmatprep.mubr.msk.bf16.mxu0 %vm544_vm0, %v12215_v62  ;;  %10689 = vmatprep.mubr.msk.bf16.mxu1 %vm544_vm0, %v1524_v22  ;;  %v3168_v16 = vshll.u32 %v12745_v8, 16 }
  0x9f   : > { %v1530_v62 = vsel %vm17040_vm2, %v1527_v38, %v1529_v13 }
  0xa5   : > { %10646 = vmatmul.mubr.msk.bf16.gmra.mxu0 %vm544_vm0, %v12218_v0  ;;  %10690 = vmatmul.mubr.msk.bf16.gmra.mxu1 %vm544_vm0, %v1526_v54  ;;  %v11565_v0 = vld [vmem:[%s17017_s1 + $0xd0] sm:$0xff]  }
  0xa6   : > { %10649 = vmatprep.mubr.msk.bf16.mxu0 %vm544_vm0, %v12230_v4  ;;  %10693 = vmatprep.mubr.msk.bf16.mxu1 %vm544_vm0, %v1528_v61  ;;  %v11569_v4 = vld [vmem:[%s17017_s1 + $0xf0] sm:$0xff]  }
  0xad   : > { %10650 = vmatmul.mubr.msk.bf16.gmra.mxu0 %vm544_vm0, %v12234_v6  ;;  %10694 = vmatmul.mubr.msk.bf16.gmra.mxu1 %vm544_vm0, %v1530_v62  ;;  %v11566_v6 = vld [vmem:[%s17017_s1 + $0xc8] sm:$0xff]   ;;  %v3138_v62 = vshrl.u32 %v12707_v53, 16 }
  0xae   : > { %10705 = vmatprep.mubr.msk.bf16.mxu0 %vm544_vm0, %v12296_v11  ;;  %10749 = vmatprep.mubr.msk.bf16.mxu1 %vm544_vm0, %v12299_v48  ;;  %v11571_v11 = vld [vmem:[%s17017_s1 + $0xe8] sm:$0xff]   ;;  %v11572_v48 = vld [vmem:[%s17017_s1 + $0xe0] sm:$0xff]  }
  0xb5   : > { %10706 = vmatmul.mubr.msk.bf16.vlgmr.msra.gmra.mxu0 %vm544_vm0, %v12302_v28  ;;  %10750 = vmatmul.mubr.msk.bf16.vlgmr.msra.gmra.mxu1 %vm544_vm0, %v12288_v63  ;;  %v11567_v63 = vld [vmem:[%s17017_s1 + $0xc0] sm:$0xff]   ;;  %v12642_v28 = vld [vmem:[%s17017_s1 + $0x118] sm:$0xff]  }
  0xb6   : > { %10786 = vmatpush3.bf16.msra.mxu0 %v12490_v33  ;;  %10709 = vmatprep.mubr.msk.bf16.mxu0 %vm544_vm0, %v12314_v51  ;;  %v17207_v51 = vld [vmem:[#allocation9_spill] sm:$0xff]  ;;  %v12679_v33 = vld [vmem:[%s11940_s7 + $0x14] sm:$0xf] }
  0xb7   : > { %10753 = vmatprep.mubr.msk.bf16.mxu1 %vm544_vm0, %v12309_v41  ;;  %10787 = vmatprep.subr.bf16.mxu0 %v11565_v0  ;;  %v17206_v41 = vld [vmem:[#allocation7_spill] sm:$0xff]  ;;  %v12683_v40 = vcombine.low %v2639_v5, %v12679_v33 }
  0xb8   : > { %10830 = vmatpush3.bf16.msra.mxu1 %v12520_v1 }
  0xb9   : > { %10831 = vmatprep.subr.bf16.mxu1 %v11569_v4  ;;  %v3121_v29 = vshrl.u32 %v12683_v40, 16  ;;  %v3124_v35 = vshll.u32 %v12683_v40, 16 }
  0xba   : > { %10788 = vmatpush3.bf16.msra.mxu0 %v11565_v0  ;;  %v3141_v0 = vshll.u32 %v12707_v53, 16 }
  0xbb   : > { %10789 = vmatprep.subr.bf16.mxu0 %v11566_v6  ;;  %v3123_v50 = vrot.slane %v3121_v29, 2  ;;  %v3126_v18 = vrot.slane %v3124_v35, 3  ;;  %v2783_v29 = vrot.slane %v12712_v31, 2  ;;  %v3165_v35 = vshrl.u32 %v12745_v8, 16 }
  0xbc   : > { %10832 = vmatpush3.bf16.msra.mxu1 %v11569_v4 }
  0xbd   : > { %10710 = vmatmul.mubr.msk.bf16.gmra.mxu0 %vm544_vm0, %v12323_v14  ;;  %10754 = vmatmul.mubr.msk.bf16.gmra.mxu1 %vm544_vm0, %v12317_v37  ;;  %v17208_v37 = vld [vmem:[#allocation8_spill] sm:$0xff]  ;;  %v17209_v14 = vld [vmem:[#allocation11_spill] sm:$0xff] }
  0xbe   : > { %10713 = vmatprep.mubr.msk.bf16.mxu0 %vm544_vm0, %v12346_v7  ;;  %10757 = vmatprep.mubr.msk.bf16.mxu1 %vm544_vm0, %v12337_v27  ;;  %v17210_v27 = vld [vmem:[#allocation10_spill] sm:$0xff]  ;;  %v17211_v7 = vld [vmem:[#allocation13_spill] sm:$0xff] }
  0xbf   : > { %10790 = vmatpush3.bf16.msra.mxu0 %v11566_v6  ;;  %10833 = vmatprep.subr.bf16.mxu1 %v11571_v11 }
  0xc0   : > { %10791 = vmatprep.subr.bf16.mxu0 %v11567_v63  ;;  %10834 = vmatpush3.bf16.msra.mxu1 %v11571_v11  ;;  %v3135_v11 = vor.u32 %v3134_v57, %v3131_v30  ;;  %v12768_v30 = vld [vmem:[%s11940_s7 + $0x40] sm:$0xff]  }
  0xc1   : > { %10835 = vmatprep.subr.bf16.mxu1 %v11572_v48 }
  0xc3   : > { %10792 = vmatpush3.bf16.msra.mxu0 %v11567_v63  ;;  %v3127_v63 = vor.u32 %v3126_v18, %v3123_v50 }
  0xc4   : > { %10836 = vmatpush3.bf16.msra.mxu1 %v11572_v48  ;;  %10873 = vmatprep.subr.bf16.mxu0 %v12642_v28 }
  0xc5   : > { %10714 = vmatmul.mubr.msk.bf16.gmra.mxu0 %vm544_vm0, %v12355_v52  ;;  %10758 = vmatmul.mubr.msk.bf16.gmra.mxu1 %vm544_vm0, %v12349_v59  ;;  %v17212_v59 = vld [vmem:[#allocation12_spill] sm:$0xff]  ;;  %v17213_v52 = vld [vmem:[#allocation15_spill] sm:$0xff]  ;;  %v3136_v5 = vsel %vm17044_vm5, %v3127_v63, %v3135_v11 }
  0xc6   : > { %10717 = vmatprep.mubr.msk.bf16.mxu0 %vm544_vm0, %v12373_v17  ;;  %10761 = vmatprep.mubr.msk.bf16.mxu1 %vm544_vm0, %v17206_v41  ;;  %v17214_v17 = vld [vmem:[#allocation14_spill] sm:$0xff] }
  0xcd   : > { %10718 = vmatmul.mubr.msk.bf16.gmra.mxu0 %vm544_vm0, %v12382_v39  ;;  %10762 = vmatmul.mubr.msk.bf16.gmra.mxu1 %vm544_vm0, %v12376_v12  ;;  %v17215_v12 = vld [vmem:[#allocation17_spill] sm:$0xff]  ;;  %v17216_v39 = vld [vmem:[#allocation16_spill] sm:$0xff] }
  0xce   : > { %10721 = vmatprep.mubr.msk.bf16.mxu0 %vm544_vm0, %v17207_v51  ;;  %10765 = vmatprep.mubr.msk.bf16.mxu1 %vm544_vm0, %v17208_v37  ;;  %v2347_v37 = vsel %vm2310_vm4, %v2344_v26, %v2346_v23  ;;  %v3167_v23 = vrot.slane %v3165_v35, 2 }
  0xd5   : > { %10722 = vmatmul.mubr.msk.bf16.gmra.mxu0 %vm544_vm0, %v17209_v14  ;;  %10766 = vmatmul.mubr.msk.bf16.gmra.mxu1 %vm544_vm0, %v17210_v27 }
  0xd6   : > { %10725 = vmatprep.mubr.msk.bf16.mxu0 %vm544_vm0, %v17211_v7  ;;  %10769 = vmatprep.mubr.msk.bf16.mxu1 %vm544_vm0, %v17212_v59  ;;  %v3140_v7 = vrot.slane %v3138_v62, 2  ;;  %v3143_v59 = vrot.slane %v3141_v0, 3  ;;  %v11581_v62 = vld [vmem:[%s17017_s1 + $0x110] sm:$0xff]   ;;  %v12775_v0 = vld [vmem:[%s11940_s7 + $0x48] sm:$0xff]  }
  0xdd   : > { %10726 = vmatmul.mubr.msk.bf16.gmra.mxu0 %vm544_vm0, %v17213_v52  ;;  %10770 = vmatmul.mubr.msk.bf16.gmra.mxu1 %vm544_vm0, %v17214_v17  ;;  %v12740_v52 = vld [vmem:[%s11940_s7 + $0x30] sm:$0xff]  }
  0xde   : > { %10729 = vmatprep.mubr.msk.bf16.mxu0 %vm544_vm0, %v17215_v12  ;;  %10773 = vmatprep.mubr.msk.bf16.mxu1 %vm544_vm0, %v17216_v39  ;;  %v3159_v58 = vshll.u32 %v12740_v52, 16  ;;  %v2785_v63 = vrot.slane %v12740_v52, 2 }
  0xe0   : > { %v3161_v18 = vrot.slane %v3159_v58, 3 }
  0xe5   : > { %v10531_v20 = vpop.f32.mrf.mxu0  ;;  %v10575_v46 = vpop.f32.mrf.mxu1  ;;  %10730 = vmatmul.mubr.msk.bf16.gmra.mxu0 %vm544_vm0, %v17217_v42  ;;  %10774 = vmatmul.mubr.msk.bf16.gmra.mxu1 %vm544_vm0, %v17218_v15  ;;  %v3144_v15 = vor.u32 %v3143_v59, %v3140_v7  ;;  %v3183_v59 = vshrl.u32 %v12775_v0, 16 }
  0xe6   : > { %v12692_v47 = vadd.f32 %v10575_v46, %v10531_v20  ;;  %10733 = vmatprep.mubr.msk.bf16.mxu0 %vm544_vm0, %v12504_v32  ;;  %10777 = vmatprep.mubr.msk.bf16.mxu1 %vm544_vm0, %v12501_v25  ;;  %v2000_v25 = vrot.slane %v1998_v3, 1  ;;  %v3156_v3 = vshrl.u32 %v12740_v52, 16 }
  0xe7   : > { %v633_v1 = vpop.f32.mrf.mxu0  ;;  %v870_v34 = vpop.f32.mrf.mxu1  ;;  %v3185_v35 = vrot.slane %v3183_v59, 2 }
  0xe8   : > { %v12702_v44 = vadd.f32 %v870_v34, %v633_v1  ;;  %v2004_v13 = vor.u32 %v2003_v2, %v2000_v25  ;;  %v3158_v50 = vrot.slane %v3156_v3, 2 }
  0xe9   : > { %v10532_v32 = vpop.f32.mrf.mxu0  ;;  %v10576_v56 = vpop.f32.mrf.mxu1 }
  0xea   : > { %v12704_v19 = vadd.f32 %v10576_v56, %v10532_v32  ;;  %v2005_v27 = vsel %vm17041_vm3, %v12524_v60, %v2004_v13  ;;  %v2781_v60 = vrot.slane %v12707_v53, 2  ;;  %v3170_v13 = vrot.slane %v3168_v16, 3 }
  0xeb   : > { %v636_v10 = vpop.f32.mrf.mxu0  ;;  %v873_v36 = vpop.f32.mrf.mxu1 }
  0xec   : > { %v12709_v22 = vadd.f32 %v873_v36, %v636_v10  ;;  %v3145_v36 = vsel %vm17044_vm5, %v3135_v11, %v3144_v15  ;;  %v3171_v7 = vor.u32 %v3170_v13, %v3167_v23  ;;  %v2791_v13 = vrot.slane %v12775_v0, 2 }
  0xed   : > { %v10535_v38 = vpop.f32.mrf.mxu0  ;;  %v10579_v54 = vpop.f32.mrf.mxu1  ;;  %10734 = vmatmul.mubr.msk.bf16.gmra.mxu0 %vm544_vm0, %v12515_v45  ;;  %10778 = vmatmul.mubr.msk.bf16.gmra.mxu1 %vm544_vm0, %v12507_v9  ;;  %v2778_v45 = vrot.slane %v12683_v40, 2  ;;  %v2779_v9 = vrot.slane %v12686_v43, 2 }
  0xee   : > { %v12718_v61 = vadd.f32 %v10579_v54, %v10535_v38  ;;  %10737 = vmatprep.mubr.msk.bf16.mxu0 %vm544_vm0, %v12540_v55  ;;  %10781 = vmatprep.mubr.msk.bf16.mxu1 %vm544_vm0, %v12532_v24  ;;  %v3147_v55 = vshrl.u32 %v12712_v31, 16  ;;  %v3150_v24 = vshll.u32 %v12712_v31, 16  ;;  %v2784_v54 = vsel %vm2310_vm4, %v2781_v60, %v2783_v29 }
  0xef   : > { %v649_v4 = vpop.f32.mrf.mxu0  ;;  %v886_v6 = vpop.f32.mrf.mxu1  ;;  %v2780_v39 = vsel %vm2310_vm4, %v2778_v45, %v2779_v9  ;;  %v2782_v2 = vsel %vm2310_vm4, %v2779_v9, %v2781_v60 }
  0xf0   : > { %v12728_v48 = vadd.f32 %v886_v6, %v649_v4  ;;  %v3149_v26 = vrot.slane %v3147_v55, 2  ;;  %v3152_v40 = vrot.slane %v3150_v24, 3  ;;  %v3162_v55 = vor.u32 %v3161_v18, %v3158_v50 }
  0xf1   : > { %v10536_v41 = vpop.f32.mrf.mxu0  ;;  %v10580_v51 = vpop.f32.mrf.mxu1  ;;  %v3174_v24 = vshrl.u32 %v12768_v30, 16 }
  0xf2   : > { %v12735_v14 = vadd.f32 %v10580_v51, %v10536_v41  ;;  %v3153_v32 = vor.u32 %v3152_v40, %v3149_v26  ;;  %v3177_v41 = vshll.u32 %v12768_v30, 16  ;;  %v2786_v26 = vsel %vm2310_vm4, %v2783_v29, %v2785_v63 }
  0xf3   : > { %v652_v17 = vpop.f32.mrf.mxu0  ;;  %v889_v12 = vpop.f32.mrf.mxu1 }
  0xf4   : > { %v12747_v21 = vadd.f32 %v889_v12, %v652_v17  ;;  %v3154_v6 = vsel %vm17044_vm5, %v3144_v15, %v3153_v32  ;;  %v11586_v17 = vld [vmem:[%s17017_s1 + $0x108] sm:$0xff]   ;;  %v3179_v60 = vrot.slane %v3177_v41, 3  ;;  %v12803_v15 = vld [vmem:[%s11940_s7 + $0x50] sm:$0xff]  }
  0xf5   : > { %v10539_v20 = vpop.f32.mrf.mxu0  ;;  %v10583_v46 = vpop.f32.mrf.mxu1  ;;  %10738 = vmatmul.mubr.msk.bf16.gmra.mxu0 %vm544_vm0, %v2005_v27  ;;  %10782 = vmatmul.mubr.msk.bf16.gmra.mxu1 %vm544_vm0, %v2347_v37  ;;  %v2787_v27 = vrot.slane %v12745_v8, 2 }
  0xf6   : > { %v12752_v42 = vadd.f32 %v10583_v46, %v10539_v20  ;;  %10793 = vmatprep.mubr.msk.bf16.mxu0 %vm544_vm0, %v2780_v39  ;;  %10837 = vmatprep.mubr.msk.bf16.mxu1 %vm544_vm0, %v3136_v5  ;;  %v3163_v20 = vsel %vm17044_vm5, %v3153_v32, %v3162_v55  ;;  %v3176_v46 = vrot.slane %v3174_v24, 2  ;;  %v11591_v32 = vld [vmem:[%s17017_s1 + $0x100] sm:$0xff]  }
  0xf7   : > { %v665_v1 = vpop.f32.mrf.mxu0  ;;  %v902_v34 = vpop.f32.mrf.mxu1 }
  0xf8   : > { %v12761_v49 = vadd.f32 %v902_v34, %v665_v1  ;;  %v2788_v1 = vsel %vm2310_vm4, %v2785_v63, %v2787_v27  ;;  %v3172_v34 = vsel %vm17044_vm5, %v3162_v55, %v3171_v7  ;;  %v3180_v18 = vor.u32 %v3179_v60, %v3176_v46  ;;  %v12839_v60 = vld [vmem:[%s11940_s7 + $0x68] sm:$0xff]  }
  0xf9   : > { %v10540_v56 = vpop.f32.mrf.mxu0  ;;  %v10584_v25 = vpop.f32.mrf.mxu1  ;;  %17220 = vst [vmem:[#allocation9_spill] sm:$0xff] %v12839_v60 }
  0xfa   : > { %v12764_v10 = vadd.f32 %v10584_v25, %v10540_v56  ;;  %v12808_v56 = vld [vmem:[%s11940_s7 + $0x58] sm:$0xff]  }
  0xfb   : > { %v668_v57 = vpop.f32.mrf.mxu0  ;;  %v905_v38 = vpop.f32.mrf.mxu1 }
  0xfc   : > { %v12777_v4 = vadd.f32 %v905_v38, %v668_v57  ;;  %v3192_v57 = vshrl.u32 %v12803_v15, 16  ;;  %v3195_v38 = vshll.u32 %v12803_v15, 16 }
  0xfd   : > { %v10543_v45 = vpop.f32.mrf.mxu0  ;;  %v10587_v9 = vpop.f32.mrf.mxu1  ;;  %10794 = vmatmul.mubr.msk.bf16.vlgmr.msra.gmra.mxu0 %vm544_vm0, %v2782_v2  ;;  %10838 = vmatmul.mubr.msk.bf16.vlgmr.msra.gmra.mxu1 %vm544_vm0, %v3145_v36  ;;  %v2789_v36 = vrot.slane %v12768_v30, 2 }
  0xfe   : > { %v12783_v11 = vadd.f32 %v10587_v9, %v10543_v45  ;;  %10874 = vmatpush3.bf16.msra.mxu0 %v12642_v28  ;;  %10797 = vmatprep.mubr.msk.bf16.mxu0 %vm544_vm0, %v2784_v54  ;;  %v3186_v28 = vshll.u32 %v12775_v0, 16  ;;  %v3204_v45 = vshll.u32 %v12808_v56, 16  ;;  %v3197_v59 = vrot.slane %v3195_v38, 3 }
  0xff   : > { %v681_v51 = vpop.f32.mrf.mxu0  ;;  %v918_v37 = vpop.f32.mrf.mxu1  ;;  %10841 = vmatprep.mubr.msk.bf16.mxu1 %vm544_vm0, %v3154_v6  ;;  %10875 = vmatprep.subr.bf16.mxu0 %v11581_v62  ;;  %v3201_v6 = vshrl.u32 %v12808_v56, 16  ;;  %v2790_v24 = vsel %vm2310_vm4, %v2787_v27, %v2789_v36 }
 0x100   : > { %v12796_v12 = vadd.f32 %v918_v37, %v681_v51  ;;  %v3188_v16 = vrot.slane %v3186_v28, 3  ;;  %v3181_v51 = vsel %vm17044_vm5, %v3171_v7, %v3180_v18  ;;  %v3194_v37 = vrot.slane %v3192_v57, 2  ;;  %v12834_v28 = vld [vmem:[%s11940_s7 + $0x60] sm:$0xff]  }
 0x101   : > { %v10544_v39 = vpop.f32.mrf.mxu0  ;;  %v10588_v5 = vpop.f32.mrf.mxu1  ;;  %17219 = vst [vmem:[#allocation7_spill] sm:$0xff] %v12834_v28  ;;  %v3206_v46 = vrot.slane %v3204_v45, 3  ;;  %v2793_v7 = vrot.slane %v12803_v15, 2  ;;  %v3222_v57 = vshll.u32 %v12839_v60, 16 }
 0x102   : > { %v12799_v40 = vadd.f32 %v10588_v5, %v10544_v39  ;;  %10876 = vmatpush3.bf16.msra.mxu0 %v11581_v62  ;;  %v3189_v62 = vor.u32 %v3188_v16, %v3185_v35  ;;  %v3210_v35 = vshrl.u32 %v12834_v28, 16  ;;  %v3213_v16 = vshll.u32 %v12834_v28, 16 }
 0x103   : > { %v684_v3 = vpop.f32.mrf.mxu0  ;;  %v921_v58 = vpop.f32.mrf.mxu1  ;;  %10877 = vmatprep.subr.bf16.mxu0 %v11586_v17 }
 0x104   : > { %v12810_v29 = vadd.f32 %v921_v58, %v684_v3 }
 0x105   : > { %v10547_v25 = vpop.f32.mrf.mxu0  ;;  %v10591_v2 = vpop.f32.mrf.mxu1  ;;  %10798 = vmatmul.mubr.msk.bf16.gmra.mxu0 %vm544_vm0, %v2786_v26  ;;  %10842 = vmatmul.mubr.msk.bf16.gmra.mxu1 %vm544_vm0, %v3163_v20  ;;  %v3190_v26 = vsel %vm17044_vm5, %v3180_v18, %v3189_v62  ;;  %v3203_v20 = vrot.slane %v3201_v6, 2  ;;  %v3219_v18 = vshrl.u32 %v12839_v60, 16  ;;  %v2794_v6 = vsel %vm2310_vm4, %v2791_v13, %v2793_v7 }
 0x106   : > { %v12818_v50 = vadd.f32 %v10591_v2, %v10547_v25  ;;  %10801 = vmatprep.mubr.msk.bf16.mxu0 %vm544_vm0, %v2788_v1  ;;  %10845 = vmatprep.mubr.msk.bf16.mxu1 %vm544_vm0, %v3172_v34  ;;  %v3198_v34 = vor.u32 %v3197_v59, %v3194_v37  ;;  %v2795_v2 = vrot.slane %v12808_v56, 2 }
 0x107   : > { %v697_v54 = vpop.f32.mrf.mxu0  ;;  %v934_v23 = vpop.f32.mrf.mxu1  ;;  %10878 = vmatpush3.bf16.msra.mxu0 %v11586_v17  ;;  %v2792_v17 = vsel %vm2310_vm4, %v2789_v36, %v2791_v13  ;;  %v3207_v36 = vor.u32 %v3206_v46, %v3203_v20  ;;  %v12867_v20 = vld [vmem:[%s11940_s7 + $0x78] sm:$0xff]  }
 0x108   : > { %v12827_v9 = vadd.f32 %v934_v23, %v697_v54  ;;  %10879 = vmatprep.subr.bf16.mxu0 %v11591_v32  ;;  %17222 = vst [vmem:[#allocation11_spill] sm:$0xff] %v12867_v20 }
 0x109   : > { %v10548_v63 = vpop.f32.mrf.mxu0  ;;  %v10592_v55 = vpop.f32.mrf.mxu1 }
 0x10a   : > { %v12830_v41 = vadd.f32 %v10592_v55, %v10548_v63  ;;  %v3199_v63 = vsel %vm17044_vm5, %v3189_v62, %v3198_v34  ;;  %v3212_v55 = vrot.slane %v3210_v35, 2  ;;  %v2797_v62 = vrot.slane %v12834_v28, 2 }
 0x10b   : > { %v700_v39 = vpop.f32.mrf.mxu0  ;;  %v937_v5 = vpop.f32.mrf.mxu1  ;;  %10880 = vmatpush3.bf16.msra.mxu0 %v11591_v32 }
 0x10c   : > { %v12841_v27 = vadd.f32 %v937_v5, %v700_v39  ;;  %v2796_v39 = vsel %vm2310_vm4, %v2793_v7, %v2795_v2  ;;  %v3208_v5 = vsel %vm17044_vm5, %v3198_v34, %v3207_v36 }
 0x10d   : > { %v10551_v3 = vpop.f32.mrf.mxu0  ;;  %v10595_v58 = vpop.f32.mrf.mxu1  ;;  %10802 = vmatmul.mubr.msk.bf16.gmra.mxu0 %vm544_vm0, %v2790_v24  ;;  %10846 = vmatmul.mubr.msk.bf16.gmra.mxu1 %vm544_vm0, %v3181_v51  ;;  %v3215_v24 = vrot.slane %v3213_v16, 3  ;;  %v12862_v51 = vld [vmem:[%s11940_s7 + $0x70] sm:$0xff]  }
 0x10e   : > { %v12846_v1 = vadd.f32 %v10595_v58, %v10551_v3  ;;  %10805 = vmatprep.mubr.msk.bf16.mxu0 %vm544_vm0, %v2792_v17  ;;  %10849 = vmatprep.mubr.msk.bf16.mxu1 %vm544_vm0, %v3190_v26  ;;  %17221 = vst [vmem:[#allocation8_spill] sm:$0xff] %v12862_v51  ;;  %v3221_v17 = vrot.slane %v3219_v18, 2  ;;  %v3224_v26 = vrot.slane %v3222_v57, 3  ;;  %v3228_v34 = vshrl.u32 %v12862_v51, 16 }
 0x10f   : > { %v713_v32 = vpop.f32.mrf.mxu0  ;;  %v950_v25 = vpop.f32.mrf.mxu1  ;;  %v3216_v7 = vor.u32 %v3215_v24, %v3212_v55  ;;  %v3231_v35 = vshll.u32 %v12862_v51, 16  ;;  %v3237_v57 = vshrl.u32 %v12867_v20, 16  ;;  %v2798_v55 = vsel %vm2310_vm4, %v2795_v2, %v2797_v62 }
 0x110   : > { %v12855_v38 = vadd.f32 %v950_v25, %v713_v32  ;;  %v2799_v25 = vrot.slane %v12839_v60, 2  ;;  %v3225_v18 = vor.u32 %v3224_v26, %v3221_v17 }
 0x111   : > { %v10552_v54 = vpop.f32.mrf.mxu0  ;;  %v10596_v23 = vpop.f32.mrf.mxu1 }
 0x112   : > { %v12858_v45 = vadd.f32 %v10596_v23, %v10552_v54  ;;  %v3240_v54 = vshll.u32 %v12867_v20, 16 }
 0x113   : > { %v716_v37 = vpop.f32.mrf.mxu0  ;;  %v953_v59 = vpop.f32.mrf.mxu1 }
 0x114   : > { %v12869_v46 = vadd.f32 %v953_v59, %v716_v37  ;;  %v3217_v37 = vsel %vm17044_vm5, %v3207_v36, %v3216_v7  ;;  %v3230_v59 = vrot.slane %v3228_v34, 2  ;;  %v2801_v36 = vrot.slane %v12862_v51, 2 }
 0x115   : > { %v10555_v13 = vpop.f32.mrf.mxu0  ;;  %v10599_v3 = vpop.f32.mrf.mxu1  ;;  %10806 = vmatmul.mubr.msk.bf16.gmra.mxu0 %vm544_vm0, %v2794_v6  ;;  %10850 = vmatmul.mubr.msk.bf16.gmra.mxu1 %vm544_vm0, %v3199_v63 }
 0x116   : > { %v12874_v58 = vadd.f32 %v10599_v3, %v10555_v13  ;;  %10809 = vmatprep.mubr.msk.bf16.mxu0 %vm544_vm0, %v2796_v39  ;;  %10853 = vmatprep.mubr.msk.bf16.mxu1 %vm544_vm0, %v3208_v5  ;;  %v3233_v39 = vrot.slane %v3231_v35, 3  ;;  %v12890_v5 = vld [vmem:[%s11940_s7 + $0x80] sm:$0xff]   ;;  %v2800_v13 = vsel %vm2310_vm4, %v2797_v62, %v2799_v25  ;;  %v3226_v3 = vsel %vm17044_vm5, %v3216_v7, %v3225_v18 }
 0x117   : > { %v729_v16 = vpop.f32.mrf.mxu0  ;;  %v966_v32 = vpop.f32.mrf.mxu1  ;;  %17225 = vst [vmem:[#allocation12_spill] sm:$0xff] %v12890_v5  ;;  %v3246_v7 = vshrl.u32 %v12890_v5, 16  ;;  %v3249_v35 = vshll.u32 %v12890_v5, 16 }
 0x118   : > { %v12883_v23 = vadd.f32 %v966_v32, %v729_v16  ;;  %v3239_v16 = vrot.slane %v3237_v57, 2  ;;  %v3242_v32 = vrot.slane %v3240_v54, 3  ;;  %v3234_v62 = vor.u32 %v3233_v39, %v3230_v59  ;;  %v12915_v39 = vld [vmem:[%s11940_s7 + $0x90] sm:$0xff]  }
 0x119   : > { %v10556_v6 = vpop.f32.mrf.mxu0  ;;  %v10600_v63 = vpop.f32.mrf.mxu1  ;;  %v2802_v59 = vsel %vm2310_vm4, %v2799_v25, %v2801_v36  ;;  %17230 = vst [vmem:[#allocation19_spill] sm:$0xff] %v12915_v39  ;;  %v3248_v51 = vrot.slane %v3246_v7, 2  ;;  %v3267_v7 = vshll.u32 %v12915_v39, 16 }
 0x11a   : > { %17223 = vst [vmem:[#allocation10_spill] sm:$0xff] %v12883_v23  ;;  %v12886_v24 = vadd.f32 %v10600_v63, %v10556_v6  ;;  %v12895_v23 = vld [vmem:[%s11940_s7 + $0x88] sm:$0xff]   ;;  %v2803_v63 = vrot.slane %v12867_v20, 2  ;;  %v3251_v20 = vrot.slane %v3249_v35, 3 }
 0x11b   : > { %v732_v17 = vpop.f32.mrf.mxu0  ;;  %v969_v26 = vpop.f32.mrf.mxu1  ;;  %17226 = vst [vmem:[#allocation15_spill] sm:$0xff] %v12895_v23 }
 0x11c   : > { %17224 = vst [vmem:[#allocation13_spill] sm:$0xff] %v12886_v24  ;;  %v12897_v60 = vadd.f32 %v969_v26, %v732_v17  ;;  %v3258_v17 = vshll.u32 %v12895_v23, 16 }
 0x11d   : > { %v10559_v2 = vpop.f32.mrf.mxu0  ;;  %v10603_v6 = vpop.f32.mrf.mxu1  ;;  %10810 = vmatmul.mubr.msk.bf16.gmra.mxu0 %vm544_vm0, %v2798_v55  ;;  %10854 = vmatmul.mubr.msk.bf16.gmra.mxu1 %vm544_vm0, %v3217_v37  ;;  %v3243_v55 = vor.u32 %v3242_v32, %v3239_v16  ;;  %v3255_v37 = vshrl.u32 %v12895_v23, 16 }
 0x11e   : > { %17227 = vst [vmem:[#allocation14_spill] sm:$0xff] %v12897_v60  ;;  %v12902_v34 = vadd.f32 %v10603_v6, %v10559_v2  ;;  %10813 = vmatprep.mubr.msk.bf16.mxu0 %vm544_vm0, %v2800_v13  ;;  %10857 = vmatprep.mubr.msk.bf16.mxu1 %vm544_vm0, %v3226_v3  ;;  %v3235_v6 = vsel %vm17044_vm5, %v3225_v18, %v3234_v62  ;;  %v3264_v18 = vshrl.u32 %v12915_v39, 16 }
 0x11f   : > { %v745_v57 = vpop.f32.mrf.mxu0  ;;  %v982_v54 = vpop.f32.mrf.mxu1  ;;  %v3244_v60 = vsel %vm17044_vm5, %v3234_v62, %v3243_v55  ;;  %v3252_v62 = vor.u32 %v3251_v20, %v3248_v51  ;;  %v12946_v20 = vld [vmem:[%s11940_s7 + $0xa0] ss:$0 sps:$4 sm:$0x77]  }
 0x120   : > { %17228 = vst [vmem:[#allocation17_spill] sm:$0xff] %v12902_v34  ;;  %v12911_v26 = vadd.f32 %v982_v54, %v745_v57  ;;  %v2804_v34 = vsel %vm2310_vm4, %v2801_v36, %v2803_v63  ;;  %v3257_v57 = vrot.slane %v3255_v37, 2  ;;  %v3260_v54 = vrot.slane %v3258_v17, 3  ;;  %17234 = vst [vmem:[#allocation22_spill] sm:$0xff] %v12946_v20 }
 0x121   : > { %v10560_v13 = vpop.f32.mrf.mxu0  ;;  %v10604_v2 = vpop.f32.mrf.mxu1  ;;  %v2805_v36 = vrot.slane %v12890_v5, 2  ;;  %v3253_v51 = vsel %vm17044_vm5, %v3243_v55, %v3252_v62 }
 0x122   : > { %17229 = vst [vmem:[#allocation16_spill] sm:$0xff] %v12911_v26  ;;  %v12917_v3 = vadd.f32 %v10604_v2, %v10560_v13  ;;  %v12923_v26 = vld [vmem:[%s11940_s7 + $0x98] sm:$0xff]   ;;  %v2807_v13 = vrot.slane %v12895_v23, 2  ;;  %v3261_v2 = vor.u32 %v3260_v54, %v3257_v57 }
 0x123   : > { %v748_v16 = vpop.f32.mrf.mxu0  ;;  %v985_v32 = vpop.f32.mrf.mxu1  ;;  %17231 = vst [vmem:[#allocation18_spill] sm:$0xff] %v12923_v26 }
 0x124   : > { %v12925_v24 = vadd.f32 %v985_v32, %v748_v16  ;;  %v2808_v54 = vsel %vm2310_vm4, %v2805_v36, %v2807_v13 }
 0x125   : > { %v10563_v25 = vpop.f32.mrf.mxu0  ;;  %v10607_v28 = vpop.f32.mrf.mxu1  ;;  %10814 = vmatmul.mubr.msk.bf16.gmra.mxu0 %vm544_vm0, %v2802_v59  ;;  %10858 = vmatmul.mubr.msk.bf16.gmra.mxu1 %vm544_vm0, %v3235_v6  ;;  %v3273_v59 = vshrl.u32 %v12923_v26, 16  ;;  %v3276_v6 = vshll.u32 %v12923_v26, 16 }
 0x126   : > { %v12931_v35 = vadd.f32 %v10607_v28, %v10563_v25  ;;  %10817 = vmatprep.mubr.msk.bf16.mxu0 %vm544_vm0, %v2804_v34  ;;  %10861 = vmatprep.mubr.msk.bf16.mxu1 %vm544_vm0, %v3244_v60  ;;  %v3266_v34 = vrot.slane %v3264_v18, 2  ;;  %v3269_v25 = vrot.slane %v3267_v7, 3  ;;  %v2806_v60 = vsel %vm2310_vm4, %v2803_v63, %v2805_v36 }
 0x127   : > { %v761_v37 = vpop.f32.mrf.mxu0  ;;  %v998_v17 = vpop.f32.mrf.mxu1  ;;  %v2809_v63 = vrot.slane %v12915_v39, 2  ;;  %v3282_v36 = vshrl.u32 %v12946_v20, 16 }
 0x128   : > { %v12939_v16 = vadd.f32 %v998_v17, %v761_v37  ;;  %v3262_v37 = vsel %vm17044_vm5, %v3252_v62, %v3261_v2  ;;  %v3275_v17 = vrot.slane %v3273_v59, 2  ;;  %v3270_v55 = vor.u32 %v3269_v25, %v3266_v34  ;;  %v3581_v34 = vld [vmem:[%s11940_s7 + $0x10] sm:$0x8] }
 0x129   : > { %v10564_v28 = vpop.f32.mrf.mxu0  ;;  %v10608_v32 = vpop.f32.mrf.mxu1  ;;  %v3285_v62 = vshll.u32 %v12946_v20, 16  ;;  %v11595_v20 = vld [vmem:[%s11940_s7 + $0xa0] ss:$0 sps:$4 sm:$0x33]   ;;  %v3284_v39 = vrot.slane %v3282_v36, 2  ;;  %s11770_s7 = scalar_lea.vmem %s16971_s17, 1024 }
 0x12a   : > { %17232 = vst [vmem:[#allocation20_spill] sm:$0xff] %v12939_v16  ;;  %v12941_v5 = vadd.f32 %v10608_v32, %v10564_v28  ;;  %v3278_v16 = vrot.slane %v3276_v6, 3  ;;  %v2811_v32 = vrot.slane %v12923_v26, 2  ;;  %p11771_p11 = scmp.ne.s32.totalorder %s16971_s17, %s11770_s7  ;;  %p11778_p1 = scmp.lt.s32.totalorder %s11776_s8, %s11770_s7 }
 0x12b   : > { %v12948_v23 = vpop.f32.mrf.mxu0  ;;  %v12950_v57 = vpop.f32.mrf.mxu1 }
 0x12c   : > { %17233 = vst [vmem:[#allocation21_spill] sm:$0xff] %v12941_v5  ;;  %17235 = vst [vmem:[#allocation23_spill] sm:$0xff] %v12948_v23  ;;  %v3287_v5 = vrot.slane %v3285_v62, 3  ;;  %p11772_p12 = pnand %p11771_p11, %p11904_p5  ;;  %p11779_p2 = por %p11778_p1, %p11777_p0 }
 0x12d   : > { %17236 = vst [vmem:[#allocation24_spill] sm:$0xff] %v12950_v57  ;;  %v10619_v18 = vpop.f32.mrf.mxu0  ;;  %10818 = vmatmul.mubr.msk.bf16.gmra.mxu0 %vm544_vm0, %v2806_v60  ;;  %v10663_v7 = vpop.f32.mrf.mxu1  ;;  %10862 = vmatmul.mubr.msk.bf16.gmra.mxu1 %vm544_vm0, %v3253_v51  ;;  %v3279_v60 = vor.u32 %v3278_v16, %v3275_v17 }
 0x12e   : > { %v1321_v28 = vadd.f32 %v10619_v18, %v12692_v47  ;;  %10821 = vmatprep.mubr.msk.bf16.mxu0 %vm544_vm0, %v2808_v54  ;;  %10865 = vmatprep.mubr.msk.bf16.mxu1 %vm544_vm0, %v3262_v37  ;;  %v2810_v54 = vsel %vm2310_vm4, %v2807_v13, %v2809_v63  ;;  %v3271_v37 = vsel %vm17044_vm5, %v3261_v2, %v3270_v55  ;;  %p11773_p13 = pneg %p11772_p12 }
 0x12f   : > { %v1176_v59 = vpop.f32.mrf.mxu0  ;;  %v1643_v6 = vpop.f32.mrf.mxu1  ;;  %v3280_v17 = vsel %vm17044_vm5, %v3270_v55, %v3279_v60  ;;  %v3288_v55 = vor.u32 %v3287_v5, %v3284_v39 }
 0x130   : > { %v1319_v51 = vadd.f32 %v1176_v59, %v12702_v44  ;;  %v12964_v57 = vadd.f32 %v10663_v7, %v1321_v28  ;;  %v2812_v44 = vsel %vm2310_vm4, %v2809_v63, %v2811_v32  ;;  %v9573_v7 = vcombine.low %v3581_v34, %v12679_v33  ;;  %p11780_p3 = pnand %p11779_p2, %p11773_p13 }
 0x131   : > { %v10620_v47 = vpop.f32.mrf.mxu0  ;;  %v10664_v25 = vpop.f32.mrf.mxu1  ;;  %v2813_v63 = vrot.slane %v11595_v20, 2  ;;  %v3289_v5 = vsel %vm17044_vm5, %v3279_v60, %v3288_v55  ;;  %v3598_v60 = vrot.slane %v12707_v53, 3 }
 0x132   : > { %v1322_v18 = vadd.f32 %v10620_v47, %v12704_v19  ;;  %v12970_v23 = vadd.f32 %v1643_v6, %v1319_v51 }
 0x133   : > { %v1179_v26 = vpop.f32.mrf.mxu0  ;;  %v12973_v16 = vpop.f32.mrf.mxu1  ;;  %v2814_v20 = vsel %vm2310_vm4, %v2811_v32, %v2813_v63 }
 0x134   : > { %v12979_v13 = vadd.f32 %v1179_v26, %v12709_v22  ;;  %v12981_v2 = vadd.f32 %v10664_v25, %v1322_v18  ;;  %v3595_v22 = vrot.slane %v9573_v7, 3  ;;  %v3596_v26 = vrot.slane %v12686_v43, 3 }
 0x135   : > { %v10623_v19 = vpop.f32.mrf.mxu0  ;;  %10822 = vmatmul.mubr.msk.bf16.gmra.mxu0 %vm544_vm0, %v2810_v54  ;;  %v10667_v28 = vpop.f32.mrf.mxu1  ;;  %10866 = vmatmul.mubr.msk.bf16.gmra.mxu1 %vm544_vm0, %v3271_v37 }
 0x136   : > { %v1325_v36 = vadd.f32 %v10623_v19, %v12718_v61  ;;  %10825 = vmatprep.mubr.msk.bf16.mxu0 %vm544_vm0, %v2812_v44  ;;  %10869 = vmatprep.mubr.msk.bf16.mxu1 %vm544_vm0, %v3280_v17  ;;  %v3597_v43 = vsel %vm17048_vm6, %v3595_v22, %v3596_v26  ;;  %v3600_v17 = vrot.slane %v12712_v31, 3 }
 0x137   : > { %v1192_v33 = vpop.f32.mrf.mxu0  ;;  %v1659_v62 = vpop.f32.mrf.mxu1 }
 0x138   : > { %v1323_v59 = vadd.f32 %v1192_v33, %v12728_v48  ;;  %v12990_v6 = vadd.f32 %v10667_v28, %v1325_v36  ;;  %v3601_v53 = vsel %vm17048_vm6, %v3598_v60, %v3600_v17 }
 0x139   : > { %v10624_v51 = vpop.f32.mrf.mxu0  ;;  %v10668_v34 = vpop.f32.mrf.mxu1 }
 0x13a   : > { %v1326_v61 = vadd.f32 %v10624_v51, %v12735_v14  ;;  %v12993_v47 = vadd.f32 %v1659_v62, %v1323_v59 }
 0x13b   : > { %v1195_v39 = vpop.f32.mrf.mxu0  ;;  %v12997_v25 = vpop.f32.mrf.mxu1 }
 0x13c   : > { %v13001_v48 = vadd.f32 %v1195_v39, %v12747_v21  ;;  %v13003_v54 = vadd.f32 %v10668_v34, %v1326_v61  ;;  %v3604_v34 = vrot.slane %v12745_v8, 3 }
 0x13d   : > { %v10627_v37 = vpop.f32.mrf.mxu0  ;;  %10826 = vmatmul.mubr.msk.bf16.gmra.mxu0 %vm544_vm0, %v2814_v20  ;;  %v10671_v14 = vpop.f32.mrf.mxu1  ;;  %10870 = vmatmul.mubr.msk.bf16.gmra.mxu1 %vm544_vm0, %v3289_v5 }
 0x13e   : > { %v1329_v32 = vadd.f32 %v10627_v37, %v12752_v42  ;;  %10881 = vmatprep.mubr.msk.bf16.mxu0 %vm544_vm0, %v3597_v43  ;;  %v3599_v42 = vsel %vm17048_vm6, %v3596_v26, %v3598_v60  ;;  %v3602_v26 = vrot.slane %v12740_v52, 3 }
 0x13f   : > { %v1208_v18 = vpop.f32.mrf.mxu0  ;;  %v1675_v44 = vpop.f32.mrf.mxu1 }
 0x140   : > { %v1327_v21 = vadd.f32 %v1208_v18, %v12761_v49  ;;  %v13012_v7 = vadd.f32 %v10671_v14, %v1329_v32  ;;  %v3605_v52 = vsel %vm17048_vm6, %v3602_v26, %v3604_v34  ;;  %v3606_v18 = vrot.slane %v12768_v30, 3 }
 0x141   : > { %v10628_v19 = vpop.f32.mrf.mxu0  ;;  %v10672_v28 = vpop.f32.mrf.mxu1 }
 0x142   : > { %v1330_v36 = vadd.f32 %v10628_v19, %v12764_v10  ;;  %v13015_v63 = vadd.f32 %v1675_v44, %v1327_v21  ;;  %v3608_v21 = vrot.slane %v12775_v0, 3 }
 0x143   : > { %v1211_v55 = vpop.f32.mrf.mxu0  ;;  %v13018_v33 = vpop.f32.mrf.mxu1 }
 0x144   : > { %v13022_v62 = vadd.f32 %v1211_v55, %v12777_v4  ;;  %v13024_v31 = vadd.f32 %v10672_v28, %v1330_v36  ;;  %v3609_v30 = vsel %vm17048_vm6, %v3606_v18, %v3608_v21 }
 0x145   : > { %v10631_v49 = vpop.f32.mrf.mxu0  ;;  %10882 = vmatmul.mubr.msk.bf16.vlgmr.msra.gmra.mxu0 %vm544_vm0, %v3599_v42  ;;  %v10675_v22 = vpop.f32.mrf.mxu1 }
 0x146   : > { %v1333_v10 = vadd.f32 %v10631_v49, %v12783_v11  ;;  %10885 = vmatprep.mubr.msk.bf16.mxu0 %vm544_vm0, %v3601_v53  ;;  %v3603_v11 = vsel %vm17048_vm6, %v3600_v17, %v3602_v26  ;;  %v3610_v26 = vrot.slane %v12803_v15, 3 }
 0x147   : > { %v1224_v59 = vpop.f32.mrf.mxu0  ;;  %v1691_v51 = vpop.f32.mrf.mxu1 }
 0x148   : > { %v1331_v61 = vadd.f32 %v1224_v59, %v12796_v12  ;;  %v13032_v4 = vadd.f32 %v10675_v22, %v1333_v10 }
 0x149   : > { %v10632_v20 = vpop.f32.mrf.mxu0  ;;  %v10676_v5 = vpop.f32.mrf.mxu1 }
 0x14a   : > { %v1334_v39 = vadd.f32 %v10632_v20, %v12799_v40  ;;  %v13035_v43 = vadd.f32 %v1691_v51, %v1331_v61 }
 0x14b   : > { %v1227_v37 = vpop.f32.mrf.mxu0  ;;  %v13038_v14 = vpop.f32.mrf.mxu1 }
 0x14c   : > { %v13042_v32 = vadd.f32 %v1227_v37, %v12810_v29  ;;  %v13044_v8 = vadd.f32 %v10676_v5, %v1334_v39 }
 0x14d   : > { %v10635_v12 = vpop.f32.mrf.mxu0  ;;  %10886 = vmatmul.mubr.msk.bf16.gmra.mxu0 %vm544_vm0, %v3603_v11  ;;  %v10679_v60 = vpop.f32.mrf.mxu1 }
 0x14e   : > { %v1337_v40 = vadd.f32 %v10635_v12, %v12818_v50  ;;  %10889 = vmatprep.mubr.msk.bf16.mxu0 %vm544_vm0, %v3605_v52  ;;  %v3607_v50 = vsel %vm17048_vm6, %v3604_v34, %v3606_v18  ;;  %v3612_v34 = vrot.slane %v12808_v56, 3  ;;  %v17237_v18 = vld [vmem:[#allocation7_spill] sm:$0xff] }
 0x14f   : > { %v1240_v44 = vpop.f32.mrf.mxu0  ;;  %v1707_v17 = vpop.f32.mrf.mxu1 }
 0x150   : > { %v1335_v19 = vadd.f32 %v1240_v44, %v12827_v9  ;;  %v13052_v29 = vadd.f32 %v10679_v60, %v1337_v40  ;;  %v3613_v15 = vsel %vm17048_vm6, %v3610_v26, %v3612_v34  ;;  %v3614_v44 = vrot.slane %v17237_v18, 3 }
 0x151   : > { %v10636_v28 = vpop.f32.mrf.mxu0  ;;  %v10680_v36 = vpop.f32.mrf.mxu1 }
 0x152   : > { %v1338_v42 = vadd.f32 %v10636_v28, %v12830_v41  ;;  %v13055_v55 = vadd.f32 %v1707_v17, %v1335_v19  ;;  %v17239_v28 = vld [vmem:[#allocation10_spill] sm:$0xff] }
 0x153   : > { %v1243_v53 = vpop.f32.mrf.mxu0  ;;  %v13058_v49 = vpop.f32.mrf.mxu1 }
 0x154   : > { %v13062_v22 = vadd.f32 %v1243_v53, %v12841_v27  ;;  %v13064_v0 = vadd.f32 %v10680_v36, %v1338_v42 }
 0x155   : > { %v10639_v9 = vpop.f32.mrf.mxu0  ;;  %10890 = vmatmul.mubr.msk.bf16.gmra.mxu0 %vm544_vm0, %v3607_v50  ;;  %v10683_v10 = vpop.f32.mrf.mxu1 }
 0x156   : > { %v1341_v41 = vadd.f32 %v10639_v9, %v12846_v1  ;;  %10893 = vmatprep.mubr.msk.bf16.mxu0 %vm544_vm0, %v3609_v30  ;;  %v3611_v1 = vsel %vm17048_vm6, %v3608_v21, %v3610_v26  ;;  %v17238_v21 = vld [vmem:[#allocation9_spill] sm:$0xff] }
 0x157   : > { %v1256_v59 = vpop.f32.mrf.mxu0  ;;  %v1723_v51 = vpop.f32.mrf.mxu1  ;;  %v3616_v19 = vrot.slane %v17238_v21, 3  ;;  %v17240_v30 = vld [vmem:[#allocation13_spill] sm:$0xff] }
 0x158   : > { %v1339_v61 = vadd.f32 %v1256_v59, %v12855_v38  ;;  %v13072_v27 = vadd.f32 %v10683_v10, %v1341_v41  ;;  %v11598_v38 = vld [vmem:[%s17019_s3 + $0x78] sm:$0xff]  }
 0x159   : > { %v10640_v20 = vpop.f32.mrf.mxu0  ;;  %v10684_v5 = vpop.f32.mrf.mxu1  ;;  %10917 = vmatprep.subr.bf16.mxu1 %v11598_v38  ;;  %v3617_v59 = vsel %vm17048_vm6, %v3614_v44, %v3616_v19 }
 0x15a   : > { %v1342_v39 = vadd.f32 %v10640_v20, %v12858_v45  ;;  %v13075_v11 = vadd.f32 %v1723_v51, %v1339_v61  ;;  %10918 = vmatpush3.bf16.msra.mxu1 %v11598_v38  ;;  %v17241_v51 = vld [vmem:[#allocation14_spill] sm:$0xff] }
 0x15b   : > { %v1259_v37 = vpop.f32.mrf.mxu0  ;;  %v13078_v52 = vpop.f32.mrf.mxu1 }
 0x15c   : > { %v13082_v12 = vadd.f32 %v1259_v37, %v12869_v46  ;;  %v13084_v56 = vadd.f32 %v10684_v5, %v1342_v39  ;;  %v11599_v5 = vld [vmem:[%s17019_s3 + $0x70] sm:$0xff]   ;;  %v17242_v37 = vld [vmem:[#allocation17_spill] sm:$0xff] }
 0x15d   : > { %v10643_v60 = vpop.f32.mrf.mxu0  ;;  %10894 = vmatmul.mubr.msk.bf16.gmra.mxu0 %vm544_vm0, %v3611_v1  ;;  %v10687_v45 = vpop.f32.mrf.mxu1  ;;  %10919 = vmatprep.subr.bf16.mxu1 %v11599_v5 }
 0x15e   : > { %v1345_v40 = vadd.f32 %v10643_v60, %v12874_v58  ;;  %10897 = vmatprep.mubr.msk.bf16.mxu0 %vm544_vm0, %v3613_v15  ;;  %v3615_v58 = vsel %vm17048_vm6, %v3612_v34, %v3614_v44  ;;  %v17243_v15 = vld [vmem:[#allocation8_spill] sm:$0xff]  ;;  %10920 = vmatpush3.bf16.msra.mxu1 %v11599_v5 }
 0x15f   : > { %v1272_v17 = vpop.f32.mrf.mxu0  ;;  %v1739_v46 = vpop.f32.mrf.mxu1  ;;  %v3618_v38 = vrot.slane %v17243_v15, 3  ;;  %v17245_v44 = vld [vmem:[#allocation16_spill] sm:$0xff] }
 0x160   : > { %v1343_v36 = vadd.f32 %v1272_v17, %v17239_v28  ;;  %v13095_v42 = vadd.f32 %v10687_v45, %v1345_v40  ;;  %v17244_v40 = vld [vmem:[#allocation11_spill] sm:$0xff] }
 0x161   : > { %v10644_v50 = vpop.f32.mrf.mxu0  ;;  %v10688_v53 = vpop.f32.mrf.mxu1  ;;  %v3620_v18 = vrot.slane %v17244_v40, 3 }
 0x162   : > { %v1346_v9 = vadd.f32 %v10644_v50, %v17240_v30  ;;  %v13098_v10 = vadd.f32 %v1739_v46, %v1343_v36 }
 0x163   : > { %v1275_v41 = vpop.f32.mrf.mxu0  ;;  %v13101_v26 = vpop.f32.mrf.mxu1 }
 0x164   : > { %v13105_v61 = vadd.f32 %v1275_v41, %v17241_v51  ;;  %v13107_v20 = vadd.f32 %v10688_v53, %v1346_v9  ;;  %v3619_v53 = vsel %vm17048_vm6, %v3616_v19, %v3618_v38 }
 0x165   : > { %v10647_v39 = vpop.f32.mrf.mxu0  ;;  %10898 = vmatmul.mubr.msk.bf16.gmra.mxu0 %vm544_vm0, %v3615_v58  ;;  %v10691_v1 = vpop.f32.mrf.mxu1  ;;  %v3621_v58 = vsel %vm17048_vm6, %v3618_v38, %v3620_v18  ;;  %v17248_v38 = vld [vmem:[#allocation20_spill] sm:$0xff] }
 0x166   : > { %v1349_v34 = vadd.f32 %v10647_v39, %v17242_v37  ;;  %10901 = vmatprep.mubr.msk.bf16.mxu0 %vm544_vm0, %v3617_v59  ;;  %v17246_v39 = vld [vmem:[#allocation12_spill] sm:$0xff] }
 0x167   : > { %v1288_v60 = vpop.f32.mrf.mxu0  ;;  %v1755_v45 = vpop.f32.mrf.mxu1  ;;  %v3622_v19 = vrot.slane %v17246_v39, 3  ;;  %v17250_v39 = vld [vmem:[#allocation19_spill] sm:$0xff] }
 0x168   : > { %v1347_v17 = vadd.f32 %v1288_v60, %v17245_v44  ;;  %v13118_v46 = vadd.f32 %v10691_v1, %v1349_v34  ;;  %v11600_v1 = vld [vmem:[%s17019_s3 + $0x68] sm:$0xff]  }
 0x169   : > { %v10648_v21 = vpop.f32.mrf.mxu0  ;;  %v10692_v28 = vpop.f32.mrf.mxu1  ;;  %10921 = vmatprep.subr.bf16.mxu1 %v11600_v1 }
 0x16a   : > { %v1350_v36 = vadd.f32 %v10648_v21, %v12917_v3  ;;  %v13121_v50 = vadd.f32 %v1755_v45, %v1347_v17  ;;  %10922 = vmatpush3.bf16.msra.mxu1 %v11600_v1  ;;  %v3626_v1 = vrot.slane %v17250_v39, 3 }
 0x16b   : > { %v1291_v30 = vpop.f32.mrf.mxu0  ;;  %v13124_v9 = vpop.f32.mrf.mxu1 }
 0x16c   : > { %v13128_v41 = vadd.f32 %v1291_v30, %v12925_v24  ;;  %v13130_v59 = vadd.f32 %v10692_v28, %v1350_v36  ;;  %v17247_v24 = vld [vmem:[#allocation15_spill] sm:$0xff]  ;;  %v3623_v28 = vsel %vm17048_vm6, %v3620_v18, %v3622_v19  ;;  %v11601_v18 = vld [vmem:[%s17019_s3 + $0x60] sm:$0xff]  }
 0x16d   : > { %v10651_v51 = vpop.f32.mrf.mxu0  ;;  %10902 = vmatmul.mubr.msk.bf16.gmra.mxu0 %vm544_vm0, %v3619_v53  ;;  %v10695_v5 = vpop.f32.mrf.mxu1  ;;  %v3624_v15 = vrot.slane %v17247_v24, 3  ;;  %v17251_v24 = vld [vmem:[#allocation18_spill] sm:$0xff]  ;;  %10923 = vmatprep.subr.bf16.mxu1 %v11601_v18 }
 0x16e   : > { %v1353_v3 = vadd.f32 %v10651_v51, %v12931_v35  ;;  %10905 = vmatprep.mubr.msk.bf16.mxu0 %vm544_vm0, %v3621_v58  ;;  %v17249_v35 = vld [vmem:[#allocation21_spill] sm:$0xff]  ;;  %10924 = vmatpush3.bf16.msra.mxu1 %v11601_v18 }
 0x16f   : > { %v1304_v37 = vpop.f32.mrf.mxu0  ;;  %v1771_v34 = vpop.f32.mrf.mxu1  ;;  %v3625_v30 = vsel %vm17048_vm6, %v3622_v19, %v3624_v15  ;;  %v3628_v19 = vrot.slane %v17251_v24, 3 }
 0x170   : > { %v1351_v60 = vadd.f32 %v1304_v37, %v17248_v38  ;;  %v13141_v45 = vadd.f32 %v10695_v5, %v1353_v3 }
 0x171   : > { %v10652_v40 = vpop.f32.mrf.mxu0  ;;  %v10696_v44 = vpop.f32.mrf.mxu1 }
 0x172   : > { %v1354_v17 = vadd.f32 %v10652_v40, %v17249_v35  ;;  %v13144_v21 = vadd.f32 %v1771_v34, %v1351_v60 }
 0x173   : > { %v13147_v36 = vpop.f32.mrf.mxu0  ;;  %v13149_v53 = vpop.f32.mrf.mxu1 }
 0x174   : > { %v13152_v58 = vadd.f32 %v10696_v44, %v1354_v17  ;;  %v3627_v17 = vsel %vm17048_vm6, %v3624_v15, %v3626_v1 }
 0x175   : > { %v10707_v51 = vpop.f32.mrf.mxu0  ;;  %10906 = vmatmul.mubr.msk.bf16.gmra.mxu0 %vm544_vm0, %v3623_v28  ;;  %v10751_v5 = vpop.f32.mrf.mxu1 }
 0x176   : > { %v2263_v3 = vadd.f32 %v10707_v51, %v12964_v57  ;;  %10909 = vmatprep.mubr.msk.bf16.mxu0 %vm544_vm0, %v3625_v30  ;;  %v3629_v51 = vsel %vm17048_vm6, %v3626_v1, %v3628_v19  ;;  %v11602_v1 = vld [vmem:[%s17019_s3 + $0x58] sm:$0xff]  }
 0x177   : > { %v2118_v37 = vpop.f32.mrf.mxu0  ;;  %v2460_v34 = vpop.f32.mrf.mxu1  ;;  %10925 = vmatprep.subr.bf16.mxu1 %v11602_v1 }
 0x178   : > { %v2261_v38 = vadd.f32 %v2118_v37, %v12970_v23  ;;  %v13163_v60 = vadd.f32 %v10751_v5, %v2263_v3  ;;  %v4002_v3 = vlaneseq  ;;  %10926 = vmatpush3.bf16.msra.mxu1 %v11602_v1  ;;  %v11605_v1 = vld [vmem:[%s17019_s3 + $0x30] sm:$0xff]  }
 0x179   : > { %v10708_v40 = vpop.f32.mrf.mxu0  ;;  %v10752_v44 = vpop.f32.mrf.mxu1 }
 0x17a   : > { %17252 = vst [vmem:[#allocation7_spill] sm:$0xff] %v13163_v60  ;;  %v2264_v57 = vadd.f32 %v10708_v40, %v12981_v2  ;;  %v13166_v35 = vadd.f32 %v2460_v34, %v2261_v38  ;;  %v17255_v2 = vld [vmem:[#allocation22_spill] sm:$0xff]  ;;  %v1787_v60 = vadd.f32 %v12973_v16, %v12979_v13  ;;  %v13316_v16 = vadd.f32 %v13058_v49, %v13062_v22 }
 0x17b   : > { %v13169_v28 = vpop.f32.mrf.mxu0  ;;  %v13171_v30 = vpop.f32.mrf.mxu1  ;;  %v3630_v37 = vrot.slane %v17255_v2, 3  ;;  %v13320_v13 = vadd.f32 %v13078_v52, %v13082_v12 }
 0x17c   : > { %17253 = vst [vmem:[#allocation9_spill] sm:$0xff] %v13166_v35  ;;  %v13174_v39 = vadd.f32 %v10752_v44, %v2264_v57  ;;  %v13186_v57 = vshrl.u32 %v4002_v3, 7  ;;  %v2262_v22 = vadd.f32 %v13169_v28, %v1787_v60 }
 0x17d   : > { %v10711_v23 = vpop.f32.mrf.mxu0  ;;  %10910 = vmatmul.mubr.msk.bf16.gmra.mxu0 %vm544_vm0, %v3627_v17  ;;  %v10755_v5 = vpop.f32.mrf.mxu1 }
 0x17e   : > { %17254 = vst [vmem:[#allocation10_spill] sm:$0xff] %v13174_v39  ;;  %v2267_v18 = vadd.f32 %v10711_v23, %v12990_v6  ;;  %10913 = vmatprep.mubr.msk.bf16.mxu0 %vm544_vm0, %v3629_v51  ;;  %v3631_v51 = vsel %vm17048_vm6, %v3628_v19, %v3630_v37  ;;  %v13203_v2 = vadd.s32 16, %v13186_v57 }
 0x17f   : > { %v2134_v15 = vpop.f32.mrf.mxu0  ;;  %v2476_v34 = vpop.f32.mrf.mxu1 }
 0x180   : > { %v2265_v24 = vadd.f32 %v2134_v15, %v12993_v47  ;;  %v13181_v38 = vadd.f32 %v10755_v5, %v2267_v18  ;;  %v11603_v18 = vld [vmem:[%s17019_s3 + $0x38] sm:$0xff]  }
 0x181   : > { %v10712_v40 = vpop.f32.mrf.mxu0  ;;  %v10756_v44 = vpop.f32.mrf.mxu1  ;;  %10969 = vmatprep.subr.bf16.mxu0 %v11603_v18 }
 0x182   : > { %17256 = vst [vmem:[#allocation13_spill] sm:$0xff] %v13181_v38  ;;  %v2268_v6 = vadd.f32 %v10712_v40, %v13003_v54  ;;  %v13189_v17 = vadd.f32 %v2476_v34, %v2265_v24  ;;  %10970 = vmatpush3.bf16.msra.mxu0 %v11603_v18 }
 0x183   : > { %v13192_v23 = vpop.f32.mrf.mxu0  ;;  %v13194_v47 = vpop.f32.mrf.mxu1  ;;  %10971 = vmatprep.subr.bf16.mxu0 %v11605_v1 }
 0x184   : > { %17257 = vst [vmem:[#allocation14_spill] sm:$0xff] %v13189_v17  ;;  %v13196_v5 = vadd.f32 %v10756_v44, %v2268_v6 }
 0x185   : > { %v10715_v3 = vpop.f32.mrf.mxu0  ;;  %10914 = vmatmul.mubr.msk.bf16.gmra.mxu0 %vm544_vm0, %v3631_v51  ;;  %v10759_v54 = vpop.f32.mrf.mxu1  ;;  %v13213_v6 = vmul.u32.u64.low 3817748708, %v13203_v2  ;;  %v13214_v51 = vmul.u32.u64.high 3817748708, %v13203_v2, %v13213_v6 }
 0x186   : > { %17258 = vst [vmem:[#allocation17_spill] sm:$0xff] %v13196_v5  ;;  %v2271_v19 = vadd.f32 %v10715_v3, %v13012_v7  ;;  %10972 = vmatpush3.bf16.msra.mxu0 %v11605_v1 }
 0x187   : > { %v2150_v37 = vpop.f32.mrf.mxu0  ;;  %v2492_v15 = vpop.f32.mrf.mxu1 }
 0x188   : > { %v2269_v34 = vadd.f32 %v2150_v37, %v13015_v63  ;;  %v13207_v24 = vadd.f32 %v10759_v54, %v2271_v19  ;;  %v11606_v19 = vld [vmem:[%s17019_s3 + $0x28] sm:$0xff]  }
 0x189   : > { %v10716_v40 = vpop.f32.mrf.mxu0  ;;  %v10760_v44 = vpop.f32.mrf.mxu1  ;;  %10973 = vmatprep.subr.bf16.mxu0 %v11606_v19 }
 0x18a   : > { %17259 = vst [vmem:[#allocation8_spill] sm:$0xff] %v13207_v24  ;;  %v2272_v7 = vadd.f32 %v10716_v40, %v13024_v31  ;;  %v13217_v3 = vadd.f32 %v2492_v15, %v2269_v34  ;;  %v11604_v31 = vld [vmem:[%s17019_s3 + $0x50] sm:$0xff]   ;;  %10974 = vmatpush3.bf16.msra.mxu0 %v11606_v19 }
 0x18b   : > { %v13219_v18 = vpop.f32.mrf.mxu0  ;;  %v13221_v63 = vpop.f32.mrf.mxu1  ;;  %10927 = vmatprep.subr.bf16.mxu1 %v11604_v31 }
 0x18c   : > { %17260 = vst [vmem:[#allocation11_spill] sm:$0xff] %v13217_v3  ;;  %v13223_v54 = vadd.f32 %v10760_v44, %v2272_v7  ;;  %v11608_v44 = vld [vmem:[%s17019_s3 + $0x20] sm:$0xff]   ;;  %10928 = vmatpush3.bf16.msra.mxu1 %v11604_v31 }
 0x18d   : > { %v10719_v37 = vpop.f32.mrf.mxu0  ;;  %v10763_v24 = vpop.f32.mrf.mxu1  ;;  %10975 = vmatprep.subr.bf16.mxu0 %v11608_v44 }
 0x18e   : > { %17261 = vst [vmem:[#allocation16_spill] sm:$0xff] %v13223_v54  ;;  %v2275_v6 = vadd.f32 %v10719_v37, %v13032_v4  ;;  %v4067_v4 = vshrl.u32 %v13214_v51, 4  ;;  %v13240_v37 = vmul.u32.u64.low 3817748708, %v13186_v57  ;;  %v13241_v3 = vmul.u32.u64.high 3817748708, %v13186_v57, %v13240_v37  ;;  %10976 = vmatpush3.bf16.msra.mxu0 %v11608_v44 }
 0x18f   : > { %v2166_v15 = vpop.f32.mrf.mxu0  ;;  %v2508_v34 = vpop.f32.mrf.mxu1 }
 0x190   : > { %v2273_v1 = vadd.f32 %v2166_v15, %v13035_v43  ;;  %v13233_v40 = vadd.f32 %v10763_v24, %v2275_v6  ;;  %v13247_v43 = vadd.s32 24, %v13186_v57  ;;  %v13254_v15 = vadd.s32 8, %v13186_v57 }
 0x191   : > { %v10720_v7 = vpop.f32.mrf.mxu0  ;;  %v10764_v54 = vpop.f32.mrf.mxu1 }
 0x192   : > { %17262 = vst [vmem:[#allocation12_spill] sm:$0xff] %v13233_v40  ;;  %v2276_v19 = vadd.f32 %v10720_v7, %v13044_v8  ;;  %v13244_v5 = vadd.f32 %v2508_v34, %v2273_v1  ;;  %v11609_v8 = vld [vmem:[%s17019_s3 + $0x18] sm:$0xff]   ;;  %v4068_v1 = vmul.u32 18, %v4067_v4  ;;  %v13262_v7 = vadd.s32 48, %v13186_v57 }
 0x193   : > { %v13249_v24 = vpop.f32.mrf.mxu0  ;;  %v13251_v6 = vpop.f32.mrf.mxu1  ;;  %10977 = vmatprep.subr.bf16.mxu0 %v11609_v8 }
 0x194   : > { %17263 = vst [vmem:[#allocation15_spill] sm:$0xff] %v13244_v5  ;;  %v13256_v51 = vadd.f32 %v10764_v54, %v2276_v19  ;;  %v13266_v5 = vmul.u32.u64.low 3817748708, %v13247_v43  ;;  %v13267_v40 = vmul.u32.u64.high 3817748708, %v13247_v43, %v13266_v5  ;;  %10978 = vmatpush3.bf16.msra.mxu0 %v11609_v8  ;;  %v13283_v39 = vsub.s32 %v13203_v2, %v4068_v1 }
 0x195   : > { %v10723_v31 = vpop.f32.mrf.mxu0  ;;  %v10767_v34 = vpop.f32.mrf.mxu1  ;;  %v11611_v5 = vld [vmem:[%s17019_s3 + $0x10] sm:$0xff]   ;;  %v1791_v2 = vadd.f32 %v12997_v25, %v13001_v48  ;;  %v11610_v48 = vld [vmem:[%s17019_s3 + $0x40] sm:$0xff]  }
 0x196   : > { %17264 = vst [vmem:[#allocation20_spill] sm:$0xff] %v13256_v51  ;;  %v2279_v37 = vadd.f32 %v10723_v31, %v13052_v29  ;;  %v13270_v19 = vmul.u32.u64.low 3817748708, %v13254_v15  ;;  %v13271_v51 = vmul.u32.u64.high 3817748708, %v13254_v15, %v13270_v19  ;;  %v11607_v29 = vld [vmem:[%s17019_s3 + $0x48] sm:$0xff]   ;;  %17266 = vst [vmem:[#allocation19_spill] sm:$0xff] %v13283_v39  ;;  %10979 = vmatprep.subr.bf16.mxu0 %v11611_v5  ;;  %vm4437_vm7 = vcmp.ne.s32.totalorder %v13283_v39, 0 }
 0x197   : > { %v2182_v44 = vpop.f32.mrf.mxu0  ;;  %v2524_v54 = vpop.f32.mrf.mxu1  ;;  %v4045_v19 = vshrl.u32 %v13241_v3, 4  ;;  %10929 = vmatprep.subr.bf16.mxu1 %v11607_v29  ;;  %v13301_v3 = vadd.f32 %v13018_v33, %v13022_v62  ;;  %v11612_v33 = vld [vmem:[%s17019_s3 + $0x8] sm:$0xff]   ;;  %vm4473_vm8 = vcmp.lt.s32.totalorder %v13283_v39, 0  ;;  %v2266_v52 = vadd.f32 %v13192_v23, %v1791_v2 }
 0x198   : > { %v2277_v17 = vadd.f32 %v2182_v44, %v13055_v55  ;;  %v13274_v4 = vadd.f32 %v10767_v34, %v2279_v37  ;;  %v13287_v8 = vmul.u32.u64.low 3817748708, %v13262_v7  ;;  %v13288_v55 = vmul.u32.u64.high 3817748708, %v13262_v7, %v13287_v8  ;;  %v17267_v34 = vld [vmem:[#allocation23_spill] sm:$0xff]  ;;  %v17268_v37 = vld [vmem:[#allocation24_spill] sm:$0xff]  ;;  %10930 = vmatpush3.bf16.msra.mxu1 %v11607_v29  ;;  %10980 = vmatpush3.bf16.msra.mxu0 %v11611_v5  ;;  %vm13356_vm9 = vmand %vm4473_vm8, %vm4437_vm7 }
 0x199   : > { %v10724_v31 = vpop.f32.mrf.mxu0  ;;  %v10768_v38 = vpop.f32.mrf.mxu1  ;;  %v1002_v44 = vadd.f32 %v17268_v37, %v17267_v34  ;;  %v4046_v49 = vmul.u32 18, %v4045_v19  ;;  %10931 = vmatprep.subr.bf16.mxu1 %v11610_v48  ;;  %10981 = vmatprep.subr.bf16.mxu0 %v11612_v33  ;;  %v4056_v29 = vshrl.u32 %v13271_v51, 4  ;;  %v17270_v23 = vmov 0  ;;  %v11616_v37 = vld [vmem:[%s17019_s3] sm:$0xff]  }
 0x19a   : > { %17265 = vst [vmem:[#allocation21_spill] sm:$0xff] %v13274_v4  ;;  %v2280_v4 = vadd.f32 %v10724_v31, %v13064_v0  ;;  %v13293_v35 = vadd.f32 %v2524_v54, %v2277_v17  ;;  %v13308_v0 = vadd.s32 32, %v13186_v57  ;;  %v13312_v17 = vadd.f32 %v13038_v14, %v13042_v32 }
 0x19b   : > { %v13303_v1 = vpop.f32.mrf.mxu0  ;;  %v13305_v8 = vpop.f32.mrf.mxu1  ;;  %v1352_v62 = vadd.f32 %v13147_v36, %v1002_v44  ;;  %v13338_v36 = vadd.s32 18, %v13283_v39  ;;  %v17271_v23 = vsel %vm13356_vm9, 4294967295, %v17270_v23  ;;  %v13365_v51 = vadd.f32 %v13124_v9, %v13128_v41 }
 0x19c   : > { %v13322_v25 = vadd.f32 %v10768_v38, %v2280_v4  ;;  %v4078_v38 = vshrl.u32 %v13267_v40, 4  ;;  %v13342_v5 = vmul.u32.u64.low 3817748708, %v13308_v0  ;;  %v13343_v31 = vmul.u32.u64.high 3817748708, %v13308_v0, %v13342_v5  ;;  %10932 = vmatpush3.bf16.msra.mxu1 %v11610_v48  ;;  %10982 = vmatpush3.bf16.msra.mxu0 %v11612_v33  ;;  %17272 = vst [vmem:[#allocation22_spill] sm:$0xff] %v17271_v23 }
 0x19d   : > { %v10727_v14 = vpop.f32.mrf.mxu0  ;;  %v10771_v32 = vpop.f32.mrf.mxu1  ;;  %17269 = vst [vmem:[#allocation18_spill] sm:$0xff] %v13338_v36  ;;  %v13361_v40 = vadd.s32 56, %v13186_v57  ;;  %v13371_v19 = vsub.s32 %v13186_v57, %v4046_v49  ;;  %v4111_v34 = vshrl.u32 %v13288_v55, 4  ;;  %v13378_v44 = vadd.f32 %v13171_v30, %v2262_v22  ;;  %10983 = vmatprep.subr.bf16.mxu0 %v11616_v37 }
 0x19e   : > { %v2283_v12 = vadd.f32 %v10727_v14, %v13072_v27  ;;  %v13347_v27 = vadd.f32 %v13101_v26, %v13105_v61  ;;  %v13368_v26 = vadd.f32 %v13149_v53, %v1352_v62  ;;  %v4079_v53 = vmul.u32 18, %v4078_v38 }
 0x19f   : > { %v2198_v54 = vpop.f32.mrf.mxu0  ;;  %v2540_v4 = vpop.f32.mrf.mxu1  ;;  %17273 = vst [vmem:[#allocation23_spill] sm:$0xff] %v13371_v19  ;;  %v13384_v2 = vadd.f32 %v13194_v47, %v2266_v52  ;;  %v4057_v62 = vmul.u32 18, %v4056_v29  ;;  %v13395_v30 = vadd.s32 40, %v13186_v57  ;;  %vm4435_vm10 = vcmp.ne.s32.totalorder %v13371_v19, 0 }
 0x1a0   : > { %v2281_v60 = vadd.f32 %v2198_v54, %v13075_v11  ;;  %v13350_v28 = vadd.f32 %v10771_v32, %v2283_v12  ;;  %v13400_v14 = vmul.u32.u64.low 3817748708, %v13361_v40  ;;  %v13401_v47 = vmul.u32.u64.high 3817748708, %v13361_v40, %v13400_v14  ;;  %10984 = vmatpush3.bf16.msra.mxu0 %v11616_v37 }
 0x1a1   : > { %v10728_v11 = vpop.f32.mrf.mxu0  ;;  %v10772_v61 = vpop.f32.mrf.mxu1  ;;  %v13404_v32 = vadd.s32 80, %v13186_v57  ;;  %vm4471_vm11 = vcmp.lt.s32.totalorder %v13371_v19, 0  ;;  %v4112_v52 = vmul.u32 18, %v4111_v34  ;;  %v13409_v12 = vadd.s32 64, %v13186_v57 }
 0x1a2   : > { %v2284_v9 = vadd.f32 %v10728_v11, %v13084_v56  ;;  %v13381_v41 = vadd.f32 %v2540_v4, %v2281_v60  ;;  %v13413_v38 = vadd.f32 %v13219_v18, %v13301_v3  ;;  %v13417_v4 = vadd.s32 18, %v13371_v19  ;;  %vm13474_vm0 = vmand %vm4471_vm11, %vm4435_vm10 }
 0x1a3   : > { %v13386_v48 = vpop.f32.mrf.mxu0  ;;  %v13388_v33 = vpop.f32.mrf.mxu1  ;;  %v13420_v29 = vsub.s32 %v13247_v43, %v4079_v53  ;;  %v13423_v11 = vsub.s32 %v13254_v15, %v4057_v62  ;;  %v13427_v34 = vmul.u32.u64.low 3817748708, %v13395_v30  ;;  %v13428_v37 = vmul.u32.u64.high 3817748708, %v13395_v30, %v13427_v34 }
 0x1a4   : > { %v13397_v56 = vadd.f32 %v10772_v61, %v2284_v9  ;;  %17275 = vst [vmem:[#allocation25_spill] sm:$0xff] %v13417_v4  ;;  %v4089_v61 = vshrl.u32 %v13343_v31, 4  ;;  %v13434_v3 = vmul.u32.u64.low 3817748708, %v13404_v32  ;;  %v13435_v9 = vmul.u32.u64.high 3817748708, %v13404_v32, %v13434_v3 }
 0x1a5   : > { %v10731_v49 = vpop.f32.mrf.mxu0  ;;  %v10775_v22 = vpop.f32.mrf.mxu1  ;;  %17276 = vst [vmem:[#allocation26_spill] sm:$0xff] %v13420_v29  ;;  %17277 = vst [vmem:[#allocation27_spill] sm:$0xff] %v13423_v11  ;;  %v13438_v14 = vsub.s32 %v13262_v7, %v4112_v52  ;;  %v13441_v15 = vmul.u32.u64.low 3817748708, %v13409_v12  ;;  %v13442_v31 = vmul.u32.u64.high 3817748708, %v13409_v12, %v13441_v15  ;;  %v13445_v62 = vadd.s32 88, %v13186_v57 }
 0x1a6   : > { %17274 = vst [vmem:[#allocation24_spill] sm:$0xff] %v13397_v56  ;;  %v2287_v54 = vadd.f32 %v10731_v49, %v13095_v42  ;;  %vm4438_vm12 = vcmp.ne.s32.totalorder %v13420_v29, 0  ;;  %vm4474_vm13 = vcmp.lt.s32.totalorder %v13420_v29, 0  ;;  %v13460_v52 = vadd.s32 18, %v13420_v29 }
 0x1a7   : > { %v2214_v5 = vpop.f32.mrf.mxu0  ;;  %v2556_v60 = vpop.f32.mrf.mxu1  ;;  %17279 = vst [vmem:[#allocation29_spill] sm:$0xff] %v13438_v14  ;;  %vm4436_vm14 = vcmp.ne.s32.totalorder %v13423_v11, 0  ;;  %vm4472_vm15 = vcmp.lt.s32.totalorder %v13423_v11, 0  ;;  %v4122_v34 = vshrl.u32 %v13401_v47, 4  ;;  %vm4441_vm4 = vcmp.ne.s32.totalorder %v13438_v14, 0  ;;  %v11617_v47 = vld [vmem:[%s17019_s3 + $0xb8] sm:$0xff]   ;;  %vm13494_vm8 = vmand %vm4474_vm13, %vm4438_vm12 }
 0x1a8   : > { %v2285_v18 = vadd.f32 %v2214_v5, %v13098_v10  ;;  %v13431_v42 = vadd.f32 %v10775_v22, %v2287_v54  ;;  %v13452_v22 = vadd.s32 72, %v13186_v57  ;;  %17281 = vst [vmem:[#allocation31_spill] sm:$0xff] %v13460_v52  ;;  %v4090_v5 = vmul.u32 18, %v4089_v61  ;;  %vm13506_vm10 = vmand %vm4472_vm15, %vm4436_vm14  ;;  %11021 = vmatprep.subr.bf16.mxu1 %v11617_v47  ;;  %v17326_v52 = vld [vmem:[#allocation10_spill] sm:$0xff] }
 0x1a9   : > { %v10732_v43 = vpop.f32.mrf.mxu0  ;;  %v10776_v53 = vpop.f32.mrf.mxu1  ;;  %vm4477_vm7 = vcmp.lt.s32.totalorder %v13438_v14, 0  ;;  %v2274_v15 = vadd.f32 %v13249_v24, %v13312_v17  ;;  %v17287_v55 = vmov 0  ;;  %v13511_v24 = vadd.s32 18, %v13438_v14 }
 0x1aa   : > { %17278 = vst [vmem:[#allocation28_spill] sm:$0xff] %v13431_v42  ;;  %v2288_v10 = vadd.f32 %v10732_v43, %v13107_v20  ;;  %v13448_v49 = vadd.f32 %v2556_v60, %v2285_v18  ;;  %v13467_v60 = vadd.s32 18, %v13423_v11  ;;  %v17284_v43 = vmov 0  ;;  %vm13524_vm11 = vmand %vm4477_vm7, %vm4441_vm4 }
 0x1ab   : > { %v13454_v54 = vpop.f32.mrf.mxu0  ;;  %v13456_v7 = vpop.f32.mrf.mxu1  ;;  %v17285_v43 = vsel %vm13474_vm0, 4294967295, %v17284_v43  ;;  %v17288_v55 = vsel %vm13494_vm8, 4294967295, %v17287_v55  ;;  %17293 = vst [vmem:[#allocation37_spill] sm:$0xff] %v13511_v24  ;;  %v13514_v17 = vsub.s32 %v13308_v0, %v4090_v5  ;;  %v4123_v42 = vmul.u32 18, %v4122_v34 }
 0x1ac   : > { %17280 = vst [vmem:[#allocation30_spill] sm:$0xff] %v13448_v49  ;;  %v13463_v20 = vadd.f32 %v10776_v53, %v2288_v10  ;;  %17283 = vst [vmem:[#allocation33_spill] sm:$0xff] %v13467_v60  ;;  %v13481_v61 = vmul.u32.u64.low 3817748708, %v13445_v62  ;;  %v13482_v53 = vmul.u32.u64.high 3817748708, %v13445_v62, %v13481_v61  ;;  %v17296_v49 = vmov 0 }
 0x1ad   : > { %v10735_v18 = vpop.f32.mrf.mxu0  ;;  %v10779_v3 = vpop.f32.mrf.mxu1  ;;  %17286 = vst [vmem:[#allocation34_spill] sm:$0xff] %v17285_v43  ;;  %17289 = vst [vmem:[#allocation35_spill] sm:$0xff] %v17288_v55  ;;  %v13499_v39 = vmul.u32.u64.low 3817748708, %v13452_v22  ;;  %v13500_v61 = vmul.u32.u64.high 3817748708, %v13452_v22, %v13499_v39  ;;  %v17297_v49 = vsel %vm13524_vm11, 4294967295, %v17296_v49  ;;  %v4155_v56 = vshrl.u32 %v13435_v9, 4 }
 0x1ae   : > { %17282 = vst [vmem:[#allocation32_spill] sm:$0xff] %v13463_v20  ;;  %v2291_v10 = vadd.f32 %v10735_v18, %v13118_v46  ;;  %v17290_v46 = vmov 0  ;;  %17294 = vst [vmem:[#allocation38_spill] sm:$0xff] %v13514_v17  ;;  %v4100_v18 = vshrl.u32 %v13428_v37, 4  ;;  %v11832_v0 = vmov 0  }
 0x1af   : > { %v2230_v36 = vpop.f32.mrf.mxu0  ;;  %v2572_v23 = vpop.f32.mrf.mxu1  ;;  %v17291_v46 = vsel %vm13506_vm10, 4294967295, %v17290_v46  ;;  %17298 = vst [vmem:[#allocation40_spill] sm:$0xff] %v17297_v49  ;;  %4760 = vst [vmem:[#allocation2 + $0x4] sm:$0xf] %v11832_v0  ;;  %v13542_v34 = vadd.s32 112, %v13186_v57  ;;  %vm4439_vm12 = vcmp.ne.s32.totalorder %v13514_v17, 0 }
 0x1b0   : > { %17292 = vst [vmem:[#allocation36_spill] sm:$0xff] %v17291_v46  ;;  %v2289_v39 = vadd.f32 %v2230_v36, %v13121_v50  ;;  %v13518_v20 = vadd.f32 %v10779_v3, %v2291_v10  ;;  %4761 = vst [vmem:[#allocation2 + $0x8] sm:$0xf] %v11832_v0  ;;  %v13531_v50 = vadd.f32 %v13221_v63, %v13413_v38  ;;  %v4133_v38 = vshrl.u32 %v13442_v31, 4 }
 0x1b1   : > { %4762 = vst [vmem:[#allocation2 + $0xc] sm:$0xf] %v11832_v0  ;;  %4763 = vst [vmem:[#allocation2 + $0xa0] sm:$0xf] %v11832_v0  ;;  %v10736_v36 = vpop.f32.mrf.mxu0  ;;  %v10780_v37 = vpop.f32.mrf.mxu1  ;;  %v13553_v10 = vadd.f32 %v13251_v6, %v2274_v15  ;;  %vm4475_vm13 = vcmp.lt.s32.totalorder %v13514_v17, 0  ;;  %v13571_v6 = vsub.s32 %v13361_v40, %v4123_v42  ;;  %v4156_v31 = vmul.u32 18, %v4155_v56 }
 0x1b2   : > { %17295 = vst [vmem:[#allocation39_spill] sm:$0xff] %v13518_v20  ;;  %4764 = vst [vmem:[#allocation2 + $0xa4] sm:$0xf] %v11832_v0  ;;  %v2292_v3 = vadd.f32 %v10736_v36, %v13130_v59  ;;  %v13545_v47 = vadd.f32 %v2572_v23, %v2289_v39  ;;  %v4101_v23 = vmul.u32 18, %v4100_v18  ;;  %v13564_v39 = vadd.s32 96, %v13186_v57 }
 0x1b3   : > { %4765 = vst [vmem:[#allocation2 + $0xa8] sm:$0xf] %v11832_v0  ;;  %17300 = vst [vmem:[#allocation42_spill] sm:$0xff] %v13553_v10  ;;  %v13555_v0 = vpop.f32.mrf.mxu0  ;;  %v13557_v5 = vpop.f32.mrf.mxu1  ;;  %v4166_v9 = vshrl.u32 %v13482_v53, 4  ;;  %v13575_v59 = vmul.u32.u64.low 3817748708, %v13542_v34  ;;  %v13576_v18 = vmul.u32.u64.high 3817748708, %v13542_v34, %v13575_v59  ;;  %v13588_v56 = vadd.f32 %v13303_v1, %v13316_v16 }
 0x1b4   : > { %17299 = vst [vmem:[#allocation41_spill] sm:$0xff] %v13545_v47  ;;  %v13566_v36 = vadd.f32 %v10780_v37, %v2292_v3  ;;  %17302 = vst [vmem:[#allocation44_spill] sm:$0xff] %v13571_v6  ;;  %v13579_v14 = vadd.s32 120, %v13186_v57  ;;  %v13583_v3 = vadd.s32 18, %v13514_v17  ;;  %v4134_v24 = vmul.u32 18, %v4133_v38 }
 0x1b5   : > { %v10739_v15 = vpop.f32.mrf.mxu0  ;;  %v10783_v63 = vpop.f32.mrf.mxu1  ;;  %v4144_v40 = vshrl.u32 %v13500_v61, 4  ;;  %v13591_v49 = vsub.s32 %v13395_v30, %v4101_v23  ;;  %v13594_v59 = vmul.u32.u64.low 3817748708, %v13564_v39  ;;  %v13595_v11 = vmul.u32.u64.high 3817748708, %v13564_v39, %v13594_v59  ;;  %vm13661_vm5 = vmand %vm4475_vm13, %vm4439_vm12 }
 0x1b6   : > { %17301 = vst [vmem:[#allocation43_spill] sm:$0xff] %v13566_v36  ;;  %v2295_v37 = vadd.f32 %v10739_v15, %v13141_v45  ;;  %17303 = vst [vmem:[#allocation45_spill] sm:$0xff] %v13583_v3  ;;  %vm4442_vm14 = vcmp.ne.s32.totalorder %v13571_v6, 0  ;;  %vm4478_vm15 = vcmp.lt.s32.totalorder %v13571_v6, 0  ;;  %v13603_v16 = vsub.s32 %v13404_v32, %v4156_v31 }
 0x1b7   : > { %v2246_v42 = vpop.f32.mrf.mxu0  ;;  %v2588_v53 = vpop.f32.mrf.mxu1  ;;  %17304 = vst [vmem:[#allocation46_spill] sm:$0xff] %v13591_v49  ;;  %v4167_v38 = vmul.u32 18, %v4166_v9  ;;  %v13606_v30 = vmul.u32.u64.low 3817748708, %v13579_v14  ;;  %v13607_v23 = vmul.u32.u64.high 3817748708, %v13579_v14, %v13606_v30  ;;  %v13620_v32 = vadd.s32 18, %v13571_v6  ;;  %vm13680_vm12 = vmand %vm4478_vm15, %vm4442_vm14 }
 0x1b8   : > { %v2293_v45 = vadd.f32 %v2246_v42, %v13144_v21  ;;  %v13598_v15 = vadd.f32 %v10783_v63, %v2295_v37  ;;  %17306 = vst [vmem:[#allocation48_spill] sm:$0xff] %v13603_v16  ;;  %v13613_v21 = vsub.s32 %v13409_v12, %v4134_v24  ;;  %v4145_v63 = vmul.u32 18, %v4144_v40 }
 0x1b9   : > { %v10740_v61 = vpop.f32.mrf.mxu0  ;;  %v10784_v1 = vpop.f32.mrf.mxu1  ;;  %17309 = vst [vmem:[#allocation51_spill] sm:$0xff] %v13620_v32  ;;  %vm4440_vm4 = vcmp.ne.s32.totalorder %v13591_v49, 0  ;;  %vm4476_vm7 = vcmp.lt.s32.totalorder %v13591_v49, 0  ;;  %v13625_v9 = vadd.s32 104, %v13186_v57  ;;  %v13632_v24 = vadd.s32 18, %v13591_v49 }
 0x1ba   : > { %17305 = vst [vmem:[#allocation47_spill] sm:$0xff] %v13598_v15  ;;  %v2296_v59 = vadd.f32 %v10740_v61, %v13152_v58  ;;  %v13610_v60 = vadd.f32 %v2588_v53, %v2293_v45  ;;  %17308 = vst [vmem:[#allocation50_spill] sm:$0xff] %v13613_v21  ;;  %v2282_v58 = vadd.f32 %v13386_v48, %v13320_v13  ;;  %v13635_v31 = vadd.s32 144, %v13186_v57  ;;  %v17313_v48 = vld [vmem:[#allocation7_spill] sm:$0xff] }
 0x1bb   : > { %v13615_v37 = vpop.f32.mrf.mxu0  ;;  %v13617_v42 = vpop.f32.mrf.mxu1  ;;  %17311 = vst [vmem:[#allocation53_spill] sm:$0xff] %v13632_v24  ;;  %vm4445_vm2 = vcmp.ne.s32.totalorder %v13603_v16, 0  ;;  %vm4481_vm3 = vcmp.lt.s32.totalorder %v13603_v16, 0  ;;  %v13642_v45 = vsub.s32 %v13445_v62, %v4167_v38  ;;  %v4199_v13 = vshrl.u32 %v13576_v18, 4  ;;  %vm13695_vm6 = vmand %vm4476_vm7, %vm4440_vm4 }
 0x1bc   : > { %17307 = vst [vmem:[#allocation49_spill] sm:$0xff] %v13610_v60  ;;  %v13629_v12 = vadd.f32 %v10784_v1, %v2296_v59  ;;  %v13649_v1 = vadd.s32 18, %v13603_v16  ;;  %vm4443_vm1 = vcmp.ne.s32.totalorder %v13613_v21, 0  ;;  %v13653_v30 = vsub.s32 %v13452_v22, %v4145_v63  ;;  %v17319_v63 = vld [vmem:[#allocation9_spill] sm:$0xff]  ;;  %vm13709_vm13 = vmand %vm4481_vm3, %vm4445_vm2 }
 0x1bd   : > { %v10795_v40 = vpop.f32.mrf.mxu0  ;;  %v13637_v53 = vpop.f32.mrf.mxu1  ;;  %17312 = vst [vmem:[#allocation54_spill] sm:$0xff] %v13642_v45  ;;  %v17316_v62 = vmov 0  ;;  %v4177_v18 = vshrl.u32 %v13595_v11, 4  ;;  %v13671_v22 = vadd.s32 128, %v13186_v57  ;;  %v17320_v19 = vmov 0 }
 0x1be   : > { %17310 = vst [vmem:[#allocation52_spill] sm:$0xff] %v13629_v12  ;;  %v13646_v61 = vadd.f32 %v10795_v40, %v17313_v48  ;;  %17314 = vst [vmem:[#allocation7_spill] sm:$0xff] %v13649_v1  ;;  %v17317_v62 = vsel %vm13661_vm5, 4294967295, %v17316_v62  ;;  %v13667_v38 = vmul.u32.u64.low 3817748708, %v13625_v9  ;;  %v13668_v40 = vmul.u32.u64.high 3817748708, %v13625_v9, %v13667_v38 }
 0x1bf   : > { %17315 = vst [vmem:[#allocation55_spill] sm:$0xff] %v13653_v30  ;;  %v2927_v59 = vpop.f32.mrf.mxu0  ;;  %v13655_v46 = vpop.f32.mrf.mxu1  ;;  %17318 = vst [vmem:[#allocation56_spill] sm:$0xff] %v17317_v62  ;;  %v17321_v19 = vsel %vm13680_vm12, 4294967295, %v17320_v19  ;;  %v13686_v11 = vmul.u32.u64.low 3817748708, %v13635_v31  ;;  %v13687_v4 = vmul.u32.u64.high 3817748708, %v13635_v31, %v13686_v11  ;;  %v4210_v29 = vshrl.u32 %v13607_v23, 4 }
 0x1c0   : > { %v13674_v48 = vadd.f32 %v2927_v59, %v17319_v63  ;;  %17322 = vst [vmem:[#allocation9_spill] sm:$0xff] %v17321_v19  ;;  %v17323_v59 = vmov 0  ;;  %v4200_v63 = vmul.u32 18, %v4199_v13  ;;  %v17327_v55 = vmov 0 }
 0x1c1   : > { %v10796_v38 = vpop.f32.mrf.mxu0  ;;  %v13689_v43 = vpop.f32.mrf.mxu1  ;;  %v17324_v59 = vsel %vm13695_vm6, 4294967295, %v17323_v59  ;;  %v17328_v55 = vsel %vm13709_vm13, 4294967295, %v17327_v55  ;;  %v13714_v12 = vadd.s32 18, %v13613_v21  ;;  %vm4444_vm4 = vcmp.ne.s32.totalorder %v13653_v30, 0 }
 0x1c2   : > { %17325 = vst [vmem:[#allocation57_spill] sm:$0xff] %v17324_v59  ;;  %v13703_v11 = vadd.f32 %v10796_v38, %v17326_v52  ;;  %17329 = vst [vmem:[#allocation10_spill] sm:$0xff] %v17328_v55  ;;  %vm4480_vm7 = vcmp.lt.s32.totalorder %v13653_v30, 0  ;;  %vm17331_vm15 = vcmp.lt.s32.totalorder %v13613_v21, 0  ;;  %v17332_v52 = vmov 0  ;;  %v17348_v59 = vld [vmem:[#allocation13_spill] sm:$0xff] }
 0x1c3   : > { %17330 = vst [vmem:[#allocation58_spill] sm:$0xff] %v13714_v12  ;;  %v13718_v13 = vpop.f32.mrf.mxu0  ;;  %v13720_v23 = vpop.f32.mrf.mxu1  ;;  %vm13726_vm14 = vmand %vm17331_vm15, %vm4443_vm1  ;;  %v13731_v38 = vadd.s32 18, %v13642_v45  ;;  %v4178_v60 = vmul.u32 18, %v4177_v18  ;;  %v13734_v15 = vmul.u32.u64.low 3817748708, %v13671_v22  ;;  %v13735_v36 = vmul.u32.u64.high 3817748708, %v13671_v22, %v13734_v15 }
 0x1c4   : > { %v17333_v52 = vsel %vm13726_vm14, 4294967295, %v17332_v52  ;;  %v13739_v47 = vadd.f32 %v13305_v8, %v13588_v56  ;;  %v2286_v20 = vadd.f32 %v13454_v54, %v13347_v27  ;;  %vm17337_vm1 = vcmp.ne.s32.totalorder %v13642_v45, 0  ;;  %vm13772_vm15 = vmand %vm4480_vm7, %vm4444_vm4 }
 0x1c5   : > { %17334 = vst [vmem:[#allocation59_spill] sm:$0xff] %v17333_v52  ;;  %17335 = vst [vmem:[#allocation60_spill] sm:$0xff] %v13731_v38  ;;  %vm17338_vm2 = vcmp.lt.s32.totalorder %v13642_v45, 0  ;;  %v17339_v18 = vmov 0  ;;  %v13756_v15 = vadd.s32 18, %v13653_v30  ;;  %v10799_v8 = vpop.f32.mrf.mxu0  ;;  %v13758_v56 = vpop.f32.mrf.mxu1  ;;  %v17343_v10 = vmov 0 }
 0x1c6   : > { %17336 = vst [vmem:[#allocation61_spill] sm:$0xff] %v13739_v47  ;;  %vm13751_vm3 = vmand %vm17338_vm2, %vm17337_vm1  ;;  %v17344_v10 = vsel %vm13772_vm15, 4294967295, %v17343_v10  ;;  %v13777_v17 = vsub.s32 %v13542_v34, %v4200_v63  ;;  %v4211_v3 = vmul.u32 18, %v4210_v29  ;;  %v13780_v62 = vadd.f32 %v13388_v33, %v2282_v58  ;;  %v17351_v58 = vld [vmem:[#allocation14_spill] sm:$0xff] }
 0x1c7   : > { %v17340_v18 = vsel %vm13751_vm3, 4294967295, %v17339_v18  ;;  %17342 = vst [vmem:[#allocation63_spill] sm:$0xff] %v13756_v15  ;;  %17345 = vst [vmem:[#allocation64_spill] sm:$0xff] %v17344_v10  ;;  %v2290_v27 = vadd.f32 %v13555_v0, %v13365_v51  ;;  %v13785_v54 = vadd.f32 %v10799_v8, %v17348_v59  ;;  %v2943_v24 = vpop.f32.mrf.mxu0  ;;  %v13791_v6 = vpop.f32.mrf.mxu1  ;;  %v13802_v29 = vsub.s32 %v13564_v39, %v4178_v60  ;;  %v4948_v8 = vld [vmem:[#allocation2 + $0x8] sm:$0xf] }
 0x1c8   : > { %17341 = vst [vmem:[#allocation62_spill] sm:$0xff] %v17340_v18  ;;  %17346 = vst [vmem:[#allocation65_spill] sm:$0xff] %v13777_v17  ;;  %v4188_v34 = vshrl.u32 %v13668_v40, 4  ;;  %v13806_v0 = vadd.f32 %v13456_v7, %v2286_v20  ;;  %v13809_v59 = vadd.f32 %v2943_v24, %v17351_v58  ;;  %v4243_v33 = vshrl.u32 %v13687_v4, 4  ;;  %v4947_v51 = vld [vmem:[#allocation2 + $0x4] sm:$0xc] }
 0x1c9   : > { %17347 = vst [vmem:[#allocation66_spill] sm:$0xff] %v13780_v62  ;;  %17349 = vst [vmem:[#allocation13_spill] sm:$0xff] %v13802_v29  ;;  %v10800_v49 = vpop.f32.mrf.mxu0  ;;  %v13816_v60 = vpop.f32.mrf.mxu1  ;;  %v13821_v7 = vsub.s32 %v13579_v14, %v4211_v3  ;;  %v5000_v20 = vld [vmem:[#allocation2 + $0x4] sm:$0x8]  ;;  %v13824_v39 = vadd.s32 152, %v13186_v57  ;;  %v13827_v24 = vadd.f32 %v13557_v5, %v2290_v27  ;;  %v13833_v58 = vadd.s32 18, %v13777_v17 }
 0x1ca   : > { %17350 = vst [vmem:[#allocation67_spill] sm:$0xff] %v13806_v0  ;;  %v17354_v40 = vld [vmem:[#allocation17_spill] sm:$0xff]  ;;  %v13836_v63 = vadd.s32 136, %v13186_v57  ;;  %v4189_v3 = vmul.u32 18, %v4188_v34  ;;  %v9676_v15 = vcombine.low %v4947_v51, %v4948_v8  ;;  %v4221_v5 = vshrl.u32 %v13735_v36, 4  ;;  %v17357_v51 = vld [vmem:[#allocation8_spill] sm:$0xff] }
 0x1cb   : > { %17352 = vst [vmem:[#allocation14_spill] sm:$0xff] %v13821_v7  ;;  %17353 = vst [vmem:[#allocation68_spill] sm:$0xff] %v13827_v24  ;;  %v13830_v4 = vadd.f32 %v10800_v49, %v17354_v40  ;;  %v13838_v30 = vpop.f32.mrf.mxu0  ;;  %v13840_v14 = vpop.f32.mrf.mxu1  ;;  %v13846_v49 = vadd.s32 18, %v13802_v29  ;;  %v13848_v27 = vcombine.low %v5000_v20, %v4948_v8  ;;  %v4244_v40 = vmul.u32 18, %v4243_v33 }
 0x1cc   : > { %17355 = vst [vmem:[#allocation17_spill] sm:$0xff] %v13833_v58  ;;  %vm4450_vm7 = vcmp.ne.s32.totalorder %v13821_v7, 0  ;;  %v13855_v34 = vadd.s32 176, %v13186_v57  ;;  %v13858_v36 = vadd.s32 160, %v13186_v57  ;;  %vm17358_vm2 = vcmp.ne.s32.totalorder %v13777_v17, 0 }
 0x1cd   : > { %17356 = vst [vmem:[#allocation69_spill] sm:$0xff] %v13846_v49  ;;  %v10803_v10 = vpop.f32.mrf.mxu0  ;;  %v13850_v45 = vpop.f32.mrf.mxu1  ;;  %vm17359_vm1 = vcmp.lt.s32.totalorder %v13777_v17, 0  ;;  %v17360_v33 = vmov 0  ;;  %v13872_v8 = vadd.s32 18, %v13821_v7  ;;  %v2294_v21 = vadd.f32 %v13615_v37, %v13368_v26 }
 0x1ce   : > { %v13861_v38 = vadd.f32 %v10803_v10, %v17357_v51  ;;  %vm13867_vm15 = vmand %vm17359_vm1, %vm17358_vm2  ;;  %v13875_v20 = vmul.u32.u64.low 3817748708, %v13824_v39  ;;  %v13876_v18 = vmul.u32.u64.high 3817748708, %v13824_v39, %v13875_v20  ;;  %vm17364_vm4 = vcmp.ne.s32.totalorder %v13802_v29, 0 }
 0x1cf   : > { %v17361_v33 = vsel %vm13867_vm15, 4294967295, %v17360_v33  ;;  %17363 = vst [vmem:[#allocation70_spill] sm:$0xff] %v13872_v8  ;;  %v2959_v10 = vpop.f32.mrf.mxu0  ;;  %v13880_v51 = vpop.f32.mrf.mxu1  ;;  %vm17365_vm1 = vcmp.lt.s32.totalorder %v13802_v29, 0  ;;  %v17366_v12 = vmov 0  ;;  %v13891_v52 = vsub.s32 %v13625_v9, %v4189_v3  ;;  %v17370_v20 = vld [vmem:[#allocation11_spill] sm:$0xff] }
 0x1d0   : > { %17362 = vst [vmem:[#allocation8_spill] sm:$0xff] %v17361_v33  ;;  %vm13886_vm2 = vmand %vm17365_vm1, %vm17364_vm4  ;;  %v5395_v16 = vshrl.u32 %v9676_v15, 16  ;;  %v4222_v1 = vmul.u32 18, %v4221_v5  ;;  %v13894_v55 = vadd.f32 %v2959_v10, %v17370_v20  ;;  %v13897_v26 = vsub.s32 %v13635_v31, %v4244_v40  ;;  %v17376_v10 = vld [vmem:[#allocation16_spill] sm:$0xff]  ;;  %v17391_v29 = vld [vmem:[#allocation15_spill] sm:$0xff] }
 0x1d1   : > { %v17367_v12 = vsel %vm13886_vm2, 4294967295, %v17366_v12  ;;  %17369 = vst [vmem:[#allocation72_spill] sm:$0xff] %v13891_v52  ;;  %v13900_v37 = vmul.u32.u64.low 3817748708, %v13836_v63  ;;  %v13901_v32 = vmul.u32.u64.high 3817748708, %v13836_v63, %v13900_v37  ;;  %v10804_v19 = vpop.f32.mrf.mxu0  ;;  %v13903_v24 = vpop.f32.mrf.mxu1  ;;  %vm17372_vm4 = vcmp.lt.s32.totalorder %v13821_v7, 0 }
 0x1d2   : > { %17368 = vst [vmem:[#allocation71_spill] sm:$0xff] %v17367_v12  ;;  %17371 = vst [vmem:[#allocation11_spill] sm:$0xff] %v13897_v26  ;;  %v17373_v9 = vmov 0  ;;  %v13914_v3 = vmul.u32.u64.low 3817748708, %v13855_v34  ;;  %v13915_v5 = vmul.u32.u64.high 3817748708, %v13855_v34, %v13914_v3  ;;  %v13922_v20 = vadd.f32 %v10804_v19, %v17376_v10 }
 0x1d3   : > { %vm13909_vm1 = vmand %vm17372_vm4, %vm4450_vm7  ;;  %v13918_v31 = vmul.u32.u64.low 3817748708, %v13858_v36  ;;  %v13919_v40 = vmul.u32.u64.high 3817748708, %v13858_v36, %v13918_v31  ;;  %v5398_v62 = vshll.u32 %v9676_v15, 16  ;;  %v13932_v47 = vpop.f32.mrf.mxu0  ;;  %v13934_v3 = vpop.f32.mrf.mxu1  ;;  %v13940_v19 = vsub.s32 %v13671_v22, %v4222_v1 }
 0x1d4   : > { %v17374_v9 = vsel %vm13909_vm1, 4294967295, %v17373_v9  ;;  %v13943_v10 = vadd.f32 %v13617_v42, %v2294_v21  ;;  %v13950_v0 = vadd.s32 18, %v13891_v52  ;;  %v13953_v31 = vadd.s32 184, %v13186_v57  ;;  %v17382_v42 = vld [vmem:[#allocation12_spill] sm:$0xff] }
 0x1d5   : > { %17375 = vst [vmem:[#allocation73_spill] sm:$0xff] %v17374_v9  ;;  %17377 = vst [vmem:[#allocation16_spill] sm:$0xff] %v13940_v19  ;;  %v13957_v37 = vadd.f32 %v13637_v53, %v13646_v61  ;;  %v10807_v1 = vpop.f32.mrf.mxu0  ;;  %v13959_v22 = vpop.f32.mrf.mxu1  ;;  %vm4453_vm4 = vcmp.ne.s32.totalorder %v13897_v26, 0  ;;  %v13963_v21 = vrot.slane %v5395_v16, 2  ;;  %vm17383_vm1 = vcmp.ne.s32.totalorder %v13891_v52, 0 }
 0x1d6   : > { %17378 = vst [vmem:[#allocation74_spill] sm:$0xff] %v13943_v10  ;;  %17379 = vst [vmem:[#allocation75_spill] sm:$0xff] %v13950_v0  ;;  %v13966_v15 = vadd.f32 %v10807_v1, %v17382_v42  ;;  %vm17384_vm2 = vcmp.lt.s32.totalorder %v13891_v52, 0  ;;  %v17385_v7 = vmov 0  ;;  %v13977_v53 = vadd.s32 18, %v13897_v26 }
 0x1d7   : > { %17380 = vst [vmem:[#allocation76_spill] sm:$0xff] %v13957_v37  ;;  %17381 = vst [vmem:[#allocation77_spill] sm:$0xff] %v13963_v21  ;;  %v13979_v61 = vrot.slane %v5398_v62, 3  ;;  %v4254_v8 = vshrl.u32 %v13876_v18, 4  ;;  %v3071_v16 = vadd.f32 %v13718_v13, %v13378_v44  ;;  %v2975_v1 = vpop.f32.mrf.mxu0  ;;  %v13984_v42 = vpop.f32.mrf.mxu1  ;;  %vm4451_vm7 = vcmp.ne.s32.totalorder %v13940_v19, 0  ;;  %v13994_v62 = vld [vmem:[%s17019_s3 + $0xf8] sm:$0xff]  }
 0x1d8   : > { %vm13972_vm15 = vmand %vm17384_vm2, %vm17383_vm1  ;;  %17388 = vst [vmem:[#allocation78_spill] sm:$0xff] %v13977_v53  ;;  %vm4487_vm2 = vcmp.lt.s32.totalorder %v13940_v19, 0  ;;  %v13989_v9 = vadd.s32 168, %v13186_v57  ;;  %v13997_v18 = vadd.f32 %v2975_v1, %v17391_v29  ;;  %vm17392_vm1 = vcmp.lt.s32.totalorder %v13897_v26, 0  ;;  %11073 = vmatprep.subr.bf16.mxu0 %v13994_v62  ;;  %v17397_v37 = vld [vmem:[#allocation20_spill] sm:$0xff] }
 0x1d9   : > { %v17386_v7 = vsel %vm13972_vm15, 4294967295, %v17385_v7  ;;  %17389 = vst [vmem:[#allocation79_spill] sm:$0xff] %v13979_v61  ;;  %17390 = vst [vmem:[#allocation80_spill] sm:$0xff] %v13994_v62  ;;  %v17393_v44 = vmov 0  ;;  %v4232_v13 = vshrl.u32 %v13901_v32, 4  ;;  %v10808_v17 = vpop.f32.mrf.mxu0  ;;  %v14012_v58 = vpop.f32.mrf.mxu1  ;;  %v14019_v1 = vadd.s32 18, %v13940_v19 }
 0x1da   : > { %17387 = vst [vmem:[#allocation12_spill] sm:$0xff] %v17386_v7  ;;  %vm14003_vm3 = vmand %vm17392_vm1, %vm4453_vm4  ;;  %v14009_v49 = vmul.u32.u64.low 3817748708, %v13953_v31  ;;  %v14010_v12 = vmul.u32.u64.high 3817748708, %v13953_v31, %v14009_v49  ;;  %v4287_v33 = vshrl.u32 %v13915_v5, 4  ;;  %v4265_v10 = vshrl.u32 %v13919_v40, 4 }
 0x1db   : > { %v17394_v44 = vsel %vm14003_vm3, 4294967295, %v17393_v44  ;;  %17396 = vst [vmem:[#allocation81_spill] sm:$0xff] %v14019_v1  ;;  %v14026_v32 = vadd.f32 %v13655_v46, %v13674_v48  ;;  %v14030_v49 = vadd.f32 %v13689_v43, %v13703_v11  ;;  %v14033_v7 = vadd.f32 %v10808_v17, %v17397_v37  ;;  %vm14039_vm4 = vmand %vm4487_vm2, %vm4451_vm7  ;;  %v14043_v29 = vpop.f32.mrf.mxu0  ;;  %v14045_v46 = vpop.f32.mrf.mxu1 }
 0x1dc   : > { %17395 = vst [vmem:[#allocation15_spill] sm:$0xff] %v17394_v44  ;;  %v17398_v5 = vmov 0  ;;  %v4255_v40 = vmul.u32 18, %v4254_v8  ;;  %v14052_v17 = vmul.u32.u64.low 3817748708, %v13989_v9  ;;  %v14053_v48 = vmul.u32.u64.high 3817748708, %v13989_v9, %v14052_v17 }
 0x1dd   : > { %v17399_v5 = vsel %vm14039_vm4, 4294967295, %v17398_v5  ;;  %v14056_v11 = vadd.s32 208, %v13186_v57  ;;  %v14059_v37 = vadd.f32 %v13720_v23, %v3071_v16  ;;  %v14063_v8 = vadd.f32 %v13758_v56, %v13785_v54  ;;  %v10811_v44 = vpop.f32.mrf.mxu0  ;;  %v14067_v43 = vpop.f32.mrf.mxu1  ;;  %v17401_v54 = vld [vmem:[#allocation21_spill] sm:$0xff] }
 0x1de   : > { %17400 = vst [vmem:[#allocation20_spill] sm:$0xff] %v17399_v5  ;;  %v4233_v52 = vmul.u32 18, %v4232_v13  ;;  %v4288_v26 = vmul.u32 18, %v4287_v33  ;;  %v14074_v23 = vadd.s32 192, %v13186_v57  ;;  %v3075_v56 = vadd.f32 %v13838_v30, %v13384_v2 }
 0x1df   : > { %v4266_v53 = vmul.u32 18, %v4265_v10  ;;  %v14079_v16 = vadd.f32 %v10811_v44, %v17401_v54  ;;  %v14082_v13 = vsub.s32 %v13824_v39, %v4255_v40  ;;  %v14085_v62 = vadd.s32 216, %v13186_v57  ;;  %v2991_v10 = vpop.f32.mrf.mxu0  ;;  %v14095_v21 = vpop.f32.mrf.mxu1 }
 0x1e0   : > { %v14089_v17 = vadd.f32 %v13791_v6, %v13809_v59  ;;  %v14093_v33 = vadd.f32 %v13816_v60, %v13830_v4  ;;  %v14098_v2 = vmul.u32.u64.low 3817748708, %v14056_v11  ;;  %v14099_v30 = vmul.u32.u64.high 3817748708, %v14056_v11, %v14098_v2 }
 0x1e1   : > { %17402 = vst [vmem:[#allocation21_spill] sm:$0xff] %v14082_v13  ;;  %v14102_v39 = vadd.f32 %v2991_v10, %v13293_v35  ;;  %v14105_v44 = vsub.s32 %v13836_v63, %v4233_v52  ;;  %v4298_v6 = vshrl.u32 %v14010_v12, 4  ;;  %v14109_v59 = vadd.s32 200, %v13186_v57  ;;  %v10812_v60 = vpop.f32.mrf.mxu0  ;;  %v14111_v4 = vpop.f32.mrf.mxu1 }
 0x1e2   : > { %17403 = vst [vmem:[#allocation82_spill] sm:$0xff] %v14089_v17  ;;  %17404 = vst [vmem:[#allocation83_spill] sm:$0xff] %v14093_v33  ;;  %v14114_v40 = vsub.s32 %v13855_v34, %v4288_v26  ;;  %v14117_v54 = vsub.s32 %v13858_v36, %v4266_v53  ;;  %v14120_v35 = vmul.u32.u64.low 3817748708, %v14074_v23  ;;  %v14121_v10 = vmul.u32.u64.high 3817748708, %v14074_v23, %v14120_v35 }
 0x1e3   : > { %17405 = vst [vmem:[#allocation84_spill] sm:$0xff] %v14105_v44  ;;  %v14124_v52 = vadd.f32 %v13840_v14, %v3075_v56  ;;  %v14127_v12 = vadd.f32 %v10812_v60, %v13322_v25  ;;  %v14131_v63 = vadd.s32 240, %v13186_v57  ;;  %v14135_v34 = vadd.f32 %v13850_v45, %v13861_v38  ;;  %v14137_v36 = vpop.f32.mrf.mxu0  ;;  %v14139_v26 = vpop.f32.mrf.mxu1 }
 0x1e4   : > { %17406 = vst [vmem:[#allocation85_spill] sm:$0xff] %v14114_v40  ;;  %17407 = vst [vmem:[#allocation86_spill] sm:$0xff] %v14117_v54  ;;  %v14143_v14 = vadd.s32 18, %v14082_v13  ;;  %v4276_v25 = vshrl.u32 %v14053_v48, 4  ;;  %v14149_v53 = vadd.s32 18, %v14105_v44  ;;  %v4299_v45 = vmul.u32 18, %v4298_v6 }
 0x1e5   : > { %17408 = vst [vmem:[#allocation87_spill] sm:$0xff] %v14124_v52  ;;  %17409 = vst [vmem:[#allocation88_spill] sm:$0xff] %v14135_v34  ;;  %v3079_v38 = vadd.f32 %v13932_v47, %v13531_v50  ;;  %v10815_v56 = vpop.f32.mrf.mxu0  ;;  %v14153_v2 = vpop.f32.mrf.mxu1  ;;  %vm17412_vm7 = vcmp.ne.s32.totalorder %v14082_v13, 0  ;;  %vm17413_vm1 = vcmp.lt.s32.totalorder %v14082_v13, 0  ;;  %v17414_v6 = vmov 0  ;;  %v17433_v13 = vld [vmem:[#allocation24_spill] sm:$0xff] }
 0x1e6   : > { %17410 = vst [vmem:[#allocation89_spill] sm:$0xff] %v14143_v14  ;;  %17411 = vst [vmem:[#allocation90_spill] sm:$0xff] %v14149_v53  ;;  %v14159_v48 = vadd.f32 %v10815_v56, %v13350_v28  ;;  %vm4491_vm14 = vcmp.lt.s32.totalorder %v14117_v54, 0  ;;  %v14171_v50 = vmul.u32.u64.low 3817748708, %v14085_v62  ;;  %v14172_v47 = vmul.u32.u64.high 3817748708, %v14085_v62, %v14171_v50 }
 0x1e7   : > { %vm14165_vm15 = vmand %vm17413_vm1, %vm17412_vm7  ;;  %v3007_v60 = vpop.f32.mrf.mxu0  ;;  %v14174_v35 = vpop.f32.mrf.mxu1  ;;  %vm17417_vm3 = vcmp.ne.s32.totalorder %v14105_v44, 0  ;;  %vm17418_vm4 = vcmp.lt.s32.totalorder %v14105_v44, 0  ;;  %v17419_v28 = vmov 0  ;;  %v14185_v56 = vadd.s32 18, %v14114_v40  ;;  %v17445_v44 = vld [vmem:[#allocation32_spill] sm:$0xff] }
 0x1e8   : > { %v17415_v6 = vsel %vm14165_vm15, 4294967295, %v17414_v6  ;;  %vm14180_vm2 = vmand %vm17418_vm4, %vm17417_vm3  ;;  %v14188_v61 = vadd.s32 18, %v14117_v54  ;;  %v4277_v19 = vmul.u32 18, %v4276_v25  ;;  %v4331_v50 = vshrl.u32 %v14099_v30, 4 }
 0x1e9   : > { %17416 = vst [vmem:[#allocation91_spill] sm:$0xff] %v17415_v6  ;;  %v17420_v28 = vsel %vm14180_vm2, 4294967295, %v17419_v28  ;;  %17422 = vst [vmem:[#allocation93_spill] sm:$0xff] %v14185_v56  ;;  %v14192_v1 = vadd.f32 %v3007_v60, %v13381_v41  ;;  %vm17424_vm7 = vcmp.ne.s32.totalorder %v14114_v40, 0  ;;  %vm17425_vm1 = vcmp.lt.s32.totalorder %v14114_v40, 0  ;;  %v10816_v25 = vpop.f32.mrf.mxu0  ;;  %v14209_v30 = vpop.f32.mrf.mxu1 }
 0x1ea   : > { %17421 = vst [vmem:[#allocation92_spill] sm:$0xff] %v17420_v28  ;;  %17423 = vst [vmem:[#allocation94_spill] sm:$0xff] %v14188_v61  ;;  %v17426_v5 = vmov 0  ;;  %v14203_v0 = vsub.s32 %v13953_v31, %v4299_v45  ;;  %v14206_v34 = vmul.u32.u64.low 3817748708, %v14109_v59  ;;  %v14207_v52 = vmul.u32.u64.high 3817748708, %v14109_v59, %v14206_v34 }
 0x1eb   : > { %vm14198_vm3 = vmand %vm17425_vm1, %vm17424_vm7  ;;  %vm17429_vm4 = vcmp.ne.s32.totalorder %v14117_v54, 0  ;;  %v17430_v60 = vmov 0  ;;  %v4309_v31 = vshrl.u32 %v14121_v10, 4  ;;  %v14230_v33 = vadd.f32 %v13880_v51, %v13894_v55  ;;  %v14248_v17 = vpop.f32.mrf.mxu1 }
 0x1ec   : > { %v17427_v5 = vsel %vm14198_vm3, 4294967295, %v17426_v5  ;;  %vm14219_vm7 = vmand %vm4491_vm14, %vm17429_vm4  ;;  %v14225_v34 = vmul.u32.u64.low 3817748708, %v14131_v63  ;;  %v14226_v45 = vmul.u32.u64.high 3817748708, %v14131_v63, %v14225_v34  ;;  %v14234_v41 = vadd.f32 %v13903_v24, %v13922_v20 }
 0x1ed   : > { %17428 = vst [vmem:[#allocation95_spill] sm:$0xff] %v17427_v5  ;;  %v17431_v60 = vsel %vm14219_vm7, 4294967295, %v17430_v60  ;;  %v14237_v14 = vadd.f32 %v10816_v25, %v17433_v13  ;;  %v14244_v6 = vadd.f32 %v13934_v3, %v3079_v38  ;;  %v14246_v34 = vpop.f32.mrf.mxu0  ;;  %v14255_v24 = vsub.s32 %v13989_v9, %v4277_v19  ;;  %v14269_v25 = vpop.f32.mrf.mxu1  ;;  %v17437_v3 = vld [vmem:[#allocation28_spill] sm:$0xff] }
 0x1ee   : > { %17432 = vst [vmem:[#allocation96_spill] sm:$0xff] %v17431_v60  ;;  %v4332_v51 = vmul.u32 18, %v4331_v50  ;;  %v14259_v20 = vadd.f32 %v13959_v22, %v13966_v15  ;;  %vm4458_vm14 = vcmp.ne.s32.totalorder %v14203_v0, 0  ;;  %v14267_v13 = vadd.s32 224, %v13186_v57  ;;  %v17436_v22 = vld [vmem:[#allocation42_spill] sm:$0xff] }
 0x1ef   : > { %17434 = vst [vmem:[#allocation24_spill] sm:$0xff] %v14255_v24  ;;  %v10819_v38 = vpop.f32.mrf.mxu0  ;;  %v14273_v9 = vadd.s32 18, %v14203_v0  ;;  %v4310_v19 = vmul.u32 18, %v4309_v31  ;;  %v14276_v15 = vadd.s32 248, %v13186_v57  ;;  %v3083_v50 = vadd.f32 %v14043_v29, %v17436_v22  ;;  %v17440_v29 = vld [vmem:[#allocation30_spill] sm:$0xff] }
 0x1f0   : > { %17435 = vst [vmem:[#allocation97_spill] sm:$0xff] %v14259_v20  ;;  %v14281_v55 = vadd.f32 %v10819_v38, %v17437_v3  ;;  %v4342_v10 = vshrl.u32 %v14172_v47, 4  ;;  %v14285_v54 = vadd.s32 232, %v13186_v57  ;;  %vm4456_vm4 = vcmp.ne.s32.totalorder %v14255_v24, 0  ;;  %v14298_v3 = vpop.f32.mrf.mxu1 }
 0x1f1   : > { %v3023_v61 = vpop.f32.mrf.mxu0  ;;  %vm4492_vm1 = vcmp.lt.s32.totalorder %v14255_v24, 0  ;;  %v14290_v31 = vadd.s32 18, %v14255_v24  ;;  %v14293_v60 = vsub.s32 %v14056_v11, %v4332_v51  ;;  %vm17441_vm7 = vcmp.lt.s32.totalorder %v14203_v0, 0 }
 0x1f2   : > { %v14296_v22 = vadd.f32 %v3023_v61, %v17440_v29  ;;  %vm14304_vm3 = vmand %vm17441_vm7, %vm4458_vm14  ;;  %v17442_v47 = vmov 0  ;;  %v4320_v38 = vshrl.u32 %v14207_v52, 4  ;;  %v14314_v61 = vsub.s32 %v14074_v23, %v4310_v19 }
 0x1f3   : > { %17438 = vst [vmem:[#allocation42_spill] sm:$0xff] %v14290_v31  ;;  %17439 = vst [vmem:[#allocation28_spill] sm:$0xff] %v14293_v60  ;;  %v17443_v47 = vsel %vm14304_vm3, 4294967295, %v17442_v47  ;;  %v14310_v40 = vmul.u32.u64.low 3817748708, %v14267_v13  ;;  %v14311_v56 = vmul.u32.u64.high 3817748708, %v14267_v13, %v14310_v40  ;;  %v10820_v11 = vpop.f32.mrf.mxu0  ;;  %v4375_v51 = vshrl.u32 %v14226_v45, 4 }
 0x1f4   : > { %17444 = vst [vmem:[#allocation30_spill] sm:$0xff] %v14314_v61  ;;  %v14318_v29 = vmul.u32.u64.low 3817748708, %v14276_v15  ;;  %v14319_v5 = vmul.u32.u64.high 3817748708, %v14276_v15, %v14318_v29  ;;  %v14322_v53 = vadd.f32 %v10820_v11, %v17445_v44  ;;  %v4343_v28 = vmul.u32 18, %v4342_v10  ;;  %vm14349_vm7 = vmand %vm4492_vm1, %vm4456_vm4  ;;  %v17463_v31 = vld [vmem:[#allocation43_spill] sm:$0xff] }
 0x1f5   : > { %v14325_v52 = vmul.u32.u64.low 3817748708, %v14285_v54  ;;  %v14326_v20 = vmul.u32.u64.high 3817748708, %v14285_v54, %v14325_v52  ;;  %v14330_v40 = vadd.f32 %v13984_v42, %v13997_v18  ;;  %v14334_v23 = vadd.f32 %v14012_v58, %v14033_v7  ;;  %v14339_v19 = vpop.f32.mrf.mxu0  ;;  %v17449_v7 = vld [vmem:[#allocation61_spill] sm:$0xff]  ;;  %v14355_v18 = vpop.f32.mrf.mxu1 }
 0x1f6   : > { %v14337_v45 = vadd.f32 %v14045_v46, %v3083_v50  ;;  %v17446_v42 = vmov 0  ;;  %v3087_v58 = vadd.f32 %v14137_v36, %v17449_v7  ;;  %vm4461_vm14 = vcmp.ne.s32.totalorder %v14293_v60, 0  ;;  %v17450_v36 = vld [vmem:[#allocation39_spill] sm:$0xff] }
 0x1f7   : > { %v17447_v42 = vsel %vm14349_vm7, 4294967295, %v17446_v42  ;;  %vm4497_vm2 = vcmp.lt.s32.totalorder %v14293_v60, 0  ;;  %v4321_v46 = vmul.u32 18, %v4320_v38  ;;  %v10823_v10 = vpop.f32.mrf.mxu0  ;;  %vm4459_vm3 = vcmp.ne.s32.totalorder %v14314_v61, 0 }
 0x1f8   : > { %17448 = vst [vmem:[#allocation32_spill] sm:$0xff] %v17447_v42  ;;  %vm4495_vm15 = vcmp.lt.s32.totalorder %v14314_v61, 0  ;;  %v4376_v50 = vmul.u32 18, %v4375_v51  ;;  %v14362_v11 = vadd.s32 272, %v13186_v57  ;;  %v14366_v29 = vadd.f32 %v14067_v43, %v14079_v16  ;;  %vm14390_vm1 = vmand %vm4497_vm2, %vm4461_vm14 }
 0x1f9   : > { %v14369_v52 = vadd.f32 %v10823_v10, %v17450_v36  ;;  %v14376_v7 = vsub.s32 %v14085_v62, %v4343_v28  ;;  %v14380_v51 = vadd.f32 %v14095_v21, %v14102_v39  ;;  %v14384_v44 = vadd.f32 %v14111_v4, %v14127_v12  ;;  %v3039_v43 = vpop.f32.mrf.mxu0  ;;  %v14403_v39 = vpop.f32.mrf.mxu1  ;;  %v17457_v4 = vld [vmem:[#allocation41_spill] sm:$0xff]  ;;  %vm14412_vm2 = vmand %vm4495_vm15, %vm4459_vm3 }
 0x1fa   : > { %v17452_v16 = vmov 0  ;;  %v14395_v62 = vadd.s32 18, %v14293_v60  ;;  %v14398_v28 = vadd.s32 18, %v14314_v61  ;;  %v14401_v21 = vadd.f32 %v14139_v26, %v3087_v58 }
 0x1fb   : > { %17451 = vst [vmem:[#allocation61_spill] sm:$0xff] %v14376_v7  ;;  %v17453_v16 = vsel %vm14390_vm1, 4294967295, %v17452_v16  ;;  %v14406_v12 = vadd.f32 %v3039_v43, %v17457_v4  ;;  %v17458_v10 = vmov 0  ;;  %v14417_v36 = vsub.s32 %v14109_v59, %v4321_v46  ;;  %v10824_v26 = vpop.f32.mrf.mxu0 }
 0x1fc   : > { %17454 = vst [vmem:[#allocation39_spill] sm:$0xff] %v17453_v16  ;;  %17455 = vst [vmem:[#allocation98_spill] sm:$0xff] %v14395_v62  ;;  %v17459_v10 = vsel %vm14412_vm2, 4294967295, %v17458_v10  ;;  %v4353_v38 = vshrl.u32 %v14311_v56, 4  ;;  %v14421_v58 = vsub.s32 %v14131_v63, %v4376_v50  ;;  %v4386_v43 = vshrl.u32 %v14319_v5, 4  ;;  %v17469_v5 = vld [vmem:[#allocation66_spill] sm:$0xff] }
 0x1fd   : > { %17456 = vst [vmem:[#allocation99_spill] sm:$0xff] %v14398_v28  ;;  %17460 = vst [vmem:[#allocation41_spill] sm:$0xff] %v17459_v10  ;;  %v14425_v4 = vmul.u32.u64.low 3817748708, %v14362_v11  ;;  %v14426_v24 = vmul.u32.u64.high 3817748708, %v14362_v11, %v14425_v4  ;;  %v14429_v42 = vadd.f32 %v10824_v26, %v17463_v31  ;;  %vm4462_vm15 = vcmp.ne.s32.totalorder %v14376_v7, 0  ;;  %v14438_v63 = vpop.f32.mrf.mxu0  ;;  %v17470_v28 = vld [vmem:[#allocation47_spill] sm:$0xff] }
 0x1fe   : > { %17461 = vst [vmem:[#allocation100_spill] sm:$0xff] %v14417_v36  ;;  %17462 = vst [vmem:[#allocation101_spill] sm:$0xff] %v14421_v58  ;;  %vm4498_vm3 = vcmp.lt.s32.totalorder %v14376_v7, 0  ;;  %v4364_v59 = vshrl.u32 %v14326_v20, 4  ;;  %v14436_v56 = vadd.f32 %v14153_v2, %v14159_v48  ;;  %v14449_v46 = vadd.s32 256, %v13186_v57  ;;  %v14451_v20 = vpop.f32.mrf.mxu1 }
 0x1ff   : > { %v14454_v2 = vadd.s32 18, %v14376_v7  ;;  %vm4460_vm4 = vcmp.ne.s32.totalorder %v14417_v36, 0  ;;  %vm4496_vm14 = vcmp.lt.s32.totalorder %v14417_v36, 0  ;;  %v4354_v48 = vmul.u32 18, %v4353_v38  ;;  %v10827_v50 = vpop.f32.mrf.mxu0  ;;  %vm14458_vm1 = vmand %vm4498_vm3, %vm4462_vm15 }
 0x200   : > { %17464 = vst [vmem:[#allocation43_spill] sm:$0xff] %v14436_v56  ;;  %v17466_v26 = vmov 0  ;;  %vm4465_vm2 = vcmp.ne.s32.totalorder %v14421_v58, 0  ;;  %vm4501_vm7 = vcmp.lt.s32.totalorder %v14421_v58, 0  ;;  %v4387_v4 = vmul.u32 18, %v4386_v43  ;;  %vm14483_vm15 = vmand %vm4496_vm14, %vm4460_vm4 }
 0x201   : > { %17465 = vst [vmem:[#allocation102_spill] sm:$0xff] %v14454_v2  ;;  %v17467_v26 = vsel %vm14458_vm1, 4294967295, %v17466_v26  ;;  %v14465_v31 = vadd.s32 280, %v13186_v57  ;;  %v3091_v61 = vadd.f32 %v14246_v34, %v17469_v5  ;;  %v14470_v10 = vadd.f32 %v10827_v50, %v17470_v28  ;;  %v3055_v16 = vpop.f32.mrf.mxu0  ;;  %vm14509_vm3 = vmand %vm4501_vm7, %vm4465_vm2  ;;  %v17482_v2 = vld [vmem:[#allocation52_spill] sm:$0xff] }
 0x202   : > { %17468 = vst [vmem:[#allocation103_spill] sm:$0xff] %v17467_v26  ;;  %v14473_v38 = vadd.s32 18, %v14417_v36  ;;  %v4365_v60 = vmul.u32 18, %v4364_v59  ;;  %v14477_v62 = vadd.f32 %v14174_v35, %v14192_v1  ;;  %v17473_v43 = vmov 0  ;;  %v3514_v35 = vpop.f32.mrf.mxu1  ;;  %v17477_v59 = vld [vmem:[#allocation49_spill] sm:$0xff]  ;;  %v17567_v36 = vld [vmem:[#allocation58_spill] sm:$0xff] }
 0x203   : > { %v17474_v43 = vsel %vm14483_vm15, 4294967295, %v17473_v43  ;;  %v14488_v34 = vadd.s32 18, %v14421_v58  ;;  %v14491_v28 = vmul.u32.u64.low 3817748708, %v14449_v46  ;;  %v14492_v5 = vmul.u32.u64.high 3817748708, %v14449_v46, %v14491_v28  ;;  %v17502_v58 = vld [vmem:[#allocation23_spill] sm:$0xff] }
 0x204   : > { %17471 = vst [vmem:[#allocation66_spill] sm:$0xff] %v14473_v38  ;;  %17472 = vst [vmem:[#allocation47_spill] sm:$0xff] %v14477_v62  ;;  %v14496_v1 = vadd.f32 %v14209_v30, %v14237_v14  ;;  %v14499_v50 = vadd.f32 %v3055_v16, %v17477_v59  ;;  %v17478_v56 = vmov 0  ;;  %v14514_v14 = vsub.s32 %v14267_v13, %v4354_v48  ;;  %v10828_v30 = vpop.f32.mrf.mxu0 }
 0x205   : > { %17475 = vst [vmem:[#allocation104_spill] sm:$0xff] %v17474_v43  ;;  %17476 = vst [vmem:[#allocation105_spill] sm:$0xff] %v14488_v34  ;;  %v17479_v56 = vsel %vm14509_vm3, 4294967295, %v17478_v56  ;;  %v14517_v16 = vsub.s32 %v14276_v15, %v4387_v4  ;;  %v4419_v28 = vshrl.u32 %v14426_v24, 4  ;;  %v14525_v7 = vadd.f32 %v14248_v17, %v3091_v61  ;;  %v17489_v4 = vld [vmem:[#allocation19_spill] sm:$0xff]  ;;  %v17499_v61 = vld [vmem:[#allocation76_spill] sm:$0xff] }
 0x206   : > { %17480 = vst [vmem:[#allocation49_spill] sm:$0xff] %v17479_v56  ;;  %17481 = vst [vmem:[#allocation106_spill] sm:$0xff] %v14514_v14  ;;  %v14521_v59 = vmul.u32.u64.low 3817748708, %v14465_v31  ;;  %v14522_v62 = vmul.u32.u64.high 3817748708, %v14465_v31, %v14521_v59  ;;  %v14528_v26 = vadd.f32 %v10828_v30, %v17482_v2  ;;  %v14535_v15 = vsub.s32 %v14285_v54, %v4365_v60  ;;  %v14545_v17 = vpop.f32.mrf.mxu0  ;;  %v17485_v54 = vld [vmem:[#allocation67_spill] sm:$0xff] }
 0x207   : > { %v14539_v24 = vadd.f32 %v14269_v25, %v14281_v55  ;;  %v14543_v48 = vadd.f32 %v14298_v3, %v14296_v22  ;;  %v14552_v2 = vadd.s32 264, %v13186_v57  ;;  %v3095_v60 = vadd.f32 %v14339_v19, %v17485_v54  ;;  %v10868_v25 = vpop.f32.mrf.mxu1  ;;  %v17488_v3 = vld [vmem:[#allocation18_spill] sm:$0xff] }
 0x208   : > { %17483 = vst [vmem:[#allocation52_spill] sm:$0xff] %v14535_v15  ;;  %v14558_v55 = vadd.f32 %v14355_v18, %v14322_v53  ;;  %v17490_v30 = vsel %vm13356_vm9, %v17488_v3, %v17489_v4  ;;  %vm4499_vm4 = vcmp.lt.s32.totalorder %v14514_v14, 0  ;;  %v10883_v57 = vpop.f32.mrf.mxu0  ;;  %v14574_v53 = vld [vmem:[%s17018_s2] ss:$0 sm:$0xff]  ;;  %v17494_v18 = vld [vmem:[#allocation31_spill] sm:$0xff]  ;;  %v17495_v54 = vld [vmem:[#allocation26_spill] sm:$0xff] }
 0x209   : > { %17484 = vst [vmem:[#allocation107_spill] sm:$0xff] %v14543_v48  ;;  %vm14565_vm7 = vcmp.lt.s32.totalorder %v17490_v30, 16  ;;  %v17496_v22 = vsel %vm13494_vm8, %v17494_v18, %v17495_v54  ;;  %v4420_v4 = vmul.u32 18, %v4419_v28  ;;  %v5830_v30 = vshrl.u32 %v13848_v27, 16  ;;  %v11648_v54 = vld [vmem:[%s17019_s3 + $0xc8] sm:$0xff]  }
 0x20a   : > { %17486 = vst [vmem:[#allocation67_spill] sm:$0xff] %v14558_v55  ;;  %vm14581_vm9 = vcmp.lt.s32.totalorder %v17496_v22, 16  ;;  %v3889_v13 = vadd.f32 %v10883_v57, %v17499_v61  ;;  %v14590_v55 = vadd.s32 18, %v14514_v14  ;;  %v14593_v19 = vadd.s32 18, %v14517_v16  ;;  %v3744_v18 = vpop.f32.mrf.mxu0  ;;  %v17501_v22 = vld [vmem:[#allocation25_spill] sm:$0xff]  ;;  %v17508_v57 = vld [vmem:[#allocation27_spill] sm:$0xff] }
 0x20b   : > { %v17503_v34 = vsel %vm13474_vm0, %v17501_v22, %v17502_v58  ;;  %v17507_v61 = vld [vmem:[#allocation33_spill] sm:$0xff]  ;;  %vm17512_vm8 = vcmp.ne.s32.totalorder %v14514_v14, 0  ;;  %vm4500_vm0 = vcmp.lt.s32.totalorder %v14535_v15, 0  ;;  %v4397_v58 = vshrl.u32 %v14492_v5, 4  ;;  %v3517_v22 = vpop.f32.mrf.mxu1 }
 0x20c   : > { %vm14601_vm2 = vcmp.lt.s32.totalorder %v17503_v34, 16  ;;  %v17509_v48 = vsel %vm13506_vm10, %v17507_v61, %v17508_v57  ;;  %vm14618_vm3 = vmand %vm4499_vm4, %vm17512_vm8  ;;  %v14625_v56 = vmul.u32.u64.low 3817748708, %v14552_v2  ;;  %v14626_v34 = vmul.u32.u64.high 3817748708, %v14552_v2, %v14625_v56  ;;  %v17529_v14 = vld [vmem:[#allocation37_spill] sm:$0xff] }
 0x20d   : > { %vm14610_vm14 = vcmp.lt.s32.totalorder %v17509_v48, 16  ;;  %v14629_v48 = vadd.f32 %v14403_v39, %v3095_v60  ;;  %v3932_v61 = vadd.f32 %v14574_v53, %v3889_v13  ;;  %v3887_v57 = vadd.f32 %v3744_v18, %v14026_v32  ;;  %v10884_v39 = vpop.f32.mrf.mxu0 }
 0x20e   : > { %vm17516_vm10 = vcmp.ne.s32.totalorder %v14517_v16, 0  ;;  %vm17517_vm4 = vcmp.lt.s32.totalorder %v14517_v16, 0  ;;  %v17518_v38 = vmov 0  ;;  %v5833_v5 = vshll.u32 %v13848_v27, 16 }
 0x20f   : > { %17515 = vst [vmem:[#allocation22_spill] sm:$0xff] %v14629_v48  ;;  %vm14637_vm8 = vmand %vm17517_vm4, %vm17516_vm10  ;;  %v14644_v56 = vadd.f32 %v14451_v20, %v14369_v52  ;;  %v14647_v60 = vadd.s32 18, %v14535_v15  ;;  %v14650_v32 = vsub.s32 %v14362_v11, %v4420_v4  ;;  %v4430_v13 = vshrl.u32 %v14522_v62, 4  ;;  %v17526_v62 = vld [vmem:[#allocation68_spill] sm:$0xff] }
 0x210   : > { %v17519_v38 = vsel %vm14637_vm8, 4294967295, %v17518_v38  ;;  %v14654_v18 = vadd.f32 %v3514_v35, %v14406_v12  ;;  %v3930_v48 = vadd.f32 %v14574_v53, %v3887_v57  ;;  %v3890_v43 = vadd.f32 %v10884_v39, %v14030_v49  ;;  %v3747_v35 = vpop.f32.mrf.mxu0  ;;  %v10871_v39 = vpop.f32.mrf.mxu1 }
 0x211   : > { %17520 = vst [vmem:[#allocation18_spill] sm:$0xff] %v17519_v38  ;;  %17521 = vst [vmem:[#allocation19_spill] sm:$0xff] %v14644_v56  ;;  %vm17523_vm10 = vcmp.ne.s32.totalorder %v14535_v15, 0  ;;  %v3099_v12 = vadd.f32 %v14438_v63, %v17526_v62  ;;  %v3968_v20 = vmax.f32 %v3932_v61, 0.0  ;;  %v4398_v4 = vmul.u32 18, %v4397_v58  ;;  %v17530_v63 = vld [vmem:[#allocation29_spill] sm:$0xff] }
 0x212   : > { %17522 = vst [vmem:[#allocation35_spill] sm:$0xff] %v14654_v18  ;;  %vm14666_vm4 = vmand %vm4500_vm0, %vm17523_vm10  ;;  %v14677_v57 = vadd.f32 %v10868_v25, %v14429_v42  ;;  %v3933_v52 = vadd.f32 %v14574_v53, %v3890_v43  ;;  %v3888_v18 = vadd.f32 %v3747_v35, %v14059_v37  ;;  %v17531_v61 = vsel %vm13524_vm11, %v17529_v14, %v17530_v63  ;;  %v10887_v58 = vpop.f32.mrf.mxu0  ;;  %v17536_v42 = vld [vmem:[#allocation51_spill] sm:$0xff]  ;;  %v17537_v25 = vld [vmem:[#allocation44_spill] sm:$0xff]  ;;  %v3530_v59 = vpop.f32.mrf.mxu1 }
 0x213   : > { %vm14686_vm0 = vcmp.lt.s32.totalorder %v17531_v61, 16  ;;  %v14690_v38 = vrot.slane %v5830_v30, 3  ;;  %vm4469_vm11 = vcmp.ne.s32.totalorder %v14650_v32, 0  ;;  %v4431_v14 = vmul.u32 18, %v4430_v13  ;;  %v17542_v63 = vld [vmem:[#allocation45_spill] sm:$0xff]  ;;  %v17543_v61 = vld [vmem:[#allocation38_spill] sm:$0xff] }
 0x214   : > { %17527 = vst [vmem:[#allocation31_spill] sm:$0xff] %v14677_v57  ;;  %v17538_v57 = vsel %vm13680_vm12, %v17536_v42, %v17537_v25  ;;  %v3966_v30 = vmax.f32 %v3930_v48, 0.0  ;;  %v3969_v56 = vmax.f32 %v3933_v52, 0.0  ;;  %v3931_v35 = vadd.f32 %v14574_v53, %v3888_v18  ;;  %v17548_v48 = vld [vmem:[#allocation53_spill] sm:$0xff]  ;;  %v17549_v52 = vld [vmem:[#allocation46_spill] sm:$0xff] }
 0x215   : > { %17534 = vst [vmem:[#allocation26_spill] sm:$0xff] %v14690_v38  ;;  %vm14697_vm10 = vcmp.lt.s32.totalorder %v17538_v57, 16  ;;  %v3893_v49 = vadd.f32 %v10887_v58, %v14063_v8  ;;  %v17544_v42 = vsel %vm13661_vm5, %v17542_v63, %v17543_v61  ;;  %v4725_v37 = vsel %vm14565_vm7, %v3968_v20, 0.0  ;;  %v3760_v38 = vpop.f32.mrf.mxu0  ;;  %v17553_v13 = vld [vmem:[#allocation82_spill] sm:$0xff] }
 0x216   : > { %vm14714_vm12 = vcmp.lt.s32.totalorder %v17544_v42, 16  ;;  %v17550_v18 = vsel %vm13695_vm6, %v17548_v48, %v17549_v52  ;;  %v14730_v58 = vadd.s32 18, %v14650_v32  ;;  %v14733_v57 = vsub.s32 %v14449_v46, %v4398_v4  ;;  %v17744_v15 = vld [vmem:[#allocation106_spill] sm:$0xff] }
 0x217   : > { %vm14725_vm8 = vcmp.lt.s32.totalorder %v17550_v18, 16  ;;  %v4408_v63 = vshrl.u32 %v14626_v34, 4  ;;  %v4726_v20 = vsel %vm14581_vm9, %v3969_v56, 0.0  ;;  %v3967_v61 = vmax.f32 %v3931_v35, 0.0  ;;  %v10888_v4 = vpop.f32.mrf.mxu0  ;;  %v17558_v18 = vld [vmem:[#allocation83_spill] sm:$0xff] }
 0x218   : > { %v3936_v42 = vadd.f32 %v14574_v53, %v3893_v49  ;;  %v3891_v48 = vadd.f32 %v3760_v38, %v17553_v13  ;;  %vm17554_vm5 = vcmp.lt.s32.totalorder %v14650_v32, 0  ;;  %v17555_v52 = vmov 0 }
 0x219   : > { %vm14744_vm6 = vmand %vm17554_vm5, %vm4469_vm11  ;;  %v14748_v46 = vadd.f32 %v3517_v22, %v3099_v12  ;;  %v9989_v34 = vpack.c.bf16 %v4726_v20, %v4725_v37  ;;  %v14751_v3 = vsub.s32 %v14465_v31, %v4431_v14  ;;  %v14753_v56 = vrot.slane %v5833_v5, 4  ;;  %v17560_v22 = vld [vmem:[#allocation7_spill] sm:$0xff]  ;;  %v17561_v12 = vld [vmem:[#allocation48_spill] sm:$0xff]  ;;  %v3763_v14 = vpop.f32.mrf.mxu0 }
 0x21a   : > { %v17556_v52 = vsel %vm14744_vm6, 4294967295, %v17555_v52  ;;  %v4723_v38 = vsel %vm14601_vm2, %v3966_v30, 0.0  ;;  %v4724_v35 = vsel %vm14610_vm14, %v3967_v61, 0.0  ;;  %v3934_v49 = vadd.f32 %v14574_v53, %v3891_v48  ;;  %v17565_v30 = vld [vmem:[#allocation59_spill] sm:$0xff]  ;;  %v17568_v20 = vld [vmem:[#allocation50_spill] sm:$0xff] }
 0x21b   : > { %17557 = vst [vmem:[#allocation76_spill] sm:$0xff] %v14753_v56  ;;  %v3894_v13 = vadd.f32 %v10888_v4, %v17558_v18  ;;  %v17562_v37 = vsel %vm13709_vm13, %v17560_v22, %v17561_v12  ;;  %10072 = vst [vmem:[#allocation2 + $0x18] sm:$0xff] %v9989_v34   ;;  %v9984_v5 = vpack.c.bf16 %v4724_v35, %v4723_v38  ;;  %v3972_v28 = vmax.f32 %v3936_v42, 0.0  ;;  %v10872_v18 = vpop.f32.mrf.mxu1  ;;  %v17572_v42 = vld [vmem:[#allocation87_spill] sm:$0xff]  ;;  %v10891_v12 = vpop.f32.mrf.mxu0 }
 0x21c   : > { %vm14766_vm7 = vcmp.lt.s32.totalorder %v17562_v37, 16  ;;  %vm17566_vm2 = vnez %v17565_v30  ;;  %v4409_v4 = vmul.u32 18, %v4408_v63  ;;  %v3892_v38 = vadd.f32 %v3763_v14, %v17572_v42  ;;  %v17573_v37 = vld [vmem:[#allocation62_spill] sm:$0xff]  ;;  %v17575_v30 = vld [vmem:[#allocation60_spill] sm:$0xff] }
 0x21d   : > { %v17569_v61 = vsel %vm17566_vm2, %v17567_v36, %v17568_v20  ;;  %v3937_v34 = vadd.f32 %v14574_v53, %v3894_v13  ;;  %vm4503_vm14 = vcmp.lt.s32.totalorder %v14733_v57, 0  ;;  %v14788_v35 = vadd.f32 %v10871_v39, %v14470_v10  ;;  %10071 = vst [vmem:[#allocation2 + $0x10] sm:$0xff] %v9984_v5   ;;  %v17576_v36 = vld [vmem:[#allocation54_spill] sm:$0xff]  ;;  %v17581_v5 = vld [vmem:[#allocation88_spill] sm:$0xff]  ;;  %v3776_v42 = vpop.f32.mrf.mxu0  ;;  %v17636_v20 = vld [vmem:[#allocation11_spill] sm:$0xff] }
 0x21e   : > { %vm14775_vm9 = vcmp.lt.s32.totalorder %v17569_v61, 16  ;;  %v3970_v22 = vmax.f32 %v3934_v49, 0.0  ;;  %vm17574_vm11 = vnez %v17573_v37  ;;  %v17580_v13 = vld [vmem:[#allocation74_spill] sm:$0xff]  ;;  %v3935_v49 = vadd.f32 %v14574_v53, %v3892_v38  ;;  %v17582_v37 = vld [vmem:[#allocation64_spill] sm:$0xff]  ;;  %v3533_v38 = vpop.f32.mrf.mxu1 }
 0x21f   : > { %v17577_v63 = vsel %vm17574_vm11, %v17575_v30, %v17576_v36  ;;  %v3103_v10 = vadd.f32 %v14545_v17, %v17580_v13  ;;  %v3973_v39 = vmax.f32 %v3937_v34, 0.0  ;;  %v3897_v14 = vadd.f32 %v10891_v12, %v17581_v5  ;;  %v17584_v30 = vld [vmem:[#allocation63_spill] sm:$0xff]  ;;  %v15353_v17 = vld [vmem:[%s17019_s3 + $0x178] sm:$0xff]  }
 0x220   : > { %vm14795_vm5 = vcmp.lt.s32.totalorder %v17577_v63, 16  ;;  %v4729_v61 = vsel %vm14686_vm0, %v3972_v28, 0.0  ;;  %vm17583_vm11 = vnez %v17582_v37  ;;  %v17585_v36 = vld [vmem:[#allocation55_spill] sm:$0xff]  ;;  %vm17589_vm13 = vcmp.ne.s32.totalorder %v14733_v57, 0 }
 0x221   : > { %v17586_v63 = vsel %vm17583_vm11, %v17584_v30, %v17585_v36  ;;  %vm14820_vm6 = vmand %vm4503_vm14, %vm17589_vm13  ;;  %v14825_v62 = vadd.s32 18, %v14733_v57  ;;  %v14828_v28 = vadd.s32 18, %v14751_v3  ;;  %v14831_v34 = vsub.s32 %v14552_v2, %v4409_v4 }
 0x222   : > { %vm14812_vm2 = vcmp.lt.s32.totalorder %v17586_v63, 16  ;;  %v4730_v12 = vsel %vm14697_vm10, %v3973_v39, 0.0  ;;  %v3971_v13 = vmax.f32 %v3935_v49, 0.0  ;;  %v3940_v5 = vadd.f32 %v14574_v53, %v3897_v14  ;;  %v10892_v49 = vpop.f32.mrf.mxu0  ;;  %v17597_v63 = vld [vmem:[#allocation8_spill] sm:$0xff] }
 0x223   : > { %v3895_v37 = vadd.f32 %v3776_v42, %v14230_v33  ;;  %vm17592_vm0 = vcmp.ne.s32.totalorder %v14751_v3, 0  ;;  %vm17593_vm13 = vcmp.lt.s32.totalorder %v14751_v3, 0  ;;  %v14846_v2 = vadd.f32 %v3530_v59, %v14499_v50  ;;  %v17599_v50 = vld [vmem:[#allocation17_spill] sm:$0xff] }
 0x224   : > { %vm14841_vm14 = vmand %vm17593_vm13, %vm17592_vm0  ;;  %v14849_v4 = vadd.f32 %v10872_v18, %v14528_v26  ;;  %v4727_v43 = vsel %vm14714_vm12, %v3970_v22, 0.0  ;;  %v9999_v39 = vpack.c.bf16 %v4730_v12, %v4729_v61  ;;  %v4728_v33 = vsel %vm14725_vm8, %v3971_v13, 0.0  ;;  %v17600_v59 = vld [vmem:[#allocation65_spill] sm:$0xff]  ;;  %v3779_v8 = vpop.f32.mrf.mxu0  ;;  %v17605_v22 = vld [vmem:[#allocation71_spill] sm:$0xff] }
 0x225   : > { %v3976_v14 = vmax.f32 %v3940_v5, 0.0  ;;  %v3938_v42 = vadd.f32 %v14574_v53, %v3895_v37  ;;  %v3898_v36 = vadd.f32 %v10892_v49, %v14234_v41  ;;  %vm17598_vm10 = vnez %v17597_v63  ;;  %v17607_v61 = vld [vmem:[#allocation69_spill] sm:$0xff]  ;;  %v14887_v5 = vld [vmem:[#allocation2 + $0x1c] sm:$0xf]  ;;  %v14891_v49 = vld [vmem:[#allocation2 + $0xc] sm:$0xff]  }
 0x226   : > { %17596 = vst [vmem:[#allocation34_spill] sm:$0xff] %v14849_v4  ;;  %v17601_v56 = vsel %vm17598_vm10, %v17599_v50, %v17600_v59  ;;  %v14866_v25 = vadd.f32 %v3533_v38, %v3103_v10  ;;  %10074 = vst [vmem:[#allocation2 + $0x28] sm:$0xff] %v9999_v39   ;;  %v9994_v18 = vpack.c.bf16 %v4728_v33, %v4727_v43  ;;  %vm17606_vm8 = vnez %v17605_v22  ;;  %v17608_v12 = vld [vmem:[#allocation13_spill] sm:$0xff]  ;;  %v14885_v38 = vld [vmem:[#allocation2 + $0x18] sm:$0xf]  ;;  %v10895_v50 = vpop.f32.mrf.mxu0 }
 0x227   : > { %vm14862_vm11 = vcmp.lt.s32.totalorder %v17601_v56, 16  ;;  %v17609_v13 = vsel %vm17606_vm8, %v17607_v61, %v17608_v12  ;;  %17612 = vst [vmem:[#allocation23_spill] sm:$0xff] %v14885_v38  ;;  %17613 = vst [vmem:[#allocation36_spill] sm:$0xff] %v14887_v5  ;;  %v3974_v37 = vmax.f32 %v3938_v42, 0.0  ;;  %v3941_v43 = vadd.f32 %v14574_v53, %v3898_v36  ;;  %v14893_v33 = vld [vmem:[#allocation2 + $0x14] sm:$0xff]   ;;  %v17615_v59 = vld [vmem:[#allocation73_spill] sm:$0xff] }
 0x228   : > { %17604 = vst [vmem:[#allocation25_spill] sm:$0xff] %v14866_v25  ;;  %vm14873_vm12 = vcmp.lt.s32.totalorder %v17609_v13, 16  ;;  %v3896_v39 = vadd.f32 %v3779_v8, %v14244_v6  ;;  %17614 = vst [vmem:[#allocation33_spill] sm:$0xff] %v14891_v49  ;;  %vm4468_vm0 = vcmp.ne.s32.totalorder %v14831_v34, 0  ;;  %v4733_v63 = vsel %vm14766_vm7, %v3976_v14, 0.0  ;;  %v17617_v22 = vld [vmem:[#allocation70_spill] sm:$0xff] }
 0x229   : > { %10073 = vst [vmem:[#allocation2 + $0x20] sm:$0xff] %v9994_v18   ;;  %vm17616_vm13 = vnez %v17615_v59  ;;  %v17618_v61 = vld [vmem:[#allocation14_spill] sm:$0xff]  ;;  %v14909_v6 = vadd.s32 18, %v14831_v34  ;;  %v4731_v31 = vsel %vm14775_vm9, %v3974_v37, 0.0  ;;  %v3977_v14 = vmax.f32 %v3941_v43, 0.0  ;;  %v17622_v12 = vld [vmem:[#allocation97_spill] sm:$0xff]  ;;  %v3792_v59 = vpop.f32.mrf.mxu0 }
 0x22a   : > { %v17619_v42 = vsel %vm17616_vm13, %v17617_v22, %v17618_v61  ;;  %v3939_v8 = vadd.f32 %v14574_v53, %v3896_v39  ;;  %v3901_v13 = vadd.f32 %v10895_v50, %v17622_v12  ;;  %v5112_v22 = vrot.slane %v14891_v49, 3  ;;  %v17623_v61 = vld [vmem:[#allocation12_spill] sm:$0xff]  ;;  %v17633_v5 = vld [vmem:[#allocation15_spill] sm:$0xff]  ;;  %v17635_v43 = vld [vmem:[#allocation78_spill] sm:$0xff] }
 0x22b   : > { %vm14903_vm10 = vcmp.lt.s32.totalorder %v17619_v42, 16  ;;  %vm17624_vm7 = vnez %v17623_v61  ;;  %v17625_v42 = vld [vmem:[#allocation75_spill] sm:$0xff]  ;;  %v17626_v10 = vld [vmem:[#allocation72_spill] sm:$0xff]  ;;  %v17149_v48 = vrot.slane %v14893_v33, 3  ;;  %v4734_v39 = vsel %vm14795_vm5, %v3977_v14, 0.0  ;;  %v11624_v26 = vld [vmem:[%s17019_s3 + $0xa8] sm:$0xff]  }
 0x22c   : > { %v17627_v56 = vsel %vm17624_vm7, %v17625_v42, %v17626_v10  ;;  %v3975_v50 = vmax.f32 %v3939_v8, 0.0  ;;  %v3944_v12 = vadd.f32 %v14574_v53, %v3901_v13  ;;  %v3899_v61 = vadd.f32 %v3792_v59, %v14330_v40  ;;  %v10896_v10 = vpop.f32.mrf.mxu0  ;;  %v17648_v38 = vld [vmem:[#allocation16_spill] sm:$0xff]  ;;  %v17684_v25 = vld [vmem:[#allocation86_spill] sm:$0xff] }
 0x22d   : > { %vm14923_vm13 = vcmp.lt.s32.totalorder %v17627_v56, 16  ;;  %v10009_v18 = vpack.c.bf16 %v4734_v39, %v4733_v63  ;;  %v17630_v56 = vrot.slane %v13848_v27, 3  ;;  %vm17631_vm9 = vcmask 1044480   ;;  %v11621_v27 = vld [vmem:[%s17019_s3 + $0xb0] sm:$0xff]   ;;  %v17666_v41 = vld [vmem:[#allocation84_spill] sm:$0xff] }
 0x22e   : > { %vm17632_vm7 = vmmov %vm17631_vm9  ;;  %vm17634_vm8 = vnez %v17633_v5  ;;  %v17640_v40 = vshrl.u32 %v14891_v49, 16  ;;  %v17642_v5 = vmov 0  ;;  %v4732_v13 = vsel %vm14812_vm2, %v3975_v50, 0.0 }
 0x22f   : > { %v5113_v42 = vsel %vm17631_vm9, %v17630_v56, %v5112_v22  ;;  %v5115_v37 = vsel %vm17632_vm7, %v5112_v22, %v17149_v48  ;;  %v17637_v14 = vsel %vm17634_vm8, %v17635_v43, %v17636_v20  ;;  %vm17641_vm9 = vcmp.lt.s32.totalorder %v14831_v34, 0  ;;  %10076 = vst [vmem:[#allocation2 + $0x38] sm:$0xff] %v10009_v18   ;;  %v3795_v56 = vpop.f32.mrf.mxu0  ;;  %v17647_v48 = vld [vmem:[#allocation81_spill] sm:$0xff] }
 0x230   : > { %vm14945_vm5 = vcmp.lt.s32.totalorder %v17637_v14, 16  ;;  %v5405_v63 = vrot.slane %v17640_v40, 2  ;;  %vm14958_vm7 = vmand %vm17641_vm9, %vm4468_vm0  ;;  %v3980_v59 = vmax.f32 %v3944_v12, 0.0  ;;  %v3942_v22 = vadd.f32 %v14574_v53, %v3899_v61  ;;  %10933 = vmatprep.mubr.bf16.mxu1 %v5113_v42  ;;  %v17645_v40 = vld [vmem:[#allocation20_spill] sm:$0xff] }
 0x231   : > { %v17643_v5 = vsel %vm14958_vm7, 4294967295, %v17642_v5  ;;  %v3902_v43 = vadd.f32 %v10896_v10, %v14334_v23  ;;  %v10004_v39 = vpack.c.bf16 %v4732_v13, %v4731_v31  ;;  %10934 = vmatmul.mubr.bf16.vlgmr.msra.gmra.mxu1 %v5115_v37  ;;  %v17644_v20 = vshll.u32 %v14891_v49, 16  ;;  %v11768_v12 = vld [vmem:[%s17019_s3 + $0xb8] sm:$0xff]   ;;  %v10899_v10 = vpop.f32.mrf.mxu0  ;;  %v17665_v49 = vld [vmem:[#allocation90_spill] sm:$0xff] }
 0x232   : > { %vm17646_vm0 = vnez %v17645_v40  ;;  %v17153_v50 = vshrl.u32 %v14893_v33, 16  ;;  %v17152_v23 = vshll.u32 %v14893_v33, 16  ;;  %v3978_v18 = vmax.f32 %v3942_v22, 0.0  ;;  %11022 = vmatpush3.bf16.msra.mxu1 %v11768_v12  ;;  %v14984_v61 = vld [vmem:[#allocation2 + $0x1c] sm:$0xff]   ;;  %v17652_v22 = vld [vmem:[#allocation91_spill] sm:$0xff] }
 0x233   : > { %v5408_v14 = vrot.slane %v17644_v20, 3  ;;  %v17649_v4 = vsel %vm17646_vm0, %v17647_v48, %v17648_v38  ;;  %v3945_v31 = vadd.f32 %v14574_v53, %v3902_v43  ;;  %v3900_v37 = vadd.f32 %v3795_v56, %v14337_v45  ;;  %10075 = vst [vmem:[#allocation2 + $0x30] sm:$0xff] %v10004_v39   ;;  %v17654_v43 = vld [vmem:[#allocation89_spill] sm:$0xff]  ;;  %11023 = vmatprep.subr.bf16.mxu1 %v11621_v27  ;;  %v17659_v12 = vld [vmem:[#allocation79_spill] sm:$0xff]  ;;  %v17663_v38 = vld [vmem:[#allocation92_spill] sm:$0xff] }
 0x234   : > { %vm14973_vm8 = vcmp.lt.s32.totalorder %v17649_v4, 16  ;;  %v14986_v4 = vld [vmem:[#allocation2 + $0x24] sm:$0xff]   ;;  %v4737_v48 = vsel %vm14862_vm11, %v3980_v59, 0.0  ;;  %v5414_v42 = vrot.slane %v17153_v50, 2  ;;  %v5417_v13 = vrot.slane %v17152_v23, 3  ;;  %v17704_v40 = vld [vmem:[#allocation39_spill] sm:$0xff] }
 0x235   : > { %v5409_v45 = vor.u32 %v5408_v14, %v5405_v63  ;;  %vm17653_vm2 = vnez %v17652_v22  ;;  %v17655_v56 = vld [vmem:[#allocation21_spill] sm:$0xff]  ;;  %v4735_v63 = vsel %vm14873_vm12, %v3978_v18, 0.0  ;;  %v3981_v59 = vmax.f32 %v3945_v31, 0.0 }
 0x236   : > { %v17656_v20 = vsel %vm17653_vm2, %v17654_v43, %v17655_v56  ;;  %v3943_v39 = vadd.f32 %v14574_v53, %v3900_v37  ;;  %v3905_v14 = vadd.f32 %v10899_v10, %v14366_v29  ;;  %v17660_v22 = vld [vmem:[#allocation77_spill] sm:$0xff]  ;;  %vm17662_vm11 = vsmask.f32 5376  ;;  %11024 = vmatpush3.bf16.msra.mxu1 %v11621_v27 }
 0x237   : > { %vm15003_vm9 = vcmp.lt.s32.totalorder %v17656_v20, 16  ;;  %v17661_v43 = vor.u32 %v17659_v12, %v17660_v22  ;;  %v3808_v20 = vpop.f32.mrf.mxu0  ;;  %v15018_v23 = vor.u32 %v5417_v13, %v5414_v42  ;;  %v5116_v50 = vrot.slane %v14984_v61, 3  ;;  %vm17670_vm2 = vmmov %vm17662_vm11  ;;  %v17677_v27 = vld [vmem:[#allocation85_spill] sm:$0xff]  ;;  %11025 = vmatprep.subr.bf16.mxu1 %v11624_v26 }
 0x238   : > { %vm17664_vm0 = vnez %v17663_v38  ;;  %v5118_v29 = vrot.slane %v14986_v4, 3  ;;  %v4738_v37 = vsel %vm14903_vm10, %v3981_v59, 0.0  ;;  %v3979_v10 = vmax.f32 %v3943_v39, 0.0  ;;  %v17674_v39 = vld [vmem:[#allocation95_spill] sm:$0xff] }
 0x239   : > { %v5410_v56 = vsel %vm17662_vm11, %v17661_v43, %v5409_v45  ;;  %v17667_v18 = vsel %vm17664_vm0, %v17665_v49, %v17666_v41  ;;  %v3948_v42 = vadd.f32 %v14574_v53, %v3905_v14  ;;  %v3903_v13 = vadd.f32 %v3808_v20, %v14380_v51  ;;  %v11637_v49 = vld [vmem:[%s17019_s3 + $0xf0] sm:$0xff]   ;;  %v10900_v22 = vpop.f32.mrf.mxu0  ;;  %v17676_v51 = vld [vmem:[#allocation93_spill] sm:$0xff] }
 0x23a   : > { %vm15026_vm12 = vcmp.lt.s32.totalorder %v17667_v18, 16  ;;  %10985 = vmatprep.mubr.bf16.mxu0 %v5410_v56  ;;  %v10019_v38 = vpack.c.bf16 %v4738_v37, %v4737_v48  ;;  %v5419_v12 = vsel %vm17670_vm2, %v5409_v45, %v15018_v23  ;;  %v17671_v43 = vrot.slane %v14893_v33, 3  ;;  %v11627_v48 = vld [vmem:[%s17019_s3 + $0xa0] sm:$0xff]   ;;  %11026 = vmatpush3.bf16.msra.mxu1 %v11624_v26 }
 0x23b   : > { %vm17672_vm11 = vcmask 1044480   ;;  %vm17675_vm0 = vnez %v17674_v39  ;;  %v4736_v45 = vsel %vm14923_vm13, %v3979_v10, 0.0  ;;  %v3984_v20 = vmax.f32 %v3948_v42, 0.0  ;;  %10986 = vmatmul.mubr.bf16.vlgmr.msra.gmra.mxu0 %v5419_v12  ;;  %v3811_v37 = vpop.f32.mrf.mxu0  ;;  %11027 = vmatprep.subr.bf16.mxu1 %v11627_v48 }
 0x23c   : > { %v5117_v36 = vsel %vm17672_vm11, %v17671_v43, %v5116_v50  ;;  %vm17673_vm10 = vmmov %vm17672_vm11  ;;  %v17678_v14 = vsel %vm17675_vm0, %v17676_v51, %v17677_v27  ;;  %v3906_v41 = vadd.f32 %v10900_v22, %v14384_v44  ;;  %10078 = vst [vmem:[#allocation2 + $0x48] sm:$0xff] %v10019_v38   ;;  %v10014_v18 = vpack.c.bf16 %v4736_v45, %v4735_v63  ;;  %v17681_v51 = vld [vmem:[#allocation96_spill] sm:$0xff]  ;;  %v17683_v27 = vld [vmem:[#allocation94_spill] sm:$0xff] }
 0x23d   : > { %v5119_v59 = vsel %vm17673_vm10, %v5116_v50, %v5118_v29  ;;  %vm15051_vm7 = vcmp.lt.s32.totalorder %v17678_v14, 16  ;;  %v3946_v50 = vadd.f32 %v14574_v53, %v3903_v13  ;;  %10937 = vmatprep.mubr.bf16.mxu1 %v5117_v36  ;;  %v17159_v43 = vshrl.u32 %v14984_v61, 16  ;;  %v15077_v63 = vld [vmem:[%s17019_s3 + $0x98] sm:$0xff]   ;;  %v11638_v38 = vld [vmem:[%s17019_s3 + $0xe8] sm:$0xff]  }
 0x23e   : > { %10938 = vmatmul.mubr.bf16.gmra.mxu1 %v5119_v59  ;;  %v17158_v39 = vshll.u32 %v14984_v61, 16  ;;  %vm17682_vm2 = vnez %v17681_v51  ;;  %v17157_v44 = vshrl.u32 %v14986_v4, 16  ;;  %v17688_v13 = vld [vmem:[#allocation80_spill] sm:$0xff]  ;;  %v4741_v12 = vsel %vm14945_vm5, %v3984_v20, 0.0  ;;  %v15087_v14 = vld [vmem:[#allocation2 + $0x2c] sm:$0xff]   ;;  %10077 = vst [vmem:[#allocation2 + $0x40] sm:$0xff] %v10014_v18   ;;  %v10903_v51 = vpop.f32.mrf.mxu0 }
 0x23f   : > { %v17685_v10 = vsel %vm17682_vm2, %v17683_v27, %v17684_v25  ;;  %11074 = vmatpush3.bf16.msra.mxu0 %v17688_v13  ;;  %v3982_v22 = vmax.f32 %v3946_v50, 0.0  ;;  %v3949_v36 = vadd.f32 %v14574_v53, %v3906_v41  ;;  %v3904_v59 = vadd.f32 %v3811_v37, %v14401_v21  ;;  %v15089_v45 = vld [vmem:[#allocation2 + $0x34] sm:$0xff]   ;;  %11028 = vmatpush3.bf16.msra.mxu1 %v11627_v48  ;;  %v11642_v48 = vld [vmem:[%s17019_s3 + $0xe0] sm:$0xff]  }
 0x240   : > { %vm15069_vm13 = vcmp.lt.s32.totalorder %v17685_v10, 16  ;;  %11075 = vmatprep.subr.bf16.mxu0 %v11637_v49  ;;  %v5423_v27 = vrot.slane %v17159_v43, 2  ;;  %v5426_v8 = vrot.slane %v17158_v39, 3  ;;  %v5432_v20 = vrot.slane %v17157_v44, 2  ;;  %v17693_v25 = vld [vmem:[#allocation43_spill] sm:$0xff]  ;;  %v3824_v44 = vpop.f32.mrf.mxu0  ;;  %v17697_v39 = vld [vmem:[#allocation24_spill] sm:$0xff]  ;;  %11029 = vmatprep.subr.bf16.mxu1 %v15077_v63 }
 0x241   : > { %v5433_v50 = vshll.u32 %v14986_v4, 16  ;;  %vm17689_vm5 = vnez %v17443_v47  ;;  %v4739_v41 = vsel %vm14973_vm8, %v3982_v22, 0.0  ;;  %v3985_v18 = vmax.f32 %v3949_v36, 0.0 }
 0x242   : > { %v17690_v21 = vsel %vm17689_vm5, %v14273_v9, %v14203_v0  ;;  %v3947_v37 = vadd.f32 %v14574_v53, %v3904_v59  ;;  %v3909_v10 = vadd.f32 %v10903_v51, %v17693_v25  ;;  %v5427_v13 = vor.u32 %v5426_v8, %v5423_v27  ;;  %v17694_v9 = vld [vmem:[#allocation32_spill] sm:$0xff]  ;;  %v17701_v27 = vld [vmem:[#allocation47_spill] sm:$0xff] }
 0x243   : > { %vm15103_vm11 = vcmp.lt.s32.totalorder %v17690_v21, 16  ;;  %v5435_v47 = vrot.slane %v5433_v50, 3  ;;  %v5120_v0 = vrot.slane %v15087_v14, 3  ;;  %vm17695_vm10 = vnez %v17694_v9  ;;  %v17696_v21 = vld [vmem:[#allocation42_spill] sm:$0xff]  ;;  %11076 = vmatpush3.bf16.msra.mxu0 %v11637_v49  ;;  %v10904_v9 = vpop.f32.mrf.mxu0  ;;  %11030 = vmatpush3.bf16.msra.mxu1 %v15077_v63 }
 0x244   : > { %v17698_v43 = vsel %vm17695_vm10, %v17696_v21, %v17697_v39  ;;  %v5122_v22 = vrot.slane %v15089_v45, 3  ;;  %v4742_v36 = vsel %vm15003_vm9, %v3985_v18, 0.0  ;;  %v3983_v59 = vmax.f32 %v3947_v37, 0.0  ;;  %11077 = vmatprep.subr.bf16.mxu0 %v11638_v38  ;;  %v17706_v18 = vld [vmem:[#allocation98_spill] sm:$0xff]  ;;  %v17707_v37 = vld [vmem:[#allocation28_spill] sm:$0xff] }
 0x245   : > { %vm15119_vm0 = vcmp.lt.s32.totalorder %v17698_v43, 16  ;;  %v3952_v51 = vadd.f32 %v14574_v53, %v3909_v10  ;;  %v3907_v8 = vadd.f32 %v3824_v44, %v17701_v27  ;;  %v10029_v25 = vpack.c.bf16 %v4742_v36, %v4741_v12  ;;  %v3827_v27 = vpop.f32.mrf.mxu0 }
 0x246   : > { %vm17702_vm8 = vsmask.f32 5376  ;;  %v15130_v39 = vor.u32 %v5435_v47, %v5432_v20  ;;  %vm17703_vm2 = vcmask 1044480   ;;  %vm17705_vm9 = vnez %v17704_v40 }
 0x247   : > { %v5428_v43 = vsel %vm17702_vm8, %v15018_v23, %v5427_v13  ;;  %v5121_v49 = vsel %vm17703_vm2, %v5118_v29, %v5120_v0  ;;  %v17708_v10 = vsel %vm17705_vm9, %v17706_v18, %v17707_v37  ;;  %v11634_v23 = vld [vmem:[%s17019_s3 + $0x90] sm:$0xff]   ;;  %v4740_v29 = vsel %vm15026_vm12, %v3983_v59, 0.0  ;;  %10080 = vst [vmem:[#allocation2 + $0x58] sm:$0xff] %v10029_v25   ;;  %vm17711_vm10 = vmmov %vm17702_vm8  ;;  %v17713_v59 = vld [vmem:[#allocation41_spill] sm:$0xff]  ;;  %11078 = vmatpush3.bf16.msra.mxu0 %v11638_v38  ;;  %v10907_v18 = vpop.f32.mrf.mxu0 }
 0x248   : > { %vm15140_vm5 = vcmp.lt.s32.totalorder %v17708_v10, 16  ;;  %v3988_v12 = vmax.f32 %v3952_v51, 0.0  ;;  %10989 = vmatprep.mubr.bf16.mxu0 %v5428_v43  ;;  %v3950_v20 = vadd.f32 %v14574_v53, %v3907_v8  ;;  %v3910_v47 = vadd.f32 %v10904_v9, %v14496_v1  ;;  %10941 = vmatprep.mubr.bf16.mxu1 %v5121_v49  ;;  %vm17712_vm8 = vmmov %vm17703_vm2  ;;  %v17715_v51 = vld [vmem:[#allocation99_spill] sm:$0xff]  ;;  %v17716_v43 = vld [vmem:[#allocation30_spill] sm:$0xff] }
 0x249   : > { %v10024_v21 = vpack.c.bf16 %v4740_v29, %v4739_v41  ;;  %v5437_v36 = vsel %vm17711_vm10, %v5427_v13, %v15130_v39  ;;  %v5123_v40 = vsel %vm17712_vm8, %v5120_v0, %v5122_v22  ;;  %v17161_v31 = vshrl.u32 %v15087_v14, 16  ;;  %v15174_v9 = vld [vmem:[#allocation2 + $0x3c] sm:$0xff]   ;;  %11079 = vmatprep.subr.bf16.mxu0 %v11642_v48  ;;  %11031 = vmatprep.subr.bf16.mxu1 %v11634_v23  ;;  %v3840_v63 = vpop.f32.mrf.mxu0  ;;  %vm17742_vm9 = vmmov %vm17711_vm10 }
 0x24a   : > { %vm17714_vm12 = vnez %v17713_v59  ;;  %v4745_v41 = vsel %vm15051_vm7, %v3988_v12, 0.0  ;;  %v3986_v13 = vmax.f32 %v3950_v20, 0.0  ;;  %10990 = vmatmul.mubr.bf16.gmra.mxu0 %v5437_v36  ;;  %v3953_v25 = vadd.f32 %v14574_v53, %v3910_v47  ;;  %10942 = vmatmul.mubr.bf16.gmra.mxu1 %v5123_v40  ;;  %v11643_v49 = vld [vmem:[%s17019_s3 + $0xd8] sm:$0xff]   ;;  %v17722_v12 = vld [vmem:[#allocation61_spill] sm:$0xff]  ;;  %vm17743_vm10 = vmmov %vm17742_vm9 }
 0x24b   : > { %v17717_v8 = vsel %vm17714_vm12, %v17715_v51, %v17716_v43  ;;  %v3908_v0 = vadd.f32 %v3827_v27, %v14525_v7  ;;  %10079 = vst [vmem:[#allocation2 + $0x50] sm:$0xff] %v10024_v21   ;;  %v5441_v38 = vrot.slane %v17161_v31, 2  ;;  %v17160_v56 = vshll.u32 %v15087_v14, 16  ;;  %v17721_v7 = vld [vmem:[#allocation102_spill] sm:$0xff]  ;;  %11080 = vmatpush3.bf16.msra.mxu0 %v11642_v48  ;;  %v17734_v48 = vld [vmem:[#allocation49_spill] sm:$0xff]  ;;  %11032 = vmatpush3.bf16.msra.mxu1 %v11634_v23 }
 0x24c   : > { %vm15166_vm2 = vcmp.lt.s32.totalorder %v17717_v8, 16  ;;  %v5448_v37 = vshrl.u32 %v15089_v45, 16  ;;  %v17162_v10 = vshll.u32 %v15089_v45, 16  ;;  %v17723_v20 = vsel %vm14458_vm1, %v17721_v7, %v17722_v12  ;;  %v15198_v59 = vld [vmem:[#allocation2 + $0x44] sm:$0xff]   ;;  %11081 = vmatprep.subr.bf16.mxu0 %v11643_v49 }
 0x24d   : > { %vm15189_vm7 = vcmp.lt.s32.totalorder %v17723_v20, 16  ;;  %v4743_v21 = vsel %vm15069_vm13, %v3986_v13, 0.0  ;;  %v3989_v36 = vmax.f32 %v3953_v25, 0.0  ;;  %v3951_v27 = vadd.f32 %v14574_v53, %v3908_v0  ;;  %v11639_v51 = vld [vmem:[%s17019_s3 + $0x88] sm:$0xff]   ;;  %v17728_v0 = vld [vmem:[#allocation100_spill] sm:$0xff] }
 0x24e   : > { %v3913_v40 = vadd.f32 %v10907_v18, %v14539_v24  ;;  %v5444_v43 = vrot.slane %v17160_v56, 3  ;;  %v5450_v42 = vrot.slane %v5448_v37, 2  ;;  %v5453_v8 = vrot.slane %v17162_v10, 3  ;;  %v17727_v25 = vld [vmem:[#allocation66_spill] sm:$0xff]  ;;  %v17732_v56 = vld [vmem:[#allocation107_spill] sm:$0xff]  ;;  %11033 = vmatprep.subr.bf16.mxu1 %v11639_v51 }
 0x24f   : > { %v5124_v13 = vrot.slane %v15174_v9, 3  ;;  %v17729_v18 = vsel %vm14483_vm15, %v17727_v25, %v17728_v0  ;;  %v4746_v7 = vsel %vm15103_vm11, %v3989_v36, 0.0  ;;  %v3987_v12 = vmax.f32 %v3951_v27, 0.0  ;;  %v11647_v24 = vld [vmem:[%s17019_s3 + $0xd0] sm:$0xff]   ;;  %vm17733_vm15 = vmmov %vm17712_vm8  ;;  %v17736_v36 = vld [vmem:[#allocation105_spill] sm:$0xff]  ;;  %11082 = vmatpush3.bf16.msra.mxu0 %v11643_v49  ;;  %11034 = vmatpush3.bf16.msra.mxu1 %v11639_v51 }
 0x250   : > { %vm15215_vm1 = vcmp.lt.s32.totalorder %v17729_v18, 16  ;;  %v3956_v20 = vadd.f32 %v14574_v53, %v3913_v40  ;;  %v3911_v31 = vadd.f32 %v3840_v63, %v17732_v56  ;;  %v10039_v10 = vpack.c.bf16 %v4746_v7, %v4745_v41  ;;  %v10908_v18 = vpop.f32.mrf.mxu0  ;;  %v17737_v27 = vld [vmem:[#allocation101_spill] sm:$0xff]  ;;  %v17741_v63 = vld [vmem:[#allocation67_spill] sm:$0xff]  ;;  %11083 = vmatprep.subr.bf16.mxu0 %v11647_v24 }
 0x251   : > { %v5445_v25 = vor.u32 %v5444_v43, %v5441_v38  ;;  %v15226_v0 = vor.u32 %v5453_v8, %v5450_v42  ;;  %v5125_v26 = vsel %vm17733_vm15, %v5122_v22, %v5124_v13  ;;  %vm17735_vm13 = vnez %v17734_v48  ;;  %v11645_v41 = vld [vmem:[%s17019_s3 + $0x80] sm:$0xff]  }
 0x252   : > { %v17738_v40 = vsel %vm17735_vm13, %v17736_v36, %v17737_v27  ;;  %v4744_v38 = vsel %vm15119_vm0, %v3987_v12, 0.0  ;;  %v3992_v43 = vmax.f32 %v3956_v20, 0.0  ;;  %v3954_v22 = vadd.f32 %v14574_v53, %v3911_v31  ;;  %10945 = vmatprep.mubr.bf16.mxu1 %v5125_v26  ;;  %10082 = vst [vmem:[#allocation2 + $0x68] sm:$0xff] %v10039_v10   ;;  %v3843_v48 = vpop.f32.mrf.mxu0  ;;  %v17748_v20 = vld [vmem:[#allocation22_spill] sm:$0xff]  ;;  %11035 = vmatprep.subr.bf16.mxu1 %v11645_v41 }
 0x253   : > { %vm15236_vm11 = vcmp.lt.s32.totalorder %v17738_v40, 16  ;;  %v3914_v42 = vadd.f32 %v10908_v18, %v17741_v63  ;;  %v10034_v8 = vpack.c.bf16 %v4744_v38, %v4743_v21  ;;  %v5446_v7 = vsel %vm17742_vm9, %v15130_v39, %v5445_v25  ;;  %v17750_v27 = vld [vmem:[#allocation18_spill] sm:$0xff]  ;;  %11084 = vmatpush3.bf16.msra.mxu0 %v11647_v24  ;;  %11036 = vmatpush3.bf16.msra.mxu1 %v11645_v41 }
 0x254   : > { %v5455_v23 = vsel %vm17743_vm10, %v5445_v25, %v15226_v0  ;;  %v5126_v36 = vrot.slane %v15198_v59, 3  ;;  %v17745_v31 = vsel %vm14618_vm3, %v14590_v55, %v17744_v15  ;;  %v4749_v10 = vsel %vm15140_vm5, %v3992_v43, 0.0  ;;  %10993 = vmatprep.mubr.bf16.mxu0 %v5446_v7  ;;  %vm17749_vm3 = vmmov %vm17712_vm8  ;;  %v10911_v18 = vpop.f32.mrf.mxu0  ;;  %v15281_v43 = vld [vmem:[#allocation2 + $0x4c] sm:$0xff]   ;;  %11085 = vmatprep.subr.bf16.mxu0 %v11648_v54 }
 0x255   : > { %vm15257_vm0 = vcmp.lt.s32.totalorder %v17745_v31, 16  ;;  %v3990_v39 = vmax.f32 %v3954_v22, 0.0  ;;  %v3957_v21 = vadd.f32 %v14574_v53, %v3914_v42  ;;  %v3912_v25 = vadd.f32 %v3843_v48, %v17748_v20  ;;  %10081 = vst [vmem:[#allocation2 + $0x60] sm:$0xff] %v10034_v8   ;;  %10994 = vmatmul.mubr.bf16.gmra.mxu0 %v5455_v23  ;;  %v17755_v42 = vld [vmem:[#allocation19_spill] sm:$0xff]  ;;  %v17756_v48 = vld [vmem:[#allocation52_spill] sm:$0xff]  ;;  %vm17767_vm15 = vmmov %vm17749_vm3 }
 0x256   : > { %v5127_v55 = vsel %vm17749_vm3, %v5124_v13, %v5126_v36  ;;  %v5457_v49 = vshrl.u32 %v15174_v9, 16  ;;  %v5460_v44 = vshll.u32 %v15174_v9, 16  ;;  %v5466_v26 = vshrl.u32 %v15198_v59, 16  ;;  %v3856_v1 = vpop.f32.mrf.mxu0 }
 0x257   : > { %vm17751_vm5 = vnez %v17750_v27  ;;  %v4747_v13 = vsel %vm15166_vm2, %v3990_v39, 0.0  ;;  %v3993_v22 = vmax.f32 %v3957_v21, 0.0  ;;  %v3955_v63 = vadd.f32 %v14574_v53, %v3912_v25  ;;  %10946 = vmatmul.mubr.bf16.gmra.mxu1 %v5127_v55  ;;  %v17760_v25 = vld [vmem:[#allocation35_spill] sm:$0xff]  ;;  %11086 = vmatpush3.bf16.msra.mxu0 %v11648_v54 }
 0x258   : > { %v17752_v40 = vsel %vm17751_vm5, %v14593_v19, %v14517_v16  ;;  %v3917_v8 = vadd.f32 %v10911_v18, %v17755_v42  ;;  %v15290_v16 = vld [vmem:[%s17019_s3 + $0x138] sm:$0xff]   ;;  %v5459_v19 = vrot.slane %v5457_v49, 2  ;;  %v5462_v51 = vrot.slane %v5460_v44, 3 }
 0x259   : > { %vm15277_vm8 = vcmp.lt.s32.totalorder %v17752_v40, 16  ;;  %v5468_v7 = vrot.slane %v5466_v26, 2  ;;  %v5469_v23 = vshll.u32 %v15198_v59, 16  ;;  %v17757_v15 = vsel %vm14666_vm4, %v14647_v60, %v17756_v48  ;;  %v10912_v60 = vpop.f32.mrf.mxu0  ;;  %v15315_v42 = vld [vmem:[#allocation2 + $0x54] sm:$0xff]   ;;  %11125 = vmatprep.subr.bf16.mxu1 %v15290_v16 }
 0x25a   : > { %vm15304_vm12 = vcmp.lt.s32.totalorder %v17757_v15, 16  ;;  %v4750_v39 = vsel %vm15189_vm7, %v3993_v22, 0.0  ;;  %v3991_v21 = vmax.f32 %v3955_v63, 0.0  ;;  %v3960_v20 = vadd.f32 %v14574_v53, %v3917_v8  ;;  %vm17766_vm7 = vmmov %vm17742_vm9 }
 0x25b   : > { %v3915_v55 = vadd.f32 %v3856_v1, %v17760_v25  ;;  %v10049_v18 = vpack.c.bf16 %v4750_v39, %v4749_v10  ;;  %v5463_v27 = vor.u32 %v5462_v51, %v5459_v19  ;;  %v5471_v11 = vrot.slane %v5469_v23, 3  ;;  %v11653_v10 = vld [vmem:[%s17019_s3 + $0xc0] sm:$0xff]   ;;  %v17765_v19 = vld [vmem:[#allocation31_spill] sm:$0xff]  ;;  %v3859_v1 = vpop.f32.mrf.mxu0 }
 0x25c   : > { %v5128_v40 = vrot.slane %v15281_v43, 3  ;;  %vm17761_vm4 = vnez %v17556_v52  ;;  %v4748_v22 = vsel %vm15215_vm1, %v3991_v21, 0.0  ;;  %v3996_v63 = vmax.f32 %v3960_v20, 0.0  ;;  %11087 = vmatprep.subr.bf16.mxu0 %v11653_v10 }
 0x25d   : > { %v17762_v47 = vsel %vm17761_vm4, %v14730_v58, %v14650_v32  ;;  %v3958_v8 = vadd.f32 %v14574_v53, %v3915_v55  ;;  %v3918_v52 = vadd.f32 %v10912_v60, %v17765_v19  ;;  %10084 = vst [vmem:[#allocation2 + $0x78] sm:$0xff] %v10049_v18   ;;  %v10044_v32 = vpack.c.bf16 %v4748_v22, %v4747_v13  ;;  %v10915_v54 = vpop.f32.mrf.mxu0 }
 0x25e   : > { %vm15322_vm2 = vcmp.lt.s32.totalorder %v17762_v47, 16  ;;  %v5464_v58 = vsel %vm17766_vm7, %v15226_v0, %v5463_v27  ;;  %v5472_v41 = vor.u32 %v5471_v11, %v5468_v7  ;;  %v5129_v51 = vsel %vm17767_vm15, %v5126_v36, %v5128_v40  ;;  %v15378_v11 = vld [vmem:[#allocation2 + $0x5c] sm:$0xff]   ;;  %11088 = vmatpush3.bf16.msra.mxu0 %v11653_v10  ;;  %v15397_v10 = vld [vmem:[#allocation2 + $0x64] sm:$0xff]  }
 0x25f   : > { %v17768_v29 = vsel %vm14820_vm6, %v14825_v62, %v14733_v57  ;;  %v4753_v13 = vsel %vm15236_vm11, %v3996_v63, 0.0  ;;  %10997 = vmatprep.mubr.bf16.mxu0 %v5464_v58  ;;  %v3994_v15 = vmax.f32 %v3958_v8, 0.0  ;;  %v3961_v0 = vadd.f32 %v14574_v53, %v3918_v52  ;;  %10949 = vmatprep.mubr.bf16.mxu1 %v5129_v51  ;;  %10083 = vst [vmem:[#allocation2 + $0x70] sm:$0xff] %v10044_v32   ;;  %vm17771_vm6 = vmmov %vm17766_vm7  ;;  %v17780_v32 = vld [vmem:[#allocation34_spill] sm:$0xff] }
 0x260   : > { %vm15342_vm1 = vcmp.lt.s32.totalorder %v17768_v29, 16  ;;  %v3916_v36 = vadd.f32 %v3859_v1, %v14748_v46  ;;  %v5473_v57 = vsel %vm17771_vm6, %v5463_v27, %v5472_v41  ;;  %v5130_v62 = vrot.slane %v15315_v42, 3  ;;  %vm17775_vm11 = vmmov %vm17749_vm3  ;;  %11177 = vmatprep.subr.bf16.mxu0 %v15353_v17 }
 0x261   : > { %v17174_v56 = vshrl.u32 %v15281_v43, 16  ;;  %v17172_v7 = vshll.u32 %v15281_v43, 16  ;;  %v17772_v46 = vsel %vm14841_vm14, %v14828_v28, %v14751_v3  ;;  %v4751_v21 = vsel %vm15257_vm0, %v3994_v15, 0.0  ;;  %10998 = vmatmul.mubr.bf16.gmra.mxu0 %v5473_v57  ;;  %v3872_v28 = vpop.f32.mrf.mxu0  ;;  %vm17781_vm10 = vmmov %vm17771_vm6 }
 0x262   : > { %vm15364_vm13 = vcmp.lt.s32.totalorder %v17772_v46, 16  ;;  %v3997_v20 = vmax.f32 %v3961_v0, 0.0  ;;  %v3959_v25 = vadd.f32 %v14574_v53, %v3916_v36  ;;  %v3921_v55 = vadd.f32 %v10915_v54, %v14788_v35  ;;  %v17782_v36 = vld [vmem:[#allocation25_spill] sm:$0xff]  ;;  %vm17783_vm0 = vmmov %vm17749_vm3 }
 0x263   : > { %v5131_v18 = vsel %vm17775_vm11, %v5128_v40, %v5130_v62  ;;  %v5477_v30 = vrot.slane %v17174_v56, 2  ;;  %v5480_v3 = vrot.slane %v17172_v7, 3  ;;  %v5484_v27 = vshrl.u32 %v15315_v42, 16  ;;  %v10916_v8 = vpop.f32.mrf.mxu0  ;;  %vm17784_vm3 = vmmov %vm17771_vm6  ;;  %v17804_v7 = vld [vmem:[#allocation36_spill] sm:$0xff] }
 0x264   : > { %vm17776_vm14 = vnez %v17643_v5  ;;  %v4754_v60 = vsel %vm15277_vm8, %v3997_v20, 0.0  ;;  %v3995_v40 = vmax.f32 %v3959_v25, 0.0  ;;  %10950 = vmatmul.mubr.bf16.gmra.mxu1 %v5131_v18  ;;  %v3964_v47 = vadd.f32 %v14574_v53, %v3921_v55  ;;  %vm17785_vm5 = vmmov %vm17783_vm0 }
 0x265   : > { %v17777_v12 = vsel %vm17776_vm14, %v14909_v6, %v14831_v34  ;;  %v3919_v22 = vadd.f32 %v3872_v28, %v14846_v2  ;;  %v10059_v5 = vpack.c.bf16 %v4754_v60, %v4753_v13  ;;  %v5481_v63 = vor.u32 %v5480_v3, %v5477_v30  ;;  %v3875_v13 = vpop.f32.mrf.mxu0  ;;  %vm17789_vm4 = vmmov %vm17784_vm3 }
 0x266   : > { %vm15385_vm9 = vcmp.lt.s32.totalorder %v17777_v12, 16  ;;  %v5486_v34 = vrot.slane %v5484_v27, 2  ;;  %v5487_v6 = vshll.u32 %v15315_v42, 16  ;;  %v4752_v38 = vsel %vm15304_vm12, %v3995_v40, 0.0  ;;  %v15416_v20 = vld [vmem:[#allocation2 + $0x6c] sm:$0xff]   ;;  %v15418_v24 = vld [vmem:[#allocation2 + $0x74] sm:$0xff]   ;;  %vm17786_vm12 = vmmov %vm17783_vm0 }
 0x267   : > { %v4000_v19 = vmax.f32 %v3964_v47, 0.0  ;;  %v3962_v52 = vadd.f32 %v14574_v53, %v3919_v22  ;;  %v3922_v2 = vadd.f32 %v10916_v8, %v17780_v32  ;;  %10086 = vst [vmem:[#allocation2 + $0x88] sm:$0xff] %v10059_v5   ;;  %v10054_v58 = vpack.c.bf16 %v4752_v38, %v4751_v21  ;;  %v11769_v53 = vld [vmem:[%s17018_s2] ss:$0 sm:$0xff]  ;;  %vm17793_vm7 = vmmov %vm17784_vm3 }
 0x268   : > { %v5482_v51 = vsel %vm17781_vm10, %v5472_v41, %v5481_v63  ;;  %v5489_v1 = vrot.slane %v5487_v6, 3  ;;  %v5132_v29 = vrot.slane %v15378_v11, 3  ;;  %v3920_v57 = vadd.f32 %v3875_v13, %v17782_v36  ;;  %vm17795_vm15 = vmmov %vm17783_vm0 }
 0x269   : > { %v4757_v15 = vsel %vm15322_vm2, %v4000_v19, 0.0  ;;  %11001 = vmatprep.mubr.bf16.mxu0 %v5482_v51  ;;  %v3998_v31 = vmax.f32 %v3962_v52, 0.0  ;;  %v3965_v0 = vadd.f32 %v11769_v53, %v3922_v2  ;;  %10085 = vst [vmem:[#allocation2 + $0x80] sm:$0xff] %v10054_v58   ;;  %v5134_v46 = vrot.slane %v15397_v10, 3  ;;  %v17787_v58 = vld [vmem:[#allocation26_spill] sm:$0xff]  ;;  %v17788_v51 = vld [vmem:[#allocation76_spill] sm:$0xff]  ;;  %vm17790_vm2 = vmmov %vm17783_vm0 }
 0x26a   : > { %v5490_v41 = vor.u32 %v5489_v1, %v5486_v34  ;;  %v5133_v54 = vsel %vm17783_vm0, %v5130_v62, %v5132_v29  ;;  %v17168_v21 = vshrl.u32 %v15378_v11, 16  ;;  %v3963_v18 = vadd.f32 %v11769_v53, %v3920_v57  ;;  %vm17797_vm6 = vmmov %vm17783_vm0 }
 0x26b   : > { %v4755_v25 = vsel %vm15342_vm1, %v3998_v31, 0.0  ;;  %v4001_v55 = vmax.f32 %v3965_v0, 0.0  ;;  %10953 = vmatprep.mubr.bf16.mxu1 %v5133_v54  ;;  %v17165_v30 = vshll.u32 %v15378_v11, 16  ;;  %v5135_v62 = vsel %vm17785_vm5, %v5132_v29, %v5134_v46  ;;  %vm17796_vm1 = vmmov %vm17784_vm3 }
 0x26c   : > { %v5491_v3 = vsel %vm17784_vm3, %v5481_v63, %v5490_v41  ;;  %v5495_v28 = vrot.slane %v17168_v21, 2  ;;  %v5502_v12 = vshrl.u32 %v15397_v10, 16  ;;  %v3999_v48 = vmax.f32 %v3963_v18, 0.0  ;;  %10954 = vmatmul.mubr.bf16.gmra.mxu1 %v5135_v62  ;;  %vm17800_vm11 = vmmov %vm17796_vm1  ;;  %v15508_v21 = vld [vmem:[#allocation2 + $0x28] sm:$0xf] }
 0x26d   : > { %11002 = vmatmul.mubr.bf16.gmra.mxu0 %v5491_v3  ;;  %v4758_v60 = vsel %vm15364_vm13, %v4001_v55, 0.0  ;;  %v5498_v40 = vrot.slane %v17165_v30, 3  ;;  %v17177_v47 = vshll.u32 %v15397_v10, 16  ;;  %v5136_v63 = vrot.slane %v15416_v20, 3  ;;  %vm17798_vm13 = vmmov %vm17796_vm1 }
 0x26e   : > { %v10069_v22 = vpack.c.bf16 %v4758_v60, %v4757_v15  ;;  %v5504_v5 = vrot.slane %v5502_v12, 2  ;;  %v5138_v34 = vrot.slane %v15418_v24, 3  ;;  %vm5828_vm8 = vsmask.f32 4352  ;;  %vm17801_vm14 = vmmov %vm17783_vm0 }
 0x26f   : > { %v4756_v39 = vsel %vm15385_vm9, %v3999_v48, 0.0  ;;  %v5499_v8 = vor.u32 %v5498_v40, %v5495_v28  ;;  %v5507_v38 = vrot.slane %v17177_v47, 3  ;;  %v17176_v19 = vshrl.u32 %v15416_v20, 16  ;;  %vm17807_vm9 = vmmov %vm17796_vm1 }
 0x270   : > { %10088 = vst [vmem:[#allocation2 + $0x98] sm:$0xff] %v10069_v22   ;;  %v10064_v52 = vpack.c.bf16 %v4756_v39, %v4755_v25  ;;  %v5137_v32 = vsel %vm17786_vm12, %v5134_v46, %v5136_v63  ;;  %v17175_v2 = vshll.u32 %v15416_v20, 16  ;;  %v5836_v1 = vor.u32 %v17788_v51, %v17787_v58  ;;  %v15450_v31 = vld [vmem:[#allocation2 + $0x7c] sm:$0xff]   ;;  %v15452_v53 = vld [vmem:[#allocation2 + $0x84] sm:$0xff]   ;;  %v6193_v22 = vld [vmem:[#allocation2 + $0xc] sm:$0x8] }
 0x271   : > { %v5500_v29 = vsel %vm17789_vm4, %v5490_v41, %v5499_v8  ;;  %v5508_v13 = vor.u32 %v5507_v38, %v5504_v5  ;;  %10957 = vmatprep.mubr.bf16.mxu1 %v5137_v32  ;;  %v5513_v35 = vrot.slane %v17176_v19, 2  ;;  %v17170_v15 = vshrl.u32 %v15418_v24, 16  ;;  %v17791_v41 = vld [vmem:[#allocation33_spill] sm:$0xff]  ;;  %v15470_v5 = vld [vmem:[#allocation2 + $0x10] sm:$0xf]  ;;  %vm17808_vm10 = vmmov %vm17783_vm0 }
 0x272   : > { %10087 = vst [vmem:[#allocation2 + $0x90] sm:$0xff] %v10064_v52   ;;  %11005 = vmatprep.mubr.bf16.mxu0 %v5500_v29  ;;  %v5139_v0 = vsel %vm17790_vm2, %v5136_v63, %v5138_v34  ;;  %v5516_v36 = vrot.slane %v17175_v2, 3  ;;  %v17169_v57 = vshll.u32 %v15418_v24, 16  ;;  %v17792_v54 = vshrl.u32 %v17791_v41, 16  ;;  %vm17809_vm0 = vmmov %vm17796_vm1 }
 0x273   : > { %v5509_v25 = vsel %vm17793_vm7, %v5499_v8, %v5508_v13  ;;  %v5522_v55 = vrot.slane %v17170_v15, 2  ;;  %v5140_v18 = vrot.slane %v15450_v31, 3  ;;  %v17794_v3 = vshll.u32 %v17791_v41, 16  ;;  %vm17812_vm3 = vmmov %vm17809_vm0 }
 0x274   : > { %v5837_v46 = vrot.slane %v17792_v54, 3  ;;  %v5517_v28 = vor.u32 %v5516_v36, %v5513_v35  ;;  %v5525_v60 = vrot.slane %v17169_v57, 3  ;;  %v17167_v48 = vshrl.u32 %v15450_v31, 16  ;;  %10958 = vmatmul.mubr.bf16.gmra.mxu1 %v5139_v0  ;;  %v15481_v35 = vld [vmem:[#allocation2 + $0x14] sm:$0xf] }
 0x275   : > { %v5838_v62 = vrot.slane %v17794_v3, 4  ;;  %v17166_v40 = vshll.u32 %v15450_v31, 16  ;;  %11006 = vmatmul.mubr.bf16.gmra.mxu0 %v5509_v25  ;;  %v5141_v63 = vsel %vm17795_vm15, %v5138_v34, %v5140_v18  ;;  %v5142_v39 = vrot.slane %v15452_v53, 3  ;;  %v17799_v3 = vld [vmem:[#allocation23_spill] sm:$0xff] }
 0x276   : > { %v17164_v8 = vshrl.u32 %v15452_v53, 16  ;;  %v17163_v38 = vshll.u32 %v15452_v53, 16  ;;  %v5518_v52 = vsel %vm17796_vm1, %v5508_v13, %v5517_v28  ;;  %v5526_v32 = vor.u32 %v5525_v60, %v5522_v55  ;;  %10961 = vmatprep.mubr.bf16.mxu1 %v5141_v63 }
 0x277   : > { %v5531_v58 = vrot.slane %v17167_v48, 2  ;;  %v5534_v51 = vrot.slane %v17166_v40, 3  ;;  %11009 = vmatprep.mubr.bf16.mxu0 %v5518_v52  ;;  %v5839_v29 = vor.u32 %v5838_v62, %v5837_v46  ;;  %v5143_v0 = vsel %vm17797_vm6, %v5140_v18, %v5142_v39  ;;  %v15501_v52 = vld [vmem:[#allocation2 + $0x24] sm:$0xf] }
 0x278   : > { %v9726_v13 = vcombine.low %v6193_v22, %v15470_v5  ;;  %v5527_v54 = vsel %vm17798_vm13, %v5517_v28, %v5526_v32  ;;  %v5540_v25 = vrot.slane %v17164_v8, 2  ;;  %v5543_v55 = vrot.slane %v17163_v38, 3  ;;  %v15499_v28 = vld [vmem:[#allocation2 + $0x20] sm:$0xf] }
 0x279   : > { %v5535_v34 = vor.u32 %v5534_v51, %v5531_v58  ;;  %v15484_v36 = vld [vmem:[#allocation2 + $0x8c] sm:$0xff]   ;;  %v5840_v41 = vsel %vm5828_vm8, %v5836_v1, %v5839_v29  ;;  %v11646_v46 = vld [vmem:[#allocation2 + $0x94] ss:$0 sps:$4 sm:$0x77]   ;;  %v9727_v62 = vcombine.low %v15481_v35, %v17799_v3  ;;  %v17803_v15 = vshll.u32 %v14893_v33, 16 }
 0x27a   : > { %v5144_v60 = vrot.slane %v15484_v36, 3  ;;  %v17171_v1 = vshrl.u32 %v15484_v36, 16  ;;  %v17173_v22 = vshll.u32 %v15484_v36, 16  ;;  %v5556_v63 = vshrl.u32 %v11646_v46, 16 }
 0x27b   : > { %v5536_v18 = vsel %vm17800_vm11, %v5526_v32, %v5535_v34  ;;  %v5559_v38 = vshll.u32 %v11646_v46, 16  ;;  %v5544_v8 = vor.u32 %v5543_v55, %v5540_v25  ;;  %v5146_v30 = vrot.slane %v11646_v46, 3 }
 0x27c   : > { %10962 = vmatmul.mubr.bf16.gmra.mxu1 %v5143_v0  ;;  %v5145_v58 = vsel %vm17801_vm14, %v5142_v39, %v5144_v60  ;;  %v5549_v51 = vrot.slane %v17171_v1, 2  ;;  %v5552_v32 = vrot.slane %v17173_v22, 3  ;;  %v6341_v40 = vshrl.u32 %v9726_v13, 16 }
 0x27d   : > { %11010 = vmatmul.mubr.bf16.gmra.mxu0 %v5527_v54  ;;  %10965 = vmatprep.mubr.bf16.mxu1 %v5145_v58  ;;  %v6344_v48 = vshll.u32 %v9726_v13, 16  ;;  %v6349_v54 = vshrl.u32 %v9727_v62, 16  ;;  %v17802_v0 = vshrl.u32 %v14893_v33, 16  ;;  %v5842_v1 = vrot.slane %v17803_v15, 4 }
 0x27e   : > { %11013 = vmatprep.mubr.bf16.mxu0 %v5536_v18  ;;  %v5553_v57 = vor.u32 %v5552_v32, %v5549_v51  ;;  %v9728_v22 = vcombine.low %v17804_v7, %v15499_v28  ;;  %v6352_v56 = vshll.u32 %v9727_v62, 16  ;;  %v17805_v25 = vshrl.u32 %v14984_v61, 16 }
 0x27f   : > { %v5841_v39 = vrot.slane %v17802_v0, 3  ;;  %v17806_v46 = vshll.u32 %v14984_v61, 16  ;;  %v5558_v18 = vrot.slane %v5556_v63, 2  ;;  %v5561_v58 = vrot.slane %v5559_v38, 3 }
 0x280   : > { %v5845_v55 = vrot.slane %v17805_v25, 3  ;;  %v9729_v32 = vcombine.low %v15501_v52, %v15508_v21  ;;  %v5545_v0 = vsel %vm17807_vm9, %v5535_v34, %v5544_v8  ;;  %v5147_v33 = vsel %vm17808_vm10, %v5144_v60, %v5146_v30  ;;  %v15531_v34 = vld [vmem:[#allocation2 + $0x2c] sm:$0xf]  ;;  %v15533_v30 = vld [vmem:[#allocation2 + $0x30] sm:$0xf] }
 0x281   : > { %v5846_v13 = vrot.slane %v17806_v46, 4  ;;  %v5843_v51 = vor.u32 %v5842_v1, %v5841_v39  ;;  %v6343_v15 = vrot.slane %v6341_v40, 3  ;;  %v5554_v62 = vsel %vm17809_vm0, %v5544_v8, %v5553_v57  ;;  %v15535_v60 = vld [vmem:[#allocation2 + $0x34] sm:$0xf] }
 0x282   : > { %v6346_v19 = vrot.slane %v6344_v48, 4  ;;  %v6351_v47 = vrot.slane %v6349_v54, 3  ;;  %v6354_v61 = vrot.slane %v6352_v56, 4  ;;  %v17810_v38 = vshrl.u32 %v14986_v4, 16 }
 0x283   : > { %v5847_v2 = vor.u32 %v5846_v13, %v5845_v55  ;;  %v5844_v25 = vsel %vm5828_vm8, %v5839_v29, %v5843_v51  ;;  %v5850_v39 = vrot.slane %v5433_v50, 4  ;;  %v5562_v40 = vor.u32 %v5561_v58, %v5558_v18  ;;  %v15544_v58 = vld [vmem:[#allocation2 + $0x38] sm:$0xf] }
 0x284   : > { %v5849_v1 = vrot.slane %v17810_v38, 3  ;;  %10966 = vmatmul.mubr.bf16.gmra.mxu1 %v5147_v33  ;;  %v6358_v48 = vshrl.u32 %v9728_v22, 16  ;;  %v6361_v8 = vshll.u32 %v9728_v22, 16  ;;  %v6367_v56 = vshrl.u32 %v9729_v32, 16 }
 0x285   : > { %v5848_v63 = vsel %vm5828_vm8, %v5843_v51, %v5847_v2  ;;  %11014 = vmatmul.mubr.bf16.gmra.mxu0 %v5545_v0  ;;  %11037 = vmatprep.mubr.bf16.mxu1 %v5840_v41  ;;  %v6370_v29 = vshll.u32 %v9729_v32, 16  ;;  %v5857_v4 = vrot.slane %v5448_v37, 3  ;;  %v9730_v50 = vcombine.low %v15531_v34, %v15533_v30 }
 0x286   : > { %11017 = vmatprep.mubr.bf16.mxu0 %v5554_v62  ;;  %v5851_v54 = vor.u32 %v5850_v39, %v5849_v1  ;;  %v17811_v55 = vshll.u32 %v15089_v45, 16  ;;  %v6347_v13 = vor.u32 %v6346_v19, %v6343_v15  ;;  %v6355_v18 = vor.u32 %v6354_v61, %v6351_v47  ;;  %v11656_v45 = vld [vmem:[%s17019_s3 + $0x130] sm:$0xff]  }
 0x287   : > { %v5563_v41 = vsel %vm17812_vm3, %v5553_v57, %v5562_v40  ;;  %v9731_v51 = vcombine.low %v15535_v60, %v15544_v58  ;;  %v6360_v37 = vrot.slane %v6358_v48, 3  ;;  %v6363_v0 = vrot.slane %v6361_v8, 4  ;;  %v11659_v8 = vld [vmem:[%s17019_s3 + $0x128] sm:$0xff]  }
 0x288   : > { %v5858_v46 = vrot.slane %v17811_v55, 4  ;;  %v5852_v22 = vsel %vm5828_vm8, %v5847_v2, %v5851_v54  ;;  %v6369_v33 = vrot.slane %v6367_v56, 3  ;;  %v6372_v62 = vrot.slane %v6370_v29, 4 }
 0x289   : > { %v6376_v47 = vshrl.u32 %v9730_v50, 16  ;;  %v6379_v19 = vshll.u32 %v9730_v50, 16  ;;  %v6356_v2 = vsel %vm5828_vm8, %v6347_v13, %v6355_v18  ;;  %v5865_v57 = vrot.slane %v5466_v26, 3  ;;  %v15566_v26 = vld [vmem:[#allocation2 + $0x40] sm:$0xf] }
 0x28a   : > { %v15549_v32 = vor.u32 %v5858_v46, %v5857_v4  ;;  %v5866_v15 = vrot.slane %v5469_v23, 4  ;;  %v17813_v61 = vshrl.u32 %v15087_v14, 16  ;;  %v17814_v1 = vshll.u32 %v15087_v14, 16  ;;  %v15571_v23 = vld [vmem:[#allocation2 + $0x3c] sm:$0xf] }
 0x28b   : > { %v6385_v40 = vshrl.u32 %v9731_v51, 16  ;;  %v6388_v48 = vshll.u32 %v9731_v51, 16  ;;  %v6364_v14 = vor.u32 %v6363_v0, %v6360_v37  ;;  %v6378_v56 = vrot.slane %v6376_v47, 3  ;;  %v15575_v4 = vld [vmem:[#allocation2 + $0x48] sm:$0xf]  ;;  %v11672_v0 = vld [vmem:[%s17019_s3 + $0x170] sm:$0xff]  }
 0x28c   : > { %11038 = vmatmul.mubr.bf16.vlgmr.msra.gmra.mxu1 %v5844_v25  ;;  %v5853_v38 = vrot.slane %v17813_v61, 3  ;;  %v5854_v39 = vrot.slane %v17814_v1, 4  ;;  %v15568_v59 = vor.u32 %v5866_v15, %v5865_v57  ;;  %v15573_v25 = vld [vmem:[#allocation2 + $0x44] sm:$0xf]  ;;  %v6381_v29 = vrot.slane %v6379_v19, 4  ;;  %v11666_v15 = vld [vmem:[%s17019_s3 + $0x118] sm:$0xff]  }
 0x28d   : > { %11018 = vmatmul.mubr.bf16.gmra.mxu0 %v5563_v41  ;;  %11041 = vmatprep.mubr.bf16.mxu1 %v5848_v63  ;;  %v6373_v63 = vor.u32 %v6372_v62, %v6369_v33  ;;  %v6387_v55 = vrot.slane %v6385_v40, 3  ;;  %v6390_v46 = vrot.slane %v6388_v48, 4  ;;  %v9732_v13 = vcombine.low %v15571_v23, %v15566_v26  ;;  %v11662_v41 = vld [vmem:[%s17019_s3 + $0x120] sm:$0xff]  }
 0x28e   : > { %11089 = vmatprep.mubr.bf16.mxu0 %v6356_v2  ;;  %11126 = vmatpush3.bf16.msra.mxu1 %v15290_v16  ;;  %v5855_v50 = vor.u32 %v5854_v39, %v5853_v38  ;;  %v9733_v16 = vcombine.low %v15573_v25, %v15575_v4  ;;  %v5873_v51 = vrot.slane %v5484_v27, 3  ;;  %v5874_v37 = vrot.slane %v5487_v6, 4  ;;  %v15621_v39 = vld [vmem:[#allocation2 + $0x54] sm:$0xf] }
 0x28f   : > { %11127 = vmatprep.subr.bf16.mxu1 %v11656_v45  ;;  %v6365_v33 = vsel %vm5828_vm8, %v6355_v18, %v6364_v14  ;;  %v5861_v62 = vrot.slane %v5457_v49, 3  ;;  %v5862_v47 = vrot.slane %v5460_v44, 4  ;;  %v6374_v42 = vsel %vm5828_vm8, %v6364_v14, %v6373_v63 }
 0x290   : > { %v15596_v19 = vor.u32 %v5874_v37, %v5873_v51  ;;  %v5856_v27 = vsel %vm5828_vm8, %v5851_v54, %v5855_v50  ;;  %v6382_v6 = vor.u32 %v6381_v29, %v6378_v56  ;;  %v15602_v18 = vor.u32 %v6390_v46, %v6387_v55  ;;  %v15609_v54 = vld [vmem:[#allocation2 + $0x4c] sm:$0xf] }
 0x291   : > { %v6394_v49 = vshrl.u32 %v9732_v13, 16  ;;  %v6397_v2 = vshll.u32 %v9732_v13, 16  ;;  %v6403_v9 = vshrl.u32 %v9733_v16, 16  ;;  %v6406_v44 = vshll.u32 %v9733_v16, 16 }
 0x292   : > { %11128 = vmatpush3.bf16.msra.mxu1 %v11656_v45  ;;  %v15600_v45 = vld [vmem:[#allocation2 + $0x50] sm:$0xf]  ;;  %v5881_v57 = vrot.slane %v5502_v12, 3  ;;  %v17815_v61 = vshll.u32 %v15397_v10, 16  ;;  %v6383_v1 = vsel %vm5828_vm8, %v6373_v63, %v6382_v6  ;;  %v5860_v12 = vsel %vm5828_vm8, %v5855_v50, %v15549_v32  ;;  %v11674_v10 = vld [vmem:[%s17019_s3 + $0x168] sm:$0xff]  }
 0x293   : > { %11129 = vmatprep.subr.bf16.mxu1 %v11659_v8  ;;  %v6392_v40 = vsel %vm5828_vm8, %v6382_v6, %v15602_v18  ;;  %v6396_v48 = vrot.slane %v6394_v49, 3  ;;  %v6405_v56 = vrot.slane %v6403_v9, 3  ;;  %v6408_v29 = vrot.slane %v6406_v44, 4  ;;  %v15630_v63 = vld [vmem:[#allocation2 + $0x58] sm:$0xf] }
 0x294   : > { %11042 = vmatmul.mubr.bf16.gmra.mxu1 %v5852_v22  ;;  %v15607_v22 = vor.u32 %v5862_v47, %v5861_v62  ;;  %v5882_v38 = vrot.slane %v17815_v61, 4  ;;  %v17816_v50 = vshrl.u32 %v15416_v20, 16  ;;  %v17817_v46 = vshll.u32 %v15416_v20, 16  ;;  %v11671_v20 = vld [vmem:[%s17019_s3 + $0x110] sm:$0xff]   ;;  %v15657_v44 = vld [vmem:[#allocation2 + $0x60] sm:$0xf] }
 0x295   : > { %11090 = vmatmul.mubr.bf16.vlgmr.msra.gmra.mxu0 %v6365_v33  ;;  %11045 = vmatprep.mubr.bf16.mxu1 %v5856_v27  ;;  %v17818_v51 = vshrl.u32 %v15281_v43, 16  ;;  %v17819_v33 = vshll.u32 %v15281_v43, 16  ;;  %v17821_v27 = vshll.u32 %v15418_v24, 16  ;;  %v11677_v43 = vld [vmem:[%s17019_s3 + $0x160] sm:$0xff]   ;;  %v15655_v9 = vor.u32 %v6408_v29, %v6405_v56  ;;  %v15674_v29 = vld [vmem:[#allocation2 + $0x5c] sm:$0xf] }
 0x296   : > { %11093 = vmatprep.mubr.bf16.mxu0 %v6374_v42  ;;  %11130 = vmatpush3.bf16.msra.mxu1 %v11659_v8  ;;  %v6399_v8 = vrot.slane %v6397_v2, 4  ;;  %v15625_v14 = vor.u32 %v5882_v38, %v5881_v57  ;;  %v5885_v55 = vrot.slane %v17816_v50, 3  ;;  %v5886_v13 = vrot.slane %v17817_v46, 4 }
 0x297   : > { %11178 = vmatpush3.bf16.msra.mxu0 %v15353_v17  ;;  %11131 = vmatprep.subr.bf16.mxu1 %v11662_v41  ;;  %v9734_v17 = vcombine.low %v15609_v54, %v15600_v45  ;;  %v5864_v16 = vsel %vm5828_vm8, %v15549_v32, %v15607_v22  ;;  %v5869_v37 = vrot.slane %v17818_v51, 3  ;;  %v5870_v62 = vrot.slane %v17819_v33, 4 }
 0x298   : > { %11179 = vmatprep.subr.bf16.mxu0 %v11672_v0  ;;  %v5887_v47 = vor.u32 %v5886_v13, %v5885_v55  ;;  %v17820_v32 = vshrl.u32 %v15418_v24, 16  ;;  %v5890_v6 = vrot.slane %v17821_v27, 4  ;;  %v6400_v49 = vor.u32 %v6399_v8, %v6396_v48  ;;  %v11681_v27 = vld [vmem:[%s17019_s3 + $0x100] sm:$0xff]  }
 0x299   : > { %v6415_v2 = vshll.u32 %v9734_v17, 16  ;;  %v15663_v24 = vor.u32 %v5870_v62, %v5869_v37  ;;  %v17824_v55 = vshll.u32 %v15450_v31, 16  ;;  %v17826_v37 = vshrl.u32 %v15452_v53, 16 }
 0x29a   : > { %11132 = vmatpush3.bf16.msra.mxu1 %v11662_v41  ;;  %v9735_v41 = vcombine.low %v15621_v39, %v15630_v63  ;;  %v5889_v42 = vrot.slane %v17820_v32, 3  ;;  %v15661_v57 = vsel %vm5828_vm8, %v15625_v14, %v5887_v47  ;;  %v17827_v62 = vshll.u32 %v15452_v53, 16  ;;  %v11679_v32 = vld [vmem:[%s17019_s3 + $0x158] sm:$0xff]  }
 0x29b   : > { %11180 = vmatpush3.bf16.msra.mxu0 %v11672_v0  ;;  %11133 = vmatprep.subr.bf16.mxu1 %v11666_v15  ;;  %v6412_v0 = vshrl.u32 %v9734_v17, 16  ;;  %v17823_v17 = vshrl.u32 %v15450_v31, 16  ;;  %v5894_v46 = vrot.slane %v17824_v55, 4  ;;  %v6417_v13 = vrot.slane %v6415_v2, 4 }
 0x29c   : > { %11046 = vmatmul.mubr.bf16.gmra.mxu1 %v5860_v12  ;;  %v5891_v61 = vor.u32 %v5890_v6, %v5889_v42  ;;  %11181 = vmatprep.subr.bf16.mxu0 %v11674_v10  ;;  %v6421_v38 = vshrl.u32 %v9735_v41, 16  ;;  %v6424_v56 = vshll.u32 %v9735_v41, 16  ;;  %v5897_v33 = vrot.slane %v17826_v37, 3  ;;  %v11682_v6 = vld [vmem:[#allocation2 + $0x94] ss:$0 sps:$4 sm:$0xff]  }
 0x29d   : > { %11094 = vmatmul.mubr.bf16.gmra.mxu0 %v6383_v1  ;;  %11049 = vmatprep.mubr.bf16.mxu1 %v5864_v16  ;;  %v17822_v1 = vshrl.u32 %v15378_v11, 16  ;;  %v5893_v48 = vrot.slane %v17823_v17, 3  ;;  %v6414_v8 = vrot.slane %v6412_v0, 3  ;;  %v17825_v16 = vshll.u32 %v15378_v11, 16 }
 0x29e   : > { %11097 = vmatprep.mubr.bf16.mxu0 %v6392_v40  ;;  %11134 = vmatpush3.bf16.msra.mxu1 %v11666_v15  ;;  %v15667_v40 = vld [vmem:[#allocation2 + $0x64] sm:$0xf]  ;;  %v11676_v15 = vld [vmem:[%s17019_s3 + $0x108] sm:$0xff]   ;;  %v15677_v50 = vsel %vm5828_vm8, %v5887_v47, %v5891_v61  ;;  %v5898_v41 = vrot.slane %v17827_v62, 4  ;;  %v5868_v0 = vsel %vm5828_vm8, %v15607_v22, %v15568_v59  ;;  %v9736_v31 = vcombine.low %v15674_v29, %v15657_v44  ;;  %v15731_v62 = vld [vmem:[#allocation2 + $0x70] sm:$0xf] }
 0x29f   : > { %v5877_v12 = vrot.slane %v17822_v1, 3  ;;  %11135 = vmatprep.subr.bf16.mxu1 %v11671_v20  ;;  %11182 = vmatpush3.bf16.msra.mxu0 %v11674_v10  ;;  %v5878_v51 = vrot.slane %v17825_v16, 4  ;;  %v15683_v10 = vld [vmem:[#allocation2 + $0x68] sm:$0xf]  ;;  %v5895_v11 = vor.u32 %v5894_v46, %v5893_v48  ;;  %v6401_v53 = vsel %vm5828_vm8, %v15602_v18, %v6400_v49 }
 0x2a0   : > { %11183 = vmatprep.subr.bf16.mxu0 %v11677_v43  ;;  %v9737_v47 = vcombine.low %v15667_v40, %v15683_v10  ;;  %v6410_v42 = vsel %vm5828_vm8, %v6400_v49, %v15655_v9  ;;  %v5899_v22 = vor.u32 %v5898_v41, %v5897_v33  ;;  %v6423_v2 = vrot.slane %v6421_v38, 3 }
 0x2a1   : > { %v6426_v1 = vrot.slane %v6424_v56, 4  ;;  %v15710_v18 = vsel %vm5828_vm8, %v5891_v61, %v5895_v11  ;;  %v6418_v49 = vor.u32 %v6417_v13, %v6414_v8  ;;  %v15715_v17 = vor.u32 %v5878_v51, %v5877_v12  ;;  %v15729_v51 = vld [vmem:[%s17019_s3 + $0x1b8] sm:$0xff]  }
 0x2a2   : > { %11136 = vmatpush3.bf16.msra.mxu1 %v11671_v20  ;;  %v5872_v20 = vsel %vm5828_vm8, %v15568_v59, %v15663_v24  ;;  %v15718_v48 = vsel %vm5828_vm8, %v5895_v11, %v5899_v22  ;;  %v17828_v55 = vshrl.u32 %v15484_v36, 16  ;;  %v6430_v38 = vshrl.u32 %v9736_v31, 16 }
 0x2a3   : > { %11137 = vmatprep.subr.bf16.mxu1 %v11676_v15  ;;  %11184 = vmatpush3.bf16.msra.mxu0 %v11677_v43  ;;  %v11683_v43 = vld [vmem:[%s17019_s3 + $0x150] sm:$0xff]   ;;  %v6433_v56 = vshll.u32 %v9736_v31, 16  ;;  %v6439_v46 = vshrl.u32 %v9737_v47, 16  ;;  %v17829_v61 = vshll.u32 %v15484_v36, 16  ;;  %v6442_v37 = vshll.u32 %v9737_v47, 16 }
 0x2a4   : > { %11050 = vmatmul.mubr.bf16.gmra.mxu1 %v5868_v0  ;;  %v5901_v59 = vrot.slane %v17828_v55, 3  ;;  %11185 = vmatprep.subr.bf16.mxu0 %v11679_v32  ;;  %v5906_v8 = vshrl.u32 %v11682_v6, 16  ;;  %v5909_v12 = vshll.u32 %v11682_v6, 16  ;;  %v9769_v13 = vcombine.low %v15470_v5, %v15481_v35  ;;  %v15738_v0 = vld [vmem:[#allocation2 + $0x74] sm:$0xf] }
 0x2a5   : > { %11098 = vmatmul.mubr.bf16.gmra.mxu0 %v6401_v53  ;;  %11053 = vmatprep.mubr.bf16.mxu1 %v5872_v20  ;;  %v5902_v16 = vrot.slane %v17829_v61, 4  ;;  %v6427_v33 = vor.u32 %v6426_v1, %v6423_v2  ;;  %v6419_v36 = vsel %vm5828_vm8, %v15655_v9, %v6418_v49  ;;  %v5876_v41 = vsel %vm5828_vm8, %v15663_v24, %v15596_v19  ;;  %v11686_v9 = vld [vmem:[%s17019_s3 + $0x148] sm:$0xff]   ;;  %v15753_v1 = vld [vmem:[#allocation2 + $0x78] sm:$0xf]  ;;  %v11697_v5 = vld [vmem:[#allocation2 + $0x30] sm:$0xff]  }
 0x2a6   : > { %11101 = vmatprep.mubr.bf16.mxu0 %v6410_v42  ;;  %11138 = vmatpush3.bf16.msra.mxu1 %v11676_v15  ;;  %v5908_v31 = vrot.slane %v5906_v8, 3  ;;  %v6432_v47 = vrot.slane %v6430_v38, 3  ;;  %v6435_v11 = vrot.slane %v6433_v56, 4  ;;  %v5911_v42 = vrot.slane %v5909_v12, 4  ;;  %v15769_v8 = vld [vmem:[#allocation2 + $0x84] sm:$0xf] }
 0x2a7   : > { %11186 = vmatpush3.bf16.msra.mxu0 %v11679_v32  ;;  %11139 = vmatprep.subr.bf16.mxu1 %v11681_v27  ;;  %v5903_v15 = vor.u32 %v5902_v16, %v5901_v59  ;;  %v15740_v32 = vld [vmem:[#allocation2 + $0x6c] sm:$0xf]  ;;  %v5880_v24 = vsel %vm5828_vm8, %v15596_v19, %v15715_v17  ;;  %v6441_v6 = vrot.slane %v6439_v46, 3  ;;  %v6444_v20 = vrot.slane %v6442_v37, 4  ;;  %v11689_v19 = vld [vmem:[%s17019_s3 + $0x140] sm:$0xff]  }
 0x2a8   : > { %11187 = vmatprep.subr.bf16.mxu0 %v11683_v43  ;;  %v9738_v2 = vcombine.low %v15740_v32, %v15731_v62  ;;  %v5912_v55 = vor.u32 %v5911_v42, %v5908_v31  ;;  %v6436_v59 = vor.u32 %v6435_v11, %v6432_v47  ;;  %v15767_v37 = vld [vmem:[#allocation2 + $0x80] sm:$0xf]  ;;  %v9772_v12 = vcombine.low %v15508_v21, %v15531_v34  ;;  %v15779_v31 = vld [vmem:[#allocation2 + $0x7c] sm:$0xf] }
 0x2a9   : > { %v15743_v53 = vsel %vm5828_vm8, %v5899_v22, %v5903_v15  ;;  %v6428_v22 = vsel %vm5828_vm8, %v6418_v49, %v6427_v33  ;;  %v9771_v49 = vcombine.low %v15499_v28, %v15501_v52  ;;  %v15784_v47 = vld [vmem:[%s17019_s3 + $0x1f8] sm:$0xff]   ;;  %vm17831_vm5 = vsmask.f32 7424  ;;  %v15881_v52 = vld [vmem:[#allocation2 + $0x60] sm:$0xff]  }
 0x2aa   : > { %11140 = vmatpush3.bf16.msra.mxu1 %v11681_v27  ;;  %v9739_v27 = vcombine.low %v15738_v0, %v15753_v1  ;;  %v15763_v38 = vsel %vm5828_vm8, %v5903_v15, %v5912_v55  ;;  %v6448_v56 = vshrl.u32 %v9738_v2, 16  ;;  %v6451_v46 = vshll.u32 %v9738_v2, 16  ;;  %vm17834_vm12 = vmmov %vm17831_vm5 }
 0x2ab   : > { %11188 = vmatpush3.bf16.msra.mxu0 %v11683_v43  ;;  %11229 = vmatprep.subr.bf16.mxu1 %v15729_v51  ;;  %v6445_v43 = vor.u32 %v6444_v20, %v6441_v6  ;;  %v9773_v15 = vcombine.low %v15533_v30, %v15535_v60  ;;  %v15789_v6 = vld [vmem:[#allocation2 + $0x88] sm:$0xf]  ;;  %vm17835_vm4 = vmmov %vm17831_vm5  ;;  %vm17852_vm13 = vsmask.f32 6400 }
 0x2ac   : > { %11054 = vmatmul.mubr.bf16.gmra.mxu1 %v5876_v41  ;;  %11189 = vmatprep.subr.bf16.mxu0 %v11686_v9  ;;  %v6457_v61 = vshrl.u32 %v9739_v27, 16  ;;  %v6460_v16 = vshll.u32 %v9739_v27, 16  ;;  %v5884_v41 = vsel %vm5828_vm8, %v15715_v17, %v15625_v14  ;;  %v6450_v42 = vrot.slane %v6448_v56, 3  ;;  %v11724_v60 = vld [vmem:[%s17019_s3 + $0x1e8] sm:$0xff]   ;;  %vm17836_vm2 = vmmov %vm17835_vm4 }
 0x2ad   : > { %11102 = vmatmul.mubr.bf16.gmra.mxu0 %v6419_v36  ;;  %11057 = vmatprep.mubr.bf16.mxu1 %v5880_v24  ;;  %v6437_v36 = vsel %vm5828_vm8, %v6427_v33, %v6436_v59  ;;  %v6446_v11 = vsel %vm5828_vm8, %v6436_v59, %v6445_v43  ;;  %v9740_v24 = vcombine.low %v15779_v31, %v15767_v37  ;;  %vm17837_vm7 = vmmov %vm17836_vm2 }
 0x2ae   : > { %11105 = vmatprep.mubr.bf16.mxu0 %v6428_v22  ;;  %v6459_v14 = vrot.slane %v6457_v61, 3  ;;  %v6462_v17 = vrot.slane %v6460_v16, 4  ;;  %v9741_v33 = vcombine.low %v15769_v8, %v15789_v6  ;;  %v15801_v61 = vld [vmem:[#allocation2 + $0x90] sm:$0xf]  ;;  %vm17838_vm15 = vmmov %vm17836_vm2 }
 0x2af   : > { %11190 = vmatpush3.bf16.msra.mxu0 %v11686_v9  ;;  %v6453_v9 = vrot.slane %v6451_v46, 4  ;;  %v6466_v27 = vshrl.u32 %v9740_v24, 16  ;;  %v6469_v55 = vshll.u32 %v9740_v24, 16  ;;  %vm17839_vm1 = vmmov %vm17836_vm2 }
 0x2b0   : > { %11191 = vmatprep.subr.bf16.mxu0 %v11689_v19  ;;  %v6463_v59 = vor.u32 %v6462_v17, %v6459_v14  ;;  %v6475_v56 = vshrl.u32 %v9741_v33, 16  ;;  %v6478_v46 = vshll.u32 %v9741_v33, 16  ;;  %v15816_v17 = vld [vmem:[#allocation2 + $0x98] sm:$0xf]  ;;  %vm17841_vm6 = vmmov %vm17839_vm1 }
 0x2b1   : > { %v6454_v22 = vor.u32 %v6453_v9, %v6450_v42  ;;  %v6468_v9 = vrot.slane %v6466_v27, 3  ;;  %v6471_v24 = vrot.slane %v6469_v55, 4  ;;  %v15861_v27 = vld [vmem:[#allocation2 + $0x28] sm:$0xff]   ;;  %vm17856_vm11 = vmmov %vm17852_vm13 }
 0x2b2   : > { %v6477_v16 = vrot.slane %v6475_v56, 3  ;;  %v11692_v56 = vld [vmem:[#allocation2 + $0x20] sm:$0xff]   ;;  %vm17859_vm14 = vmmov %vm17856_vm11 }
 0x2b3   : > { %11192 = vmatpush3.bf16.msra.mxu0 %v11689_v19  ;;  %v6455_v42 = vsel %vm5828_vm8, %v6445_v43, %v6454_v22  ;;  %v6464_v33 = vsel %vm5828_vm8, %v6454_v22, %v6463_v59  ;;  %v6480_v19 = vrot.slane %v6478_v46, 4  ;;  %v6472_v55 = vor.u32 %v6471_v24, %v6468_v9  ;;  %v11687_v24 = vld [vmem:[#allocation2 + $0x10] sm:$0xff]   ;;  %v11688_v9 = vld [vmem:[#allocation2 + $0x18] sm:$0xff]   ;;  %vm17863_vm9 = vmmov %vm17856_vm11 }
 0x2b4   : > { %11058 = vmatmul.mubr.bf16.gmra.mxu1 %v5884_v41  ;;  %11281 = vmatprep.subr.bf16.mxu0 %v15784_v47  ;;  %vm17868_vm10 = vmmov %vm17863_vm9 }
 0x2b5   : > { %11106 = vmatmul.mubr.bf16.gmra.mxu0 %v6437_v36  ;;  %11061 = vmatprep.mubr.bf16.mxu1 %v15661_v57  ;;  %v15805_v57 = vld [vmem:[#allocation2 + $0x94] sm:$0xf]  ;;  %v15807_v36 = vld [vmem:[#allocation2 + $0x8c] sm:$0xf]  ;;  %v6481_v22 = vor.u32 %v6480_v19, %v6477_v16  ;;  %vm17875_vm0 = vmmov %vm17863_vm9 }
 0x2b6   : > { %11109 = vmatprep.mubr.bf16.mxu0 %v6446_v11  ;;  %v9742_v14 = vcombine.low %v15807_v36, %v15801_v61  ;;  %v9743_v41 = vcombine.low %v15805_v57, %v15816_v17  ;;  %vm17878_vm3 = vmmov %vm17875_vm0 }
 0x2b7   : > { %v6482_v19 = vsel %vm5828_vm8, %v6472_v55, %v6481_v22 }
 0x2b8   : > { %v6487_v11 = vshll.u32 %v9742_v14, 16  ;;  %v6493_v2 = vshrl.u32 %v9743_v41, 16 }
 0x2ba   : > { %v6489_v20 = vrot.slane %v6487_v11, 4  ;;  %v6495_v16 = vrot.slane %v6493_v2, 3 }
 0x2bc   : > { %11062 = vmatmul.mubr.bf16.gmra.mxu1 %v15677_v50  ;;  %v6496_v50 = vshll.u32 %v9743_v41, 16 }
 0x2bd   : > { %11110 = vmatmul.mubr.bf16.gmra.mxu0 %v6455_v42  ;;  %11065 = vmatprep.mubr.bf16.mxu1 %v15710_v18  ;;  %v6484_v42 = vshrl.u32 %v9742_v14, 16  ;;  %v6473_v18 = vsel %vm5828_vm8, %v6463_v59, %v6472_v55 }
 0x2be   : > { %11113 = vmatprep.mubr.bf16.mxu0 %v6464_v33  ;;  %v15831_v33 = vld [vmem:[#allocation2 + $0x9c] sm:$0xf]  ;;  %v6498_v41 = vrot.slane %v6496_v50, 4 }
 0x2bf   : > { %v6486_v43 = vrot.slane %v6484_v42, 3  ;;  %v9744_v59 = vcombine.low %v15831_v33, %v15831_v33 }
 0x2c0   : > { %v6499_v55 = vor.u32 %v6498_v41, %v6495_v16  ;;  %v7251_v41 = vshrl.u32 %v11687_v24, 16 }
 0x2c1   : > { %v6490_v42 = vor.u32 %v6489_v20, %v6486_v43  ;;  %v6502_v2 = vshrl.u32 %v9744_v59, 16  ;;  %v6505_v50 = vshll.u32 %v9744_v59, 16 }
 0x2c3   : > { %v6491_v46 = vsel %vm5828_vm8, %v6481_v22, %v6490_v42  ;;  %v6504_v43 = vrot.slane %v6502_v2, 3  ;;  %v6507_v16 = vrot.slane %v6505_v50, 4 }
 0x2c4   : > { %11066 = vmatmul.mubr.bf16.gmra.mxu1 %v15718_v48  ;;  %v7253_v48 = vshll.u32 %v11687_v24, 16  ;;  %v11702_v24 = vld [vmem:[#allocation2 + $0x40] sm:$0xff]  }
 0x2c5   : > { %11114 = vmatmul.mubr.bf16.gmra.mxu0 %v6473_v18  ;;  %11069 = vmatprep.mubr.bf16.mxu1 %v15743_v53  ;;  %v15845_v18 = vld [vmem:[#allocation2 + $0x28] sm:$0xff]   ;;  %v6500_v53 = vsel %vm5828_vm8, %v6490_v42, %v6499_v55  ;;  %v7266_v42 = vshll.u32 %v11692_v56, 16  ;;  %v6508_v11 = vor.u32 %v6507_v16, %v6504_v43  ;;  %v11698_v43 = vld [vmem:[#allocation2 + $0x38] sm:$0xff]   ;;  %v11707_v16 = vld [vmem:[#allocation2 + $0x50] sm:$0xff]  }
 0x2c6   : > { %11117 = vmatprep.mubr.bf16.mxu0 %v6482_v19  ;;  %17830 = vst [vmem:[#allocation27_spill] sm:$0xff] %v15845_v18  ;;  %v17179_v19 = vshll.u32 %v15845_v18, 16  ;;  %v7255_v14 = vrot.slane %v7253_v48, 1  ;;  %v17178_v20 = vshrl.u32 %v15845_v18, 16  ;;  %v7314_v28 = vshll.u32 %v11707_v16, 16 }
 0x2c7   : > { %v6509_v35 = vsel %vm5828_vm8, %v6499_v55, %v6508_v11  ;;  %v7268_v50 = vrot.slane %v7266_v42, 1  ;;  %v11703_v11 = vld [vmem:[#allocation2 + $0x48] sm:$0xff]   ;;  %v7270_v55 = vshrl.u32 %v11692_v56, 16  ;;  %v7290_v42 = vshll.u32 %v11698_v43, 16  ;;  %vm17833_vm8 = vmmov %vm17831_vm5 }
 0x2c8   : > { %v8622_v22 = vrot.slane %v17179_v19, 2  ;;  %v8621_v59 = vrot.slane %v17178_v20, 1  ;;  %v11706_v20 = vld [vmem:[%s17019_s3 + $0x1a0] sm:$0xff]   ;;  %v15888_v19 = vld [vmem:[#allocation2 + $0x68] sm:$0xff]   ;;  %v7310_v34 = vshrl.u32 %v11703_v11, 16 }
 0x2c9   : > { %v7338_v30 = vshll.u32 %v15888_v19, 16 }
 0x2ca   : > { %v15859_v48 = vor.u32 %v8622_v22, %v8621_v59  ;;  %v7274_v22 = vshll.u32 %v15861_v27, 16  ;;  %v15879_v59 = vld [vmem:[#allocation2 + $0x58] sm:$0xff]  }
 0x2cc   : > { %11070 = vmatmul.mubr.bf16.gmra.mxu1 %v15763_v38  ;;  %v7256_v38 = vor.u32 %v7255_v14, %v7251_v41  ;;  %v17832_v14 = vcombine.low %v17799_v3, %v17804_v7  ;;  %v7282_v41 = vshll.u32 %v11697_v5, 16  ;;  %v11701_v7 = vld [vmem:[%s17019_s3 + $0x1a8] sm:$0xff]   ;;  %v7298_v3 = vshll.u32 %v11702_v24, 16 }
 0x2cd   : > { %11118 = vmatmul.mubr.bf16.gmra.mxu0 %v6491_v46  ;;  %11141 = vmatprep.mubr.bf16.mxu1 %v9769_v13  ;;  %v7258_v46 = vshll.u32 %v11688_v9, 16  ;;  %v11696_v13 = vld [vmem:[%s17019_s3 + $0x1b0] sm:$0xff]   ;;  %v7276_v56 = vrot.slane %v7274_v22, 1  ;;  %v7330_v22 = vshll.u32 %v15881_v52, 16 }
 0x2ce   : > { %11121 = vmatprep.mubr.bf16.mxu0 %v6500_v53 }
 0x2cf   : > { %v7260_v53 = vrot.slane %v7258_v46, 1  ;;  %v7262_v46 = vshrl.u32 %v11688_v9, 16 }
 0x2d1   : > { %v7261_v2 = vsel %vm17831_vm5, %v7256_v38, %v7260_v53  ;;  %v7272_v38 = vor.u32 %v7270_v55, %v7268_v50  ;;  %v7322_v55 = vshll.u32 %v15879_v59, 16  ;;  %vm17879_vm5 = vmmov %vm17875_vm0 }
 0x2d4   : > { %11142 = vmatmul.mubr.bf16.vlgmr.msra.gmra.mxu1 %v17832_v14  ;;  %v7300_v14 = vrot.slane %v7298_v3, 1  ;;  %v7278_v3 = vshrl.u32 %v15861_v27, 16 }
 0x2d5   : > { %11122 = vmatmul.mubr.bf16.gmra.mxu0 %v6509_v35  ;;  %11145 = vmatprep.mubr.bf16.mxu1 %v9771_v49  ;;  %v7264_v49 = vor.u32 %v7262_v46, %v7260_v53  ;;  %v7284_v35 = vrot.slane %v7282_v41, 1  ;;  %v11721_v53 = vld [vmem:[%s17019_s3 + $0x1f0] sm:$0xff]   ;;  %v7302_v41 = vshrl.u32 %v11702_v24, 16 }
 0x2d6   : > { %11193 = vmatprep.mubr.bf16.mxu0 %v7261_v2  ;;  %11230 = vmatpush3.bf16.msra.mxu1 %v15729_v51  ;;  %v7306_v51 = vshll.u32 %v11703_v11, 16  ;;  %v7286_v2 = vshrl.u32 %v11697_v5, 16  ;;  %v7292_v5 = vrot.slane %v7290_v42, 1  ;;  %v11712_v42 = vld [vmem:[%s17019_s3 + $0x198] sm:$0xff]  }
 0x2d7   : > { %11231 = vmatprep.subr.bf16.mxu1 %v11696_v13  ;;  %v7269_v9 = vsel %vm17833_vm8, %v7264_v49, %v7268_v50  ;;  %v7316_v50 = vrot.slane %v7314_v28, 1  ;;  %v7304_v21 = vor.u32 %v7302_v41, %v7300_v14  ;;  %v15917_v28 = vld [vmem:[#allocation2 + $0x30] sm:$0xff]   ;;  %v15929_v41 = vld [vmem:[#allocation2 + $0x48] sm:$0xff]   ;;  %vm17881_vm8 = vmmov %vm17875_vm0 }
 0x2d8   : > { %v7308_v46 = vrot.slane %v7306_v51, 1  ;;  %v7288_v49 = vor.u32 %v7286_v2, %v7284_v35  ;;  %v15919_v51 = vld [vmem:[#allocation2 + $0x38] sm:$0xff]  }
 0x2da   : > { %11232 = vmatpush3.bf16.msra.mxu1 %v11696_v13  ;;  %v7277_v13 = vsel %vm17834_vm12, %v7272_v38, %v7276_v56  ;;  %v7294_v38 = vshrl.u32 %v11698_v43, 16  ;;  %v15910_v43 = vrot.slane %v7330_v22, 1  ;;  %v7312_v11 = vor.u32 %v7310_v34, %v7308_v46  ;;  %v15927_v22 = vld [vmem:[#allocation2 + $0x40] sm:$0xff]   ;;  %v15964_v34 = vld [vmem:[#allocation2 + $0x68] sm:$0xff]   ;;  %vm17884_vm12 = vmmov %vm17875_vm0 }
 0x2db   : > { %11233 = vmatprep.subr.bf16.mxu1 %v11701_v7 }
 0x2dc   : > { %11146 = vmatmul.mubr.bf16.gmra.mxu1 %v9772_v12  ;;  %v7324_v12 = vrot.slane %v7322_v55, 1  ;;  %v7296_v27 = vor.u32 %v7294_v38, %v7292_v5  ;;  %v7293_v55 = vsel %vm17836_vm2, %v7288_v49, %v7292_v5  ;;  %v17843_v38 = vcombine.low %v15575_v4, %v15609_v54  ;;  %vm17895_vm2 = vmmov %vm17839_vm1 }
 0x2dd   : > { %11194 = vmatmul.mubr.bf16.vlgmr.msra.gmra.mxu0 %v7269_v9  ;;  %11149 = vmatprep.mubr.bf16.mxu1 %v9773_v15  ;;  %v7318_v9 = vshrl.u32 %v11707_v16, 16  ;;  %v7280_v15 = vor.u32 %v7278_v3, %v7276_v56  ;;  %v15914_v16 = vld [vmem:[#allocation2 + $0x20] sm:$0xff]   ;;  %v15934_v3 = vsel %vm17838_vm15, %v7304_v21, %v7308_v46  ;;  %v17848_v54 = vshrl.u32 %v15919_v51, 16  ;;  %vm17897_vm15 = vmmov %vm17875_vm0 }
 0x2de   : > { %11197 = vmatprep.mubr.bf16.mxu0 %v7277_v13  ;;  %11234 = vmatpush3.bf16.msra.mxu1 %v11701_v7  ;;  %v7326_v7 = vshrl.u32 %v15879_v59, 16  ;;  %v15924_v56 = vsel %vm17837_vm7, %v7296_v27, %v7300_v14  ;;  %v7334_v13 = vshrl.u32 %v15881_v52, 16  ;;  %v15931_v59 = vld [vmem:[#allocation2 + $0x50] sm:$0xff]   ;;  %v15941_v14 = vrot.slane %v7338_v30, 1  ;;  %v11728_v52 = vld [vmem:[%s17019_s3 + $0x1e0] sm:$0xff]   ;;  %vm17896_vm7 = vmmov %vm17839_vm1 }
 0x2df   : > { %11282 = vmatpush3.bf16.msra.mxu0 %v15784_v47  ;;  %11235 = vmatprep.subr.bf16.mxu1 %v11706_v20  ;;  %v7320_v24 = vor.u32 %v7318_v9, %v7316_v50  ;;  %v15912_v47 = vld [vmem:[#allocation2 + $0x70] sm:$0xff]   ;;  %v7285_v2 = vsel %vm17835_vm4, %v7280_v15, %v7284_v35  ;;  %v15937_v35 = vsel %vm17839_vm1, %v7312_v11, %v7316_v50  ;;  %v17183_v9 = vshll.u32 %v15914_v16, 16  ;;  %v15962_v21 = vld [vmem:[#allocation2 + $0x60] sm:$0xff]   ;;  %v15978_v11 = vld [vmem:[#allocation2 + $0x78] sm:$0xff]  }
 0x2e0   : > { %11283 = vmatprep.subr.bf16.mxu0 %v11721_v53  ;;  %v15939_v5 = vor.u32 %v7326_v7, %v7324_v12  ;;  %v17840_v50 = vcombine.low %v15544_v58, %v15571_v23  ;;  %v15958_v49 = vor.u32 %v7334_v13, %v15910_v43  ;;  %v15966_v30 = vld [vmem:[#allocation2 + $0x70] sm:$0xff]   ;;  %v17842_v58 = vcombine.low %v15566_v26, %v15573_v25  ;;  %v11726_v23 = vld [vmem:[%s17019_s3 + $0x188] sm:$0xff]   ;;  %v16001_v15 = vld [vmem:[#allocation2 + $0x98] sm:$0xff]  }
 0x2e1   : > { %v15955_v46 = vsel %vm17841_vm6, %v7320_v24, %v7324_v12  ;;  %v17182_v12 = vshrl.u32 %v15914_v16, 16  ;;  %v15986_v13 = vld [vmem:[#allocation2 + $0x88] sm:$0xff]   ;;  %v15995_v26 = vld [vmem:[#allocation2 + $0x90] sm:$0xff]   ;;  %v16011_v27 = vld [vmem:[#allocation2 + $0xa0] sm:$0xff]   ;;  %v8618_v7 = vrot.slane %v17183_v9, 2  ;;  %v17845_v25 = vshll.u32 %v15917_v28, 16 }
 0x2e2   : > { %11236 = vmatpush3.bf16.msra.mxu1 %v11706_v20  ;;  %v11719_v20 = vld [vmem:[%s17019_s3 + $0x190] sm:$0xff]   ;;  %v17849_v9 = vshll.u32 %v15919_v51, 16  ;;  %vm17889_vm4 = vmmov %vm17875_vm0 }
 0x2e3   : > { %11284 = vmatpush3.bf16.msra.mxu0 %v11721_v53  ;;  %11237 = vmatprep.subr.bf16.mxu1 %v11712_v42  ;;  %v15949_v53 = vld [vmem:[#allocation2 + $0x58] sm:$0xff]   ;;  %v8617_v24 = vrot.slane %v17182_v12, 1  ;;  %v8626_v18 = vrot.slane %v17845_v25, 2  ;;  %v17846_v12 = vcombine.low %v15600_v45, %v15621_v39  ;;  %v17851_v45 = vshll.u32 %v15927_v22, 16  ;;  %vm17901_vm1 = vmmov %vm17875_vm0 }
 0x2e4   : > { %11285 = vmatprep.subr.bf16.mxu0 %v11724_v60  ;;  %11150 = vmatmul.mubr.bf16.gmra.mxu1 %v17840_v50  ;;  %v11731_v50 = vld [vmem:[%s17019_s3 + $0x1d8] sm:$0xff]   ;;  %v17858_v25 = vshrl.u32 %v15931_v59, 16  ;;  %vm17903_vm6 = vmmov %vm17875_vm0 }
 0x2e5   : > { %11198 = vmatmul.mubr.bf16.gmra.mxu0 %v7285_v2  ;;  %11153 = vmatprep.mubr.bf16.mxu1 %v17842_v58  ;;  %v16040_v4 = vor.u32 %v8618_v7, %v8617_v24  ;;  %v8630_v58 = vrot.slane %v17849_v9, 2  ;;  %v8634_v39 = vrot.slane %v17851_v45, 2  ;;  %v16057_v9 = vld [vmem:[%s17019_s3 + $0x238] sm:$0xff]   ;;  %v17854_v24 = vshrl.u32 %v15929_v41, 16 }
 0x2e6   : > { %11201 = vmatprep.mubr.bf16.mxu0 %v7293_v55  ;;  %11238 = vmatpush3.bf16.msra.mxu1 %v11712_v42  ;;  %v15984_v55 = vld [vmem:[#allocation2 + $0x80] sm:$0xff]  }
 0x2e7   : > { %11286 = vmatpush3.bf16.msra.mxu0 %v11724_v60  ;;  %11239 = vmatprep.subr.bf16.mxu1 %v11719_v20  ;;  %v11733_v60 = vld [vmem:[%s17019_s3 + $0x180] sm:$0xff]   ;;  %17847 = vst [vmem:[#allocation68_spill] sm:$0xff] %v16040_v4  ;;  %v8637_v7 = vrot.slane %v17854_v24, 1 }
 0x2e8   : > { %11287 = vmatprep.subr.bf16.mxu0 %v11728_v52 }
 0x2ea   : > { %11240 = vmatpush3.bf16.msra.mxu1 %v11719_v20  ;;  %v11735_v20 = vld [vmem:[%s17019_s3 + $0x1d0] sm:$0xff]  }
 0x2eb   : > { %11288 = vmatpush3.bf16.msra.mxu0 %v11728_v52  ;;  %11241 = vmatprep.subr.bf16.mxu1 %v11726_v23  ;;  %v17844_v52 = vshrl.u32 %v15917_v28, 16 }
 0x2ec   : > { %11289 = vmatprep.subr.bf16.mxu0 %v11731_v50  ;;  %11154 = vmatmul.mubr.bf16.gmra.mxu1 %v17843_v38  ;;  %v8629_v38 = vrot.slane %v17848_v54, 1 }
 0x2ed   : > { %11202 = vmatmul.mubr.bf16.gmra.mxu0 %v15924_v56  ;;  %v8625_v42 = vrot.slane %v17844_v52, 1  ;;  %11157 = vmatprep.mubr.bf16.mxu1 %v17846_v12  ;;  %v11739_v12 = vld [vmem:[%s17019_s3 + $0x1c8] sm:$0xff]   ;;  %v8641_v56 = vrot.slane %v17858_v25, 1  ;;  %v17866_v25 = vshrl.u32 %v15962_v21, 16 }
 0x2ee   : > { %11205 = vmatprep.mubr.bf16.mxu0 %v15934_v3  ;;  %11242 = vmatpush3.bf16.msra.mxu1 %v11726_v23  ;;  %v17850_v3 = vshrl.u32 %v15927_v22, 16  ;;  %v8631_v23 = vor.u32 %v8630_v58, %v8629_v38  ;;  %v17861_v38 = vshll.u32 %v15931_v59, 16 }
 0x2ef   : > { %11290 = vmatpush3.bf16.msra.mxu0 %v11731_v50  ;;  %v8627_v52 = vor.u32 %v8626_v18, %v8625_v42  ;;  %11243 = vmatprep.subr.bf16.mxu1 %v11733_v60  ;;  %v16062_v18 = vsel %vm17852_vm13, %v16040_v4, %v15859_v48  ;;  %v17855_v50 = vshll.u32 %v15929_v41, 16  ;;  %vm17907_vm13 = vmmov %vm17875_vm0 }
 0x2f0   : > { %v8633_v2 = vrot.slane %v17850_v3, 1  ;;  %11291 = vmatprep.subr.bf16.mxu0 %v11735_v20  ;;  %17853 = vst [vmem:[#allocation40_spill] sm:$0xff] %v16062_v18  ;;  %v8642_v24 = vrot.slane %v17861_v38, 2  ;;  %v17862_v18 = vshrl.u32 %v15949_v53, 16  ;;  %v17870_v38 = vshll.u32 %v15964_v34, 16 }
 0x2f1   : > { %v8638_v42 = vrot.slane %v17855_v50, 2  ;;  %v16071_v3 = vsel %vm17856_vm11, %v15859_v48, %v8627_v52  ;;  %v16076_v4 = vsel %vm17859_vm14, %v8627_v52, %v8631_v23  ;;  %v17865_v48 = vshll.u32 %v15949_v53, 16  ;;  %vm17909_vm11 = vmmov %vm17875_vm0 }
 0x2f2   : > { %17857 = vst [vmem:[#allocation37_spill] sm:$0xff] %v16071_v3  ;;  %v8635_v45 = vor.u32 %v8634_v39, %v8633_v2  ;;  %17860 = vst [vmem:[#allocation29_spill] sm:$0xff] %v16076_v4  ;;  %v8645_v50 = vrot.slane %v17862_v18, 1  ;;  %11244 = vmatpush3.bf16.msra.mxu1 %v11733_v60  ;;  %v8649_v39 = vrot.slane %v17866_v25, 1  ;;  %v17867_v52 = vshll.u32 %v15962_v21, 16 }
 0x2f3   : > { %v8639_v58 = vor.u32 %v8638_v42, %v8637_v7  ;;  %11292 = vmatpush3.bf16.msra.mxu0 %v11735_v20  ;;  %v8646_v2 = vrot.slane %v17865_v48, 2  ;;  %v11742_v42 = vld [vmem:[%s17019_s3 + $0x1c0] sm:$0xff]   ;;  %11333 = vmatprep.subr.bf16.mxu1 %v16057_v9  ;;  %v8643_v20 = vor.u32 %v8642_v24, %v8641_v56  ;;  %v17869_v18 = vshrl.u32 %v15964_v34, 16  ;;  %vm17911_vm14 = vmmov %vm17895_vm2 }
 0x2f4   : > { %v16083_v54 = vsel %vm17863_vm9, %v8631_v23, %v8635_v45  ;;  %v8650_v7 = vrot.slane %v17867_v52, 2  ;;  %11293 = vmatprep.subr.bf16.mxu0 %v11739_v12  ;;  %v8654_v48 = vrot.slane %v17870_v38, 2  ;;  %v17871_v25 = vcombine.low %v15630_v63, %v15674_v29  ;;  %vm17912_vm9 = vmmov %vm17895_vm2 }
 0x2f5   : > { %17864 = vst [vmem:[#allocation9_spill] sm:$0xff] %v16083_v54  ;;  %v16096_v60 = vsel %vm17868_vm10, %v8635_v45, %v8639_v58  ;;  %v8653_v23 = vrot.slane %v17869_v18, 1  ;;  %11206 = vmatmul.mubr.bf16.gmra.mxu0 %v15937_v35  ;;  %v8647_v52 = vor.u32 %v8646_v2, %v8645_v50  ;;  %v17872_v4 = vshrl.u32 %v15966_v30, 16  ;;  %vm17915_vm10 = vmmov %vm17895_vm2 }
 0x2f6   : > { %11158 = vmatmul.mubr.bf16.gmra.mxu1 %v17871_v25  ;;  %v8651_v54 = vor.u32 %v8650_v7, %v8649_v39  ;;  %v17873_v45 = vshll.u32 %v15966_v30, 16  ;;  %11209 = vmatprep.mubr.bf16.mxu0 %v15955_v46  ;;  %v17874_v24 = vcombine.low %v15657_v44, %v15667_v40  ;;  %v16115_v35 = vsel %vm17875_vm0, %v8639_v58, %v8643_v20  ;;  %vm17916_vm0 = vmmov %vm17895_vm2 }
 0x2f7   : > { %v8657_v3 = vrot.slane %v17872_v4, 1  ;;  %v8655_v18 = vor.u32 %v8654_v48, %v8653_v23  ;;  %v17876_v63 = vshrl.u32 %v15978_v11, 16  ;;  %v17877_v50 = vshll.u32 %v15978_v11, 16  ;;  %11294 = vmatpush3.bf16.msra.mxu0 %v11739_v12 }
 0x2f8   : > { %v8658_v56 = vrot.slane %v17873_v45, 2  ;;  %11161 = vmatprep.mubr.bf16.mxu1 %v17874_v24  ;;  %v16122_v4 = vsel %vm17878_vm3, %v8643_v20, %v8647_v52  ;;  %v16125_v46 = vsel %vm17879_vm5, %v8647_v52, %v8651_v54  ;;  %v17880_v44 = vshrl.u32 %v15984_v55, 16  ;;  %11295 = vmatprep.subr.bf16.mxu0 %v11742_v42  ;;  %vm17920_vm3 = vmmov %vm17916_vm0 }
 0x2f9   : > { %v8661_v29 = vrot.slane %v17876_v63, 1  ;;  %v8662_v2 = vrot.slane %v17877_v50, 2  ;;  %v16130_v58 = vsel %vm17881_vm8, %v8651_v54, %v8655_v18  ;;  %v17882_v23 = vshll.u32 %v15984_v55, 16  ;;  %vm17921_vm5 = vmmov %vm17916_vm0 }
 0x2fa   : > { %v8659_v39 = vor.u32 %v8658_v56, %v8657_v3  ;;  %v8665_v40 = vrot.slane %v17880_v44, 1  ;;  %v17883_v12 = vshrl.u32 %v15986_v13, 16  ;;  %v17886_v25 = vshll.u32 %v15986_v13, 16  ;;  %v11718_v44 = vld [vmem:[#allocation2 + $0x78] sm:$0xff]   ;;  %vm17923_vm8 = vmmov %vm17916_vm0 }
 0x2fb   : > { %v8663_v7 = vor.u32 %v8662_v2, %v8661_v29  ;;  %v8666_v38 = vrot.slane %v17882_v23, 2  ;;  %v17887_v52 = vshrl.u32 %v15995_v26, 16  ;;  %v17888_v56 = vshll.u32 %v15995_v26, 16  ;;  %11296 = vmatpush3.bf16.msra.mxu0 %v11742_v42 }
 0x2fc   : > { %v8669_v48 = vrot.slane %v17883_v12, 1  ;;  %v16137_v20 = vsel %vm17884_vm12, %v8655_v18, %v8659_v39  ;;  %v8670_v3 = vrot.slane %v17886_v25, 2  ;;  %v17891_v29 = vshrl.u32 %v16001_v15, 16  ;;  %vm17929_vm12 = vmmov %vm17916_vm0 }
 0x2fd   : > { %17885 = vst [vmem:[#allocation51_spill] sm:$0xff] %v16137_v20  ;;  %v8673_v45 = vrot.slane %v17887_v52, 1  ;;  %v8674_v54 = vrot.slane %v17888_v56, 2  ;;  %v16146_v24 = vsel %vm17889_vm4, %v8659_v39, %v8663_v7  ;;  %v8667_v63 = vor.u32 %v8666_v38, %v8665_v40  ;;  %vm17930_vm4 = vmmov %vm17916_vm0 }
 0x2fe   : > { %17890 = vst [vmem:[#allocation44_spill] sm:$0xff] %v16146_v24  ;;  %v8677_v50 = vrot.slane %v17891_v29, 1  ;;  %v17892_v2 = vshll.u32 %v16001_v15, 16  ;;  %v8671_v23 = vor.u32 %v8670_v3, %v8669_v48  ;;  %v17893_v25 = vshrl.u32 %v16011_v27, 16 }
 0x2ff   : > { %v8675_v12 = vor.u32 %v8674_v54, %v8673_v45  ;;  %v17894_v20 = vshll.u32 %v16011_v27, 16  ;;  %v7333_v39 = vsel %vm17895_vm2, %v15939_v5, %v15910_v43  ;;  %v7341_v40 = vsel %vm17896_vm7, %v15958_v49, %v15941_v14  ;;  %v11723_v45 = vld [vmem:[#allocation2 + $0x80] sm:$0xff]   ;;  %vm17932_vm7 = vmmov %vm17916_vm0 }
 0x300   : > { %v8678_v18 = vrot.slane %v17892_v2, 2  ;;  %v8681_v52 = vrot.slane %v17893_v25, 1  ;;  %v16163_v38 = vsel %vm17897_vm15, %v8663_v7, %v8667_v63  ;;  %11210 = vmatmul.mubr.bf16.gmra.mxu0 %v7333_v39  ;;  %v17899_v48 = vcombine.low %v15683_v10, %v15740_v32 }
 0x301   : > { %v8682_v56 = vrot.slane %v17894_v20, 2  ;;  %17898 = vst [vmem:[#allocation56_spill] sm:$0xff] %v16163_v38  ;;  %v17900_v3 = vshll.u32 %v15912_v47, 16  ;;  %v16171_v54 = vsel %vm17901_vm1, %v8667_v63, %v8671_v23  ;;  %v16174_v43 = vsel %vm17903_vm6, %v8671_v23, %v8675_v12  ;;  %11213 = vmatprep.mubr.bf16.mxu0 %v7341_v40  ;;  %vm17938_vm1 = vmmov %vm17916_vm0 }
 0x302   : > { %v8679_v42 = vor.u32 %v8678_v18, %v8677_v50  ;;  %11162 = vmatmul.mubr.bf16.gmra.mxu1 %v17899_v48  ;;  %17902 = vst [vmem:[#allocation45_spill] sm:$0xff] %v16171_v54  ;;  %17904 = vst [vmem:[#allocation38_spill] sm:$0xff] %v16174_v43  ;;  %v17906_v49 = vcombine.low %v15731_v62, %v15738_v0  ;;  %v7350_v32 = vshrl.u32 %v15912_v47, 16  ;;  %v7354_v7 = vshll.u32 %v11718_v44, 16  ;;  %v10935_v50 = vpop.f32.mrf.mxu1  ;;  %v11725_v0 = vld [vmem:[#allocation2 + $0x88] sm:$0xff]  }
 0x303   : > { %v7348_v20 = vrot.slane %v17900_v3, 1  ;;  %v16176_v5 = vor.u32 %v8682_v56, %v8681_v52  ;;  %v7342_v29 = vshrl.u32 %v15888_v19, 16  ;;  %v7362_v18 = vshll.u32 %v11723_v45, 16  ;;  %v7677_v56 = vld [vmem:[#allocation2 + $0x18] sm:$0xf]  ;;  %v10987_v3 = vpop.f32.mrf.mxu0 }
 0x304   : > { %11165 = vmatprep.mubr.bf16.mxu1 %v17906_v49  ;;  %v16182_v10 = vsel %vm17907_vm13, %v8675_v12, %v8679_v42  ;;  %v5248_v25 = vpop.f32.mrf.mxu1  ;;  %v7356_v62 = vrot.slane %v7354_v7, 1  ;;  %v16192_v47 = vld [vmem:[#allocation2 + $0x1c] sm:$0xf]  ;;  %v17913_v19 = vcombine.low %v15753_v1, %v15779_v31  ;;  %v7370_v49 = vshll.u32 %v11725_v0, 16  ;;  %vm17940_vm13 = vmmov %vm17916_vm0 }
 0x305   : > { %17905 = vst [vmem:[#allocation57_spill] sm:$0xff] %v16176_v5  ;;  %17908 = vst [vmem:[#allocation53_spill] sm:$0xff] %v16182_v10  ;;  %v16187_v63 = vsel %vm17909_vm11, %v8679_v42, %v16176_v5  ;;  %v7352_v2 = vor.u32 %v7350_v32, %v7348_v20  ;;  %v7344_v23 = vor.u32 %v7342_v29, %v15941_v14  ;;  %v7364_v40 = vrot.slane %v7362_v18, 1  ;;  %v11730_v42 = vld [vmem:[#allocation2 + $0x90] sm:$0xff]   ;;  %v5664_v1 = vpop.f32.mrf.mxu0 }
 0x306   : > { %17910 = vst [vmem:[#allocation46_spill] sm:$0xff] %v16187_v63  ;;  %v10936_v52 = vpop.f32.mrf.mxu1  ;;  %v17914_v14 = vcombine.low %v15767_v37, %v15769_v8  ;;  %v9854_v32 = vcombine.low %v7677_v56, %v16192_v47  ;;  %v16202_v7 = vadd.f32 %v10987_v3, %v10935_v50  ;;  %v7358_v29 = vshrl.u32 %v11718_v44, 16  ;;  %v11732_v8 = vld [vmem:[#allocation2 + $0x98] sm:$0xff]  }
 0x307   : > { %v7349_v12 = vsel %vm17911_vm14, %v7344_v23, %v7348_v20  ;;  %v7357_v39 = vsel %vm17912_vm9, %v7352_v2, %v7356_v62  ;;  %v7366_v20 = vshrl.u32 %v11723_v45, 16  ;;  %v7378_v31 = vshll.u32 %v11730_v42, 16  ;;  %v10988_v37 = vpop.f32.mrf.mxu0  ;;  %vm17946_vm14 = vmmov %vm17916_vm0 }
 0x308   : > { %11214 = vmatmul.mubr.bf16.gmra.mxu0 %v7349_v12  ;;  %v5251_v48 = vpop.f32.mrf.mxu1  ;;  %v7360_v18 = vor.u32 %v7358_v29, %v7356_v62  ;;  %v16204_v12 = vadd.f32 %v5664_v1, %v5248_v25  ;;  %v16207_v5 = vadd.f32 %v10988_v37, %v10936_v52  ;;  %v17917_v50 = vcombine.low %v15789_v6, %v15807_v36 }
 0x309   : > { %11217 = vmatprep.mubr.bf16.mxu0 %v7357_v39  ;;  %v7368_v23 = vor.u32 %v7366_v20, %v7364_v40  ;;  %v5667_v62 = vpop.f32.mrf.mxu0  ;;  %v7380_v25 = vrot.slane %v7378_v31, 1  ;;  %v17918_v3 = vcombine.low %v15801_v61, %v15805_v57  ;;  %v7382_v52 = vshrl.u32 %v11730_v42, 16 }
 0x30a   : > { %11166 = vmatmul.mubr.bf16.gmra.mxu1 %v17913_v19  ;;  %v10939_v2 = vpop.f32.mrf.mxu1  ;;  %v7372_v19 = vrot.slane %v7370_v49, 1  ;;  %v7365_v45 = vsel %vm17915_vm10, %v7360_v18, %v7364_v40  ;;  %v16216_v20 = vadd.f32 %v5667_v62, %v5251_v48  ;;  %v7386_v49 = vshll.u32 %v11732_v8, 16  ;;  %v11738_v18 = vld [vmem:[#allocation2 + $0xa0] ss:$0 sps:$4 sm:$0x11]   ;;  %vm17948_vm10 = vmmov %vm17916_vm0 }
 0x30b   : > { %11169 = vmatprep.mubr.bf16.mxu1 %v17914_v14  ;;  %v7827_v14 = vshll.u32 %v9854_v32, 16  ;;  %v7374_v1 = vshrl.u32 %v11725_v0, 16  ;;  %v7384_v37 = vor.u32 %v7382_v52, %v7380_v25  ;;  %v7825_v6 = vshrl.u32 %v9854_v32, 16 }
 0x30c   : > { %v5264_v39 = vpop.f32.mrf.mxu1  ;;  %v7373_v44 = vsel %vm17916_vm0, %v7368_v23, %v7372_v19  ;;  %v10991_v23 = vpop.f32.mrf.mxu0  ;;  %v17919_v36 = vshll.u32 %v15914_v16, 16  ;;  %v7388_v61 = vrot.slane %v7386_v49, 1  ;;  %v7394_v0 = vshll.u32 %v11738_v18, 16  ;;  %v17924_v18 = vld [vmem:[#allocation27_spill] sm:$0xff] }
 0x30d   : > { %v7829_v29 = vrot.slane %v7827_v14, 1  ;;  %v8251_v14 = vld [vmem:[#allocation2 + $0x18] sm:$0xe]  ;;  %vm17931_vm2 = vcmask 1046528  }
 0x30e   : > { %v10940_v56 = vpop.f32.mrf.mxu1  ;;  %v7834_v31 = vrot.slane %v17919_v36, 1  ;;  %v5680_v57 = vpop.f32.mrf.mxu0  ;;  %v7389_v52 = vsel %vm17921_vm5, %v7384_v37, %v7388_v61  ;;  %v17922_v36 = vcombine.low %v15816_v17, %v15831_v33  ;;  %vm17937_vm15 = vmmov %vm17931_vm2 }
 0x30f   : > { %v7830_v48 = vor.u32 %v7829_v29, %v7825_v6  ;;  %v16233_v29 = vcombine.low %v8251_v14, %v16192_v47  ;;  %v17926_v6 = vshrl.u32 %v15914_v16, 16  ;;  %vm17939_vm6 = vmmov %vm17931_vm2 }
 0x310   : > { %11218 = vmatmul.mubr.bf16.gmra.mxu0 %v7365_v45  ;;  %v5267_v40 = vpop.f32.mrf.mxu1  ;;  %v10992_v32 = vpop.f32.mrf.mxu0  ;;  %vm17945_vm11 = vmmov %vm17931_vm2 }
 0x311   : > { %11221 = vmatprep.mubr.bf16.mxu0 %v7373_v44  ;;  %v16220_v44 = vadd.f32 %v10991_v23, %v10939_v2  ;;  %v7835_v2 = vsel %vm17923_vm8, %v7830_v48, %v7834_v31  ;;  %v16230_v49 = vadd.f32 %v10992_v32, %v10940_v56  ;;  %v17925_v23 = vshll.u32 %v17924_v18, 16  ;;  %vm17947_vm9 = vmmov %vm17931_vm2 }
 0x312   : > { %11170 = vmatmul.mubr.bf16.gmra.mxu1 %v17917_v50  ;;  %v10943_v45 = vpop.f32.mrf.mxu1  ;;  %v7376_v50 = vor.u32 %v7374_v1, %v7372_v19  ;;  %v7838_v17 = vor.u32 %v17926_v6, %v7834_v31  ;;  %v8273_v56 = vrot.slane %v15914_v16, 1  ;;  %v17927_v48 = vshll.u32 %v15917_v28, 16  ;;  %v11747_v16 = vld [vmem:[%s17019_s3 + $0x230] sm:$0xff]   ;;  %vm17953_vm0 = vmmov %vm17931_vm2 }
 0x313   : > { %11173 = vmatprep.mubr.bf16.mxu1 %v17918_v3  ;;  %v16223_v3 = vadd.f32 %v5680_v57, %v5264_v39  ;;  %v5683_v39 = vpop.f32.mrf.mxu0  ;;  %v7842_v37 = vrot.slane %v17925_v23, 1  ;;  %v7396_v57 = vrot.slane %v7394_v0, 1  ;;  %v8272_v47 = vrot.slane %v16233_v29, 1  ;;  %vm17955_vm5 = vmmov %vm17953_vm0 }
 0x314   : > { %v5280_v62 = vpop.f32.mrf.mxu1  ;;  %v7381_v42 = vsel %vm17920_vm3, %v7376_v50, %v7380_v25  ;;  %v7390_v25 = vshrl.u32 %v11732_v8, 16  ;;  %v16239_v33 = vadd.f32 %v5683_v39, %v5267_v40  ;;  %v7850_v8 = vrot.slane %v17927_v48, 1  ;;  %v11750_v48 = vld [vmem:[%s17019_s3 + $0x228] sm:$0xff]   ;;  %vm17954_vm3 = vmmov %vm17938_vm1 }
 0x315   : > { %v17928_v32 = vshrl.u32 %v17924_v18, 16  ;;  %v8274_v0 = vsel %vm17931_vm2, %v8272_v47, %v8273_v56  ;;  %v17933_v6 = vshll.u32 %v15919_v51, 16  ;;  %vm17956_vm8 = vmmov %vm17938_vm1 }
 0x316   : > { %v10944_v19 = vpop.f32.mrf.mxu1  ;;  %v7392_v50 = vor.u32 %v7390_v25, %v7388_v61  ;;  %v7843_v61 = vsel %vm17930_vm4, %v7838_v17, %v7842_v37  ;;  %vm17962_vm4 = vmmov %vm17938_vm1 }
 0x317   : > { %v7858_v17 = vrot.slane %v17933_v6, 1  ;;  %vm17963_vm2 = vmmov %vm17953_vm0 }
 0x318   : > { %11222 = vmatmul.mubr.bf16.gmra.mxu0 %v7381_v42  ;;  %v5283_v1 = vpop.f32.mrf.mxu1  ;;  %v10995_v42 = vpop.f32.mrf.mxu0  ;;  %v7397_v31 = vsel %vm17929_vm12, %v7392_v50, %v7396_v57  ;;  %v17934_v57 = vshrl.u32 %v15917_v28, 16  ;;  %vm17961_vm12 = vmmov %vm17953_vm0 }
 0x319   : > { %11225 = vmatprep.mubr.bf16.mxu0 %v7389_v52  ;;  %v16244_v52 = vadd.f32 %v10995_v42, %v10943_v45 }
 0x31a   : > { %11174 = vmatmul.mubr.bf16.gmra.mxu1 %v17922_v36  ;;  %v10947_v14 = vpop.f32.mrf.mxu1  ;;  %v7846_v36 = vor.u32 %v17928_v32, %v7842_v37  ;;  %v5696_v40 = vpop.f32.mrf.mxu0 }
 0x31b   : > { %11245 = vmatprep.mubr.bf16.mxu1 %v7835_v2  ;;  %v16255_v45 = vadd.f32 %v5696_v40, %v5280_v62  ;;  %v7854_v62 = vor.u32 %v17934_v57, %v7850_v8  ;;  %v17936_v40 = vshrl.u32 %v15919_v51, 16 }
 0x31c   : > { %v7851_v2 = vsel %vm17932_vm7, %v7846_v36, %v7850_v8  ;;  %v5296_v25 = vpop.f32.mrf.mxu1  ;;  %v10996_v39 = vpop.f32.mrf.mxu0  ;;  %v8275_v36 = vrot.slane %v17924_v18, 1  ;;  %vm17964_vm7 = vmmov %vm17938_vm1 }
 0x31d   : > { %v16258_v23 = vadd.f32 %v10996_v39, %v10944_v19  ;;  %v8277_v19 = vrot.slane %v15917_v28, 1  ;;  %v11753_v28 = vld [vmem:[%s17019_s3 + $0x220] sm:$0xff]  }
 0x31e   : > { %v10948_v37 = vpop.f32.mrf.mxu1  ;;  %v5699_v50 = vpop.f32.mrf.mxu0 }
 0x31f   : > { %v16268_v42 = vadd.f32 %v5699_v50, %v5283_v1  ;;  %v7859_v1 = vsel %vm17938_vm1, %v7854_v62, %v7858_v17  ;;  %v17942_v62 = vshrl.u32 %v15927_v22, 16 }
 0x320   : > { %11226 = vmatmul.mubr.bf16.gmra.mxu0 %v7397_v31  ;;  %v5299_v47 = vpop.f32.mrf.mxu1 }
 0x321   : > { %11297 = vmatprep.mubr.bf16.mxu0 %v8274_v0  ;;  %v10999_v31 = vpop.f32.mrf.mxu0  ;;  %v8276_v0 = vsel %vm17937_vm15, %v8273_v56, %v8275_v36  ;;  %vm17969_vm15 = vmmov %vm17953_vm0 }
 0x322   : > { %11246 = vmatmul.mubr.bf16.vlgmr.msra.gmra.mxu1 %v7843_v61  ;;  %v7862_v61 = vor.u32 %v17936_v40, %v7858_v17  ;;  %v16276_v8 = vadd.f32 %v10999_v31, %v10947_v14  ;;  %v17941_v17 = vshll.u32 %v15929_v41, 16  ;;  %v8281_v40 = vrot.slane %v15927_v22, 1 }
 0x323   : > { %11249 = vmatprep.mubr.bf16.mxu1 %v7851_v2  ;;  %11334 = vmatpush3.bf16.msra.mxu1 %v16057_v9  ;;  %v17935_v9 = vshll.u32 %v15927_v22, 16  ;;  %v8278_v2 = vsel %vm17939_vm6, %v8275_v36, %v8277_v19  ;;  %v5712_v18 = vpop.f32.mrf.mxu0  ;;  %v11756_v36 = vld [vmem:[%s17019_s3 + $0x218] sm:$0xff]   ;;  %v11759_v22 = vld [vmem:[%s17019_s3 + $0x210] sm:$0xff]   ;;  %vm17970_vm6 = vmmov %vm17953_vm0 }
 0x324   : > { %11335 = vmatprep.subr.bf16.mxu1 %v11747_v16  ;;  %v10951_v39 = vpop.f32.mrf.mxu1  ;;  %v16285_v14 = vadd.f32 %v5712_v18, %v5296_v25  ;;  %v7874_v50 = vrot.slane %v17941_v17, 1 }
 0x325   : > { %v7866_v32 = vrot.slane %v17935_v9, 1  ;;  %v11000_v56 = vpop.f32.mrf.mxu0 }
 0x326   : > { %v16289_v57 = vadd.f32 %v11000_v56, %v10948_v37  ;;  %v8279_v37 = vrot.slane %v15919_v51, 1 }
 0x327   : > { %11336 = vmatpush3.bf16.msra.mxu1 %v11747_v16  ;;  %v7867_v6 = vsel %vm17940_vm13, %v7862_v61, %v7866_v32  ;;  %v5312_v16 = vpop.f32.mrf.mxu1  ;;  %v7870_v9 = vor.u32 %v17942_v62, %v7866_v32  ;;  %v5715_v31 = vpop.f32.mrf.mxu0  ;;  %v17943_v61 = vshll.u32 %v15931_v59, 16  ;;  %vm17971_vm13 = vmmov %vm17938_vm1 }
 0x328   : > { %11337 = vmatprep.subr.bf16.mxu1 %v11750_v48  ;;  %11298 = vmatmul.mubr.bf16.vlgmr.msra.gmra.mxu0 %v8276_v0  ;;  %v8280_v18 = vsel %vm17945_vm11, %v8277_v19, %v8279_v37  ;;  %vm17977_vm11 = vmmov %vm17953_vm0 }
 0x329   : > { %11301 = vmatprep.mubr.bf16.mxu0 %v8278_v2  ;;  %v10952_v25 = vpop.f32.mrf.mxu1  ;;  %v7882_v0 = vrot.slane %v17943_v61, 1  ;;  %v17944_v2 = vshrl.u32 %v15929_v41, 16  ;;  %v17950_v61 = vshrl.u32 %v15931_v59, 16 }
 0x32a   : > { %11250 = vmatmul.mubr.bf16.gmra.mxu1 %v7859_v1  ;;  %v16299_v1 = vadd.f32 %v5715_v31, %v5299_v47  ;;  %v8282_v47 = vsel %vm17947_vm9, %v8279_v37, %v8281_v40  ;;  %v11762_v37 = vld [vmem:[%s17019_s3 + $0x208] sm:$0xff]   ;;  %vm17979_vm9 = vmmov %vm17953_vm0 }
 0x32b   : > { %11253 = vmatprep.mubr.bf16.mxu1 %v7867_v6  ;;  %11338 = vmatpush3.bf16.msra.mxu1 %v11750_v48  ;;  %v5315_v48 = vpop.f32.mrf.mxu1  ;;  %v7878_v32 = vor.u32 %v17944_v2, %v7874_v50  ;;  %v7875_v6 = vsel %vm17946_vm14, %v7870_v9, %v7874_v50  ;;  %v17949_v50 = vshll.u32 %v15949_v53, 16  ;;  %v7886_v2 = vor.u32 %v17950_v61, %v7882_v0  ;;  %vm17978_vm14 = vmmov %vm17938_vm1 }
 0x32c   : > { %11339 = vmatprep.subr.bf16.mxu1 %v11753_v28 }
 0x32d   : > { %v11003_v56 = vpop.f32.mrf.mxu0  ;;  %v10955_v17 = vpop.f32.mrf.mxu1  ;;  %v7883_v51 = vsel %vm17948_vm10, %v7878_v32, %v7882_v0  ;;  %v7890_v9 = vrot.slane %v17949_v50, 1  ;;  %v17952_v0 = vshrl.u32 %v15949_v53, 16  ;;  %vm17980_vm10 = vmmov %vm17938_vm1 }
 0x32e   : > { %v16311_v62 = vadd.f32 %v11003_v56, %v10951_v39 }
 0x32f   : > { %11340 = vmatpush3.bf16.msra.mxu1 %v11753_v28  ;;  %v5728_v19 = vpop.f32.mrf.mxu0  ;;  %v5328_v28 = vpop.f32.mrf.mxu1  ;;  %v7891_v63 = vsel %vm17954_vm3, %v7886_v2, %v7890_v9  ;;  %vm17986_vm3 = vmmov %vm17938_vm1 }
 0x330   : > { %11341 = vmatprep.subr.bf16.mxu1 %v11756_v36  ;;  %11302 = vmatmul.mubr.bf16.gmra.mxu0 %v8280_v18  ;;  %v16315_v31 = vadd.f32 %v5728_v19, %v5312_v16  ;;  %v8285_v18 = vrot.slane %v15931_v59, 1  ;;  %v8283_v16 = vrot.slane %v15929_v41, 1  ;;  %v7894_v19 = vor.u32 %v17952_v0, %v7890_v9  ;;  %v11765_v59 = vld [vmem:[%s17019_s3 + $0x200] sm:$0xff]  }
 0x331   : > { %11305 = vmatprep.mubr.bf16.mxu0 %v8282_v47  ;;  %v11004_v39 = vpop.f32.mrf.mxu0  ;;  %v10956_v32 = vpop.f32.mrf.mxu1  ;;  %v17957_v9 = vshll.u32 %v15964_v34, 16  ;;  %v17958_v0 = vshrl.u32 %v15962_v21, 16 }
 0x332   : > { %11254 = vmatmul.mubr.bf16.gmra.mxu1 %v7875_v6  ;;  %v17951_v6 = vshll.u32 %v15962_v21, 16  ;;  %v16325_v47 = vadd.f32 %v11004_v39, %v10952_v25  ;;  %v8284_v61 = vsel %vm17953_vm0, %v8281_v40, %v8283_v16  ;;  %v8286_v41 = vsel %vm17955_vm5, %v8283_v16, %v8285_v18  ;;  %vm17987_vm5 = vmmov %vm17953_vm0 }
 0x333   : > { %11257 = vmatprep.mubr.bf16.mxu1 %v7883_v51  ;;  %11342 = vmatpush3.bf16.msra.mxu1 %v11756_v36  ;;  %v5731_v36 = vpop.f32.mrf.mxu0  ;;  %v5331_v51 = vpop.f32.mrf.mxu1  ;;  %v7906_v2 = vrot.slane %v17957_v9, 1 }
 0x334   : > { %11343 = vmatprep.subr.bf16.mxu1 %v11759_v22  ;;  %v7898_v56 = vrot.slane %v17951_v6, 1  ;;  %v16330_v50 = vadd.f32 %v5731_v36, %v5315_v48 }
 0x335   : > { %v11007_v25 = vpop.f32.mrf.mxu0  ;;  %v10959_v39 = vpop.f32.mrf.mxu1 }
 0x336   : > { %v7899_v6 = vsel %vm17956_vm8, %v7894_v19, %v7898_v56  ;;  %v8289_v19 = vrot.slane %v15962_v21, 1  ;;  %vm17988_vm8 = vmmov %vm17938_vm1 }
 0x337   : > { %11344 = vmatpush3.bf16.msra.mxu1 %v11759_v22  ;;  %v16339_v22 = vadd.f32 %v11007_v25, %v10955_v17  ;;  %v5744_v40 = vpop.f32.mrf.mxu0  ;;  %v5344_v48 = vpop.f32.mrf.mxu1  ;;  %v17959_v17 = vshll.u32 %v15966_v30, 16 }
 0x338   : > { %11345 = vmatprep.subr.bf16.mxu1 %v11762_v37  ;;  %11306 = vmatmul.mubr.bf16.gmra.mxu0 %v8284_v61  ;;  %v16343_v36 = vadd.f32 %v5744_v40, %v5328_v28  ;;  %v7902_v61 = vor.u32 %v17958_v0, %v7898_v56  ;;  %v17960_v28 = vshrl.u32 %v15964_v34, 16 }
 0x339   : > { %11309 = vmatprep.mubr.bf16.mxu0 %v8286_v41  ;;  %v11008_v16 = vpop.f32.mrf.mxu0  ;;  %v7914_v25 = vrot.slane %v17959_v17, 1 }
 0x33a   : > { %11258 = vmatmul.mubr.bf16.gmra.mxu1 %v7891_v63  ;;  %v10960_v63 = vpop.f32.mrf.mxu1  ;;  %v16350_v41 = vadd.f32 %v11008_v16, %v10956_v32  ;;  %v7907_v0 = vsel %vm17962_vm4, %v7902_v61, %v7906_v2  ;;  %vm17991_vm4 = vmmov %vm17953_vm0 }
 0x33b   : > { %11261 = vmatprep.mubr.bf16.mxu1 %v7899_v6  ;;  %11346 = vmatpush3.bf16.msra.mxu1 %v11762_v37  ;;  %v8287_v6 = vrot.slane %v15949_v53, 1  ;;  %v5747_v10 = vpop.f32.mrf.mxu0  ;;  %v7910_v37 = vor.u32 %v17960_v28, %v7906_v2  ;;  %v17966_v2 = vshrl.u32 %v15966_v30, 16 }
 0x33c   : > { %11347 = vmatprep.subr.bf16.mxu1 %v11765_v59  ;;  %v5347_v9 = vpop.f32.mrf.mxu1  ;;  %v16355_v40 = vadd.f32 %v5747_v10, %v5331_v51  ;;  %v17965_v10 = vshll.u32 %v15978_v11, 16 }
 0x33d   : > { %v8288_v56 = vsel %vm17961_vm12, %v8285_v18, %v8287_v6  ;;  %v11011_v21 = vpop.f32.mrf.mxu0  ;;  %v8290_v17 = vsel %vm17963_vm2, %v8287_v6, %v8289_v19  ;;  %v7915_v53 = vsel %vm17964_vm7, %v7910_v37, %v7914_v25  ;;  %v7918_v61 = vor.u32 %v17966_v2, %v7914_v25  ;;  %vm17990_vm12 = vmmov %vm17938_vm1 }
 0x33e   : > { %v10963_v32 = vpop.f32.mrf.mxu1  ;;  %v16361_v16 = vadd.f32 %v11011_v21, %v10959_v39  ;;  %v7922_v51 = vrot.slane %v17965_v10, 1  ;;  %v17967_v37 = vshll.u32 %v15984_v55, 16  ;;  %v17968_v10 = vshrl.u32 %v15978_v11, 16  ;;  %vm17992_vm2 = vmmov %vm17953_vm0 }
 0x33f   : > { %11348 = vmatpush3.bf16.msra.mxu1 %v11765_v59  ;;  %v5760_v28 = vpop.f32.mrf.mxu0  ;;  %vm17994_vm7 = vsmask.f32 6400 }
 0x340   : > { %11310 = vmatmul.mubr.bf16.gmra.mxu0 %v8288_v56  ;;  %v5360_v59 = vpop.f32.mrf.mxu1  ;;  %v16365_v18 = vadd.f32 %v5760_v28, %v5344_v48  ;;  %v7930_v39 = vrot.slane %v17967_v37, 1  ;;  %v7926_v48 = vor.u32 %v17968_v10, %v7922_v51  ;;  %v7923_v2 = vsel %vm17938_vm1, %v7918_v61, %v7922_v51  ;;  %vm18010_vm1 = vmmov %vm17994_vm7 }
 0x341   : > { %11313 = vmatprep.mubr.bf16.mxu0 %v8290_v17  ;;  %v11012_v56 = vpop.f32.mrf.mxu0  ;;  %v8291_v17 = vrot.slane %v15964_v34, 1  ;;  %v17973_v51 = vshrl.u32 %v15984_v55, 16 }
 0x342   : > { %11262 = vmatmul.mubr.bf16.gmra.mxu1 %v7907_v0  ;;  %v10964_v6 = vpop.f32.mrf.mxu1  ;;  %v8293_v0 = vrot.slane %v15966_v30, 1  ;;  %v16372_v21 = vadd.f32 %v11012_v56, %v10960_v63  ;;  %v7931_v63 = vsel %vm17971_vm13, %v7926_v48, %v7930_v39  ;;  %v17974_v48 = vshll.u32 %v15995_v26, 16 }
 0x343   : > { %11265 = vmatprep.mubr.bf16.mxu1 %v7915_v53  ;;  %v5763_v53 = vpop.f32.mrf.mxu0  ;;  %v8292_v25 = vsel %vm17969_vm15, %v8289_v19, %v8291_v17  ;;  %v7934_v61 = vor.u32 %v17973_v51, %v7930_v39  ;;  %vm17995_vm15 = vmmov %vm17953_vm0 }
 0x344   : > { %v5363_v43 = vpop.f32.mrf.mxu1  ;;  %v16377_v28 = vadd.f32 %v5763_v53, %v5347_v9  ;;  %v8294_v30 = vsel %vm17970_vm6, %v8291_v17, %v8293_v0  ;;  %v17972_v9 = vshll.u32 %v15986_v13, 16 }
 0x345   : > { %v11015_v54 = vpop.f32.mrf.mxu0 }
 0x346   : > { %v10967_v37 = vpop.f32.mrf.mxu1  ;;  %v16383_v34 = vadd.f32 %v11015_v54, %v10963_v32  ;;  %v7938_v53 = vrot.slane %v17972_v9, 1  ;;  %v7946_v54 = vrot.slane %v17974_v48, 1  ;;  %v17976_v9 = vshrl.u32 %v15986_v13, 16 }
 0x347   : > { %v5776_v56 = vpop.f32.mrf.mxu0 }
 0x348   : > { %11314 = vmatmul.mubr.bf16.gmra.mxu0 %v8292_v25  ;;  %v5376_v10 = vpop.f32.mrf.mxu1  ;;  %v16387_v19 = vadd.f32 %v5776_v56, %v5360_v59  ;;  %v7942_v59 = vor.u32 %v17976_v9, %v7938_v53  ;;  %v7939_v51 = vsel %vm17978_vm14, %v7934_v61, %v7938_v53  ;;  %v17982_v9 = vshrl.u32 %v15995_v26, 16 }
 0x349   : > { %11317 = vmatprep.mubr.bf16.mxu0 %v8294_v30  ;;  %v11016_v25 = vpop.f32.mrf.mxu0  ;;  %v8295_v30 = vrot.slane %v15978_v11, 1  ;;  %v17981_v11 = vshll.u32 %v16001_v15, 16 }
 0x34a   : > { %11266 = vmatmul.mubr.bf16.gmra.mxu1 %v7923_v2  ;;  %v10968_v17 = vpop.f32.mrf.mxu1  ;;  %v8297_v2 = vrot.slane %v15984_v55, 1  ;;  %v16394_v32 = vadd.f32 %v11016_v25, %v10964_v6  ;;  %v7947_v6 = vsel %vm17980_vm10, %v7942_v59, %v7946_v54  ;;  %v7950_v59 = vor.u32 %v17982_v9, %v7946_v54 }
 0x34b   : > { %11269 = vmatprep.mubr.bf16.mxu1 %v7931_v63  ;;  %v5779_v63 = vpop.f32.mrf.mxu0  ;;  %v8296_v39 = vsel %vm17977_vm11, %v8293_v0, %v8295_v30  ;;  %v7954_v25 = vrot.slane %v17981_v11, 1  ;;  %v16410_v0 = vld [vmem:[#allocation2 + $0xa8] ss:$0 sps:$4 sm:$0x11]   ;;  %v8299_v11 = vrot.slane %v15986_v13, 1 }
 0x34c   : > { %17975 = vst [vmem:[#allocation82_spill] sm:$0xff] %v16394_v32  ;;  %v5379_v38 = vpop.f32.mrf.mxu1  ;;  %v16399_v56 = vadd.f32 %v5779_v63, %v5363_v43  ;;  %v8298_v55 = vsel %vm17979_vm9, %v8295_v30, %v8297_v2 }
 0x34d   : > { %v11019_v24 = vpop.f32.mrf.mxu0 }
 0x34e   : > { %v11039_v48 = vpop.f32.mrf.mxu1  ;;  %v16407_v32 = vadd.f32 %v11019_v24, %v10967_v37  ;;  %v8301_v24 = vrot.slane %v15995_v26, 1  ;;  %v17983_v37 = vshrl.u32 %v16001_v15, 16  ;;  %v8613_v26 = vshll.u32 %v16233_v29, 16 }
 0x34f   : > { %v6159_v43 = vadd.f32 %v11039_v48, %v16202_v7  ;;  %v5792_v53 = vpop.f32.mrf.mxu0  ;;  %v17984_v7 = vshll.u32 %v16011_v27, 16 }
 0x350   : > { %11318 = vmatmul.mubr.bf16.gmra.mxu0 %v8296_v39  ;;  %v6014_v61 = vpop.f32.mrf.mxu1  ;;  %v16412_v63 = vadd.f32 %v5792_v53, %v5376_v10  ;;  %v8302_v13 = vsel %vm17987_vm5, %v8299_v11, %v8301_v24 }
 0x351   : > { %11321 = vmatprep.mubr.bf16.mxu0 %v8298_v55  ;;  %v6157_v30 = vadd.f32 %v6014_v61, %v16204_v12  ;;  %v11020_v39 = vpop.f32.mrf.mxu0  ;;  %v7958_v55 = vor.u32 %v17983_v37, %v7954_v25  ;;  %v7962_v48 = vrot.slane %v17984_v7, 1  ;;  %v7968_v12 = vshll.u32 %v16410_v0, 16 }
 0x352   : > { %11270 = vmatmul.mubr.bf16.gmra.mxu1 %v7939_v51  ;;  %v11040_v51 = vpop.f32.mrf.mxu1  ;;  %v8610_v61 = vshrl.u32 %v16233_v29, 16  ;;  %v8300_v37 = vsel %vm17953_vm0, %v8297_v2, %v8299_v11  ;;  %v17989_v29 = vshrl.u32 %v16011_v27, 16 }
 0x353   : > { %11273 = vmatprep.mubr.bf16.mxu1 %v7947_v6  ;;  %v16422_v6 = vadd.f32 %v11020_v39, %v10968_v17  ;;  %v6160_v10 = vadd.f32 %v11040_v51, %v16207_v5  ;;  %v5795_v53 = vpop.f32.mrf.mxu0  ;;  %v7955_v17 = vsel %vm17986_vm3, %v7950_v59, %v7954_v25  ;;  %v7963_v51 = vsel %vm17988_vm8, %v7958_v55, %v7962_v48 }
 0x354   : > { %v6017_v54 = vpop.f32.mrf.mxu1  ;;  %v16429_v9 = vadd.f32 %v5795_v53, %v5379_v38  ;;  %v7966_v2 = vor.u32 %v17989_v29, %v7962_v48  ;;  %v8612_v59 = vrot.slane %v8610_v61, 1 }
 0x355   : > { %17985 = vst [vmem:[#allocation83_spill] sm:$0xff] %v16422_v6  ;;  %v6158_v7 = vadd.f32 %v6017_v54, %v16216_v20  ;;  %v11091_v39 = vpop.f32.mrf.mxu0  ;;  %v7970_v20 = vrot.slane %v7968_v12, 1  ;;  %v8615_v54 = vrot.slane %v8613_v26, 2 }
 0x356   : > { %v11043_v5 = vpop.f32.mrf.mxu1  ;;  %v16436_v6 = vadd.f32 %v11091_v39, %v6159_v43  ;;  %v8303_v43 = vrot.slane %v16001_v15, 1  ;;  %v8305_v39 = vrot.slane %v16011_v27, 1 }
 0x357   : > { %v6163_v38 = vadd.f32 %v11043_v5, %v16220_v44  ;;  %v6610_v53 = vpop.f32.mrf.mxu0  ;;  %v7971_v48 = vsel %vm17990_vm12, %v7966_v2, %v7970_v20  ;;  %v8616_v61 = vor.u32 %v8615_v54, %v8612_v59 }
 0x358   : > { %11322 = vmatmul.mubr.bf16.gmra.mxu0 %v8300_v37  ;;  %v6030_v25 = vpop.f32.mrf.mxu1  ;;  %v16441_v37 = vadd.f32 %v6610_v53, %v6157_v30  ;;  %v8304_v30 = vsel %vm17991_vm4, %v8301_v24, %v8303_v43  ;;  %v8306_v15 = vsel %vm17992_vm2, %v8303_v43, %v8305_v39 }
 0x359   : > { %11325 = vmatprep.mubr.bf16.mxu0 %v8302_v13  ;;  %v6161_v11 = vadd.f32 %v6030_v25, %v16223_v3 }
 0x35a   : > { %11274 = vmatmul.mubr.bf16.gmra.mxu1 %v7955_v17  ;;  %v11092_v17 = vpop.f32.mrf.mxu0  ;;  %v11044_v55 = vpop.f32.mrf.mxu1 }
 0x35b   : > { %11277 = vmatprep.mubr.bf16.mxu1 %v7963_v51  ;;  %v16446_v44 = vadd.f32 %v11092_v17, %v6160_v10  ;;  %v6164_v13 = vadd.f32 %v11044_v55, %v16230_v49  ;;  %v17993_v10 = vld [vmem:[#allocation68_spill] sm:$0xff] }
 0x35c   : > { %v6613_v12 = vpop.f32.mrf.mxu0  ;;  %v6033_v5 = vpop.f32.mrf.mxu1  ;;  %v8620_v49 = vsel %vm17994_vm7, %v8616_v61, %v17993_v10 }
 0x35d   : > { %v16450_v26 = vadd.f32 %v6613_v12, %v6158_v7  ;;  %v6162_v3 = vadd.f32 %v6033_v5, %v16239_v33  ;;  %v8307_v7 = vrot.slane %v16410_v0, 1  ;;  %v17996_v12 = vld [vmem:[#allocation40_spill] sm:$0xff]  ;;  %v17997_v5 = vld [vmem:[#allocation37_spill] sm:$0xff] }
 0x35e   : > { %v11095_v51 = vpop.f32.mrf.mxu0  ;;  %v11047_v27 = vpop.f32.mrf.mxu1 }
 0x35f   : > { %v16457_v29 = vadd.f32 %v11095_v51, %v6163_v38  ;;  %v6167_v2 = vadd.f32 %v11047_v27, %v16244_v52  ;;  %v8308_v38 = vsel %vm17995_vm15, %v8305_v39, %v8307_v7 }
 0x360   : > { %11326 = vmatmul.mubr.bf16.gmra.mxu0 %v8304_v30  ;;  %v6626_v24 = vpop.f32.mrf.mxu0  ;;  %v6046_v20 = vpop.f32.mrf.mxu1 }
 0x361   : > { %11329 = vmatprep.mubr.bf16.mxu0 %v8306_v15  ;;  %v16461_v33 = vadd.f32 %v6626_v24, %v6161_v11  ;;  %v6165_v53 = vadd.f32 %v6046_v20, %v16255_v45  ;;  %v17998_v24 = vld [vmem:[#allocation29_spill] sm:$0xff] }
 0x362   : > { %11278 = vmatmul.mubr.bf16.gmra.mxu1 %v7971_v48  ;;  %v11096_v25 = vpop.f32.mrf.mxu0  ;;  %v11048_v59 = vpop.f32.mrf.mxu1 }
 0x363   : > { %11349 = vmatprep.mubr.bf16.mxu1 %v8620_v49  ;;  %v16464_v54 = vadd.f32 %v11096_v25, %v6164_v13  ;;  %v6168_v17 = vadd.f32 %v11048_v59, %v16258_v23 }
 0x364   : > { %v6629_v55 = vpop.f32.mrf.mxu0  ;;  %v6049_v43 = vpop.f32.mrf.mxu1 }
 0x365   : > { %v16468_v52 = vadd.f32 %v6629_v55, %v6162_v3  ;;  %v6166_v0 = vadd.f32 %v6049_v43, %v16268_v42 }
 0x366   : > { %v11099_v48 = vpop.f32.mrf.mxu0  ;;  %v11051_v11 = vpop.f32.mrf.mxu1 }
 0x367   : > { %v16472_v45 = vadd.f32 %v11099_v48, %v6167_v2  ;;  %v6171_v13 = vadd.f32 %v11051_v11, %v16276_v8 }
 0x368   : > { %11330 = vmatmul.mubr.bf16.gmra.mxu0 %v8308_v38  ;;  %v6642_v23 = vpop.f32.mrf.mxu0  ;;  %v6062_v61 = vpop.f32.mrf.mxu1 }
 0x369   : > { %v16476_v39 = vadd.f32 %v6642_v23, %v6165_v53  ;;  %v6169_v30 = vadd.f32 %v6062_v61, %v16285_v14  ;;  %v17999_v53 = vld [vmem:[#allocation9_spill] sm:$0xff] }
 0x36a   : > { %11350 = vmatmul.mubr.bf16.vlgmr.msra.gmra.mxu1 %v17996_v12  ;;  %v11100_v3 = vpop.f32.mrf.mxu0  ;;  %v11052_v51 = vpop.f32.mrf.mxu1 }
 0x36b   : > { %11353 = vmatprep.mubr.bf16.mxu1 %v17997_v5  ;;  %v16479_v42 = vadd.f32 %v11100_v3, %v6168_v17  ;;  %v6172_v15 = vadd.f32 %v11052_v51, %v16289_v57 }
 0x36c   : > { %v6645_v27 = vpop.f32.mrf.mxu0  ;;  %v6065_v10 = vpop.f32.mrf.mxu1 }
 0x36d   : > { %v16482_v49 = vadd.f32 %v6645_v27, %v6166_v0  ;;  %v6170_v8 = vadd.f32 %v6065_v10, %v16299_v1 }
 0x36e   : > { %v11103_v2 = vpop.f32.mrf.mxu0  ;;  %v11055_v7 = vpop.f32.mrf.mxu1 }
 0x36f   : > { %v16486_v20 = vadd.f32 %v11103_v2, %v6171_v13  ;;  %v6175_v14 = vadd.f32 %v11055_v7, %v16311_v62 }
 0x370   : > { %v6658_v25 = vpop.f32.mrf.mxu0  ;;  %v6078_v59 = vpop.f32.mrf.mxu1 }
 0x371   : > { %v16490_v17 = vadd.f32 %v6658_v25, %v6169_v30  ;;  %v6173_v57 = vadd.f32 %v6078_v59, %v16315_v31 }
 0x372   : > { %11354 = vmatmul.mubr.bf16.gmra.mxu1 %v17998_v24  ;;  %v11104_v38 = vpop.f32.mrf.mxu0  ;;  %v11056_v55 = vpop.f32.mrf.mxu1 }
 0x373   : > { %11357 = vmatprep.mubr.bf16.mxu1 %v17999_v53  ;;  %v16493_v43 = vadd.f32 %v11104_v38, %v6172_v15  ;;  %v6176_v1 = vadd.f32 %v11056_v55, %v16325_v47 }
 0x374   : > { %v6661_v0 = vpop.f32.mrf.mxu0  ;;  %v6081_v48 = vpop.f32.mrf.mxu1 }
 0x375   : > { %v16496_v11 = vadd.f32 %v6661_v0, %v6170_v8  ;;  %v6174_v62 = vadd.f32 %v6081_v48, %v16330_v50  ;;  %v18000_v0 = vld [vmem:[#allocation51_spill] sm:$0xff] }
 0x376   : > { %v11107_v12 = vpop.f32.mrf.mxu0  ;;  %v11059_v13 = vpop.f32.mrf.mxu1 }
 0x377   : > { %v16500_v5 = vadd.f32 %v11107_v12, %v6175_v14  ;;  %v6179_v31 = vadd.f32 %v11059_v13, %v16339_v22 }
 0x378   : > { %v6674_v23 = vpop.f32.mrf.mxu0  ;;  %v6094_v61 = vpop.f32.mrf.mxu1 }
 0x379   : > { %v16504_v30 = vadd.f32 %v6674_v23, %v6173_v57  ;;  %v6177_v47 = vadd.f32 %v6094_v61, %v16343_v36 }
 0x37a   : > { %11358 = vmatmul.mubr.bf16.gmra.mxu1 %v16096_v60  ;;  %v11108_v3 = vpop.f32.mrf.mxu0  ;;  %v11060_v51 = vpop.f32.mrf.mxu1 }
 0x37b   : > { %11361 = vmatprep.mubr.bf16.mxu1 %v16115_v35  ;;  %v16507_v15 = vadd.f32 %v11108_v3, %v6176_v1  ;;  %v6180_v50 = vadd.f32 %v11060_v51, %v16350_v41 }
 0x37c   : > { %v6677_v27 = vpop.f32.mrf.mxu0  ;;  %v6097_v60 = vpop.f32.mrf.mxu1 }
 0x37d   : > { %v16510_v10 = vadd.f32 %v6677_v27, %v6174_v62  ;;  %v6178_v22 = vadd.f32 %v6097_v60, %v16355_v40  ;;  %v18002_v27 = vld [vmem:[#allocation44_spill] sm:$0xff] }
 0x37e   : > { %v11111_v8 = vpop.f32.mrf.mxu0  ;;  %v11063_v35 = vpop.f32.mrf.mxu1 }
 0x37f   : > { %v16514_v2 = vadd.f32 %v11111_v8, %v6179_v31  ;;  %v6183_v36 = vadd.f32 %v11063_v35, %v16361_v16 }
 0x380   : > { %v6690_v7 = vpop.f32.mrf.mxu0  ;;  %v6110_v24 = vpop.f32.mrf.mxu1 }
 0x381   : > { %v16518_v14 = vadd.f32 %v6690_v7, %v6177_v47  ;;  %v6181_v41 = vadd.f32 %v6110_v24, %v16365_v18 }
 0x382   : > { %11362 = vmatmul.mubr.bf16.gmra.mxu1 %v16122_v4  ;;  %v11112_v53 = vpop.f32.mrf.mxu0  ;;  %v11064_v25 = vpop.f32.mrf.mxu1 }
 0x383   : > { %11365 = vmatprep.mubr.bf16.mxu1 %v16125_v46  ;;  %v16521_v59 = vadd.f32 %v11112_v53, %v6180_v50  ;;  %v6184_v40 = vadd.f32 %v11064_v25, %v16372_v21 }
 0x384   : > { %v6693_v57 = vpop.f32.mrf.mxu0  ;;  %v6113_v4 = vpop.f32.mrf.mxu1 }
 0x385   : > { %v16524_v38 = vadd.f32 %v6693_v57, %v6178_v22  ;;  %v6182_v16 = vadd.f32 %v6113_v4, %v16377_v28  ;;  %v18001_v28 = vld [vmem:[#allocation82_spill] sm:$0xff]  ;;  %v18003_v22 = vld [vmem:[#allocation56_spill] sm:$0xff] }
 0x386   : > { %v11115_v55 = vpop.f32.mrf.mxu0  ;;  %v11067_v46 = vpop.f32.mrf.mxu1 }
 0x387   : > { %v16528_v1 = vadd.f32 %v11115_v55, %v6183_v36  ;;  %v6187_v18 = vadd.f32 %v11067_v46, %v16383_v34 }
 0x388   : > { %v6706_v48 = vpop.f32.mrf.mxu0  ;;  %v6126_v62 = vpop.f32.mrf.mxu1 }
 0x389   : > { %v16532_v12 = vadd.f32 %v6706_v48, %v6181_v41  ;;  %v6185_v21 = vadd.f32 %v6126_v62, %v16387_v19  ;;  %v18006_v48 = vld [vmem:[#allocation38_spill] sm:$0xff] }
 0x38a   : > { %11366 = vmatmul.mubr.bf16.gmra.mxu1 %v16130_v58  ;;  %v11116_v13 = vpop.f32.mrf.mxu0  ;;  %v11068_v31 = vpop.f32.mrf.mxu1 }
 0x38b   : > { %11369 = vmatprep.mubr.bf16.mxu1 %v18000_v0  ;;  %v16535_v23 = vadd.f32 %v11116_v13, %v6184_v40  ;;  %v6188_v61 = vadd.f32 %v11068_v31, %v18001_v28  ;;  %v11767_v40 = vld [vmem:[#allocation2 + $0xa8] ss:$0 sps:$4 sm:$0x33]  }
 0x38c   : > { %v6709_v47 = vpop.f32.mrf.mxu0  ;;  %v6129_v58 = vpop.f32.mrf.mxu1  ;;  %v8686_v62 = vshrl.u32 %v11767_v40, 16 }
 0x38d   : > { %v16538_v3 = vadd.f32 %v6709_v47, %v6182_v16  ;;  %v6186_v34 = vadd.f32 %v6129_v58, %v16399_v56  ;;  %v18004_v56 = vld [vmem:[#allocation83_spill] sm:$0xff] }
 0x38e   : > { %v11119_v51 = vpop.f32.mrf.mxu0  ;;  %v11071_v50 = vpop.f32.mrf.mxu1 }
 0x38f   : > { %v16542_v60 = vadd.f32 %v11119_v51, %v6187_v18  ;;  %v6191_v19 = vadd.f32 %v11071_v50, %v16407_v32  ;;  %v18005_v18 = vld [vmem:[#allocation45_spill] sm:$0xff]  ;;  %v8688_v51 = vrot.slane %v8686_v62, 1 }
 0x390   : > { %v6722_v8 = vpop.f32.mrf.mxu0  ;;  %v6142_v35 = vpop.f32.mrf.mxu1 }
 0x391   : > { %v16546_v36 = vadd.f32 %v6722_v8, %v6185_v21  ;;  %v6189_v7 = vadd.f32 %v6142_v35, %v16412_v63  ;;  %v8689_v21 = vshll.u32 %v11767_v40, 16 }
 0x392   : > { %11370 = vmatmul.mubr.bf16.gmra.mxu1 %v18002_v27  ;;  %v11120_v24 = vpop.f32.mrf.mxu0  ;;  %v11072_v41 = vpop.f32.mrf.mxu1 }
 0x393   : > { %11373 = vmatprep.mubr.bf16.mxu1 %v18003_v22  ;;  %v16549_v53 = vadd.f32 %v11120_v24, %v6188_v61  ;;  %v6192_v25 = vadd.f32 %v11072_v41, %v18004_v56  ;;  %v8691_v50 = vrot.slane %v8689_v21, 2  ;;  %v18008_v41 = vld [vmem:[#allocation46_spill] sm:$0xff] }
 0x394   : > { %v6725_v57 = vpop.f32.mrf.mxu0  ;;  %v6145_v4 = vpop.f32.mrf.mxu1 }
 0x395   : > { %v16552_v16 = vadd.f32 %v6725_v57, %v6186_v34  ;;  %v6190_v32 = vadd.f32 %v6145_v4, %v16429_v9  ;;  %v8692_v56 = vor.u32 %v8691_v50, %v8688_v51 }
 0x396   : > { %v11123_v55 = vpop.f32.mrf.mxu0  ;;  %v11143_v46 = vpop.f32.mrf.mxu1 }
 0x397   : > { %v16556_v0 = vadd.f32 %v11123_v55, %v6191_v19  ;;  %v7069_v63 = vadd.f32 %v11143_v46, %v16436_v6  ;;  %v18009_v46 = vld [vmem:[#allocation57_spill] sm:$0xff] }
 0x398   : > { %v6738_v13 = vpop.f32.mrf.mxu0  ;;  %v6924_v31 = vpop.f32.mrf.mxu1 }
 0x399   : > { %v16560_v28 = vadd.f32 %v6738_v13, %v6189_v7  ;;  %v7067_v61 = vadd.f32 %v6924_v31, %v16441_v37  ;;  %v18007_v7 = vld [vmem:[#allocation53_spill] sm:$0xff] }
 0x39a   : > { %11374 = vmatmul.mubr.bf16.gmra.mxu1 %v18005_v18  ;;  %v11124_v47 = vpop.f32.mrf.mxu0  ;;  %v11144_v9 = vpop.f32.mrf.mxu1  ;;  %v8693_v18 = vsel %vm18010_vm1, %v18009_v46, %v8692_v56 }
 0x39b   : > { %11377 = vmatprep.mubr.bf16.mxu1 %v18006_v48  ;;  %v16563_v58 = vadd.f32 %v11124_v47, %v6192_v25  ;;  %v7070_v34 = vadd.f32 %v11144_v9, %v16446_v44 }
 0x39c   : > { %v6741_v27 = vpop.f32.mrf.mxu0  ;;  %v6927_v6 = vpop.f32.mrf.mxu1 }
 0x39d   : > { %v16566_v19 = vadd.f32 %v6741_v27, %v6190_v32  ;;  %v7068_v22 = vadd.f32 %v6927_v6, %v16450_v26 }
 0x39e   : > { %v11195_v8 = vpop.f32.mrf.mxu0  ;;  %v11147_v35 = vpop.f32.mrf.mxu1 }
 0x39f   : > { %v16570_v24 = vadd.f32 %v11195_v8, %v7069_v63  ;;  %v7073_v37 = vadd.f32 %v11147_v35, %v16457_v29 }
 0x3a0   : > { %v7498_v44 = vpop.f32.mrf.mxu0  ;;  %v6940_v25 = vpop.f32.mrf.mxu1 }
 0x3a1   : > { %v16574_v40 = vadd.f32 %v7498_v44, %v7067_v61  ;;  %v7071_v57 = vadd.f32 %v6940_v25, %v16461_v33 }
 0x3a2   : > { %11378 = vmatmul.mubr.bf16.gmra.mxu1 %v18007_v7  ;;  %v11196_v4 = vpop.f32.mrf.mxu0  ;;  %v11148_v32 = vpop.f32.mrf.mxu1 }
 0x3a3   : > { %11381 = vmatprep.mubr.bf16.mxu1 %v18008_v41  ;;  %v16577_v26 = vadd.f32 %v11196_v4, %v7070_v34  ;;  %v7074_v55 = vadd.f32 %v11148_v32, %v16464_v54 }
 0x3a4   : > { %v7501_v63 = vpop.f32.mrf.mxu0  ;;  %v6943_v29 = vpop.f32.mrf.mxu1 }
 0x3a5   : > { %v16582_v48 = vadd.f32 %v7501_v63, %v7068_v22  ;;  %v7072_v62 = vadd.f32 %v6943_v29, %v16468_v52 }
 0x3a6   : > { %v11199_v21 = vpop.f32.mrf.mxu0  ;;  %v11151_v13 = vpop.f32.mrf.mxu1 }
 0x3a7   : > { %v16585_v31 = vadd.f32 %v11199_v21, %v7073_v37  ;;  %v7077_v33 = vadd.f32 %v11151_v13, %v16472_v45 }
 0x3a8   : > { %v7514_v61 = vpop.f32.mrf.mxu0  ;;  %v6956_v47 = vpop.f32.mrf.mxu1 }
 0x3a9   : > { %v16588_v9 = vadd.f32 %v7514_v61, %v7071_v57  ;;  %v7075_v54 = vadd.f32 %v6956_v47, %v16476_v39 }
 0x3aa   : > { %11382 = vmatmul.mubr.bf16.gmra.mxu1 %v8693_v18  ;;  %v11200_v34 = vpop.f32.mrf.mxu0  ;;  %v11152_v51 = vpop.f32.mrf.mxu1 }
 0x3ab   : > { %v16591_v50 = vadd.f32 %v11200_v34, %v7074_v55  ;;  %v7078_v27 = vadd.f32 %v11152_v51, %v16479_v42 }
 0x3ac   : > { %v7517_v52 = vpop.f32.mrf.mxu0  ;;  %v6959_v6 = vpop.f32.mrf.mxu1 }
 0x3ad   : > { %v16594_v22 = vadd.f32 %v7517_v52, %v7072_v62  ;;  %v7076_v8 = vadd.f32 %v6959_v6, %v16482_v49 }
 0x3ae   : > { %v11203_v35 = vpop.f32.mrf.mxu0  ;;  %v11155_v45 = vpop.f32.mrf.mxu1 }
 0x3af   : > { %v16597_v7 = vadd.f32 %v11203_v35, %v7077_v33  ;;  %v7081_v37 = vadd.f32 %v11155_v45, %v16486_v20 }
 0x3b0   : > { %v7530_v41 = vpop.f32.mrf.mxu0  ;;  %v6972_v39 = vpop.f32.mrf.mxu1 }
 0x3b1   : > { %v16600_v56 = vadd.f32 %v7530_v41, %v7075_v54  ;;  %v7079_v44 = vadd.f32 %v6972_v39, %v16490_v17 }
 0x3b2   : > { %v11204_v25 = vpop.f32.mrf.mxu0  ;;  %v11156_v42 = vpop.f32.mrf.mxu1 }
 0x3b3   : > { %v16603_v57 = vadd.f32 %v11204_v25, %v7078_v27  ;;  %v7082_v4 = vadd.f32 %v11156_v42, %v16493_v43 }
 0x3b4   : > { %v7533_v32 = vpop.f32.mrf.mxu0  ;;  %v6975_v49 = vpop.f32.mrf.mxu1 }
 0x3b5   : > { %v16606_v55 = vadd.f32 %v7533_v32, %v7076_v8  ;;  %v7080_v46 = vadd.f32 %v6975_v49, %v16496_v11 }
 0x3b6   : > { %v11207_v18 = vpop.f32.mrf.mxu0  ;;  %v11159_v20 = vpop.f32.mrf.mxu1 }
 0x3b7   : > { %v16609_v63 = vadd.f32 %v11207_v18, %v7081_v37  ;;  %v7085_v29 = vadd.f32 %v11159_v20, %v16500_v5 }
 0x3b8   : > { %v7546_v62 = vpop.f32.mrf.mxu0  ;;  %v6988_v17 = vpop.f32.mrf.mxu1 }
 0x3b9   : > { %v16612_v21 = vadd.f32 %v7546_v62, %v7079_v44  ;;  %v7083_v13 = vadd.f32 %v6988_v17, %v16504_v30 }
 0x3ba   : > { %v11208_v33 = vpop.f32.mrf.mxu0  ;;  %v11160_v43 = vpop.f32.mrf.mxu1 }
 0x3bb   : > { %v16615_v61 = vadd.f32 %v11208_v33, %v7082_v4  ;;  %v7086_v47 = vadd.f32 %v11160_v43, %v16507_v15 }
 0x3bc   : > { %v7549_v54 = vpop.f32.mrf.mxu0  ;;  %v6991_v11 = vpop.f32.mrf.mxu1 }
 0x3bd   : > { %v16618_v34 = vadd.f32 %v7549_v54, %v7080_v46  ;;  %v7084_v51 = vadd.f32 %v6991_v11, %v16510_v10 }
 0x3c0   : > { %v11211_v27 = vpop.f32.mrf.mxu0 }
 0x3c1   : > { %v16621_v52 = vadd.f32 %v11211_v27, %v7085_v29 }
 0x3c2   : > { %v11163_v5 = vpop.f32.mrf.mxu1  ;;  %v7562_v8 = vpop.f32.mrf.mxu0 }
 0x3c3   : > { %v7089_v6 = vadd.f32 %v11163_v5, %v16514_v2  ;;  %v16624_v35 = vadd.f32 %v7562_v8, %v7083_v13 }
 0x3c4   : > { %v7004_v30 = vpop.f32.mrf.mxu1  ;;  %v11212_v37 = vpop.f32.mrf.mxu0 }
 0x3c5   : > { %v7087_v45 = vadd.f32 %v7004_v30, %v16518_v14  ;;  %v16627_v41 = vadd.f32 %v11212_v37, %v7086_v47 }
 0x3c6   : > { %v11164_v15 = vpop.f32.mrf.mxu1  ;;  %v7565_v44 = vpop.f32.mrf.mxu0 }
 0x3c7   : > { %v7090_v39 = vadd.f32 %v11164_v15, %v16521_v59  ;;  %v16630_v25 = vadd.f32 %v7565_v44, %v7084_v51 }
 0x3c8   : > { %v7007_v10 = vpop.f32.mrf.mxu1  ;;  %v11215_v4 = vpop.f32.mrf.mxu0 }
 0x3c9   : > { %v7088_v42 = vadd.f32 %v7007_v10, %v16524_v38  ;;  %v16633_v32 = vadd.f32 %v11215_v4, %v7089_v6 }
 0x3ca   : > { %v11167_v2 = vpop.f32.mrf.mxu1  ;;  %v7578_v46 = vpop.f32.mrf.mxu0 }
 0x3cb   : > { %v7093_v49 = vadd.f32 %v11167_v2, %v16528_v1  ;;  %v16636_v18 = vadd.f32 %v7578_v46, %v7087_v45 }
 0x3cc   : > { %v7020_v14 = vpop.f32.mrf.mxu1  ;;  %v11216_v29 = vpop.f32.mrf.mxu0 }
 0x3cd   : > { %v7091_v20 = vadd.f32 %v7020_v14, %v16532_v12  ;;  %v16639_v62 = vadd.f32 %v11216_v29, %v7090_v39 }
 0x3ce   : > { %v11168_v59 = vpop.f32.mrf.mxu1  ;;  %v7581_v13 = vpop.f32.mrf.mxu0 }
 0x3cf   : > { %v7094_v17 = vadd.f32 %v11168_v59, %v16535_v23  ;;  %v16642_v33 = vadd.f32 %v7581_v13, %v7088_v42 }
 0x3d0   : > { %v7023_v38 = vpop.f32.mrf.mxu1  ;;  %v11219_v47 = vpop.f32.mrf.mxu0 }
 0x3d1   : > { %v7092_v43 = vadd.f32 %v7023_v38, %v16538_v3  ;;  %v16645_v54 = vadd.f32 %v11219_v47, %v7093_v49 }
 0x3d2   : > { %v11171_v1 = vpop.f32.mrf.mxu1  ;;  %v7594_v51 = vpop.f32.mrf.mxu0 }
 0x3d3   : > { %v7097_v11 = vadd.f32 %v11171_v1, %v16542_v60  ;;  %v16648_v27 = vadd.f32 %v7594_v51, %v7091_v20 }
 0x3d4   : > { %v7036_v12 = vpop.f32.mrf.mxu1  ;;  %v11220_v6 = vpop.f32.mrf.mxu0 }
 0x3d5   : > { %v7095_v5 = vadd.f32 %v7036_v12, %v16546_v36  ;;  %v16651_v8 = vadd.f32 %v11220_v6, %v7094_v17 }
 0x3d6   : > { %v11172_v23 = vpop.f32.mrf.mxu1  ;;  %v7597_v45 = vpop.f32.mrf.mxu0 }
 0x3d7   : > { %v7098_v30 = vadd.f32 %v11172_v23, %v16549_v53  ;;  %v16654_v37 = vadd.f32 %v7597_v45, %v7092_v43 }
 0x3d8   : > { %v7039_v3 = vpop.f32.mrf.mxu1  ;;  %v11223_v39 = vpop.f32.mrf.mxu0 }
 0x3d9   : > { %v7096_v15 = vadd.f32 %v7039_v3, %v16552_v16  ;;  %v16657_v44 = vadd.f32 %v11223_v39, %v7097_v11 }
 0x3da   : > { %v11175_v60 = vpop.f32.mrf.mxu1  ;;  %v7610_v42 = vpop.f32.mrf.mxu0 }
 0x3db   : > { %v7101_v10 = vadd.f32 %v11175_v60, %v16556_v0  ;;  %v16660_v4 = vadd.f32 %v7610_v42, %v7095_v5 }
 0x3dc   : > { %v7052_v36 = vpop.f32.mrf.mxu1  ;;  %v11224_v49 = vpop.f32.mrf.mxu0 }
 0x3dd   : > { %v7099_v2 = vadd.f32 %v7052_v36, %v16560_v28  ;;  %v16663_v46 = vadd.f32 %v11224_v49, %v7098_v30 }
 0x3de   : > { %v11176_v53 = vpop.f32.mrf.mxu1  ;;  %v7613_v20 = vpop.f32.mrf.mxu0 }
 0x3df   : > { %v7102_v14 = vadd.f32 %v11176_v53, %v16563_v58  ;;  %v16666_v29 = vadd.f32 %v7613_v20, %v7096_v15 }
 0x3e0   : > { %v7055_v16 = vpop.f32.mrf.mxu1  ;;  %v11227_v17 = vpop.f32.mrf.mxu0 }
 0x3e1   : > { %v7100_v59 = vadd.f32 %v7055_v16, %v16566_v19  ;;  %v16669_v13 = vadd.f32 %v11227_v17, %v7101_v10 }
 0x3e2   : > { %v11247_v0 = vpop.f32.mrf.mxu1  ;;  %v7626_v28 = vpop.f32.mrf.mxu0 }
 0x3e3   : > { %v16672_v38 = vadd.f32 %v11247_v0, %v16570_v24  ;;  %v16674_v47 = vadd.f32 %v7626_v28, %v7099_v2 }
 0x3e4   : > { %v8072_v43 = vpop.f32.mrf.mxu1  ;;  %v11228_v58 = vpop.f32.mrf.mxu0 }
 0x3e5   : > { %v16677_v1 = vadd.f32 %v8072_v43, %v16574_v40  ;;  %v16679_v51 = vadd.f32 %v11228_v58, %v7102_v14 }
 0x3e6   : > { %v11248_v11 = vpop.f32.mrf.mxu1  ;;  %v7629_v12 = vpop.f32.mrf.mxu0 }
 0x3e7   : > { %v16682_v19 = vadd.f32 %v11248_v11, %v16577_v26  ;;  %v16684_v6 = vadd.f32 %v7629_v12, %v7100_v59 }
 0x3e8   : > { %v8075_v5 = vpop.f32.mrf.mxu1  ;;  %v16689_v23 = vpop.f32.mrf.mxu0 }
 0x3e9   : > { %v16687_v24 = vadd.f32 %v8075_v5, %v16582_v48 }
 0x3ea   : > { %v11251_v30 = vpop.f32.mrf.mxu1  ;;  %v16694_v45 = vpop.f32.mrf.mxu0 }
 0x3eb   : > { %v16692_v40 = vadd.f32 %v11251_v30, %v16585_v31 }
 0x3ec   : > { %v8088_v3 = vpop.f32.mrf.mxu1  ;;  %v16699_v26 = vpop.f32.mrf.mxu0 }
 0x3ed   : > { %v16697_v15 = vadd.f32 %v8088_v3, %v16588_v9 }
 0x3ee   : > { %v11252_v39 = vpop.f32.mrf.mxu1  ;;  %v16704_v48 = vpop.f32.mrf.mxu0 }
 0x3ef   : > { %v16702_v60 = vadd.f32 %v11252_v39, %v16591_v50 }
 0x3f0   : > { %v8091_v10 = vpop.f32.mrf.mxu1  ;;  %v16709_v31 = vpop.f32.mrf.mxu0 }
 0x3f1   : > { %v16707_v42 = vadd.f32 %v8091_v10, %v16594_v22 }
 0x3f2   : > { %v11255_v36 = vpop.f32.mrf.mxu1  ;;  %v16714_v9 = vpop.f32.mrf.mxu0 }
 0x3f3   : > { %v16712_v2 = vadd.f32 %v11255_v36, %v16597_v7 }
 0x3f4   : > { %v8104_v49 = vpop.f32.mrf.mxu1  ;;  %v16719_v14 = vpop.f32.mrf.mxu0 }
 0x3f5   : > { %v16717_v53 = vadd.f32 %v8104_v49, %v16600_v56 }
 0x3f6   : > { %v11256_v50 = vpop.f32.mrf.mxu1  ;;  %v16727_v17 = vpop.f32.mrf.mxu0 }
 0x3f7   : > { %v16722_v20 = vadd.f32 %v11256_v50, %v16603_v57 }
 0x3f8   : > { %v8107_v22 = vpop.f32.mrf.mxu1  ;;  %v16735_v43 = vpop.f32.mrf.mxu0 }
 0x3f9   : > { %v16725_v16 = vadd.f32 %v8107_v22, %v16606_v55 }
 0x3fa   : > { %v11259_v59 = vpop.f32.mrf.mxu1  ;;  %v16743_v12 = vpop.f32.mrf.mxu0 }
 0x3fb   : > { %v16730_v7 = vadd.f32 %v11259_v59, %v16609_v63 }
 0x3fc   : > { %v8120_v0 = vpop.f32.mrf.mxu1  ;;  %v16751_v3 = vpop.f32.mrf.mxu0 }
 0x3fd   : > { %v16733_v56 = vadd.f32 %v8120_v0, %v16612_v21 }
 0x3fe   : > { %v11260_v28 = vpop.f32.mrf.mxu1  ;;  %v16759_v36 = vpop.f32.mrf.mxu0 }
 0x3ff   : > { %v16738_v57 = vadd.f32 %v11260_v28, %v16615_v61 }
 0x400   : > { %v8123_v58 = vpop.f32.mrf.mxu1  ;;  %v16767_v22 = vpop.f32.mrf.mxu0 }
 0x401   : > { %v16741_v55 = vadd.f32 %v8123_v58, %v16618_v34 }
 0x402   : > { %v11263_v11 = vpop.f32.mrf.mxu1  ;;  %v16775_v28 = vpop.f32.mrf.mxu0 }
 0x403   : > { %v16746_v63 = vadd.f32 %v11263_v11, %v16621_v52 }
 0x404   : > { %v8136_v5 = vpop.f32.mrf.mxu1 }
 0x405   : > { %v16749_v21 = vadd.f32 %v8136_v5, %v16624_v35  ;;  %v16783_v5 = vpop.f32.mrf.mxu0 }
 0x406   : > { %v11264_v30 = vpop.f32.mrf.mxu1 }
 0x407   : > { %v16754_v61 = vadd.f32 %v11264_v30, %v16627_v41 }
 0x408   : > { %v8139_v39 = vpop.f32.mrf.mxu1 }
 0x409   : > { %v16757_v34 = vadd.f32 %v8139_v39, %v16630_v25 }
 0x40a   : > { %v11267_v10 = vpop.f32.mrf.mxu1 }
 0x40b   : > { %v16762_v52 = vadd.f32 %v11267_v10, %v16633_v32  ;;  %v16791_v10 = vpop.f32.mrf.mxu0 }
 0x40c   : > { %v8152_v49 = vpop.f32.mrf.mxu1 }
 0x40d   : > { %v16765_v35 = vadd.f32 %v8152_v49, %v16636_v18 }
 0x40e   : > { %v11268_v50 = vpop.f32.mrf.mxu1 }
 0x40f   : > { %v16770_v41 = vadd.f32 %v11268_v50, %v16639_v62 }
 0x410   : > { %v8155_v59 = vpop.f32.mrf.mxu1 }
 0x411   : > { %v16773_v25 = vadd.f32 %v8155_v59, %v16642_v33  ;;  %v16799_v59 = vpop.f32.mrf.mxu0 }
 0x412   : > { %v11271_v0 = vpop.f32.mrf.mxu1 }
 0x413   : > { %v16778_v32 = vadd.f32 %v11271_v0, %v16645_v54 }
 0x414   : > { %v8168_v58 = vpop.f32.mrf.mxu1 }
 0x415   : > { %v16781_v18 = vadd.f32 %v8168_v58, %v16648_v27 }
 0x416   : > { %v11272_v11 = vpop.f32.mrf.mxu1 }
 0x417   : > { %v16786_v62 = vadd.f32 %v11272_v11, %v16651_v8  ;;  %v16807_v11 = vpop.f32.mrf.mxu0 }
 0x418   : > { %v8171_v30 = vpop.f32.mrf.mxu1 }
 0x419   : > { %v16789_v33 = vadd.f32 %v8171_v30, %v16654_v37 }
 0x41a   : > { %v11275_v39 = vpop.f32.mrf.mxu1 }
 0x41b   : > { %v16794_v54 = vadd.f32 %v11275_v39, %v16657_v44 }
 0x41c   : > { %v8184_v49 = vpop.f32.mrf.mxu1 }
 0x41d   : > { %v16797_v27 = vadd.f32 %v8184_v49, %v16660_v4  ;;  %v16815_v49 = vpop.f32.mrf.mxu0 }
 0x41e   : > { %v11276_v50 = vpop.f32.mrf.mxu1 }
 0x41f   : > { %v16802_v8 = vadd.f32 %v11276_v50, %v16663_v46 }
 0x420   : > { %v8187_v0 = vpop.f32.mrf.mxu1 }
 0x421   : > { %v16805_v37 = vadd.f32 %v8187_v0, %v16666_v29  ;;  %v8554_v29 = vadd.f32 %v16689_v23, %v16672_v38 }
 0x422   : > { %v11279_v58 = vpop.f32.mrf.mxu1 }
 0x423   : > { %18011 = vst [vmem:[#allocation10_spill] sm:$0xff] %v16805_v37  ;;  %v16810_v44 = vadd.f32 %v11279_v58, %v16669_v13  ;;  %v16828_v13 = vld [vmem:[%s17020_s4] ss:$0 sm:$0xff]  ;;  %v16832_v58 = vpop.f32.mrf.mxu0 }
 0x424   : > { %v8200_v30 = vpop.f32.mrf.mxu1 }
 0x425   : > { %v16813_v4 = vadd.f32 %v8200_v30, %v16674_v47  ;;  %v8552_v47 = vadd.f32 %v16694_v45, %v16677_v1 }
 0x426   : > { %v11280_v39 = vpop.f32.mrf.mxu1 }
 0x427   : > { %18012 = vst [vmem:[#allocation7_spill] sm:$0xff] %v16813_v4  ;;  %v16818_v46 = vadd.f32 %v11280_v39, %v16679_v51  ;;  %v8555_v39 = vadd.f32 %v16699_v26, %v16682_v19 }
 0x428   : > { %v8203_v50 = vpop.f32.mrf.mxu1 }
 0x429   : > { %18013 = vst [vmem:[#allocation48_spill] sm:$0xff] %v16818_v46  ;;  %v16823_v0 = vadd.f32 %v8203_v50, %v16684_v6  ;;  %v8553_v50 = vadd.f32 %v16704_v48, %v16687_v24 }
 0x42a   : > { %v11351_v37 = vpop.f32.mrf.mxu1 }
 0x42b   : > { %18014 = vst [vmem:[#allocation59_spill] sm:$0xff] %v16823_v0  ;;  %v8939_v51 = vadd.f32 %v11351_v37, %v8554_v29  ;;  %v16839_v0 = vpop.f32.mrf.mxu0  ;;  %v8558_v37 = vadd.f32 %v16709_v31, %v16692_v40  ;;  %v8559_v40 = vadd.f32 %v16719_v14, %v16702_v60  ;;  %v8562_v60 = vadd.f32 %v16735_v43, %v16712_v2 }
 0x42c   : > { %v8794_v30 = vpop.f32.mrf.mxu1  ;;  %v8563_v2 = vadd.f32 %v16751_v3, %v16722_v20 }
 0x42d   : > { %v8982_v38 = vadd.f32 %v16828_v13, %v8939_v51  ;;  %v8937_v6 = vadd.f32 %v8794_v30, %v8552_v47  ;;  %v8556_v51 = vadd.f32 %v16714_v9, %v16697_v15  ;;  %v16847_v24 = vpop.f32.mrf.mxu0  ;;  %v8557_v15 = vadd.f32 %v16727_v17, %v16707_v42 }
 0x42e   : > { %v11352_v23 = vpop.f32.mrf.mxu1  ;;  %v8560_v42 = vadd.f32 %v16743_v12, %v16717_v53  ;;  %v8561_v53 = vadd.f32 %v16759_v36, %v16725_v16  ;;  %v8564_v36 = vadd.f32 %v16775_v28, %v16733_v56 }
 0x42f   : > { %v9018_v46 = vmax.f32 %v8982_v38, 0.0  ;;  %v8980_v4 = vadd.f32 %v16828_v13, %v8937_v6  ;;  %v8940_v1 = vadd.f32 %v11352_v23, %v8555_v39  ;;  %v16855_v9 = vpop.f32.mrf.mxu0 }
 0x430   : > { %v8797_v45 = vpop.f32.mrf.mxu1 }
 0x431   : > { %9054 = vst [vmem:[#allocation3 + $0x10] sm:$0xff] %v9018_v46  ;;  %v9016_v29 = vmax.f32 %v8980_v4, 0.0  ;;  %v8983_v19 = vadd.f32 %v16828_v13, %v8940_v1  ;;  %v8938_v26 = vadd.f32 %v8797_v45, %v8553_v50  ;;  %v16863_v17 = vpop.f32.mrf.mxu0 }
 0x432   : > { %v11355_v47 = vpop.f32.mrf.mxu1 }
 0x433   : > { %9052 = vst [vmem:[#allocation3] sm:$0xff] %v9016_v29  ;;  %v9019_v48 = vmax.f32 %v8983_v19, 0.0  ;;  %v8981_v30 = vadd.f32 %v16828_v13, %v8938_v26  ;;  %v8943_v39 = vadd.f32 %v11355_v47, %v8558_v37  ;;  %v16872_v12 = vpop.f32.mrf.mxu0 }
 0x434   : > { %v8810_v38 = vpop.f32.mrf.mxu1 }
 0x435   : > { %9055 = vst [vmem:[#allocation3 + $0x18] sm:$0xff] %v9019_v48  ;;  %v9017_v31 = vmax.f32 %v8981_v30, 0.0  ;;  %v8986_v4 = vadd.f32 %v16828_v13, %v8943_v39  ;;  %v8941_v46 = vadd.f32 %v8810_v38, %v8556_v51 }
 0x436   : > { %v11356_v6 = vpop.f32.mrf.mxu1 }
 0x437   : > { %9053 = vst [vmem:[#allocation3 + $0x8] sm:$0xff] %v9017_v31  ;;  %v9022_v23 = vmax.f32 %v8986_v4, 0.0  ;;  %v8984_v50 = vadd.f32 %v16828_v13, %v8941_v46  ;;  %v8944_v1 = vadd.f32 %v11356_v6, %v8559_v40  ;;  %v8566_v6 = vadd.f32 %v16767_v22, %v16730_v7 }
 0x438   : > { %v8813_v45 = vpop.f32.mrf.mxu1 }
 0x439   : > { %9058 = vst [vmem:[#allocation3 + $0x30] sm:$0xff] %v9022_v23  ;;  %v9020_v14 = vmax.f32 %v8984_v50, 0.0  ;;  %v8987_v37 = vadd.f32 %v16828_v13, %v8944_v1  ;;  %v8942_v29 = vadd.f32 %v8813_v45, %v8557_v15 }
 0x43a   : > { %v11359_v19 = vpop.f32.mrf.mxu1 }
 0x43b   : > { %9056 = vst [vmem:[#allocation3 + $0x20] sm:$0xff] %v9020_v14  ;;  %v9023_v26 = vmax.f32 %v8987_v37, 0.0  ;;  %v8985_v47 = vadd.f32 %v16828_v13, %v8942_v29  ;;  %v8947_v51 = vadd.f32 %v11359_v19, %v8562_v60  ;;  %v16882_v14 = vpop.f32.mrf.mxu0  ;;  %v8567_v19 = vadd.f32 %v16783_v5, %v16738_v57 }
 0x43c   : > { %v8826_v48 = vpop.f32.mrf.mxu1 }
 0x43d   : > { %9059 = vst [vmem:[#allocation3 + $0x38] sm:$0xff] %v9023_v26  ;;  %v9021_v43 = vmax.f32 %v8985_v47, 0.0  ;;  %v8990_v30 = vadd.f32 %v16828_v13, %v8947_v51  ;;  %v8945_v39 = vadd.f32 %v8826_v48, %v8560_v42  ;;  %v8565_v48 = vadd.f32 %v16791_v10, %v16741_v55 }
 0x43e   : > { %v11360_v38 = vpop.f32.mrf.mxu1  ;;  %v9088_v40 = vld [vmem:[#allocation3] ss:$2 sm:$0xff]  ;;  %v9090_v31 = vld [vmem:[#allocation3 + $0x1] ss:$2 sm:$0xff] }
 0x43f   : > { %9057 = vst [vmem:[#allocation3 + $0x28] sm:$0xff] %v9021_v43  ;;  %v9026_v4 = vmax.f32 %v8990_v30, 0.0  ;;  %v8988_v46 = vadd.f32 %v16828_v13, %v8945_v39  ;;  %v8948_v20 = vadd.f32 %v11360_v38, %v8563_v2  ;;  %v9091_v50 = vmax.f32 %v9088_v40, %v9090_v31  ;;  %v16890_v2 = vpop.f32.mrf.mxu0 }
 0x440   : > { %v8829_v3 = vpop.f32.mrf.mxu1  ;;  %v8568_v31 = vadd.f32 %v16807_v11, %v16749_v21 }
 0x441   : > { %9062 = vst [vmem:[#allocation3 + $0x50] sm:$0xff] %v9026_v4  ;;  %v9024_v15 = vmax.f32 %v8988_v46, 0.0  ;;  %v8991_v23 = vadd.f32 %v16828_v13, %v8948_v20  ;;  %v8946_v16 = vadd.f32 %v8829_v3, %v8561_v53  ;;  %v8570_v53 = vadd.f32 %v16799_v59, %v16746_v63 }
 0x442   : > { %v9093_v1 = vld [vmem:[#allocation3 + $0x12] ss:$2 sm:$0xff]  ;;  %v9095_v45 = vld [vmem:[#allocation3 + $0x13] ss:$2 sm:$0xff]  ;;  %v11363_v60 = vpop.f32.mrf.mxu1 }
 0x443   : > { %v9096_v37 = vmax.f32 %v9093_v1, %v9095_v45  ;;  %9060 = vst [vmem:[#allocation3 + $0x40] sm:$0xff] %v9024_v15  ;;  %v9027_v29 = vmax.f32 %v8991_v23, 0.0  ;;  %v8989_v7 = vadd.f32 %v16828_v13, %v8946_v16  ;;  %v8951_v22 = vadd.f32 %v11363_v60, %v8566_v6  ;;  %v16901_v6 = vpop.f32.mrf.mxu0 }
 0x444   : > { %v8842_v42 = vpop.f32.mrf.mxu1  ;;  %v8571_v16 = vadd.f32 %v16815_v49, %v16754_v61  ;;  %v8569_v60 = vadd.f32 %v16832_v58, %v16757_v34  ;;  %v8574_v49 = vadd.f32 %v16839_v0, %v16762_v52  ;;  %v8572_v34 = vadd.f32 %v16847_v24, %v16765_v35 }
 0x445   : > { %v9097_v26 = vmax.f32 %v9091_v50, %v9096_v37  ;;  %9063 = vst [vmem:[#allocation3 + $0x58] sm:$0xff] %v9027_v29  ;;  %v9025_v47 = vmax.f32 %v8989_v7, 0.0  ;;  %v8994_v56 = vadd.f32 %v16828_v13, %v8951_v22  ;;  %v8949_v28 = vadd.f32 %v8842_v42, %v8564_v36  ;;  %v16909_v37 = vpop.f32.mrf.mxu0 }
 0x446   : > { %v11364_v51 = vpop.f32.mrf.mxu1  ;;  %v9100_v43 = vld [vmem:[#allocation3 + $0x24] ss:$2 sm:$0xff]  ;;  %v9102_v30 = vld [vmem:[#allocation3 + $0x25] ss:$2 sm:$0xff]  ;;  %v8575_v52 = vadd.f32 %v16855_v9, %v16770_v41  ;;  %v8573_v35 = vadd.f32 %v16863_v17, %v16773_v25  ;;  %v8578_v9 = vadd.f32 %v16872_v12, %v16778_v32 }
 0x447   : > { %9098 = vst [vmem:[%s16892_s15] sm:$0xff] %v9097_v26  ;;  %9061 = vst [vmem:[#allocation3 + $0x48] sm:$0xff] %v9025_v47  ;;  %v9030_v57 = vmax.f32 %v8994_v56, 0.0  ;;  %v8992_v5 = vadd.f32 %v16828_v13, %v8949_v28  ;;  %v8952_v39 = vadd.f32 %v11364_v51, %v8567_v19  ;;  %v9103_v4 = vmax.f32 %v9100_v43, %v9102_v30  ;;  %v16918_v58 = vpop.f32.mrf.mxu0 }
 0x448   : > { %v8845_v38 = vpop.f32.mrf.mxu1 }
 0x449   : > { %9066 = vst [vmem:[#allocation3 + $0x70] sm:$0xff] %v9030_v57  ;;  %v9028_v40 = vmax.f32 %v8992_v5, 0.0  ;;  %v8995_v55 = vadd.f32 %v16828_v13, %v8952_v39  ;;  %v8950_v10 = vadd.f32 %v8845_v38, %v8565_v48 }
 0x44a   : > { %v9105_v46 = vld [vmem:[#allocation3 + $0x36] ss:$2 sm:$0xff]  ;;  %v9107_v20 = vld [vmem:[#allocation3 + $0x37] ss:$2 sm:$0xff]  ;;  %v11367_v3 = vpop.f32.mrf.mxu1 }
 0x44b   : > { %v9108_v15 = vmax.f32 %v9105_v46, %v9107_v20  ;;  %9064 = vst [vmem:[#allocation3 + $0x60] sm:$0xff] %v9028_v40  ;;  %v9031_v23 = vmax.f32 %v8995_v55, 0.0  ;;  %v8993_v63 = vadd.f32 %v16828_v13, %v8950_v10  ;;  %v8955_v59 = vadd.f32 %v11367_v3, %v8570_v53  ;;  %v11328_v40 = vpop.f32.mrf.mxu0 }
 0x44c   : > { %v8858_v36 = vpop.f32.mrf.mxu1 }
 0x44d   : > { %v9109_v50 = vmax.f32 %v9103_v4, %v9108_v15  ;;  %9067 = vst [vmem:[#allocation3 + $0x78] sm:$0xff] %v9031_v23  ;;  %v9029_v21 = vmax.f32 %v8993_v63, 0.0  ;;  %v8998_v11 = vadd.f32 %v16828_v13, %v8955_v59  ;;  %v8953_v1 = vadd.f32 %v8858_v36, %v8568_v31  ;;  %v8524_v23 = vpop.f32.mrf.mxu0 }
 0x44e   : > { %v11368_v45 = vpop.f32.mrf.mxu1  ;;  %v9113_v56 = vld [vmem:[#allocation3 + $0x48] ss:$2 sm:$0xff]  ;;  %v9115_v28 = vld [vmem:[#allocation3 + $0x49] ss:$2 sm:$0xff]  ;;  %v8576_v15 = vadd.f32 %v16882_v14, %v16781_v18  ;;  %v8577_v18 = vadd.f32 %v16901_v6, %v16789_v33 }
 0x44f   : > { %9932 = vst [vmem:[%s16892_s15 + $0x8] sm:$0xff] %v9109_v50  ;;  %9065 = vst [vmem:[#allocation3 + $0x68] sm:$0xff] %v9029_v21  ;;  %v9034_v29 = vmax.f32 %v8998_v11, 0.0  ;;  %v8996_v7 = vadd.f32 %v16828_v13, %v8953_v1  ;;  %v8956_v22 = vadd.f32 %v11368_v45, %v8571_v16  ;;  %v9116_v24 = vmax.f32 %v9113_v56, %v9115_v28 }
 0x450   : > { %v8861_v61 = vpop.f32.mrf.mxu1  ;;  %v8579_v50 = vadd.f32 %v16890_v2, %v16786_v62  ;;  %v8582_v2 = vadd.f32 %v16909_v37, %v16794_v54 }
 0x451   : > { %9070 = vst [vmem:[#allocation3 + $0x90] sm:$0xff] %v9034_v29  ;;  %v9032_v19 = vmax.f32 %v8996_v7, 0.0  ;;  %v8999_v42 = vadd.f32 %v16828_v13, %v8956_v22  ;;  %v8954_v26 = vadd.f32 %v8861_v61, %v8569_v60  ;;  %v11331_v7 = vpop.f32.mrf.mxu0 }
 0x452   : > { %v11371_v47 = vpop.f32.mrf.mxu1 }
 0x453   : > { %9068 = vst [vmem:[#allocation3 + $0x80] sm:$0xff] %v9032_v19  ;;  %v9035_v51 = vmax.f32 %v8999_v42, 0.0  ;;  %v8997_v48 = vadd.f32 %v16828_v13, %v8954_v26  ;;  %v8959_v43 = vadd.f32 %v11371_v47, %v8574_v49  ;;  %v8537_v56 = vpop.f32.mrf.mxu0 }
 0x454   : > { %v8874_v30 = vpop.f32.mrf.mxu1 }
 0x455   : > { %9071 = vst [vmem:[#allocation3 + $0x98] sm:$0xff] %v9035_v51  ;;  %v9033_v0 = vmax.f32 %v8997_v48, 0.0  ;;  %v9002_v57 = vadd.f32 %v16828_v13, %v8959_v43  ;;  %v8957_v5 = vadd.f32 %v8874_v30, %v8572_v34  ;;  %v8580_v34 = vadd.f32 %v16918_v58, %v16797_v27 }
 0x456   : > { %v9118_v39 = vld [vmem:[#allocation3 + $0x5a] ss:$2 sm:$0xff]  ;;  %v9120_v38 = vld [vmem:[#allocation3 + $0x5b] ss:$2 sm:$0xff]  ;;  %v11372_v53 = vpop.f32.mrf.mxu1  ;;  %v8583_v30 = vadd.f32 %v11328_v40, %v16802_v8  ;;  %v8586_v8 = vadd.f32 %v11331_v7, %v16810_v44 }
 0x457   : > { %v9121_v55 = vmax.f32 %v9118_v39, %v9120_v38  ;;  %9069 = vst [vmem:[#allocation3 + $0x88] sm:$0xff] %v9033_v0  ;;  %v9038_v10 = vmax.f32 %v9002_v57, 0.0  ;;  %v9000_v31 = vadd.f32 %v16828_v13, %v8957_v5  ;;  %v8960_v41 = vadd.f32 %v11372_v53, %v8575_v52  ;;  %v9126_v63 = vld [vmem:[#allocation3 + $0x6c] ss:$2 sm:$0xff]  ;;  %v9128_v59 = vld [vmem:[#allocation3 + $0x6d] ss:$2 sm:$0xff]  ;;  %v11332_v38 = vpop.f32.mrf.mxu0 }
 0x458   : > { %v8877_v4 = vpop.f32.mrf.mxu1  ;;  %v9129_v14 = vmax.f32 %v9126_v63, %v9128_v59  ;;  %v18015_v5 = vld [vmem:[#allocation10_spill] sm:$0xff] }
 0x459   : > { %v9122_v46 = vmax.f32 %v9116_v24, %v9121_v55  ;;  %9074 = vst [vmem:[#allocation3 + $0xb0] sm:$0xff] %v9038_v10  ;;  %v9036_v20 = vmax.f32 %v9000_v31, 0.0  ;;  %v9003_v25 = vadd.f32 %v16828_v13, %v8960_v41  ;;  %v8958_v17 = vadd.f32 %v8877_v4, %v8573_v35 }
 0x45a   : > { %v11375_v3 = vpop.f32.mrf.mxu1  ;;  %v8581_v35 = vadd.f32 %v8524_v23, %v18015_v5 }
 0x45b   : > { %9933 = vst [vmem:[%s16892_s15 + $0x10] sm:$0xff] %v9122_v46  ;;  %9072 = vst [vmem:[#allocation3 + $0xa0] sm:$0xff] %v9036_v20  ;;  %v9039_v16 = vmax.f32 %v9003_v25, 0.0  ;;  %v9001_v36 = vadd.f32 %v16828_v13, %v8958_v17  ;;  %v8963_v32 = vadd.f32 %v11375_v3, %v8578_v9  ;;  %v18016_v25 = vld [vmem:[#allocation7_spill] sm:$0xff]  ;;  %v8540_v3 = vpop.f32.mrf.mxu0 }
 0x45c   : > { %v8890_v12 = vpop.f32.mrf.mxu1  ;;  %v9139_v28 = vld [vmem:[#allocation3 + $0x90] ss:$2 sm:$0xff]  ;;  %v9141_v51 = vld [vmem:[#allocation3 + $0x91] ss:$2 sm:$0xff]  ;;  %v8584_v17 = vadd.f32 %v8537_v56, %v18016_v25 }
 0x45d   : > { %9075 = vst [vmem:[#allocation3 + $0xb8] sm:$0xff] %v9039_v16  ;;  %v9037_v21 = vmax.f32 %v9001_v36, 0.0  ;;  %v9006_v11 = vadd.f32 %v16828_v13, %v8963_v32  ;;  %v8961_v1 = vadd.f32 %v8890_v12, %v8576_v15  ;;  %v9142_v27 = vmax.f32 %v9139_v28, %v9141_v51  ;;  %v18017_v36 = vld [vmem:[#allocation48_spill] sm:$0xff] }
 0x45e   : > { %v9131_v45 = vld [vmem:[#allocation3 + $0x7e] ss:$2 sm:$0xff]  ;;  %v9133_v60 = vld [vmem:[#allocation3 + $0x7f] ss:$2 sm:$0xff]  ;;  %v11376_v29 = vpop.f32.mrf.mxu1  ;;  %v8587_v32 = vadd.f32 %v11332_v38, %v18017_v36 }
 0x45f   : > { %v9134_v22 = vmax.f32 %v9131_v45, %v9133_v60  ;;  %9073 = vst [vmem:[#allocation3 + $0xa8] sm:$0xff] %v9037_v21  ;;  %v9042_v61 = vmax.f32 %v9006_v11, 0.0  ;;  %v9004_v49 = vadd.f32 %v16828_v13, %v8961_v1  ;;  %v8964_v62 = vadd.f32 %v11376_v29, %v8579_v50  ;;  %v18018_v11 = vld [vmem:[#allocation59_spill] sm:$0xff] }
 0x460   : > { %v8893_v19 = vpop.f32.mrf.mxu1  ;;  %v8585_v1 = vadd.f32 %v8540_v3, %v18018_v11 }
 0x461   : > { %v9135_v42 = vmax.f32 %v9129_v14, %v9134_v22  ;;  %9078 = vst [vmem:[#allocation3 + $0xd0] sm:$0xff] %v9042_v61  ;;  %v9040_v26 = vmax.f32 %v9004_v49, 0.0  ;;  %v9007_v33 = vadd.f32 %v16828_v13, %v8964_v62  ;;  %v8962_v6 = vadd.f32 %v8893_v19, %v8577_v18 }
 0x462   : > { %v11379_v47 = vpop.f32.mrf.mxu1 }
 0x463   : > { %9934 = vst [vmem:[%s16892_s15 + $0x18] sm:$0xff] %v9135_v42  ;;  %9076 = vst [vmem:[#allocation3 + $0xc0] sm:$0xff] %v9040_v26  ;;  %v9043_v48 = vmax.f32 %v9007_v33, 0.0  ;;  %v9005_v43 = vadd.f32 %v16828_v13, %v8962_v6  ;;  %v8967_v54 = vadd.f32 %v11379_v47, %v8582_v2 }
 0x464   : > { %v8906_v37 = vpop.f32.mrf.mxu1 }
 0x465   : > { %9079 = vst [vmem:[#allocation3 + $0xd8] sm:$0xff] %v9043_v48  ;;  %v9041_v52 = vmax.f32 %v9005_v43, 0.0  ;;  %v9010_v0 = vadd.f32 %v16828_v13, %v8967_v54  ;;  %v8965_v57 = vadd.f32 %v8906_v37, %v8580_v34 }
 0x466   : > { %v9144_v58 = vld [vmem:[#allocation3 + $0xa2] ss:$2 sm:$0xff]  ;;  %v9146_v24 = vld [vmem:[#allocation3 + $0xa3] ss:$2 sm:$0xff]  ;;  %v11380_v39 = vpop.f32.mrf.mxu1 }
 0x467   : > { %v9147_v53 = vmax.f32 %v9144_v58, %v9146_v24  ;;  %9077 = vst [vmem:[#allocation3 + $0xc8] sm:$0xff] %v9041_v52  ;;  %v9046_v55 = vmax.f32 %v9010_v0, 0.0  ;;  %v9008_v10 = vadd.f32 %v16828_v13, %v8965_v57  ;;  %v8968_v31 = vadd.f32 %v11380_v39, %v8583_v30 }
 0x468   : > { %v8909_v40 = vpop.f32.mrf.mxu1 }
 0x469   : > { %v9148_v41 = vmax.f32 %v9142_v27, %v9147_v53  ;;  %9082 = vst [vmem:[#allocation3 + $0xf0] sm:$0xff] %v9046_v55  ;;  %v9044_v9 = vmax.f32 %v9008_v10, 0.0  ;;  %v9011_v4 = vadd.f32 %v16828_v13, %v8968_v31  ;;  %v8966_v46 = vadd.f32 %v8909_v40, %v8581_v35 }
 0x46a   : > { %v11383_v20 = vpop.f32.mrf.mxu1  ;;  %v9152_v15 = vld [vmem:[#allocation3 + $0xb4] ss:$2 sm:$0xff]  ;;  %v9154_v23 = vld [vmem:[#allocation3 + $0xb5] ss:$2 sm:$0xff] }
 0x46b   : > { %9935 = vst [vmem:[%s16892_s15 + $0x20] sm:$0xff] %v9148_v41  ;;  %9080 = vst [vmem:[#allocation3 + $0xe0] sm:$0xff] %v9044_v9  ;;  %v9047_v63 = vmax.f32 %v9011_v4, 0.0  ;;  %v9009_v59 = vadd.f32 %v16828_v13, %v8966_v46  ;;  %v8971_v16 = vadd.f32 %v11383_v20, %v8586_v8  ;;  %v9155_v18 = vmax.f32 %v9152_v15, %v9154_v23 }
 0x46c   : > { %v8922_v44 = vpop.f32.mrf.mxu1 }
 0x46d   : > { %9083 = vst [vmem:[#allocation3 + $0xf8] sm:$0xff] %v9047_v63  ;;  %v9045_v12 = vmax.f32 %v9009_v59, 0.0  ;;  %v9014_v50 = vadd.f32 %v16828_v13, %v8971_v16  ;;  %v8969_v21 = vadd.f32 %v8922_v44, %v8584_v17 }
 0x46e   : > { %v9157_v14 = vld [vmem:[#allocation3 + $0xc6] ss:$2 sm:$0xff]  ;;  %v9159_v45 = vld [vmem:[#allocation3 + $0xc7] ss:$2 sm:$0xff]  ;;  %v11384_v60 = vpop.f32.mrf.mxu1 }
 0x46f   : > { %v9160_v29 = vmax.f32 %v9157_v14, %v9159_v45  ;;  %9081 = vst [vmem:[#allocation3 + $0xe8] sm:$0xff] %v9045_v12  ;;  %v9050_v7 = vmax.f32 %v9014_v50, 0.0  ;;  %v9012_v22 = vadd.f32 %v16828_v13, %v8969_v21  ;;  %v8972_v61 = vadd.f32 %v11384_v60, %v8587_v32 }
 0x470   : > { %v8925_v49 = vpop.f32.mrf.mxu1 }
 0x471   : > { %v9161_v62 = vmax.f32 %v9155_v18, %v9160_v29  ;;  %9086 = vst [vmem:[#allocation3 + $0x110] sm:$0xff] %v9050_v7  ;;  %v9048_v2 = vmax.f32 %v9012_v22, 0.0  ;;  %v9015_v19 = vadd.f32 %v16828_v13, %v8972_v61  ;;  %v8970_v42 = vadd.f32 %v8925_v49, %v8585_v1 }
 0x472   : > { %v9165_v6 = vld [vmem:[#allocation3 + $0xd8] ss:$2 sm:$0xff]  ;;  %v9167_v47 = vld [vmem:[#allocation3 + $0xd9] ss:$2 sm:$0xff] }
 0x473   : > { %9936 = vst [vmem:[%s16892_s15 + $0x28] sm:$0xff] %v9161_v62  ;;  %9084 = vst [vmem:[#allocation3 + $0x100] sm:$0xff] %v9048_v2  ;;  %v9051_v26 = vmax.f32 %v9015_v19, 0.0  ;;  %v9013_v33 = vadd.f32 %v16828_v13, %v8970_v42  ;;  %v9168_v51 = vmax.f32 %v9165_v6, %v9167_v47 }
 0x475   : > { %9087 = vst [vmem:[#allocation3 + $0x118] sm:$0xff] %v9051_v26  ;;  %v9049_v34 = vmax.f32 %v9013_v33, 0.0 }
 0x476   : > { %v9170_v56 = vld [vmem:[#allocation3 + $0xea] ss:$2 sm:$0xff]  ;;  %v9172_v28 = vld [vmem:[#allocation3 + $0xeb] ss:$2 sm:$0xff] }
 0x477   : > { %v9173_v48 = vmax.f32 %v9170_v56, %v9172_v28  ;;  %9085 = vst [vmem:[#allocation3 + $0x108] sm:$0xff] %v9049_v34 }
 0x479   : > { %v9174_v43 = vmax.f32 %v9168_v51, %v9173_v48 }
 0x47b   : > { %9937 = vst [vmem:[%s16892_s15 + $0x30] sm:$0xff] %v9174_v43 }
 0x47e   : > { %v9178_v54 = vld [vmem:[#allocation3 + $0xfc] ss:$2 sm:$0xff]  ;;  %v9180_v37 = vld [vmem:[#allocation3 + $0xfd] ss:$2 sm:$0xff] }
 0x47f   : > { %v9183_v30 = vld [vmem:[#allocation3 + $0x10e] ss:$2 sm:$0xff]  ;;  %v9181_v13 = vmax.f32 %v9178_v54, %v9180_v37  ;;  %v9185_v52 = vld [vmem:[#allocation3 + $0x10f] ss:$2 sm:$0xff] }
 0x480   : > { %v9186_v0 = vmax.f32 %v9183_v30, %v9185_v52 }
 0x482   : > { %v9187_v57 = vmax.f32 %v9181_v13, %v9186_v0 }
 0x484   : > { %9938 = vst [vmem:[%s16892_s15 + $0x38] sm:$0xff] %v9187_v57 }
 0x485   : > { %11783 = shalt.err (!%p11780_p3)
}
 0x486   : > { %s11784_s9 = scalar_lea.hbm %s16969_s26, 1024  ;;  %s11788_s12 = scalar_lea.hbm %s17021_s5, 2048 }
 0x487   : > { %p11785_p4 = scmp.ne.s32.totalorder %s16969_s26, %s11784_s9  ;;  %p11789_p9 = scmp.lt.s32.totalorder %s16969_s26, %s17021_s5 }
 0x488   : > { %p11790_p10 = scmp.lt.s32.totalorder %s11788_s12, %s11784_s9 }
 0x489   : > { %p11786_p7 = pnand %p11785_p4, %p11904_p5 }
 0x48a   : > { %p11791_p11 = por %p11790_p10, %p11789_p9 }
 0x48b   : > { %p11787_p8 = pneg %p11786_p7 }
 0x48d   : > { %p11792_p12 = pnand %p11791_p11, %p11787_p8 }
 0x48f   : > { %11795 = shalt.err (!%p11792_p12)
}
 0x490   : > { %s11834_s15 = smov 128   ;;  %s11835_s16 = smov 8  }
 0x491   : > { %11458 = dma.vmem_to_hbm [thread:$0]  (%p11904_p5), %s16971_s17, 1024, %s16969_s26, %s16976_s22, %s11834_s15, %s11834_s15, %s11835_s16  }
 0x492 PF: > { %p11464_p13 = scmp.ge.s32.totalorder %s11830_s21, 2  ;;  %s9219_s23 = sand.u32 1, %s11818_s18  }
 0x493   : > { %s9220_s25 = scalar_lea.sflag [#allocation5], %s9219_s23 }
 0x494   : > { %p11461_p0 = pnand %p11464_p13, %p11908_p6 }
 0x496   : > { %p11462_p1 = pneg %p11461_p0 }
 0x498   : > { %11813 = dma.done.wait (%p11462_p1), %s9220_s25, 1024  }
 0x499   : > { %11815 = vsyncadd (%p11462_p1), %s9220_s25, 4294966272  ;;  %p15_p2 = scmp.ge.s32.totalorder %s11891_s24, 4   ;;  %s18019_s18 = smov %s11822_s19 }
 0x49a   : > { %s18020_s19 = smov %s11826_s20  ;;  %s18021_s20 = smov %s11902_s27 }
 0x49b   : > { %s18022_s21 = smov %s11891_s24  ;;  %17 = sbr.rel (!%p15_p2) target bundleno = 3 (0x3), region = 129 }
 0x4a0   :  { %9225 = vsyncpa [#allocation5], 1 }
 0x4a1   :  { %9227 = vsyncpa [#allocation5 + $0x1], 1 }

</bundles_post_ra>
